<compile_context>
chip_gen: v5e
topology: v5e:2x2
jax: 0.10.0
libtpu: 0.0.40
codegen_flags: <defaults>
</compile_context>

<pallas_src>
import functools

import jax
import jax.numpy as jnp
from jax.experimental import pallas as pl
from jax.experimental.pallas import tpu as pltpu


# ---------------------------------------------------------------------------
# Kernel
# ---------------------------------------------------------------------------
def _ae_kernel(n_layers, x_ref, *rest):
    # rest = [w0, b0, w1, b1, ..., w{n-1}, b{n-1}, out_ref]
    out_ref = rest[-1]
    wb_refs = rest[:-1]

    h = x_ref[...]  # (tm, D) f32; scale_in already folded into layer 0

    for layer in range(n_layers):
        w = wb_refs[2 * layer][...]          # (K, N) bf16, resident across grid
        b = wb_refs[2 * layer + 1][...]      # (1, N) f32
        # bf16 MXU operands, f32 accumulation; bias add / ReLU stay in f32.
        h = jnp.dot(h.astype(jnp.bfloat16), w,
                    preferred_element_type=jnp.float32) + b
        if layer < n_layers - 1:             # ReLU after every layer but the last
            h = jnp.maximum(h, 0.0)

    out_ref[...] = h                         # scale_out already folded into last layer


# ---------------------------------------------------------------------------
# Wrapper
# ---------------------------------------------------------------------------
def scaled_autoencoder_forward(x, fweights, fbiases, *, tm=None):
    """x: (B, D) f32; fweights[i]: (in_i, out_i) bf16; fbiases[i]: (1, out_i) f32."""
    B, D = x.shape
    n_layers = len(fweights)

    if tm is None:
        # >=128 fills the MXU M dim; 256 tiles the v6e/v7x 256-wide MXU and,
        # with B>=512, gives >=2 grid programs for megacore sharding on v7x.
        tm = 256 if B >= 512 else 128

    # Pad batch so the grid tiles evenly; padded rows are sliced off below.
    Bp = pl.cdiv(B, tm) * tm
    xp = x if Bp == B else jnp.pad(x, ((0, Bp - B), (0, 0)))

    full = lambda shape: pl.BlockSpec(shape, lambda i: (0,) * len(shape))

    in_specs = [pl.BlockSpec((tm, D), lambda i: (i, 0))]  # x, tiled over batch
    args = [xp]
    for w, b in zip(fweights, fbiases):
        in_specs.append(full(w.shape))   # constant index_map -> weights stay resident
        in_specs.append(full(b.shape))
        args.append(w)
        args.append(b)

    kernel = functools.partial(_ae_kernel, n_layers)

    out = pl.pallas_call(
        kernel,
        out_shape=jax.ShapeDtypeStruct((Bp, D), jnp.float32),
        grid_spec=pltpu.PrefetchScalarGridSpec(
            num_scalar_prefetch=0,
            grid=(Bp // tm,),
            in_specs=in_specs,
            out_specs=pl.BlockSpec((tm, D), lambda i: (i, 0)),
        ),
        # Total VMEM: ~1.2 MB bf16 weights (x2 buffers) + double-buffered
        # (tm, 256) f32 x/out tiles + spilled (tm, 512) f32 activations -> a
        # few MB, well inside the 32 MiB scoped default on every generation
        # (incl. v7x's 64 MiB physical), so no explicit vmem_limit needed.
        compiler_params=pltpu.CompilerParams(
            dimension_semantics=("parallel",),
        ),
    )(*args)

    return out if Bp == B else out[:B]


# ---------------------------------------------------------------------------
# Parameter construction / algebraic folding
# ---------------------------------------------------------------------------
def init_params(key, input_dim, latent_dim):
    """PyTorch-style uniform(+/- 1/sqrt(fan_in)) init.

    Returns weights as (in, out) = torch W.T, biases as (1, out), all f32."""
    enc_dims = [input_dim, 512, 256, 128, 64, latent_dim]
    dec_dims = [latent_dim, 64, 128, 256, 512, input_dim]
    layer_dims = list(zip(enc_dims[:-1], enc_dims[1:])) + list(
        zip(dec_dims[:-1], dec_dims[1:])
    )

    weights, biases = [], []
    for (fan_in, fan_out) in layer_dims:
        key, kw, kb = jax.random.split(key, 3)
        bound = 1.0 / jnp.sqrt(fan_in)
        w = jax.random.uniform(kw, (fan_in, fan_out), jnp.float32, -bound, bound)
        b = jax.random.uniform(kb, (1, fan_out), jnp.float32, -bound, bound)
        weights.append(w)
        biases.append(b)
    return weights, biases


def fold_params(weights, biases, mu, sig):
    """One-time constant transform (exact algebra, done in f32):
       * scale_in  (x - mu)/sig  folded into layer 0:  W0' = diag(1/sig)@W0,
         b0' = b0 - (mu/sig)@W0
       * scale_out y*sig + mu    folded into last:     Wl' = Wl*sig (col-wise),
         bl' = bl*sig + mu
       * no-ReLU latent pair (enc-last, dec-first) merged: W' = W4@W5,
         b' = b4@W5 + b5
    Weights are then cast to bf16 for the MXU; biases stay f32."""
    n = len(weights)
    enc_last, dec_first = n // 2 - 1, n // 2

    ws = [w.astype(jnp.float32) for w in weights]
    bs = [b.astype(jnp.float32) for b in biases]

    inv_sig = 1.0 / sig                               # (1, D)
    ws[0] = ws[0] * inv_sig.reshape(-1, 1)            # scale rows of (D, 512)
    bs[0] = bs[0] - (mu * inv_sig) @ weights[0]

    ws[-1] = ws[-1] * sig                             # scale columns of (512, D)
    bs[-1] = bs[-1] * sig + mu

    w_mid = ws[enc_last] @ ws[dec_first]              # (64, 64)
    b_mid = bs[enc_last] @ ws[dec_first] + bs[dec_first]

    fw = ws[:enc_last] + [w_mid] + ws[dec_first + 1:]
    fb = bs[:enc_last] + [b_mid] + bs[dec_first + 1:]

    fw = [w.astype(jnp.bfloat16) for w in fw]
    return fw, fb


# ---------------------------------------------------------------------------
# References
# ---------------------------------------------------------------------------
def reference_forward(x, mu, sig, weights, biases):
    """Pure-JAX f32 reference matching the PyTorch module semantics exactly."""
    h = (x - mu) / sig
    n = len(weights)
    no_relu = {n // 2 - 1, n - 1}
    for i, (w, b) in enumerate(zip(weights, biases)):
        h = h @ w + b
        if i not in no_relu:
            h = jnp.maximum(h, 0.0)
    return h * sig + mu


def matched_reference(x, fweights, fbiases):
    """Plain-XLA forward using the same folded bf16 weights / f32 accumulation."""
    h = x
    n = len(fweights)
    for i, (w, b) in enumerate(zip(fweights, fbiases)):
        h = jnp.dot(h.astype(jnp.bfloat16), w,
                    preferred_element_type=jnp.float32) + b
        if i < n - 1:
            h = jnp.maximum(h, 0.0)
    return h


# ---------------------------------------------------------------------------
if __name__ == "__main__":
    input_dim = 256
    latent_dim = 8
    batch = 512  # tm=256 -> grid=(2,): both v7x TensorCores get work

    key = jax.random.PRNGKey(0)
    key, kx, kmu, ksig = jax.random.split(key, 4)

    x = jax.random.normal(kx, (batch, input_dim), jnp.float32)
    mu = jax.random.normal(kmu, (1, input_dim), jnp.float32)
    sig = jax.random.uniform(ksig, (1, input_dim), jnp.float32, 0.5, 1.5)

    weights, biases = init_params(key, input_dim, latent_dim)
    fweights, fbiases = fold_params(weights, biases, mu, sig)

    out = scaled_autoencoder_forward(x, fweights, fbiases)
    out = jax.block_until_ready(out)
    assert out.shape == (batch, input_dim)

    # (a) tight check vs. an XLA forward with identical folded bf16 weights.
    matched = matched_reference(x, fweights, fbiases)
    assert jnp.allclose(out, matched, atol=1e-3, rtol=1e-3), "mismatch vs matched ref"

    # (b) semantic check vs. the exact f32 PyTorch-equivalent forward; bf16
    #     matmul operands shift rounding, so use a scale-relative bound.
    ref = reference_forward(x, mu, sig, weights, biases)
    err = float(jnp.max(jnp.abs(out - ref)))
    scale = float(jnp.max(jnp.abs(ref)))
    assert err <= 0.05 * scale + 1e-2, (err, scale)

    print("KERNEL_OK")
</pallas_src>

<mosaic_0001>
module attributes {stable_mosaic.version = 11 : i64} {
  func.func @_ae_kernel(%arg0: i32, %arg1: memref<256x256xf32, #tpu.memory_space<vmem>>, %arg2: memref<256x512xbf16, #tpu.memory_space<vmem>>, %arg3: memref<1x512xf32, #tpu.memory_space<vmem>>, %arg4: memref<512x256xbf16, #tpu.memory_space<vmem>>, %arg5: memref<1x256xf32, #tpu.memory_space<vmem>>, %arg6: memref<256x128xbf16, #tpu.memory_space<vmem>>, %arg7: memref<1x128xf32, #tpu.memory_space<vmem>>, %arg8: memref<128x64xbf16, #tpu.memory_space<vmem>>, %arg9: memref<1x64xf32, #tpu.memory_space<vmem>>, %arg10: memref<64x64xbf16, #tpu.memory_space<vmem>>, %arg11: memref<1x64xf32, #tpu.memory_space<vmem>>, %arg12: memref<64x128xbf16, #tpu.memory_space<vmem>>, %arg13: memref<1x128xf32, #tpu.memory_space<vmem>>, %arg14: memref<128x256xbf16, #tpu.memory_space<vmem>>, %arg15: memref<1x256xf32, #tpu.memory_space<vmem>>, %arg16: memref<256x512xbf16, #tpu.memory_space<vmem>>, %arg17: memref<1x512xf32, #tpu.memory_space<vmem>>, %arg18: memref<512x256xbf16, #tpu.memory_space<vmem>>, %arg19: memref<1x256xf32, #tpu.memory_space<vmem>>, %arg20: memref<256x256xf32, #tpu.memory_space<vmem>>) attributes {dimension_semantics = [#tpu.dimension_semantics<parallel>], iteration_bounds = array<i64: 2>, scalar_prefetch = 0 : i64, scratch_operands = 0 : i64, tpu.core_type = #tpu.core_type<tc>, window_params = [{transform_indices = @transform_0, window_bounds = array<i64: 256, 256>}, {pipeline_mode = #tpu.pipeline_mode<synchronous>, transform_indices = @transform_1, window_bounds = array<i64: 256, 512>}, {pipeline_mode = #tpu.pipeline_mode<synchronous>, transform_indices = @transform_2, window_bounds = array<i64: 1, 512>}, {pipeline_mode = #tpu.pipeline_mode<synchronous>, transform_indices = @transform_3, window_bounds = array<i64: 512, 256>}, {pipeline_mode = #tpu.pipeline_mode<synchronous>, transform_indices = @transform_4, window_bounds = array<i64: 1, 256>}, {pipeline_mode = #tpu.pipeline_mode<synchronous>, transform_indices = @transform_5, window_bounds = array<i64: 256, 128>}, {pipeline_mode = #tpu.pipeline_mode<synchronous>, transform_indices = @transform_6, window_bounds = array<i64: 1, 128>}, {pipeline_mode = #tpu.pipeline_mode<synchronous>, transform_indices = @transform_7, window_bounds = array<i64: 128, 64>}, {pipeline_mode = #tpu.pipeline_mode<synchronous>, transform_indices = @transform_8, window_bounds = array<i64: 1, 64>}, {pipeline_mode = #tpu.pipeline_mode<synchronous>, transform_indices = @transform_9, window_bounds = array<i64: 64, 64>}, {pipeline_mode = #tpu.pipeline_mode<synchronous>, transform_indices = @transform_10, window_bounds = array<i64: 1, 64>}, {pipeline_mode = #tpu.pipeline_mode<synchronous>, transform_indices = @transform_11, window_bounds = array<i64: 64, 128>}, {pipeline_mode = #tpu.pipeline_mode<synchronous>, transform_indices = @transform_12, window_bounds = array<i64: 1, 128>}, {pipeline_mode = #tpu.pipeline_mode<synchronous>, transform_indices = @transform_13, window_bounds = array<i64: 128, 256>}, {pipeline_mode = #tpu.pipeline_mode<synchronous>, transform_indices = @transform_14, window_bounds = array<i64: 1, 256>}, {pipeline_mode = #tpu.pipeline_mode<synchronous>, transform_indices = @transform_15, window_bounds = array<i64: 256, 512>}, {pipeline_mode = #tpu.pipeline_mode<synchronous>, transform_indices = @transform_16, window_bounds = array<i64: 1, 512>}, {pipeline_mode = #tpu.pipeline_mode<synchronous>, transform_indices = @transform_17, window_bounds = array<i64: 512, 256>}, {pipeline_mode = #tpu.pipeline_mode<synchronous>, transform_indices = @transform_18, window_bounds = array<i64: 1, 256>}, {transform_indices = @transform_19, window_bounds = array<i64: 256, 256>}]} {
    %c0 = arith.constant 0 : index
    %c0_0 = arith.constant 0 : index
    %0 = vector.load %arg1[%c0, %c0_0] : memref<256x256xf32, #tpu.memory_space<vmem>>, vector<256x256xf32>
    %c0_1 = arith.constant 0 : index
    %c0_2 = arith.constant 0 : index
    %1 = vector.load %arg2[%c0_1, %c0_2] : memref<256x512xbf16, #tpu.memory_space<vmem>>, vector<256x512xbf16>
    %c0_3 = arith.constant 0 : index
    %c0_4 = arith.constant 0 : index
    %2 = vector.load %arg3[%c0_3, %c0_4] : memref<1x512xf32, #tpu.memory_space<vmem>>, vector<1x512xf32>
    %3 = arith.truncf %0 : vector<256x256xf32> to vector<256x256xbf16>
    %cst = arith.constant dense<0.000000e+00> : vector<256x512xf32>
    %4 = tpu.matmul %3, %1, %cst {dimension_numbers = #tpu.dot_dimension_numbers<[1], [0], [0], [1], [0, 0, 1, 1], [], []>} : vector<256x256xbf16>, vector<256x512xbf16>, vector<256x512xf32> -> vector<256x512xf32>
    %5 = vector.broadcast %2 : vector<1x512xf32> to vector<256x512xf32>
    %6 = arith.addf %4, %5 : vector<256x512xf32>
    %cst_5 = arith.constant 0.000000e+00 : f32
    %7 = vector.broadcast %cst_5 : f32 to vector<256x512xf32>
    %8 = arith.maximumf %6, %7 : vector<256x512xf32>
    %c0_6 = arith.constant 0 : index
    %c0_7 = arith.constant 0 : index
    %9 = vector.load %arg4[%c0_6, %c0_7] : memref<512x256xbf16, #tpu.memory_space<vmem>>, vector<512x256xbf16>
    %c0_8 = arith.constant 0 : index
    %c0_9 = arith.constant 0 : index
    %10 = vector.load %arg5[%c0_8, %c0_9] : memref<1x256xf32, #tpu.memory_space<vmem>>, vector<1x256xf32>
    %11 = arith.truncf %8 : vector<256x512xf32> to vector<256x512xbf16>
    %cst_10 = arith.constant dense<0.000000e+00> : vector<256x256xf32>
    %12 = tpu.matmul %11, %9, %cst_10 {dimension_numbers = #tpu.dot_dimension_numbers<[1], [0], [0], [1], [0, 0, 1, 1], [], []>} : vector<256x512xbf16>, vector<512x256xbf16>, vector<256x256xf32> -> vector<256x256xf32>
    %13 = vector.broadcast %10 : vector<1x256xf32> to vector<256x256xf32>
    %14 = arith.addf %12, %13 : vector<256x256xf32>
    %cst_11 = arith.constant 0.000000e+00 : f32
    %15 = vector.broadcast %cst_11 : f32 to vector<256x256xf32>
    %16 = arith.maximumf %14, %15 : vector<256x256xf32>
    %c0_12 = arith.constant 0 : index
    %c0_13 = arith.constant 0 : index
    %17 = vector.load %arg6[%c0_12, %c0_13] : memref<256x128xbf16, #tpu.memory_space<vmem>>, vector<256x128xbf16>
    %c0_14 = arith.constant 0 : index
    %c0_15 = arith.constant 0 : index
    %18 = vector.load %arg7[%c0_14, %c0_15] : memref<1x128xf32, #tpu.memory_space<vmem>>, vector<1x128xf32>
    %19 = arith.truncf %16 : vector<256x256xf32> to vector<256x256xbf16>
    %cst_16 = arith.constant dense<0.000000e+00> : vector<256x128xf32>
    %20 = tpu.matmul %19, %17, %cst_16 {dimension_numbers = #tpu.dot_dimension_numbers<[1], [0], [0], [1], [0, 0, 1, 1], [], []>} : vector<256x256xbf16>, vector<256x128xbf16>, vector<256x128xf32> -> vector<256x128xf32>
    %21 = vector.broadcast %18 : vector<1x128xf32> to vector<256x128xf32>
    %22 = arith.addf %20, %21 : vector<256x128xf32>
    %cst_17 = arith.constant 0.000000e+00 : f32
    %23 = vector.broadcast %cst_17 : f32 to vector<256x128xf32>
    %24 = arith.maximumf %22, %23 : vector<256x128xf32>
    %c0_18 = arith.constant 0 : index
    %c0_19 = arith.constant 0 : index
    %25 = vector.load %arg8[%c0_18, %c0_19] : memref<128x64xbf16, #tpu.memory_space<vmem>>, vector<128x64xbf16>
    %c0_20 = arith.constant 0 : index
    %c0_21 = arith.constant 0 : index
    %26 = vector.load %arg9[%c0_20, %c0_21] : memref<1x64xf32, #tpu.memory_space<vmem>>, vector<1x64xf32>
    %27 = arith.truncf %24 : vector<256x128xf32> to vector<256x128xbf16>
    %cst_22 = arith.constant dense<0.000000e+00> : vector<256x64xf32>
    %28 = tpu.matmul %27, %25, %cst_22 {dimension_numbers = #tpu.dot_dimension_numbers<[1], [0], [0], [1], [0, 0, 1, 1], [], []>} : vector<256x128xbf16>, vector<128x64xbf16>, vector<256x64xf32> -> vector<256x64xf32>
    %29 = vector.broadcast %26 : vector<1x64xf32> to vector<256x64xf32>
    %30 = arith.addf %28, %29 : vector<256x64xf32>
    %cst_23 = arith.constant 0.000000e+00 : f32
    %31 = vector.broadcast %cst_23 : f32 to vector<256x64xf32>
    %32 = arith.maximumf %30, %31 : vector<256x64xf32>
    %c0_24 = arith.constant 0 : index
    %c0_25 = arith.constant 0 : index
    %33 = vector.load %arg10[%c0_24, %c0_25] : memref<64x64xbf16, #tpu.memory_space<vmem>>, vector<64x64xbf16>
    %c0_26 = arith.constant 0 : index
    %c0_27 = arith.constant 0 : index
    %34 = vector.load %arg11[%c0_26, %c0_27] : memref<1x64xf32, #tpu.memory_space<vmem>>, vector<1x64xf32>
    %35 = arith.truncf %32 : vector<256x64xf32> to vector<256x64xbf16>
    %cst_28 = arith.constant dense<0.000000e+00> : vector<256x64xf32>
    %36 = tpu.matmul %35, %33, %cst_28 {dimension_numbers = #tpu.dot_dimension_numbers<[1], [0], [0], [1], [0, 0, 1, 1], [], []>} : vector<256x64xbf16>, vector<64x64xbf16>, vector<256x64xf32> -> vector<256x64xf32>
    %37 = vector.broadcast %34 : vector<1x64xf32> to vector<256x64xf32>
    %38 = arith.addf %36, %37 : vector<256x64xf32>
    %cst_29 = arith.constant 0.000000e+00 : f32
    %39 = vector.broadcast %cst_29 : f32 to vector<256x64xf32>
    %40 = arith.maximumf %38, %39 : vector<256x64xf32>
    %c0_30 = arith.constant 0 : index
    %c0_31 = arith.constant 0 : index
    %41 = vector.load %arg12[%c0_30, %c0_31] : memref<64x128xbf16, #tpu.memory_space<vmem>>, vector<64x128xbf16>
    %c0_32 = arith.constant 0 : index
    %c0_33 = arith.constant 0 : index
    %42 = vector.load %arg13[%c0_32, %c0_33] : memref<1x128xf32, #tpu.memory_space<vmem>>, vector<1x128xf32>
    %43 = arith.truncf %40 : vector<256x64xf32> to vector<256x64xbf16>
    %cst_34 = arith.constant dense<0.000000e+00> : vector<256x128xf32>
    %44 = tpu.matmul %43, %41, %cst_34 {dimension_numbers = #tpu.dot_dimension_numbers<[1], [0], [0], [1], [0, 0, 1, 1], [], []>} : vector<256x64xbf16>, vector<64x128xbf16>, vector<256x128xf32> -> vector<256x128xf32>
    %45 = vector.broadcast %42 : vector<1x128xf32> to vector<256x128xf32>
    %46 = arith.addf %44, %45 : vector<256x128xf32>
    %cst_35 = arith.constant 0.000000e+00 : f32
    %47 = vector.broadcast %cst_35 : f32 to vector<256x128xf32>
    %48 = arith.maximumf %46, %47 : vector<256x128xf32>
    %c0_36 = arith.constant 0 : index
    %c0_37 = arith.constant 0 : index
    %49 = vector.load %arg14[%c0_36, %c0_37] : memref<128x256xbf16, #tpu.memory_space<vmem>>, vector<128x256xbf16>
    %c0_38 = arith.constant 0 : index
    %c0_39 = arith.constant 0 : index
    %50 = vector.load %arg15[%c0_38, %c0_39] : memref<1x256xf32, #tpu.memory_space<vmem>>, vector<1x256xf32>
    %51 = arith.truncf %48 : vector<256x128xf32> to vector<256x128xbf16>
    %cst_40 = arith.constant dense<0.000000e+00> : vector<256x256xf32>
    %52 = tpu.matmul %51, %49, %cst_40 {dimension_numbers = #tpu.dot_dimension_numbers<[1], [0], [0], [1], [0, 0, 1, 1], [], []>} : vector<256x128xbf16>, vector<128x256xbf16>, vector<256x256xf32> -> vector<256x256xf32>
    %53 = vector.broadcast %50 : vector<1x256xf32> to vector<256x256xf32>
    %54 = arith.addf %52, %53 : vector<256x256xf32>
    %cst_41 = arith.constant 0.000000e+00 : f32
    %55 = vector.broadcast %cst_41 : f32 to vector<256x256xf32>
    %56 = arith.maximumf %54, %55 : vector<256x256xf32>
    %c0_42 = arith.constant 0 : index
    %c0_43 = arith.constant 0 : index
    %57 = vector.load %arg16[%c0_42, %c0_43] : memref<256x512xbf16, #tpu.memory_space<vmem>>, vector<256x512xbf16>
    %c0_44 = arith.constant 0 : index
    %c0_45 = arith.constant 0 : index
    %58 = vector.load %arg17[%c0_44, %c0_45] : memref<1x512xf32, #tpu.memory_space<vmem>>, vector<1x512xf32>
    %59 = arith.truncf %56 : vector<256x256xf32> to vector<256x256xbf16>
    %cst_46 = arith.constant dense<0.000000e+00> : vector<256x512xf32>
    %60 = tpu.matmul %59, %57, %cst_46 {dimension_numbers = #tpu.dot_dimension_numbers<[1], [0], [0], [1], [0, 0, 1, 1], [], []>} : vector<256x256xbf16>, vector<256x512xbf16>, vector<256x512xf32> -> vector<256x512xf32>
    %61 = vector.broadcast %58 : vector<1x512xf32> to vector<256x512xf32>
    %62 = arith.addf %60, %61 : vector<256x512xf32>
    %cst_47 = arith.constant 0.000000e+00 : f32
    %63 = vector.broadcast %cst_47 : f32 to vector<256x512xf32>
    %64 = arith.maximumf %62, %63 : vector<256x512xf32>
    %c0_48 = arith.constant 0 : index
    %c0_49 = arith.constant 0 : index
    %65 = vector.load %arg18[%c0_48, %c0_49] : memref<512x256xbf16, #tpu.memory_space<vmem>>, vector<512x256xbf16>
    %c0_50 = arith.constant 0 : index
    %c0_51 = arith.constant 0 : index
    %66 = vector.load %arg19[%c0_50, %c0_51] : memref<1x256xf32, #tpu.memory_space<vmem>>, vector<1x256xf32>
    %67 = arith.truncf %64 : vector<256x512xf32> to vector<256x512xbf16>
    %cst_52 = arith.constant dense<0.000000e+00> : vector<256x256xf32>
    %68 = tpu.matmul %67, %65, %cst_52 {dimension_numbers = #tpu.dot_dimension_numbers<[1], [0], [0], [1], [0, 0, 1, 1], [], []>} : vector<256x512xbf16>, vector<512x256xbf16>, vector<256x256xf32> -> vector<256x256xf32>
    %69 = vector.broadcast %66 : vector<1x256xf32> to vector<256x256xf32>
    %70 = arith.addf %68, %69 : vector<256x256xf32>
    %c0_53 = arith.constant 0 : index
    %c0_54 = arith.constant 0 : index
    %71 = vector.load %arg20[%c0_53, %c0_54] : memref<256x256xf32, #tpu.memory_space<vmem>>, vector<256x256xf32>
    tpu.vector_store %arg20[%c0_53, %c0_54], %70 {strides = array<i32>} : memref<256x256xf32, #tpu.memory_space<vmem>>, vector<256x256xf32>,
    return
  }
  func.func @transform_0(%arg0: i32) -> (i32, i32) {
    %c0_i32 = arith.constant 0 : i32
    %c0_i32_0 = arith.constant 0 : i32
    return %arg0, %c0_i32 : i32, i32
  }
  func.func @transform_1(%arg0: i32) -> (i32, i32) {
    %c0_i32 = arith.constant 0 : i32
    %c0_i32_0 = arith.constant 0 : i32
    %c0_i32_1 = arith.constant 0 : i32
    return %c0_i32, %c0_i32_0 : i32, i32
  }
  func.func @transform_2(%arg0: i32) -> (i32, i32) {
    %c0_i32 = arith.constant 0 : i32
    %c0_i32_0 = arith.constant 0 : i32
    %c0_i32_1 = arith.constant 0 : i32
    return %c0_i32, %c0_i32_0 : i32, i32
  }
  func.func @transform_3(%arg0: i32) -> (i32, i32) {
    %c0_i32 = arith.constant 0 : i32
    %c0_i32_0 = arith.constant 0 : i32
    %c0_i32_1 = arith.constant 0 : i32
    return %c0_i32, %c0_i32_0 : i32, i32
  }
  func.func @transform_4(%arg0: i32) -> (i32, i32) {
    %c0_i32 = arith.constant 0 : i32
    %c0_i32_0 = arith.constant 0 : i32
    %c0_i32_1 = arith.constant 0 : i32
    return %c0_i32, %c0_i32_0 : i32, i32
  }
  func.func @transform_5(%arg0: i32) -> (i32, i32) {
    %c0_i32 = arith.constant 0 : i32
    %c0_i32_0 = arith.constant 0 : i32
    %c0_i32_1 = arith.constant 0 : i32
    return %c0_i32, %c0_i32_0 : i32, i32
  }
  func.func @transform_6(%arg0: i32) -> (i32, i32) {
    %c0_i32 = arith.constant 0 : i32
    %c0_i32_0 = arith.constant 0 : i32
    %c0_i32_1 = arith.constant 0 : i32
    return %c0_i32, %c0_i32_0 : i32, i32
  }
  func.func @transform_7(%arg0: i32) -> (i32, i32) {
    %c0_i32 = arith.constant 0 : i32
    %c0_i32_0 = arith.constant 0 : i32
    %c0_i32_1 = arith.constant 0 : i32
    return %c0_i32, %c0_i32_0 : i32, i32
  }
  func.func @transform_8(%arg0: i32) -> (i32, i32) {
    %c0_i32 = arith.constant 0 : i32
    %c0_i32_0 = arith.constant 0 : i32
    %c0_i32_1 = arith.constant 0 : i32
    return %c0_i32, %c0_i32_0 : i32, i32
  }
  func.func @transform_9(%arg0: i32) -> (i32, i32) {
    %c0_i32 = arith.constant 0 : i32
    %c0_i32_0 = arith.constant 0 : i32
    %c0_i32_1 = arith.constant 0 : i32
    return %c0_i32, %c0_i32_0 : i32, i32
  }
  func.func @transform_10(%arg0: i32) -> (i32, i32) {
    %c0_i32 = arith.constant 0 : i32
    %c0_i32_0 = arith.constant 0 : i32
    %c0_i32_1 = arith.constant 0 : i32
    return %c0_i32, %c0_i32_0 : i32, i32
  }
  func.func @transform_11(%arg0: i32) -> (i32, i32) {
    %c0_i32 = arith.constant 0 : i32
    %c0_i32_0 = arith.constant 0 : i32
    %c0_i32_1 = arith.constant 0 : i32
    return %c0_i32, %c0_i32_0 : i32, i32
  }
  func.func @transform_12(%arg0: i32) -> (i32, i32) {
    %c0_i32 = arith.constant 0 : i32
    %c0_i32_0 = arith.constant 0 : i32
    %c0_i32_1 = arith.constant 0 : i32
    return %c0_i32, %c0_i32_0 : i32, i32
  }
  func.func @transform_13(%arg0: i32) -> (i32, i32) {
    %c0_i32 = arith.constant 0 : i32
    %c0_i32_0 = arith.constant 0 : i32
    %c0_i32_1 = arith.constant 0 : i32
    return %c0_i32, %c0_i32_0 : i32, i32
  }
  func.func @transform_14(%arg0: i32) -> (i32, i32) {
    %c0_i32 = arith.constant 0 : i32
    %c0_i32_0 = arith.constant 0 : i32
    %c0_i32_1 = arith.constant 0 : i32
    return %c0_i32, %c0_i32_0 : i32, i32
  }
  func.func @transform_15(%arg0: i32) -> (i32, i32) {
    %c0_i32 = arith.constant 0 : i32
    %c0_i32_0 = arith.constant 0 : i32
    %c0_i32_1 = arith.constant 0 : i32
    return %c0_i32, %c0_i32_0 : i32, i32
  }
  func.func @transform_16(%arg0: i32) -> (i32, i32) {
    %c0_i32 = arith.constant 0 : i32
    %c0_i32_0 = arith.constant 0 : i32
    %c0_i32_1 = arith.constant 0 : i32
    return %c0_i32, %c0_i32_0 : i32, i32
  }
  func.func @transform_17(%arg0: i32) -> (i32, i32) {
    %c0_i32 = arith.constant 0 : i32
    %c0_i32_0 = arith.constant 0 : i32
    %c0_i32_1 = arith.constant 0 : i32
    return %c0_i32, %c0_i32_0 : i32, i32
  }
  func.func @transform_18(%arg0: i32) -> (i32, i32) {
    %c0_i32 = arith.constant 0 : i32
    %c0_i32_0 = arith.constant 0 : i32
    %c0_i32_1 = arith.constant 0 : i32
    return %c0_i32, %c0_i32_0 : i32, i32
  }
  func.func @transform_19(%arg0: i32) -> (i32, i32) {
    %c0_i32 = arith.constant 0 : i32
    %c0_i32_0 = arith.constant 0 : i32
    return %arg0, %c0_i32 : i32, i32
  }
}

</mosaic_0001>

<bundles_post_ra>
// kernel: tpu_custom_call.1
= control target key start
LH: loop header
LB: loop body
LE: loop exit
PB: predicated region body
PF: predicated region fallthrough
CT: control target
= control target key end

     0   :  { %s12449_s0 = inlined_call_operand.hbm [shape: f32[512,256], index: 0, kind: input, shape index: {}]   ;;  %s12450_s1 = inlined_call_operand.hbm [shape: bf16[256,512], index: 1, kind: input, shape index: {}]   ;;  %s12451_s2 = inlined_call_operand.vmem [shape: f32[1,512], index: 2, kind: input, shape index: {}]   ;;  %s12452_s3 = inlined_call_operand.hbm [shape: bf16[512,256], index: 3, kind: input, shape index: {}]   ;;  %s12453_s4 = inlined_call_operand.vmem [shape: f32[1,256], index: 4, kind: input, shape index: {}]   ;;  %s12454_s5 = inlined_call_operand.hbm [shape: bf16[256,128], index: 5, kind: input, shape index: {}]   ;;  %s12455_s6 = inlined_call_operand.vmem [shape: f32[1,128], index: 6, kind: input, shape index: {}]   ;;  %s12456_s7 = inlined_call_operand.vmem [shape: bf16[128,64], index: 7, kind: input, shape index: {}]   ;;  %s12457_s8 = inlined_call_operand.vmem [shape: f32[1,64], index: 8, kind: input, shape index: {}]   ;;  %s12458_s9 = inlined_call_operand.vmem [shape: bf16[64,64], index: 9, kind: input, shape index: {}]   ;;  %s12459_s10 = inlined_call_operand.vmem [shape: f32[1,64], index: 10, kind: input, shape index: {}]   ;;  %s12460_s11 = inlined_call_operand.vmem [shape: bf16[64,128], index: 11, kind: input, shape index: {}]   ;;  %s12461_s12 = inlined_call_operand.vmem [shape: f32[1,128], index: 12, kind: input, shape index: {}]   ;;  %s12462_s13 = inlined_call_operand.hbm [shape: bf16[128,256], index: 13, kind: input, shape index: {}]   ;;  %s12463_s14 = inlined_call_operand.vmem [shape: f32[1,256], index: 14, kind: input, shape index: {}]   ;;  %s12464_s15 = inlined_call_operand.hbm [shape: bf16[256,512], index: 15, kind: input, shape index: {}]   ;;  %s12465_s16 = inlined_call_operand.vmem [shape: f32[1,512], index: 16, kind: input, shape index: {}]   ;;  %s12466_s17 = inlined_call_operand.hbm [shape: bf16[512,256], index: 17, kind: input, shape index: {}]   ;;  %s12467_s18 = inlined_call_operand.vmem [shape: f32[1,256], index: 18, kind: input, shape index: {}]   ;;  %s12468_s19 = inlined_call_operand.hbm [shape: f32[512,256], index: 19, kind: output, shape index: {}]  }
   0x1   :  { %12592 = sst [smem:[#allocation84_spill]] %s12449_s0 }
   0x2   :  { %12593 = sst [smem:[#allocation85_spill]] %s12450_s1 }
   0x3   :  { %12594 = sst [smem:[#allocation86_spill]] %s12451_s2 }
   0x4   :  { %12595 = sst [smem:[#allocation87_spill]] %s12452_s3 }
   0x5   :  { %12596 = sst [smem:[#allocation88_spill]] %s12454_s5 }
   0x6   :  { %12597 = sst [smem:[#allocation89_spill]] %s12457_s8 }
   0x7   :  { %12598 = sst [smem:[#allocation90_spill]] %s12459_s10 }
   0x8   :  { %12599 = sst [smem:[#allocation91_spill]] %s12460_s11 }
   0x9   :  { %12600 = sst [smem:[#allocation92_spill]] %s12461_s12 }
   0xa   :  { %12601 = sst [smem:[#allocation93_spill]] %s12462_s13 }
   0xb   :  { %12602 = sst [smem:[#allocation94_spill]] %s12463_s14 }
   0xc   :  { %12603 = sst [smem:[#allocation95_spill]] %s12464_s15 }
   0xd   :  { %12604 = sst [smem:[#allocation96_spill]] %s12465_s16 }
   0xe   :  { %12605 = sst [smem:[#allocation97_spill]] %s12467_s18 }
   0xf   :  { %12606 = sst [smem:[#allocation98_spill]] %s12468_s19 }
  0x10   :  { %24 = vsyncpa [#allocation3], 0 }
  0x11   :  { %26 = vsyncpa [#allocation3 + $0x1], 0 }
  0x12   :  { %27 = vsyncpa [#allocation6], 0 }
  0x13   :  { %28 = vsyncpa [#allocation9], 0 }
  0x14   :  { %29 = vsyncpa [#allocation12], 0 }
  0x15   :  { %30 = vsyncpa [#allocation4], 0 }
  0x16   :  { %32 = vsyncpa [#allocation4 + $0x1], 0  ;;  %s9445_s0 = smov 0   ;;  %s9447_s30 = smov 0  }
  0x17   :  { %s9449_s20 = smov 0   ;;  %s9451_s21 = smov 0  }
  0x18 LB: > { %s12607_s2 = sld [smem:[#allocation85_spill]]  ;;  %s9469_s24 = sadd.s32 4294967295, %s9329_s21   ;;  %s9329_s21 = sphi %s9451_s21, %s12967_s21   ;;  %s9325_s20 = sphi %s9449_s20, %s12966_s20   ;;  %s9321_s30 = sphi %s9447_s30, %s12965_s30   ;;  %s9317_s0 = sphi %s9445_s0, %s12964_s0  }
  0x19   : > { %p7312_p0 = scmp.ge.s32.totalorder %s9329_s21, 1  ;;  %p59_p1 = scmp.eq.s32.totalorder %s9469_s24, 0 }
  0x1a   : > { %p473_p2 = scmp.lt.s32.totalorder %s9329_s21, 3  ;;  %s9331_s3 = smov [#allocation5]  }
  0x1b   : > { %s486_s26 = sshll.u32 %s9331_s3, 4  ;;  %s12609_s5 = sld [smem:[#allocation88_spill]]  ;;  %s487_s26 = int_to_ptr.vmem [resolvable:$true] %s486_s26 }
  0x1c   : > { %p9474_p3 = pnand %p7312_p0, %p473_p2  ;;  %s9332_s22 = smov [#allocation8]  }
  0x1d   : > { %s12474_s3 = smov 256   ;;  %s12475_s19 = smov 16  }
  0x1e   : > { %s484_s23 = sshll.u32 %s12607_s2, 4  ;;  %p8947_p4 = pneg %p9474_p3  ;;  %s485_s23 = int_to_ptr.hbm [resolvable:$true] %s484_s23 }
  0x1f   : > { %s520_s2 = sshll.u32 %s9332_s22, 4  ;;  %s9335_s27 = smov 64   ;;  %s521_s2 = int_to_ptr.vmem [resolvable:$true] %s520_s2 }
  0x20   : > { %p9486_p6 = pnand %p8947_p4, %p59_p1  ;;  %s9336_s28 = smov 4  }
  0x21   : > { %s518_s29 = sshll.u32 %s12609_s5, 4  ;;  %s12611_s15 = sld [smem:[#allocation95_spill]]  ;;  %s519_s29 = int_to_ptr.hbm [resolvable:$true] %s518_s29 }
  0x22   : > { %8950 = dma.hbm_to_vmem [thread:$0]  (!%p9486_p6), %s485_s23, 8192, %s487_s26, [#allocation6], %s12474_s3, %s12474_s3, %s12475_s19  }
  0x23   : > { %8956 = dma.hbm_to_vmem [thread:$0]  (!%p9486_p6), %s519_s29, 2048, %s521_s2, [#allocation9], %s9335_s27, %s9335_s27, %s9336_s28  }
  0x24   : > { %s9337_s14 = smov [#allocation11]   ;;  %s12612_s8 = sld [smem:[#allocation87_spill]] }
  0x25   : > { %s572_s22 = sshll.u32 %s9337_s14, 4  ;;  %s9338_s23 = smov [#allocation7]   ;;  %s573_s22 = int_to_ptr.vmem [resolvable:$true] %s572_s22 }
  0x26   : > { %s503_s26 = sshll.u32 %s9338_s23, 4  ;;  %s9339_s5 = smov 128   ;;  %s504_s26 = int_to_ptr.vmem [resolvable:$true] %s503_s26 }
  0x27   : > { %s570_s16 = sshll.u32 %s12611_s15, 4  ;;  %s9340_s14 = smov 8   ;;  %s571_s16 = int_to_ptr.hbm [resolvable:$true] %s570_s16 }
  0x28   : > { %8962 = dma.hbm_to_vmem [thread:$0]  (!%p9486_p6), %s571_s16, 8192, %s573_s22, [#allocation12], %s12474_s3, %s12474_s3, %s12475_s19  }
  0x29   : > { %s12613_s13 = sld [smem:[#allocation93_spill]]  ;;  %s9341_s16 = smov [#allocation10]  }
  0x2a   : > { %s501_s11 = sshll.u32 %s12612_s8, 4  ;;  %s555_s18 = sshll.u32 %s9341_s16, 4  ;;  %s502_s11 = int_to_ptr.hbm [resolvable:$true] %s501_s11  ;;  %s556_s18 = int_to_ptr.vmem [resolvable:$true] %s555_s18 }
  0x2b   : > { %8953 = dma.hbm_to_vmem [thread:$0]  (!%p9486_p6), %s502_s11, 8192, %s504_s26, [#allocation6], %s9339_s5, %s9339_s5, %s9340_s14  }
  0x2c   : > { %s587_s27 = sshll.u32 %s12466_s17, 4  ;;  %s9342_s11 = smov [#allocation13]   ;;  %s588_s27 = int_to_ptr.hbm [resolvable:$true] %s587_s27 }
  0x2d   : > { %s589_s28 = sshll.u32 %s9342_s11, 4  ;;  %s7311_s22 = sadd.s32 4294967294, %s9329_s21   ;;  %s590_s28 = int_to_ptr.vmem [resolvable:$true] %s589_s28 }
  0x2e   : > { %8965 = dma.hbm_to_vmem [thread:$0]  (!%p9486_p6), %s588_s27, 8192, %s590_s28, [#allocation12], %s9339_s5, %s9339_s5, %s9340_s14  }
  0x2f   : > { %s553_s8 = sshll.u32 %s12613_s13, 4  ;;  %s9522_s23 = sadd.s32 1, %s9329_s21   ;;  %s554_s8 = int_to_ptr.hbm [resolvable:$true] %s553_s8 }
  0x30   : > { %8959 = dma.hbm_to_vmem [thread:$0]  (!%p9486_p6), %s554_s8, 2048, %s556_s18, [#allocation9], %s9339_s5, %s9339_s5, %s9340_s14  }
  0x31   : > { %s42_s26 = ssub.s32 %s9329_s21, %s9522_s23  ;;  %s45_s10 = sadd.s32 1, %s9325_s20 }
  0x32   : > { %p43_p7 = scmp.eq.s32.totalorder %s42_s26, 0  ;;  %p52_p8 = scmp.ne.s32.totalorder %s9325_s20, %s9321_s30 }
  0x33   : > { %p53_p9 = scmp.eq.s32.totalorder %s9329_s21, 0  ;;  %p58_p10 = scmp.ne.s32.totalorder %s9321_s30, %s9317_s0 }
  0x34   : > { %s9533_s12 = scalar_select %p43_p7, %s9325_s20, %s45_s10  }
  0x35   : > { %p9535_p11 = por %p53_p9, %p52_p8  ;;  %p9541_p12 = por %p59_p1, %p58_p10 }
  0x36   : > { %p460_p13 = scmp.eq.s32.totalorder %s9469_s24, 1  ;;  %p466_p0 = scmp.eq.s32.totalorder %s7311_s22, 1 }
  0x37   : > { %p8980_p2 = scmp.lt.s32.totalorder %s9329_s21, 2  ;;  %s606_s5 = sand.u32 1, %s9325_s20  }
  0x38   : > { %p9548_p4 = por %p460_p13, %p52_p8  ;;  %p9552_p6 = por %p466_p0, %p58_p10 }
  0x39   : > { %s7320_s18 = sshll.u32 %s606_s5, 9  ;;  %s8588_s29 = sshll.u32 %s9329_s21, 9 }
  0x3a   : > { %s12618_s11 = sld [smem:[#allocation84_spill]]  ;;  %s610_s26 = scalar_lea.vmem [#allocation2], %s7320_s18 }
  0x3b   : > { %s619_s10 = sshll.u32 %s610_s26, 4  ;;  %p9562_p7 = pnand %p8980_p2, %p9535_p11  ;;  %s620_s10 = int_to_ptr.vmem [resolvable:$true] %s619_s10 }
  0x3c   : > { %s607_s19 = scalar_lea.sflag [#allocation3], %s606_s5 }
  0x3d   : > { %p9225_p9 = pneg %p9562_p7 }
  0x40   : > { %s616_s28 = scalar_lea.hbm %s12618_s11, %s8588_s29  ;;  %s9228_s2 = scalar_lea.hbm %s12618_s11, 1024 }
  0x41   : > { %s617_s3 = sshll.u32 %s616_s28, 4  ;;  %s618_s3 = int_to_ptr.hbm [resolvable:$true] %s617_s3 }
  0x42   : > { %s9221_s13 = sshra.s32 %s618_s3, 4  ;;  %s9222_s13 = int_to_ptr.hbm [resolvable:$true] %s9221_s13 }
  0x43   : > { %s9223_s15 = scalar_lea.hbm %s9222_s13, 512  ;;  %p9229_p11 = scmp.lt.s32.totalorder %s9222_s13, %s12618_s11 }
  0x44   : > { %p9224_p8 = scmp.ne.s32.totalorder %s9222_s13, %s9223_s15  ;;  %p9230_p0 = scmp.lt.s32.totalorder %s9228_s2, %s9223_s15 }
  0x46   : > { %p9226_p10 = pnand %p9225_p9, %p9224_p8  ;;  %p9231_p2 = por %p9230_p0, %p9229_p11 }
  0x48   : > { %p9227_p13 = pneg %p9226_p10 }
  0x4a   : > { %p9232_p5 = pnand %p9231_p2, %p9227_p13 }
  0x4c   : > { %9235 = shalt.err (!%p9232_p5)
}
  0x4d   : > { %s12620_s5 = smov 16   ;;  %s12621_s28 = smov 256  }
  0x4e   : > { %8969 = dma.hbm_to_vmem [thread:$0]  (!%p9562_p7), %s618_s3, 8192, %s620_s10, %s607_s19, %s12621_s28, %s12621_s28, %s12620_s5  }
  0x4f   : > { %631 = sbr.rel (%p9474_p3) target bundleno = 3217 (0xc91), region = 96 }
  0x54   : > { %s9582_s26 = sand.u32 1, %s9321_s30  }
  0x55   : > { %s7325_s13 = sshll.u32 %s9582_s26, 9  ;;  %s634_s15 = scalar_lea.sflag [#allocation3], %s9582_s26 }
  0x56   : > { %s9588_s18 = scalar_lea.vmem [#allocation2], %s7325_s13 }
  0x57   : > { %9296 = dma.done.wait (%p9541_p12), %s634_s15, 8192  }
  0x58   : > { %9298 = vsyncadd (%p9541_p12), %s634_s15, 4294959104 }
  0x59   : > { %9300 = dma.done.wait (%p59_p1), [#allocation6], 16384  }
  0x5a   : > { %9302 = vsyncadd (%p59_p1), [#allocation6], 4294950912 }
  0x5b   : > { %9304 = dma.done.wait (%p59_p1), [#allocation9], 4096  }
  0x5c   : > { %9306 = vsyncadd (%p59_p1), [#allocation9], 4294963200 }
  0x5d   : > { %9308 = dma.done.wait (%p59_p1), [#allocation12], 16384  }
  0x5e   : > { %9310 = vsyncadd (%p59_p1), [#allocation12], 4294950912  ;;  %v7447_v0 = vld [vmem:[#allocation5 + $0xe0] sm:$0xf]  ;;  %v8619_v1 = vld [vmem:[#allocation5 + $0xec] sm:$0xf0] }
  0x5f   : > { %v7575_v2 = vld [vmem:[#allocation5 + $0x1e0] sm:$0xf]  ;;  %v7448_v3 = vor.u32 %v8619_v1, %v7447_v0  ;;  %v8651_v4 = vld [vmem:[#allocation5 + $0x1ec] sm:$0xf0]  ;;  %v8617_v5 = vld [vmem:[#allocation5 + $0xe4] sm:$0xf] }
  0x60   : > { %v7449_v6 = vld [vmem:[#allocation5 + $0xf0] sm:$0xf0]  ;;  %v9606_v7 = vor.u32 %v8651_v4, %v7575_v2  ;;  %v7431_v9 = vld [vmem:[#allocation5 + $0xc0] sm:$0xf]  ;;  %v8615_v10 = vld [vmem:[#allocation5 + $0xcc] sm:$0xf0] }
  0x61   : > { %v9608_v8 = vor.u32 %v8617_v5, %v7449_v6  ;;  %v7559_v11 = vld [vmem:[#allocation5 + $0x1c0] sm:$0xf]  ;;  %1216 = vmatpush.bf16.msra.mxu0 %v7448_v3  ;;  %8895 = vmatpush.bf16.msra.mxu3 %v7448_v3  ;;  %v7432_v12 = vor.u32 %v8615_v10, %v7431_v9  ;;  %v8647_v13 = vld [vmem:[#allocation5 + $0x1cc] sm:$0xf0]  ;;  %v8613_v14 = vld [vmem:[#allocation5 + $0xc4] sm:$0xf] }
  0x62   : > { %v7433_v15 = vld [vmem:[#allocation5 + $0xd0] sm:$0xf0]  ;;  %1305 = vmatpush.bf16.msra.mxu1 %v9606_v7  ;;  %v9612_v16 = vor.u32 %v8647_v13, %v7559_v11  ;;  %v7415_v18 = vld [vmem:[#allocation5 + $0xa0] sm:$0xf]  ;;  %v8611_v19 = vld [vmem:[#allocation5 + $0xac] sm:$0xf0] }
  0x63   : > { %1394 = vmatpush.bf16.msra.mxu2 %v9608_v8  ;;  %v9614_v17 = vor.u32 %v8613_v14, %v7433_v15  ;;  %v7543_v20 = vld [vmem:[#allocation5 + $0x1a0] sm:$0xf]  ;;  %v8643_v21 = vld [vmem:[#allocation5 + $0x1ac] sm:$0xf0]  ;;  %v8609_v22 = vld [vmem:[#allocation5 + $0xa4] sm:$0xf]  ;;  %v7416_v24 = vor.u32 %v8611_v19, %v7415_v18 }
  0x64   : > { %v7417_v23 = vld [vmem:[#allocation5 + $0xb0] sm:$0xf0]  ;;  %v9618_v25 = vor.u32 %v8643_v21, %v7543_v20  ;;  %v7399_v27 = vld [vmem:[#allocation5 + $0x80] sm:$0xf]  ;;  %v8607_v28 = vld [vmem:[#allocation5 + $0x8c] sm:$0xf0] }
  0x65   : > { %1217 = vmatpush.bf16.msra.mxu0 %v7432_v12  ;;  %8896 = vmatpush.bf16.msra.mxu3 %v7432_v12  ;;  %v9620_v26 = vor.u32 %v8609_v22, %v7417_v23  ;;  %v7527_v29 = vld [vmem:[#allocation5 + $0x180] sm:$0xf]  ;;  %v8639_v30 = vld [vmem:[#allocation5 + $0x18c] sm:$0xf0]  ;;  %v8605_v31 = vld [vmem:[#allocation5 + $0x84] sm:$0xf]  ;;  %v7400_v33 = vor.u32 %v8607_v28, %v7399_v27 }
  0x66   : > { %1306 = vmatpush.bf16.msra.mxu1 %v9612_v16  ;;  %v7401_v32 = vld [vmem:[#allocation5 + $0x90] sm:$0xf0]  ;;  %v9624_v34 = vor.u32 %v8639_v30, %v7527_v29  ;;  %v7383_v36 = vld [vmem:[#allocation5 + $0x60] sm:$0xf]  ;;  %v8603_v37 = vld [vmem:[#allocation5 + $0x6c] sm:$0xf0] }
  0x67   : > { %1395 = vmatpush.bf16.msra.mxu2 %v9614_v17  ;;  %v9626_v35 = vor.u32 %v8605_v31, %v7401_v32  ;;  %v7511_v38 = vld [vmem:[#allocation5 + $0x160] sm:$0xf]  ;;  %v8635_v39 = vld [vmem:[#allocation5 + $0x16c] sm:$0xf0]  ;;  %v8601_v40 = vld [vmem:[#allocation5 + $0x64] sm:$0xf]  ;;  %v7384_v42 = vor.u32 %v8603_v37, %v7383_v36 }
  0x68   : > { %v7385_v41 = vld [vmem:[#allocation5 + $0x70] sm:$0xf0]  ;;  %v9630_v43 = vor.u32 %v8635_v39, %v7511_v38  ;;  %v7367_v45 = vld [vmem:[#allocation5 + $0x40] sm:$0xf]  ;;  %v8599_v46 = vld [vmem:[#allocation5 + $0x4c] sm:$0xf0] }
  0x69   : > { %1218 = vmatpush.bf16.msra.mxu0 %v7416_v24  ;;  %8897 = vmatpush.bf16.msra.mxu3 %v7416_v24  ;;  %v9632_v44 = vor.u32 %v8601_v40, %v7385_v41  ;;  %v7495_v47 = vld [vmem:[#allocation5 + $0x140] sm:$0xf]  ;;  %v8631_v48 = vld [vmem:[#allocation5 + $0x14c] sm:$0xf0]  ;;  %v8597_v49 = vld [vmem:[#allocation5 + $0x44] sm:$0xf]  ;;  %v7368_v52 = vor.u32 %v8599_v46, %v7367_v45 }
  0x6a   : > { %1307 = vmatpush.bf16.msra.mxu1 %v9618_v25  ;;  %v7369_v50 = vld [vmem:[#allocation5 + $0x50] sm:$0xf0]  ;;  %v7351_v51 = vld [vmem:[#allocation5 + $0x20] sm:$0xf]  ;;  %v8595_v53 = vld [vmem:[#allocation5 + $0x2c] sm:$0xf0]  ;;  %v7496_v56 = vor.u32 %v8631_v48, %v7495_v47 }
  0x6b   : > { %1396 = vmatpush.bf16.msra.mxu2 %v9620_v26  ;;  %v7479_v54 = vld [vmem:[#allocation5 + $0x120] sm:$0xf]  ;;  %v8627_v55 = vld [vmem:[#allocation5 + $0x12c] sm:$0xf0]  ;;  %v9636_v57 = vor.u32 %v8597_v49, %v7369_v50  ;;  %v8593_v58 = vld [vmem:[#allocation5 + $0x24] sm:$0xf]  ;;  %v7352_v60 = vor.u32 %v8595_v53, %v7351_v51 }
  0x6c   : > { %v7353_v59 = vld [vmem:[#allocation5 + $0x30] sm:$0xf0]  ;;  %v7480_v61 = vor.u32 %v8627_v55, %v7479_v54  ;;  %v7335_v63 = vld [vmem:[#allocation5] sm:$0xf]  ;;  %v8591_v0 = vld [vmem:[#allocation5 + $0xc] sm:$0xf0] }
  0x6d   : > { %1219 = vmatpush.bf16.msra.mxu0 %v7400_v33  ;;  %8898 = vmatpush.bf16.msra.mxu3 %v7400_v33  ;;  %v9639_v62 = vor.u32 %v8593_v58, %v7353_v59  ;;  %v7463_v1 = vld [vmem:[#allocation5 + $0x100] sm:$0xf]  ;;  %v8623_v2 = vld [vmem:[#allocation5 + $0x10c] sm:$0xf0]  ;;  %v8589_v3 = vld [vmem:[#allocation5 + $0x4] sm:$0xf]  ;;  %v7336_v6 = vor.u32 %v8591_v0, %v7335_v63 }
  0x6e   : > { %1308 = vmatpush.bf16.msra.mxu1 %v9624_v34  ;;  %v7337_v4 = vld [vmem:[#allocation5 + $0x10] sm:$0xf0]  ;;  %v726_v5 = vld [vmem:[%s9588_s18] sm:$0xff]  ;;  %v7464_v12 = vor.u32 %v8623_v2, %v7463_v1  ;;  %v727_v14 = vld [vmem:[%s9588_s18 + $0x8] sm:$0xff]  ;;  %s12638_s3 = sld [smem:[#allocation86_spill]]  ;;  %vm3917_vm0 = vcmask 523264  }
  0x6f   : > { %1397 = vmatpush.bf16.msra.mxu2 %v9626_v35  ;;  %v728_v9 = vld [vmem:[%s9588_s18 + $0x10] sm:$0xff]  ;;  %v774_v10 = vld [vmem:[%s9588_s18 + $0x180] sm:$0xff]  ;;  %v9646_v13 = vor.u32 %v8589_v3, %v7337_v4  ;;  %v729_v15 = vld [vmem:[%s9588_s18 + $0x18] sm:$0xff]  ;;  %s12849_s8 = sld [smem:[#allocation91_spill]] }
  0x70   : > { %v776_v11 = vld [vmem:[%s9588_s18 + $0x190] sm:$0xff]  ;;  %v9650_v18 = vpack.c.bf16 %v728_v9, %v726_v5  ;;  %v9654_v20 = vpack.c.bf16 %v729_v15, %v727_v14  ;;  %v730_v21 = vld [vmem:[%s9588_s18 + $0x20] sm:$0xff]  ;;  %v733_v27 = vld [vmem:[%s9588_s18 + $0x38] sm:$0xff]  ;;  %s12856_s1 = sld [smem:[#allocation89_spill]] }
  0x71   : > { %1220 = vmatpush.bf16.msra.mxu0 %v7384_v42  ;;  %8899 = vmatpush.bf16.msra.mxu3 %v7384_v42  ;;  %v9652_v19 = vpack.c.bf16 %v776_v11, %v774_v10  ;;  %v732_v22 = vld [vmem:[%s9588_s18 + $0x30] sm:$0xff]  ;;  %v778_v23 = vld [vmem:[%s9588_s18 + $0x1a0] sm:$0xff]  ;;  %v735_v33 = vld [vmem:[%s9588_s18 + $0x48] sm:$0xff]  ;;  %s12857_s28 = sld [smem:[#allocation90_spill]] }
  0x72   : > { %1309 = vmatpush.bf16.msra.mxu1 %v9630_v43  ;;  %12623 = vst [vmem:[#allocation21_spill] sm:$0xff] %v9654_v20  ;;  %v780_v24 = vld [vmem:[%s9588_s18 + $0x1b0] sm:$0xff]  ;;  %v9671_v28 = vpack.c.bf16 %v732_v22, %v730_v21  ;;  %v782_v31 = vld [vmem:[%s9588_s18 + $0x1c0] sm:$0xff]  ;;  %v739_v42 = vld [vmem:[%s9588_s18 + $0x68] sm:$0xff]  ;;  %s12858_s19 = sld [smem:[#allocation92_spill]] }
  0x73   : > { %1398 = vmatpush.bf16.msra.mxu2 %v9632_v44  ;;  %12622 = vst [vmem:[#allocation20_spill] sm:$0xff] %v9652_v19  ;;  %v9673_v29 = vpack.c.bf16 %v780_v24, %v778_v23  ;;  %v736_v30 = vld [vmem:[%s9588_s18 + $0x50] sm:$0xff]  ;;  %v738_v39 = vld [vmem:[%s9588_s18 + $0x60] sm:$0xff]  ;;  %v775_v47 = vld [vmem:[%s9588_s18 + $0x188] sm:$0xff]  ;;  %s12859_s10 = sld [smem:[#allocation94_spill]] }
  0x74   : > { %v784_v32 = vld [vmem:[%s9588_s18 + $0x1d0] sm:$0xff]  ;;  %v786_v41 = vld [vmem:[%s9588_s18 + $0x1e0] sm:$0xff]  ;;  %v743_v48 = vld [vmem:[%s9588_s18 + $0x88] sm:$0xff]  ;;  %s12860_s2 = sld [smem:[#allocation96_spill]] }
  0x75   : > { %1221 = vmatpush.bf16.msra.mxu0 %v7368_v52  ;;  %8900 = vmatpush.bf16.msra.mxu3 %v7368_v52  ;;  %12624 = vst [vmem:[#allocation22_spill] sm:$0xff] %v9673_v29  ;;  %v9690_v37 = vpack.c.bf16 %v784_v32, %v782_v31  ;;  %v740_v40 = vld [vmem:[%s9588_s18 + $0x70] sm:$0xff]  ;;  %v745_v49 = vld [vmem:[%s9588_s18 + $0x98] sm:$0xff]  ;;  %v746_v53 = vld [vmem:[%s9588_s18 + $0xa0] sm:$0xff] }
  0x76   : > { %1310 = vmatpush.bf16.msra.mxu1 %v7496_v56  ;;  %v9708_v45 = vpack.c.bf16 %v740_v40, %v738_v39  ;;  %v9732_v52 = vpack.c.bf16 %v745_v49, %v743_v48  ;;  %v748_v54 = vld [vmem:[%s9588_s18 + $0xb0] sm:$0xff]  ;;  %v779_v55 = vld [vmem:[%s9588_s18 + $0x1a8] sm:$0xff]  ;;  %v749_v58 = vld [vmem:[%s9588_s18 + $0xb8] sm:$0xff] }
  0x77   : > { %1399 = vmatpush.bf16.msra.mxu2 %v9636_v57  ;;  %12626 = vst [vmem:[#allocation24_spill] sm:$0xff] %v9690_v37  ;;  %v9744_v59 = vpack.c.bf16 %v748_v54, %v746_v53  ;;  %v752_v63 = vld [vmem:[%s9588_s18 + $0xd0] sm:$0xff]  ;;  %v783_v0 = vld [vmem:[%s9588_s18 + $0x1c8] sm:$0xff]  ;;  %v785_v1 = vld [vmem:[%s9588_s18 + $0x1d8] sm:$0xff] }
  0x78   : > { %12631 = vst [vmem:[#allocation29_spill] sm:$0xff] %v9732_v52  ;;  %v751_v2 = vld [vmem:[%s9588_s18 + $0xc8] sm:$0xff]  ;;  %v753_v3 = vld [vmem:[%s9588_s18 + $0xd8] sm:$0xff]  ;;  %v9762_v5 = vpack.c.bf16 %v785_v1, %v783_v0  ;;  %v8649_v9 = vld [vmem:[#allocation5 + $0x1e4] sm:$0xf] }
  0x79   : > { %1222 = vmatpush.bf16.msra.mxu0 %v7352_v60  ;;  %8901 = vmatpush.bf16.msra.mxu3 %v7352_v60  ;;  %v7577_v10 = vld [vmem:[#allocation5 + $0x1f0] sm:$0xf0]  ;;  %v787_v14 = vld [vmem:[%s9588_s18 + $0x1e8] sm:$0xff]  ;;  %v789_v15 = vld [vmem:[%s9588_s18 + $0x1f8] sm:$0xff] }
  0x7a   : > { %1311 = vmatpush.bf16.msra.mxu1 %v7480_v61  ;;  %12634 = vst [vmem:[#allocation32_spill] sm:$0xff] %v9762_v5  ;;  %v7580_v11 = vor.u32 %v8649_v9, %v7577_v10  ;;  %v755_v21 = vld [vmem:[%s9588_s18 + $0xe8] sm:$0xff]  ;;  %v757_v22 = vld [vmem:[%s9588_s18 + $0xf8] sm:$0xff]  ;;  %v9778_v24 = vpack.c.bf16 %v789_v15, %v787_v14  ;;  %v8641_v31 = vld [vmem:[#allocation5 + $0x1a4] sm:$0xf] }
  0x7b   : > { %1400 = vmatpush.bf16.msra.mxu2 %v9639_v62  ;;  %v7545_v32 = vld [vmem:[#allocation5 + $0x1b0] sm:$0xf0]  ;;  %v8620_v39 = vld [vmem:[#allocation5 + $0xf4] sm:$0xf0]  ;;  %v7583_v40 = vld [vmem:[#allocation5 + $0x1e8] sm:$0xf] }
  0x7c   : > { %12636 = vst [vmem:[#allocation34_spill] sm:$0xff] %v9778_v24  ;;  %v8637_v48 = vld [vmem:[#allocation5 + $0x184] sm:$0xf]  ;;  %v7529_v49 = vld [vmem:[#allocation5 + $0x190] sm:$0xf0] }
  0x7d   : > { %1223 = vmatpush.bf16.msra.mxu0 %v7336_v6  ;;  %8902 = vmatpush.bf16.msra.mxu3 %v7336_v6  ;;  %v9764_v6 = vpack.c.bf16 %v753_v3, %v751_v2  ;;  %v7532_v53 = vor.u32 %v8637_v48, %v7529_v49  ;;  %v7457_v0 = vld [vmem:[#allocation5 + $0xf8] sm:$0xf0]  ;;  %v8633_v3 = vld [vmem:[#allocation5 + $0x164] sm:$0xf]  ;;  %v7513_v9 = vld [vmem:[#allocation5 + $0x170] sm:$0xf0] }
  0x7e   : > { %1312 = vmatpush.bf16.msra.mxu1 %v7464_v12  ;;  %v7567_v14 = vld [vmem:[#allocation5 + $0x1c8] sm:$0xf]  ;;  %v762_v48 = vld [vmem:[%s9588_s18 + $0x120] sm:$0xff]  ;;  %v764_v49 = vld [vmem:[%s9588_s18 + $0x130] sm:$0xff] }
  0x7f   : > { %1401 = vmatpush.bf16.msra.mxu2 %v9646_v13  ;;  %12635 = vst [vmem:[#allocation33_spill] sm:$0xff] %v9764_v6 }
  0x80   : > { %1224 = vmatmul.bf16.vlgmr.msra.gmra.mxu0 %v9650_v18  ;;  %1284 = vmatmul.bf16.vlgmr.msra.gmra.mxu3 %v9652_v19 }
  0x81   : > { %8903 = vmatpush.bf16.msrb.mxu3 %v9606_v7  ;;  %1313 = vmatmul.bf16.vlgmr.msra.gmra.mxu1 %v9654_v20  ;;  %v731_v7 = vld [vmem:[%s9588_s18 + $0x28] sm:$0xff] }
  0x82   : > { %1402 = vmatmul.bf16.vlgmr.msra.gmra.mxu2 %v9650_v18 }
  0x85   : > { %8904 = vmatpush.bf16.msrb.mxu3 %v9612_v16  ;;  %v9675_v16 = vpack.c.bf16 %v733_v27, %v731_v7  ;;  %v8645_v7 = vld [vmem:[#allocation5 + $0x1c4] sm:$0xf]  ;;  %v7561_v27 = vld [vmem:[#allocation5 + $0x1d0] sm:$0xf0] }
  0x87   : > { %12625 = vst [vmem:[#allocation23_spill] sm:$0xff] %v9675_v16 }
  0x89   : > { %8905 = vmatpush.bf16.msrb.mxu3 %v9618_v25  ;;  %v734_v25 = vld [vmem:[%s9588_s18 + $0x40] sm:$0xff] }
  0x8a   : > { %v9688_v36 = vpack.c.bf16 %v736_v30, %v734_v25  ;;  %v9780_v25 = vpack.c.bf16 %v757_v22, %v755_v21  ;;  %v7564_v30 = vor.u32 %v8645_v7, %v7561_v27  ;;  %v8648_v22 = vld [vmem:[#allocation5 + $0x1d4] sm:$0xf0]  ;;  %v8614_v7 = vld [vmem:[#allocation5 + $0xcc] sm:$0xf]  ;;  %v7441_v27 = vld [vmem:[#allocation5 + $0xd8] sm:$0xf0] }
  0x8c   : > { %12637 = vst [vmem:[#allocation35_spill] sm:$0xff] %v9780_v25 }
  0x8d   : > { %8906 = vmatpush.bf16.msrb.mxu3 %v9624_v34  ;;  %v737_v34 = vld [vmem:[%s9588_s18 + $0x58] sm:$0xff] }
  0x8e   : > { %v9693_v38 = vpack.c.bf16 %v737_v34, %v735_v33  ;;  %v7455_v33 = vld [vmem:[#allocation5 + $0xe8] sm:$0xf]  ;;  %v7548_v34 = vor.u32 %v8641_v31, %v7545_v32  ;;  %v7568_v31 = vor.u32 %v8648_v22, %v7567_v14  ;;  %v7444_v32 = vor.u32 %v8614_v7, %v7441_v27  ;;  %v8640_v7 = vld [vmem:[#allocation5 + $0x194] sm:$0xf0]  ;;  %v8606_v27 = vld [vmem:[#allocation5 + $0x8c] sm:$0xf] }
  0x90   : > { %1229 = vmatmul.bf16.gmra.mxu0 %v9671_v28  ;;  %1289 = vmatmul.bf16.gmra.mxu3 %v9673_v29  ;;  %12627 = vst [vmem:[#allocation25_spill] sm:$0xff] %v9693_v38 }
  0x91   : > { %8907 = vmatpush.bf16.msrb.mxu3 %v9630_v43  ;;  %1318 = vmatmul.bf16.gmra.mxu1 %v9675_v16  ;;  %v741_v43 = vld [vmem:[%s9588_s18 + $0x78] sm:$0xff] }
  0x92   : > { %1407 = vmatmul.bf16.gmra.mxu2 %v9671_v28 }
  0x95   : > { %8908 = vmatpush.bf16.msrb.mxu3 %v7496_v56  ;;  %v781_v56 = vld [vmem:[%s9588_s18 + $0x1b8] sm:$0xff] }
  0x96   : > { %v9746_v60 = vpack.c.bf16 %v781_v56, %v779_v55 }
  0x98   : > { %12632 = vst [vmem:[#allocation30_spill] sm:$0xff] %v9746_v60 }
  0x99   : > { %8909 = vmatpush.bf16.msrb.mxu3 %v7480_v61 }
  0x9d   : > { %8910 = vmatpush.bf16.msrb.mxu3 %v7464_v12  ;;  %v754_v12 = vld [vmem:[%s9588_s18 + $0xe0] sm:$0xff] }
  0xa0   : > { %1234 = vmatmul.bf16.gmra.mxu0 %v9688_v36  ;;  %1294 = vmatmul.bf16.gmra.mxu3 %v9690_v37 }
  0xa1   : > { %8911 = vmatpush.bf16.msra.mxu3 %v9608_v8  ;;  %1323 = vmatmul.bf16.gmra.mxu1 %v9693_v38  ;;  %v788_v8 = vld [vmem:[%s9588_s18 + $0x1f0] sm:$0xff] }
  0xa2   : > { %1412 = vmatmul.bf16.gmra.mxu2 %v9688_v36  ;;  %v9710_v46 = vpack.c.bf16 %v788_v8, %v786_v41  ;;  %v8652_v41 = vld [vmem:[#allocation5 + $0x1f4] sm:$0xf0]  ;;  %v7456_v8 = vor.u32 %v8620_v39, %v7455_v33 }
  0xa4   : > { %12628 = vst [vmem:[#allocation26_spill] sm:$0xff] %v9710_v46  ;;  %1572 = vmatpush.bf16.msrb.mxu0 %v7456_v8  ;;  %v7551_v8 = vld [vmem:[#allocation5 + $0x1a8] sm:$0xf] }
  0xa5   : > { %8912 = vmatpush.bf16.msra.mxu3 %v9614_v17  ;;  %v9712_v17 = vpack.c.bf16 %v741_v43, %v739_v42  ;;  %v7584_v42 = vor.u32 %v8652_v41, %v7583_v40  ;;  %v9789_v43 = vld [vmem:[%s12638_s3] sm:$0xf]  ;;  %v7423_v40 = vld [vmem:[#allocation5 + $0xa8] sm:$0xf]  ;;  %v8612_v41 = vld [vmem:[#allocation5 + $0xb4] sm:$0xf0] }
  0xa6   : > { %v9796_v54 = vperm.slane %v9789_v43, 0 }
  0xa7   : > { %12629 = vst [vmem:[#allocation27_spill] sm:$0xff] %v9712_v17  ;;  %1661 = vmatpush.bf16.msrb.mxu1 %v7584_v42 }
  0xa9   : > { %8913 = vmatpush.bf16.msra.mxu3 %v9620_v26  ;;  %v742_v26 = vld [vmem:[%s9588_s18 + $0x80] sm:$0xff] }
  0xab   : > { %1662 = vmatpush.bf16.msrb.mxu1 %v7568_v31 }
  0xad   : > { %8914 = vmatpush.bf16.msra.mxu3 %v9626_v35  ;;  %v744_v35 = vld [vmem:[%s9588_s18 + $0x90] sm:$0xff] }
  0xae   : > { %v9728_v50 = vpack.c.bf16 %v744_v35, %v742_v26  ;;  %v758_v26 = vld [vmem:[%s9588_s18 + $0x100] sm:$0xff]  ;;  %v760_v35 = vld [vmem:[%s9588_s18 + $0x110] sm:$0xff] }
  0xaf   : > { %v9798_v55 = vpack.c.bf16 %v760_v35, %v758_v26  ;;  %v7424_v26 = vor.u32 %v8612_v41, %v7423_v40  ;;  %v8644_v35 = vld [vmem:[#allocation5 + $0x1b4] sm:$0xf0] }
  0xb0   : > { %1239 = vmatmul.bf16.gmra.mxu0 %v9708_v45  ;;  %1299 = vmatmul.bf16.gmra.mxu3 %v9710_v46 }
  0xb1   : > { %8915 = vmatpush.bf16.msra.mxu3 %v9632_v44  ;;  %1328 = vmatmul.bf16.gmra.mxu1 %v9712_v17  ;;  %v777_v44 = vld [vmem:[%s9588_s18 + $0x198] sm:$0xff] }
  0xb2   : > { %1417 = vmatmul.bf16.gmra.mxu2 %v9708_v45  ;;  %v9730_v51 = vpack.c.bf16 %v777_v44, %v775_v47  ;;  %v759_v47 = vld [vmem:[%s9588_s18 + $0x108] sm:$0xff]  ;;  %v761_v44 = vld [vmem:[%s9588_s18 + $0x118] sm:$0xff] }
  0xb4   : > { %12630 = vst [vmem:[#allocation28_spill] sm:$0xff] %v9730_v51 }
  0xb5   : > { %8916 = vmatpush.bf16.msra.mxu3 %v9636_v57  ;;  %v747_v57 = vld [vmem:[%s9588_s18 + $0xa8] sm:$0xff] }
  0xb6   : > { %v9748_v61 = vpack.c.bf16 %v749_v58, %v747_v57  ;;  %v9800_v57 = vpack.c.bf16 %v761_v44, %v759_v47  ;;  %v8610_v47 = vld [vmem:[#allocation5 + $0xac] sm:$0xf]  ;;  %v7425_v44 = vld [vmem:[#allocation5 + $0xb8] sm:$0xf0] }
  0xb8   : > { %12633 = vst [vmem:[#allocation31_spill] sm:$0xff] %v9748_v61 }
  0xb9   : > { %8917 = vmatpush.bf16.msra.mxu3 %v9639_v62  ;;  %v750_v62 = vld [vmem:[%s9588_s18 + $0xc0] sm:$0xff]  ;;  %12639 = vst [vmem:[#allocation36_spill] sm:$0xff] %v9800_v57 }
  0xba   : > { %v9760_v4 = vpack.c.bf16 %v752_v63, %v750_v62  ;;  %v8618_v63 = vld [vmem:[#allocation5 + $0xec] sm:$0xf] }
  0xbb   : > { %v7460_v2 = vor.u32 %v8618_v63, %v7457_v0  ;;  %v765_v63 = vld [vmem:[%s9588_s18 + $0x138] sm:$0xff]  ;;  %v8629_v0 = vld [vmem:[#allocation5 + $0x144] sm:$0xf] }
  0xbd   : > { %8918 = vmatpush.bf16.msra.mxu3 %v9646_v13  ;;  %v756_v13 = vld [vmem:[%s9588_s18 + $0xf0] sm:$0xff]  ;;  %1750 = vmatpush.bf16.msrb.mxu2 %v7460_v2 }
  0xbe   : > { %v9776_v23 = vpack.c.bf16 %v756_v13, %v754_v12  ;;  %v7439_v12 = vld [vmem:[#allocation5 + $0xc8] sm:$0xf]  ;;  %v8616_v13 = vld [vmem:[#allocation5 + $0xd4] sm:$0xf0] }
  0xbf   : > { %v7440_v21 = vor.u32 %v8616_v13, %v7439_v12  ;;  %v7535_v12 = vld [vmem:[#allocation5 + $0x188] sm:$0xf] }
  0xc0   : > { %1244 = vmatmul.bf16.gmra.mxu0 %v9728_v50  ;;  %1373 = vmatmul.bf16.vlgmr.msrb.gmra.mxu3 %v9730_v51 }
  0xc1   : > { %1333 = vmatmul.bf16.gmra.mxu1 %v9732_v52  ;;  %1483 = vmatpush.bf16.msrb.mxu3 %v7580_v11  ;;  %v7516_v11 = vor.u32 %v8633_v3, %v7513_v9  ;;  %v7407_v9 = vld [vmem:[#allocation5 + $0x88] sm:$0xf] }
  0xc2   : > { %1422 = vmatmul.bf16.gmra.mxu2 %v9728_v50  ;;  %1573 = vmatpush.bf16.msrb.mxu0 %v7440_v21  ;;  %v9822_v21 = vpack.c.bf16 %v764_v49, %v762_v48  ;;  %v7393_v49 = vld [vmem:[#allocation5 + $0x78] sm:$0xf0] }
  0xc3   : > { %1751 = vmatpush.bf16.msrb.mxu2 %v7444_v32 }
  0xc5   : > { %1484 = vmatpush.bf16.msrb.mxu3 %v7564_v30 }
  0xc6   : > { %1574 = vmatpush.bf16.msrb.mxu0 %v7424_v26 }
  0xc9   : > { %1485 = vmatpush.bf16.msrb.mxu3 %v7548_v34 }
  0xcd   : > { %1486 = vmatpush.bf16.msrb.mxu3 %v7532_v53  ;;  %v763_v53 = vld [vmem:[%s9588_s18 + $0x128] sm:$0xff] }
  0xce   : > { %v9824_v32 = vpack.c.bf16 %v765_v63, %v763_v53  ;;  %v8625_v53 = vld [vmem:[#allocation5 + $0x124] sm:$0xf] }
  0xd0   : > { %1249 = vmatmul.bf16.gmra.mxu0 %v9744_v59  ;;  %1378 = vmatmul.bf16.gmra.mxu3 %v9746_v60  ;;  %12641 = vst [vmem:[#allocation38_spill] sm:$0xff] %v9824_v32 }
  0xd1   : > { %1338 = vmatmul.bf16.gmra.mxu1 %v9748_v61  ;;  %1487 = vmatpush.bf16.msrb.mxu3 %v7516_v11  ;;  %v8608_v11 = vld [vmem:[#allocation5 + $0x94] sm:$0xf0] }
  0xd2   : > { %1427 = vmatmul.bf16.gmra.mxu2 %v9744_v59  ;;  %v7408_v22 = vor.u32 %v8608_v11, %v7407_v9 }
  0xd4   : > { %1575 = vmatpush.bf16.msrb.mxu0 %v7408_v22  ;;  %v8598_v22 = vld [vmem:[#allocation5 + $0x4c] sm:$0xf] }
  0xe0   : > { %1254 = vmatmul.bf16.gmra.mxu0 %v9760_v4  ;;  %1383 = vmatmul.bf16.gmra.mxu3 %v9762_v5 }
  0xe1   : > { %1343 = vmatmul.bf16.gmra.mxu1 %v9764_v6 }
  0xe2   : > { %1432 = vmatmul.bf16.gmra.mxu2 %v9760_v4 }
  0xf0   : > { %1259 = vmatmul.bf16.gmra.mxu0 %v9776_v23  ;;  %1388 = vmatmul.bf16.gmra.mxu3 %v9778_v24 }
  0xf1   : > { %1348 = vmatmul.bf16.gmra.mxu1 %v9780_v25 }
  0xf2   : > { %1437 = vmatmul.bf16.gmra.mxu2 %v9776_v23 }
  0xfd   : > { %v1225_v56 = vpop.f32.mrf.mxu0 }
  0xfe   : > { %v1226_v58 = vadd.f32 %v1225_v56, %v9796_v54  ;;  %v1314_v62 = vpop.f32.mrf.mxu1  ;;  %v7552_v56 = vor.u32 %v8644_v35, %v7551_v8  ;;  %v8604_v8 = vld [vmem:[#allocation5 + $0x74] sm:$0xf0]  ;;  %v7519_v35 = vld [vmem:[#allocation5 + $0x168] sm:$0xf] }
 0x100   : > { %v1315_v1 = vadd.f32 %v1314_v62, %v1226_v58  ;;  %1264 = vmatmul.bf16.gmra.mxu0 %v9798_v55  ;;  %1462 = vmatmul.bf16.vlgmr.msra.gmra.mxu3 %v9652_v19  ;;  %v7428_v58 = vor.u32 %v8610_v47, %v7425_v44  ;;  %v8636_v47 = vld [vmem:[#allocation5 + $0x174] sm:$0xf0]  ;;  %v8602_v44 = vld [vmem:[#allocation5 + $0x6c] sm:$0xf] }
 0x101   : > { %1353 = vmatmul.bf16.gmra.mxu1 %v9800_v57  ;;  %v7520_v48 = vor.u32 %v8636_v47, %v7519_v35  ;;  %v8628_v35 = vld [vmem:[#allocation5 + $0x134] sm:$0xf0]  ;;  %v8594_v47 = vld [vmem:[#allocation5 + $0x2c] sm:$0xf] }
 0x102   : > { %1442 = vmatmul.bf16.gmra.mxu2 %v9798_v55  ;;  %v1928_v33 = vmax.f32 %v1315_v1, 0.0  ;;  %v7497_v1 = vld [vmem:[#allocation5 + $0x150] sm:$0xf0]  ;;  %1663 = vmatpush.bf16.msrb.mxu1 %v7552_v56 }
 0x103   : > { %v9807_v10 = vpop.f32.mrf.mxu3  ;;  %v7500_v3 = vor.u32 %v8629_v0, %v7497_v1  ;;  %1752 = vmatpush.bf16.msrb.mxu2 %v7428_v58  ;;  %v7481_v56 = vld [vmem:[#allocation5 + $0x130] sm:$0xf0]  ;;  %v7396_v58 = vor.u32 %v8602_v44, %v7393_v49  ;;  %v7375_v0 = vld [vmem:[#allocation5 + $0x48] sm:$0xf]  ;;  %v8600_v1 = vld [vmem:[#allocation5 + $0x54] sm:$0xf0] }
 0x104   : > { %v7484_v63 = vor.u32 %v8625_v53, %v7481_v56  ;;  %v7376_v11 = vor.u32 %v8600_v1, %v7375_v0  ;;  %v7361_v44 = vld [vmem:[#allocation5 + $0x38] sm:$0xf0]  ;;  %v768_v49 = vld [vmem:[%s9588_s18 + $0x150] sm:$0xff]  ;;  %v767_v53 = vld [vmem:[%s9588_s18 + $0x148] sm:$0xff] }
 0x105   : > { %v9809_v15 = vpop.f32.mrf.mxu2  ;;  %v1227_v30 = vpop.f32.mrf.mxu0  ;;  %1488 = vmatpush.bf16.msrb.mxu3 %v7500_v3  ;;  %v7503_v3 = vld [vmem:[#allocation5 + $0x148] sm:$0xf]  ;;  %v8621_v0 = vld [vmem:[#allocation5 + $0x104] sm:$0xf]  ;;  %v7465_v1 = vld [vmem:[#allocation5 + $0x110] sm:$0xf0] }
 0x106   : > { %v1228_v34 = vadd.f32 %v1227_v30, %v9796_v54  ;;  %v1316_v39 = vpop.f32.mrf.mxu1  ;;  %v7409_v30 = vld [vmem:[#allocation5 + $0x98] sm:$0xf0] }
 0x108   : > { %v1317_v42 = vadd.f32 %v1316_v39, %v1228_v34  ;;  %v7536_v34 = vor.u32 %v8640_v7, %v7535_v12  ;;  %v7412_v39 = vor.u32 %v8606_v27, %v7409_v30  ;;  %v8632_v12 = vld [vmem:[#allocation5 + $0x154] sm:$0xf0]  ;;  %v7377_v7 = vld [vmem:[#allocation5 + $0x58] sm:$0xf0] }
 0x109   : > { %1489 = vmatpush.bf16.msrb.mxu3 %v7484_v63  ;;  %v7504_v30 = vor.u32 %v8632_v12, %v7503_v3  ;;  %v769_v63 = vld [vmem:[%s9588_s18 + $0x158] sm:$0xff]  ;;  %v7343_v12 = vld [vmem:[#allocation5 + $0x8] sm:$0xf] }
 0x10a   : > { %v1932_v62 = vmax.f32 %v1317_v42, 0.0  ;;  %1664 = vmatpush.bf16.msrb.mxu1 %v7536_v34  ;;  %1753 = vmatpush.bf16.msrb.mxu2 %v7412_v39 }
 0x10b   : > { %v9816_v2 = vpop.f32.mrf.mxu3 }
 0x10c   : > { %v9818_v13 = vpack.c.bf16 %v1932_v62, %v1928_v33  ;;  %v7391_v33 = vld [vmem:[#allocation5 + $0x68] sm:$0xf] }
 0x10d   : > { %v9820_v14 = vpop.f32.mrf.mxu2  ;;  %v1230_v31 = vpop.f32.mrf.mxu0  ;;  %v7392_v26 = vor.u32 %v8604_v8, %v7391_v33  ;;  %v7487_v33 = vld [vmem:[#allocation5 + $0x128] sm:$0xf] }
 0x10e   : > { %12640 = vst [vmem:[#allocation37_spill] sm:$0xff] %v9818_v13  ;;  %v1231_v40 = vadd.f32 %v1230_v31, %v9796_v54  ;;  %v1319_v41 = vpop.f32.mrf.mxu1  ;;  %1665 = vmatpush.bf16.msrb.mxu1 %v7520_v48  ;;  %1754 = vmatpush.bf16.msrb.mxu2 %v7396_v58  ;;  %v7380_v31 = vor.u32 %v8598_v22, %v7377_v7  ;;  %v766_v48 = vld [vmem:[%s9588_s18 + $0x140] sm:$0xff]  ;;  %v8592_v22 = vld [vmem:[#allocation5 + $0x14] sm:$0xf0]  ;;  %v7471_v7 = vld [vmem:[#allocation5 + $0x108] sm:$0xf] }
 0x10f   : > { %1576 = vmatpush.bf16.msrb.mxu0 %v7392_v26  ;;  %v7488_v56 = vor.u32 %v8628_v35, %v7487_v33  ;;  %v7364_v58 = vor.u32 %v8594_v47, %v7361_v44  ;;  %v9850_v33 = vpack.c.bf16 %v769_v63, %v767_v53 }
 0x110   : > { %v9827_v42 = vadd.f32 %v1319_v41, %v1231_v40  ;;  %1269 = vmatmul.bf16.gmra.mxu0 %v9822_v21  ;;  %1467 = vmatmul.bf16.gmra.mxu3 %v9673_v29  ;;  %v7359_v40 = vld [vmem:[#allocation5 + $0x28] sm:$0xf]  ;;  %v8596_v41 = vld [vmem:[#allocation5 + $0x34] sm:$0xf0] }
 0x111   : > { %1358 = vmatmul.bf16.gmra.mxu1 %v9824_v32  ;;  %v7360_v26 = vor.u32 %v8596_v41, %v7359_v40  ;;  %v7345_v40 = vld [vmem:[#allocation5 + $0x18] sm:$0xf0]  ;;  %12642 = vst [vmem:[#allocation39_spill] sm:$0xff] %v9850_v33 }
 0x112   : > { %1447 = vmatmul.bf16.gmra.mxu2 %v9822_v21  ;;  %1666 = vmatpush.bf16.msrb.mxu1 %v7504_v30  ;;  %v9848_v30 = vpack.c.bf16 %v768_v49, %v766_v48  ;;  %v8650_v48 = vld [vmem:[#allocation5 + $0x1ec] sm:$0xf]  ;;  %v7585_v49 = vld [vmem:[#allocation5 + $0x1f8] sm:$0xf0] }
 0x113   : > { %v9833_v62 = vpop.f32.mrf.mxu3  ;;  %1577 = vmatpush.bf16.msrb.mxu0 %v7376_v11  ;;  %1755 = vmatpush.bf16.msrb.mxu2 %v7380_v31  ;;  %v7468_v11 = vor.u32 %v8621_v0, %v7465_v1  ;;  %v7344_v31 = vor.u32 %v8592_v22, %v7343_v12  ;;  %v770_v22 = vld [vmem:[%s9588_s18 + $0x160] sm:$0xff] }
 0x115   : > { %v9835_v9 = vpop.f32.mrf.mxu2  ;;  %v1232_v27 = vpop.f32.mrf.mxu0  ;;  %1490 = vmatpush.bf16.msrb.mxu3 %v7468_v11 }
 0x116   : > { %v1233_v34 = vadd.f32 %v1232_v27, %v9796_v54  ;;  %v1321_v39 = vpop.f32.mrf.mxu1  ;;  %1667 = vmatpush.bf16.msrb.mxu1 %v7488_v56 }
 0x117   : > { %1578 = vmatpush.bf16.msrb.mxu0 %v7360_v26  ;;  %1756 = vmatpush.bf16.msrb.mxu2 %v7364_v58  ;;  %v7588_v58 = vor.u32 %v8650_v48, %v7585_v49 }
 0x118   : > { %v9838_v8 = vadd.f32 %v1321_v39, %v1233_v34  ;;  %v8624_v34 = vld [vmem:[#allocation5 + $0x114] sm:$0xf0]  ;;  %v8590_v39 = vld [vmem:[#allocation5 + $0xc] sm:$0xf] }
 0x119   : > { %v7472_v26 = vor.u32 %v8624_v34, %v7471_v7  ;;  %v7348_v44 = vor.u32 %v8590_v39, %v7345_v40  ;;  %1839 = vmatpush.bf16.msra.mxu3 %v7588_v58  ;;  %v772_v7 = vld [vmem:[%s9588_s18 + $0x170] sm:$0xff]  ;;  %v773_v34 = vld [vmem:[%s9588_s18 + $0x178] sm:$0xff] }
 0x11b   : > { %v9844_v3 = vpop.f32.mrf.mxu3  ;;  %1579 = vmatpush.bf16.msrb.mxu0 %v7344_v31  ;;  %1668 = vmatpush.bf16.msrb.mxu1 %v7472_v26  ;;  %v771_v31 = vld [vmem:[%s9588_s18 + $0x168] sm:$0xff]  ;;  %s12917_s18 = sld [smem:[#allocation97_spill]] }
 0x11c   : > { %1757 = vmatpush.bf16.msrb.mxu2 %v7348_v44 }
 0x11d   : > { %v9846_v27 = vpop.f32.mrf.mxu2  ;;  %v1235_v41 = vpop.f32.mrf.mxu0 }
 0x11e   : > { %v1236_v35 = vadd.f32 %v1235_v41, %v9796_v54  ;;  %v1324_v47 = vpop.f32.mrf.mxu1  ;;  %v9874_v41 = vpack.c.bf16 %v772_v7, %v770_v22 }
 0x120   : > { %v9853_v56 = vadd.f32 %v1324_v47, %v1236_v35  ;;  %1274 = vmatmul.bf16.gmra.mxu0 %v9848_v30  ;;  %1472 = vmatmul.bf16.gmra.mxu3 %v9690_v37  ;;  %v9876_v35 = vpack.c.bf16 %v773_v34, %v771_v31 }
 0x121   : > { %1363 = vmatmul.bf16.gmra.mxu1 %v9850_v33 }
 0x122   : > { %1452 = vmatmul.bf16.gmra.mxu2 %v9848_v30  ;;  %12643 = vst [vmem:[#allocation40_spill] sm:$0xff] %v9876_v35 }
 0x123   : > { %v9859_v53 = vpop.f32.mrf.mxu3 }
 0x125   : > { %v9861_v63 = vpop.f32.mrf.mxu2  ;;  %v1237_v0 = vpop.f32.mrf.mxu0 }
 0x126   : > { %v1238_v1 = vadd.f32 %v1237_v0, %v9796_v54  ;;  %v1326_v11 = vpop.f32.mrf.mxu1 }
 0x128   : > { %v9864_v12 = vadd.f32 %v1326_v11, %v1238_v1 }
 0x12b   : > { %v9870_v39 = vpop.f32.mrf.mxu3 }
 0x12d   : > { %v9872_v40 = vpop.f32.mrf.mxu2  ;;  %v1240_v26 = vpop.f32.mrf.mxu0 }
 0x12e   : > { %v1241_v47 = vadd.f32 %v1240_v26, %v9796_v54  ;;  %v1329_v44 = vpop.f32.mrf.mxu1 }
 0x130   : > { %v9879_v48 = vadd.f32 %v1329_v44, %v1241_v47  ;;  %1279 = vmatmul.bf16.gmra.mxu0 %v9874_v41  ;;  %1477 = vmatmul.bf16.gmra.mxu3 %v9710_v46 }
 0x131   : > { %1368 = vmatmul.bf16.gmra.mxu1 %v9876_v35 }
 0x132   : > { %1457 = vmatmul.bf16.gmra.mxu2 %v9874_v41 }
 0x133   : > { %v9885_v49 = vpop.f32.mrf.mxu3 }
 0x135   : > { %v9887_v58 = vpop.f32.mrf.mxu2  ;;  %v1242_v0 = vpop.f32.mrf.mxu0 }
 0x136   : > { %v1243_v1 = vadd.f32 %v1242_v0, %v9796_v54  ;;  %v1331_v11 = vpop.f32.mrf.mxu1  ;;  %v1286_v0 = vadd.f32 %v9807_v10, %v9796_v54 }
 0x138   : > { %v9890_v22 = vadd.f32 %v1331_v11, %v1243_v1  ;;  %v8646_v1 = vld [vmem:[#allocation5 + $0x1cc] sm:$0xf]  ;;  %v7569_v11 = vld [vmem:[#allocation5 + $0x1d8] sm:$0xf0] }
 0x139   : > { %v7572_v46 = vor.u32 %v8646_v1, %v7569_v11 }
 0x13b   : > { %v9892_v7 = vpop.f32.mrf.mxu3  ;;  %1840 = vmatpush.bf16.msra.mxu3 %v7572_v46 }
 0x13d   : > { %v9894_v31 = vpop.f32.mrf.mxu2  ;;  %v1245_v34 = vpop.f32.mrf.mxu0 }
 0x13e   : > { %v1246_v26 = vadd.f32 %v1245_v34, %v9796_v54  ;;  %v1334_v47 = vpop.f32.mrf.mxu1 }
 0x140   : > { %v9897_v44 = vadd.f32 %v1334_v47, %v1246_v26  ;;  %1491 = vmatmul.bf16.vlgmr.msrb.gmra.mxu3 %v9654_v20  ;;  %1580 = vmatmul.bf16.vlgmr.msrb.gmra.mxu0 %v9650_v18 }
 0x141   : > { %1669 = vmatmul.bf16.vlgmr.msrb.gmra.mxu1 %v9654_v20 }
 0x142   : > { %1758 = vmatmul.bf16.vlgmr.msrb.gmra.mxu2 %v9650_v18  ;;  %v1288_v18 = vadd.f32 %v9816_v2, %v9796_v54 }
 0x143   : > { %v1374_v13 = vpop.f32.mrf.mxu3 }
 0x144   : > { %v1375_v24 = vadd.f32 %v1374_v13, %v1286_v0 }
 0x145   : > { %v9905_v34 = vpop.f32.mrf.mxu2  ;;  %v1247_v26 = vpop.f32.mrf.mxu0 }
 0x146   : > { %v1248_v47 = vadd.f32 %v1247_v26, %v9796_v54  ;;  %v1336_v37 = vpop.f32.mrf.mxu1  ;;  %v2024_v19 = vmax.f32 %v1375_v24, 0.0 }
 0x148   : > { %v9908_v5 = vadd.f32 %v1336_v37, %v1248_v47 }
 0x14b   : > { %v1376_v20 = vpop.f32.mrf.mxu3 }
 0x14c   : > { %v1377_v29 = vadd.f32 %v1376_v20, %v1288_v18  ;;  %v1291_v20 = vadd.f32 %v9833_v62, %v9796_v54 }
 0x14d   : > { %v9912_v10 = vpop.f32.mrf.mxu2  ;;  %v1250_v60 = vpop.f32.mrf.mxu0 }
 0x14e   : > { %v2028_v1 = vmax.f32 %v1377_v29, 0.0  ;;  %v1251_v13 = vadd.f32 %v1250_v60, %v9796_v54  ;;  %v1339_v0 = vpop.f32.mrf.mxu1 }
 0x150   : > { %v9915_v11 = vadd.f32 %v1339_v0, %v1251_v13  ;;  %1496 = vmatmul.bf16.gmra.mxu3 %v9675_v16  ;;  %1585 = vmatmul.bf16.gmra.mxu0 %v9671_v28  ;;  %v9919_v37 = vpack.c.bf16 %v2028_v1, %v2024_v19  ;;  %v1293_v19 = vadd.f32 %v9844_v3, %v9796_v54 }
 0x151   : > { %1674 = vmatmul.bf16.gmra.mxu1 %v9675_v16  ;;  %v1296_v3 = vadd.f32 %v9859_v53, %v9796_v54 }
 0x152   : > { %12644 = vst [vmem:[#allocation41_spill] sm:$0xff] %v9919_v37  ;;  %1763 = vmatmul.bf16.gmra.mxu2 %v9671_v28 }
 0x153   : > { %v1379_v46 = vpop.f32.mrf.mxu3 }
 0x154   : > { %v1380_v29 = vadd.f32 %v1379_v46, %v1291_v20 }
 0x155   : > { %v9925_v24 = vpop.f32.mrf.mxu2  ;;  %v1252_v60 = vpop.f32.mrf.mxu0 }
 0x156   : > { %v1253_v2 = vadd.f32 %v1252_v60, %v9796_v54  ;;  %v1341_v26 = vpop.f32.mrf.mxu1  ;;  %v2032_v0 = vmax.f32 %v1380_v29, 0.0  ;;  %v8642_v29 = vld [vmem:[#allocation5 + $0x1ac] sm:$0xf] }
 0x158   : > { %v9928_v47 = vadd.f32 %v1341_v26, %v1253_v2  ;;  %v7553_v2 = vld [vmem:[#allocation5 + $0x1b8] sm:$0xf0] }
 0x15b   : > { %v1381_v18 = vpop.f32.mrf.mxu3 }
 0x15c   : > { %v1382_v1 = vadd.f32 %v1381_v18, %v1293_v19  ;;  %v7556_v19 = vor.u32 %v8642_v29, %v7553_v2 }
 0x15d   : > { %v9932_v13 = vpop.f32.mrf.mxu2  ;;  %v1255_v28 = vpop.f32.mrf.mxu0 }
 0x15e   : > { %v2036_v62 = vmax.f32 %v1382_v1, 0.0  ;;  %v1256_v20 = vadd.f32 %v1255_v28, %v9796_v54  ;;  %v1344_v46 = vpop.f32.mrf.mxu1  ;;  %1841 = vmatpush.bf16.msra.mxu3 %v7556_v19 }
 0x160   : > { %v9935_v37 = vadd.f32 %v1344_v46, %v1256_v20  ;;  %1501 = vmatmul.bf16.gmra.mxu3 %v9693_v38  ;;  %1590 = vmatmul.bf16.gmra.mxu0 %v9688_v36  ;;  %v9939_v60 = vpack.c.bf16 %v2036_v62, %v2032_v0 }
 0x161   : > { %1679 = vmatmul.bf16.gmra.mxu1 %v9693_v38 }
 0x162   : > { %12645 = vst [vmem:[#allocation42_spill] sm:$0xff] %v9939_v60  ;;  %1768 = vmatmul.bf16.gmra.mxu2 %v9688_v36  ;;  %v1298_v36 = vadd.f32 %v9870_v39, %v9796_v54  ;;  %v1301_v39 = vadd.f32 %v9885_v49, %v9796_v54 }
 0x163   : > { %v1384_v26 = vpop.f32.mrf.mxu3 }
 0x164   : > { %v1385_v18 = vadd.f32 %v1384_v26, %v1296_v3 }
 0x165   : > { %v9945_v1 = vpop.f32.mrf.mxu2  ;;  %v1257_v28 = vpop.f32.mrf.mxu0 }
 0x166   : > { %v1258_v20 = vadd.f32 %v1257_v28, %v9796_v54  ;;  %v1346_v0 = vpop.f32.mrf.mxu1  ;;  %v2040_v16 = vmax.f32 %v1385_v18, 0.0 }
 0x168   : > { %v9948_v62 = vadd.f32 %v1346_v0, %v1258_v20 }
 0x16b   : > { %v1386_v46 = vpop.f32.mrf.mxu3 }
 0x16c   : > { %v1387_v60 = vadd.f32 %v1386_v46, %v1298_v36 }
 0x16d   : > { %v9952_v53 = vpop.f32.mrf.mxu2  ;;  %v1260_v38 = vpop.f32.mrf.mxu0 }
 0x16e   : > { %v2044_v29 = vmax.f32 %v1387_v60, 0.0  ;;  %v1261_v3 = vadd.f32 %v1260_v38, %v9796_v54  ;;  %v1349_v2 = vpop.f32.mrf.mxu1 }
 0x170   : > { %v9955_v26 = vadd.f32 %v1349_v2, %v1261_v3  ;;  %1506 = vmatmul.bf16.gmra.mxu3 %v9712_v17  ;;  %1595 = vmatmul.bf16.gmra.mxu0 %v9708_v45  ;;  %v9959_v19 = vpack.c.bf16 %v2044_v29, %v2040_v16  ;;  %v1303_v16 = vadd.f32 %v9892_v7, %v9796_v54  ;;  %v1936_v7 = vmax.f32 %v9827_v42, 0.0 }
 0x171   : > { %1684 = vmatmul.bf16.gmra.mxu1 %v9712_v17 }
 0x172   : > { %12646 = vst [vmem:[#allocation43_spill] sm:$0xff] %v9959_v19  ;;  %1773 = vmatmul.bf16.gmra.mxu2 %v9708_v45 }
 0x173   : > { %v1389_v18 = vpop.f32.mrf.mxu3 }
 0x174   : > { %v1390_v60 = vadd.f32 %v1389_v18, %v1301_v39 }
 0x175   : > { %v9965_v28 = vpop.f32.mrf.mxu2  ;;  %v1262_v38 = vpop.f32.mrf.mxu0 }
 0x176   : > { %v1263_v20 = vadd.f32 %v1262_v38, %v9796_v54  ;;  %v1351_v0 = vpop.f32.mrf.mxu1  ;;  %v2048_v2 = vmax.f32 %v1390_v60, 0.0  ;;  %v8638_v60 = vld [vmem:[#allocation5 + $0x18c] sm:$0xf] }
 0x178   : > { %v9968_v36 = vadd.f32 %v1351_v0, %v1263_v20  ;;  %v1940_v20 = vmax.f32 %v9838_v8, 0.0  ;;  %v7537_v0 = vld [vmem:[#allocation5 + $0x198] sm:$0xf0] }
 0x17b   : > { %v1391_v46 = vpop.f32.mrf.mxu3 }
 0x17c   : > { %v1392_v29 = vadd.f32 %v1391_v46, %v1303_v16  ;;  %v7540_v46 = vor.u32 %v8638_v60, %v7537_v0 }
 0x17d   : > { %v9972_v3 = vpop.f32.mrf.mxu2  ;;  %v1265_v45 = vpop.f32.mrf.mxu0 }
 0x17e   : > { %v2052_v49 = vmax.f32 %v1392_v29, 0.0  ;;  %v1266_v39 = vadd.f32 %v1265_v45, %v9796_v54  ;;  %v1354_v18 = vpop.f32.mrf.mxu1  ;;  %1842 = vmatpush.bf16.msra.mxu3 %v7540_v46 }
 0x180   : > { %v9975_v19 = vadd.f32 %v1354_v18, %v1266_v39  ;;  %1511 = vmatmul.bf16.gmra.mxu3 %v9732_v52  ;;  %1600 = vmatmul.bf16.gmra.mxu0 %v9728_v50  ;;  %v9979_v38 = vpack.c.bf16 %v2052_v49, %v2048_v2  ;;  %v9989_v39 = vpack.c.bf16 %v1940_v20, %v1936_v7  ;;  %v1944_v7 = vmax.f32 %v9853_v56, 0.0 }
 0x181   : > { %1689 = vmatmul.bf16.gmra.mxu1 %v9732_v52  ;;  %v1948_v20 = vmax.f32 %v9864_v12, 0.0 }
 0x182   : > { %12647 = vst [vmem:[#allocation44_spill] sm:$0xff] %v9979_v38  ;;  %1778 = vmatmul.bf16.gmra.mxu2 %v9728_v50 }
 0x183   : > { %v9985_v16 = vpop.f32.mrf.mxu3 }
 0x184   : > { %12648 = vst [vmem:[#allocation45_spill] sm:$0xff] %v9985_v16 }
 0x185   : > { %v9987_v29 = vpop.f32.mrf.mxu2  ;;  %v1267_v45 = vpop.f32.mrf.mxu0 }
 0x186   : > { %v1268_v2 = vadd.f32 %v1267_v45, %v9796_v54  ;;  %v1356_v42 = vpop.f32.mrf.mxu1 }
 0x188   : > { %v9992_v49 = vadd.f32 %v1356_v42, %v1268_v2  ;;  %v10011_v2 = vpack.c.bf16 %v1948_v20, %v1944_v7  ;;  %v1952_v7 = vmax.f32 %v9879_v48, 0.0  ;;  %v1956_v20 = vmax.f32 %v9890_v22, 0.0 }
 0x18b   : > { %v9994_v8 = vpop.f32.mrf.mxu3 }
 0x18c   : > { %12649 = vst [vmem:[#allocation46_spill] sm:$0xff] %v9994_v8 }
 0x18d   : > { %v9996_v18 = vpop.f32.mrf.mxu2  ;;  %v1270_v50 = vpop.f32.mrf.mxu0 }
 0x18e   : > { %v1271_v38 = vadd.f32 %v1270_v50, %v9796_v54  ;;  %v1359_v16 = vpop.f32.mrf.mxu1 }
 0x190   : > { %v9999_v60 = vadd.f32 %v1359_v16, %v1271_v38  ;;  %1516 = vmatmul.bf16.gmra.mxu3 %v9748_v61  ;;  %1605 = vmatmul.bf16.gmra.mxu0 %v9744_v59 }
 0x191   : > { %1694 = vmatmul.bf16.gmra.mxu1 %v9748_v61 }
 0x192   : > { %1783 = vmatmul.bf16.gmra.mxu2 %v9744_v59 }
 0x193   : > { %v10007_v0 = vpop.f32.mrf.mxu3 }
 0x194   : > { %12650 = vst [vmem:[#allocation47_spill] sm:$0xff] %v10007_v0 }
 0x195   : > { %v10009_v46 = vpop.f32.mrf.mxu2  ;;  %v1272_v45 = vpop.f32.mrf.mxu0 }
 0x196   : > { %v1273_v38 = vadd.f32 %v1272_v45, %v9796_v54  ;;  %v1361_v16 = vpop.f32.mrf.mxu1  ;;  %v8634_v45 = vld [vmem:[#allocation5 + $0x16c] sm:$0xf] }
 0x198   : > { %v10014_v42 = vadd.f32 %v1361_v16, %v1273_v38  ;;  %v7521_v38 = vld [vmem:[#allocation5 + $0x178] sm:$0xf0] }
 0x19b   : > { %v10016_v50 = vpop.f32.mrf.mxu3 }
 0x19c   : > { %12651 = vst [vmem:[#allocation48_spill] sm:$0xff] %v10016_v50 }
 0x19d   : > { %v10018_v56 = vpop.f32.mrf.mxu2  ;;  %v1275_v12 = vpop.f32.mrf.mxu0 }
 0x19e   : > { %v1276_v61 = vadd.f32 %v1275_v12, %v9796_v54  ;;  %v1364_v59 = vpop.f32.mrf.mxu1  ;;  %v7524_v12 = vor.u32 %v8634_v45, %v7521_v38  ;;  %v8668_v38 = vld [vmem:[#allocation7 + $0x74] sm:$0xf0] }
 0x1a0   : > { %v10021_v8 = vadd.f32 %v1364_v59, %v1276_v61  ;;  %1521 = vmatmul.bf16.gmra.mxu3 %v9764_v6  ;;  %1610 = vmatmul.bf16.gmra.mxu0 %v9760_v4  ;;  %v10033_v59 = vpack.c.bf16 %v1956_v20, %v1952_v7  ;;  %v1960_v7 = vmax.f32 %v9897_v44, 0.0  ;;  %v1964_v20 = vmax.f32 %v9908_v5, 0.0 }
 0x1a1   : > { %1699 = vmatmul.bf16.gmra.mxu1 %v9764_v6  ;;  %1843 = vmatpush.bf16.msra.mxu3 %v7524_v12 }
 0x1a2   : > { %1788 = vmatmul.bf16.gmra.mxu2 %v9760_v4  ;;  %12653 = vst [vmem:[#allocation50_spill] sm:$0xff] %v10033_v59  ;;  %v10055_v59 = vpack.c.bf16 %v1964_v20, %v1960_v7 }
 0x1a3   : > { %v10029_v16 = vpop.f32.mrf.mxu3 }
 0x1a4   : > { %12652 = vst [vmem:[#allocation49_spill] sm:$0xff] %v10029_v16 }
 0x1a5   : > { %v10031_v50 = vpop.f32.mrf.mxu2  ;;  %v1277_v61 = vpop.f32.mrf.mxu0  ;;  %12656 = vst [vmem:[#allocation53_spill] sm:$0xff] %v10055_v59 }
 0x1a6   : > { %v1278_v0 = vadd.f32 %v1277_v61, %v9796_v54  ;;  %v1366_v48 = vpop.f32.mrf.mxu1 }
 0x1a8   : > { %v10036_v52 = vadd.f32 %v1366_v48, %v1278_v0  ;;  %v7647_v0 = vld [vmem:[#allocation7 + $0x70] sm:$0xf] }
 0x1a9   : > { %v7648_v61 = vor.u32 %v8668_v38, %v7647_v0  ;;  %v7711_v48 = vld [vmem:[#allocation7 + $0xf0] sm:$0xf] }
 0x1ab   : > { %v10038_v22 = vpop.f32.mrf.mxu3  ;;  %2510 = vmatpush.bf16.msra.mxu0 %v7648_v61  ;;  %v1968_v61 = vmax.f32 %v9915_v11, 0.0 }
 0x1ac   : > { %12654 = vst [vmem:[#allocation51_spill] sm:$0xff] %v10038_v22 }
 0x1ad   : > { %v10040_v6 = vpop.f32.mrf.mxu2  ;;  %v1280_v4 = vpop.f32.mrf.mxu0 }
 0x1ae   : > { %v1281_v17 = vadd.f32 %v1280_v4, %v9796_v54  ;;  %v1369_v16 = vpop.f32.mrf.mxu1 }
 0x1b0   : > { %v10043_v45 = vadd.f32 %v1369_v16, %v1281_v17  ;;  %1526 = vmatmul.bf16.gmra.mxu3 %v9780_v25  ;;  %1615 = vmatmul.bf16.gmra.mxu0 %v9776_v23  ;;  %v8684_v17 = vld [vmem:[#allocation7 + $0xf4] sm:$0xf0] }
 0x1b1   : > { %1704 = vmatmul.bf16.gmra.mxu1 %v9780_v25  ;;  %v7712_v4 = vor.u32 %v8684_v17, %v7711_v48  ;;  %v10068_v48 = vperm.slane %v9789_v43, 1  ;;  %v1972_v17 = vmax.f32 %v9928_v47, 0.0 }
 0x1b2   : > { %1793 = vmatmul.bf16.gmra.mxu2 %v9776_v23  ;;  %v10061_v23 = vperm.slane %v9789_v43, 2  ;;  %v8630_v43 = vld [vmem:[#allocation5 + $0x14c] sm:$0xf] }
 0x1b3   : > { %v10051_v12 = vpop.f32.mrf.mxu3  ;;  %2599 = vmatpush.bf16.msra.mxu1 %v7712_v4  ;;  %v7505_v4 = vld [vmem:[#allocation5 + $0x158] sm:$0xf0]  ;;  %v1406_v11 = vadd.f32 %v9820_v14, %v10068_v48  ;;  %v1976_v14 = vmax.f32 %v9935_v37, 0.0 }
 0x1b4   : > { %12655 = vst [vmem:[#allocation52_spill] sm:$0xff] %v10051_v12 }
 0x1b5   : > { %v10053_v16 = vpop.f32.mrf.mxu2  ;;  %v1282_v22 = vpop.f32.mrf.mxu0 }
 0x1b6   : > { %v1283_v5 = vadd.f32 %v1282_v22, %v9796_v54  ;;  %v1371_v44 = vpop.f32.mrf.mxu1  ;;  %v1404_v54 = vadd.f32 %v9809_v15, %v10068_v48 }
 0x1b8   : > { %v10058_v25 = vadd.f32 %v1371_v44, %v1283_v5  ;;  %v7508_v44 = vor.u32 %v8630_v43, %v7505_v4 }
 0x1ba   : > { %1844 = vmatpush.bf16.msra.mxu3 %v7508_v44  ;;  %v1980_v44 = vmax.f32 %v9948_v62, 0.0 }
 0x1bb   : > { %v10063_v12 = vpop.f32.mrf.mxu3 }
 0x1bc   : > { %12657 = vst [vmem:[#allocation54_spill] sm:$0xff] %v10063_v12  ;;  %v10110_v37 = vpack.c.bf16 %v1980_v44, %v1976_v14  ;;  %v1414_v14 = vadd.f32 %v9861_v63, %v10068_v48 }
 0x1bd   : > { %v10065_v0 = vpop.f32.mrf.mxu2  ;;  %v1581_v38 = vpop.f32.mrf.mxu0 }
 0x1be   : > { %12658 = vst [vmem:[#allocation55_spill] sm:$0xff] %v10065_v0  ;;  %v1582_v7 = vadd.f32 %v1581_v38, %v10061_v23  ;;  %v1670_v20 = vpop.f32.mrf.mxu1 }
 0x1bf   : > { %12664 = vst [vmem:[#allocation61_spill] sm:$0xff] %v10110_v37 }
 0x1c0   : > { %v10073_v22 = vadd.f32 %v1670_v20, %v1582_v7  ;;  %1531 = vmatmul.bf16.gmra.mxu3 %v9800_v57  ;;  %1620 = vmatmul.bf16.gmra.mxu0 %v9798_v55  ;;  %v10085_v20 = vpack.c.bf16 %v1972_v17, %v1968_v61 }
 0x1c1   : > { %1709 = vmatmul.bf16.gmra.mxu1 %v9800_v57 }
 0x1c2   : > { %1798 = vmatmul.bf16.gmra.mxu2 %v9798_v55  ;;  %12660 = vst [vmem:[#allocation57_spill] sm:$0xff] %v10085_v20 }
 0x1c3   : > { %v1492_v5 = vpop.f32.mrf.mxu3 }
 0x1c4   : > { %v1493_v38 = vadd.f32 %v1492_v5, %v1404_v54  ;;  %v1409_v5 = vadd.f32 %v9835_v9, %v10068_v48 }
 0x1c5   : > { %v10081_v15 = vpop.f32.mrf.mxu2  ;;  %v10083_v7 = vpop.f32.mrf.mxu0 }
 0x1c6   : > { %12659 = vst [vmem:[#allocation56_spill] sm:$0xff] %v10081_v15  ;;  %v10087_v12 = vpop.f32.mrf.mxu1  ;;  %v1929_v0 = vmax.f32 %v1493_v38, 0.0 }
 0x1cb   : > { %v1494_v47 = vpop.f32.mrf.mxu3 }
 0x1cc   : > { %v1495_v57 = vadd.f32 %v1494_v47, %v1406_v11  ;;  %v8682_v11 = vld [vmem:[#allocation7 + $0xe4] sm:$0xf0] }
 0x1cd   : > { %v10091_v55 = vpop.f32.mrf.mxu2  ;;  %v1586_v59 = vpop.f32.mrf.mxu0 }
 0x1ce   : > { %12661 = vst [vmem:[#allocation58_spill] sm:$0xff] %v10091_v55  ;;  %v1933_v43 = vmax.f32 %v1495_v57, 0.0  ;;  %v1587_v54 = vadd.f32 %v1586_v59, %v10061_v23  ;;  %v1675_v4 = vpop.f32.mrf.mxu1  ;;  %v7639_v57 = vld [vmem:[#allocation7 + $0x60] sm:$0xf]  ;;  %v8666_v59 = vld [vmem:[#allocation7 + $0x64] sm:$0xf0] }
 0x1cf   : > { %v7640_v9 = vor.u32 %v8666_v59, %v7639_v57 }
 0x1d0   : > { %v10096_v61 = vpack.c.bf16 %v1933_v43, %v1929_v0  ;;  %v10098_v17 = vadd.f32 %v1675_v4, %v1587_v54  ;;  %1536 = vmatmul.bf16.gmra.mxu3 %v9824_v32  ;;  %1625 = vmatmul.bf16.gmra.mxu0 %v9822_v21  ;;  %v7703_v0 = vld [vmem:[#allocation7 + $0xe0] sm:$0xf] }
 0x1d1   : > { %1714 = vmatmul.bf16.gmra.mxu1 %v9824_v32  ;;  %v7704_v54 = vor.u32 %v8682_v11, %v7703_v0  ;;  %2511 = vmatpush.bf16.msra.mxu0 %v7640_v9  ;;  %v1988_v9 = vmax.f32 %v9968_v36, 0.0 }
 0x1d2   : > { %12662 = vst [vmem:[#allocation59_spill] sm:$0xff] %v10096_v61  ;;  %1803 = vmatmul.bf16.gmra.mxu2 %v9822_v21  ;;  %v1411_v21 = vadd.f32 %v9846_v27, %v10068_v48 }
 0x1d3   : > { %v1497_v38 = vpop.f32.mrf.mxu3  ;;  %2600 = vmatpush.bf16.msra.mxu1 %v7704_v54 }
 0x1d4   : > { %v1498_v47 = vadd.f32 %v1497_v38, %v1409_v5 }
 0x1d5   : > { %v10106_v43 = vpop.f32.mrf.mxu2  ;;  %v10108_v4 = vpop.f32.mrf.mxu0 }
 0x1d6   : > { %12663 = vst [vmem:[#allocation60_spill] sm:$0xff] %v10106_v43  ;;  %v10112_v62 = vpop.f32.mrf.mxu1  ;;  %v1937_v5 = vmax.f32 %v1498_v47, 0.0  ;;  %v7489_v47 = vld [vmem:[#allocation5 + $0x138] sm:$0xf0] }
 0x1db   : > { %v1499_v32 = vpop.f32.mrf.mxu3 }
 0x1dc   : > { %v1500_v55 = vadd.f32 %v1499_v32, %v1411_v21  ;;  %v1984_v32 = vmax.f32 %v9955_v26, 0.0  ;;  %v1416_v26 = vadd.f32 %v9872_v40, %v10068_v48 }
 0x1dd   : > { %v10116_v57 = vpop.f32.mrf.mxu2  ;;  %v1591_v59 = vpop.f32.mrf.mxu0 }
 0x1de   : > { %12665 = vst [vmem:[#allocation62_spill] sm:$0xff] %v10116_v57  ;;  %v1941_v38 = vmax.f32 %v1500_v55, 0.0  ;;  %v1592_v0 = vadd.f32 %v1591_v59, %v10061_v23  ;;  %v1680_v11 = vpop.f32.mrf.mxu1  ;;  %v8626_v55 = vld [vmem:[#allocation5 + $0x12c] sm:$0xf] }
 0x1df   : > { %v7492_v63 = vor.u32 %v8626_v55, %v7489_v47 }
 0x1e0   : > { %v10121_v44 = vadd.f32 %v1680_v11, %v1592_v0  ;;  %1541 = vmatmul.bf16.gmra.mxu3 %v9850_v33  ;;  %1630 = vmatmul.bf16.gmra.mxu0 %v9848_v30  ;;  %v10125_v27 = vpack.c.bf16 %v1941_v38, %v1937_v5  ;;  %v10135_v5 = vpack.c.bf16 %v1988_v9, %v1984_v32  ;;  %v1992_v9 = vmax.f32 %v9975_v19, 0.0 }
 0x1e1   : > { %1719 = vmatmul.bf16.gmra.mxu1 %v9850_v33  ;;  %1845 = vmatpush.bf16.msra.mxu3 %v7492_v63  ;;  %v1996_v63 = vmax.f32 %v9992_v49, 0.0 }
 0x1e2   : > { %12666 = vst [vmem:[#allocation63_spill] sm:$0xff] %v10125_v27  ;;  %1808 = vmatmul.bf16.gmra.mxu2 %v9848_v30 }
 0x1e3   : > { %v1502_v54 = vpop.f32.mrf.mxu3  ;;  %12668 = vst [vmem:[#allocation65_spill] sm:$0xff] %v10135_v5  ;;  %v10160_v19 = vpack.c.bf16 %v1996_v63, %v1992_v9  ;;  %v1424_v9 = vadd.f32 %v9905_v34, %v10068_v48  ;;  %v7775_v63 = vld [vmem:[#allocation7 + $0x170] sm:$0xf]  ;;  %v8622_v34 = vld [vmem:[#allocation5 + $0x10c] sm:$0xf] }
 0x1e4   : > { %v1503_v21 = vadd.f32 %v1502_v54, %v1414_v14  ;;  %v1419_v54 = vadd.f32 %v9887_v58, %v10068_v48 }
 0x1e5   : > { %v10131_v59 = vpop.f32.mrf.mxu2  ;;  %v10133_v0 = vpop.f32.mrf.mxu0  ;;  %12672 = vst [vmem:[#allocation69_spill] sm:$0xff] %v10160_v19 }
 0x1e6   : > { %12667 = vst [vmem:[#allocation64_spill] sm:$0xff] %v10131_v59  ;;  %v10137_v38 = vpop.f32.mrf.mxu1  ;;  %v1945_v57 = vmax.f32 %v1503_v21, 0.0  ;;  %v8664_v21 = vld [vmem:[#allocation7 + $0x54] sm:$0xf0] }
 0x1eb   : > { %v1504_v36 = vpop.f32.mrf.mxu3 }
 0x1ec   : > { %v1505_v11 = vadd.f32 %v1504_v36, %v1416_v26  ;;  %v7695_v36 = vld [vmem:[#allocation7 + $0xd0] sm:$0xf] }
 0x1ed   : > { %v10141_v30 = vpop.f32.mrf.mxu2  ;;  %v1596_v33 = vpop.f32.mrf.mxu0 }
 0x1ee   : > { %12669 = vst [vmem:[#allocation66_spill] sm:$0xff] %v10141_v30  ;;  %v1949_v55 = vmax.f32 %v1505_v11, 0.0  ;;  %v1597_v14 = vadd.f32 %v1596_v33, %v10061_v23  ;;  %v1685_v47 = vpop.f32.mrf.mxu1  ;;  %v7631_v33 = vld [vmem:[#allocation7 + $0x50] sm:$0xf]  ;;  %v8680_v11 = vld [vmem:[#allocation7 + $0xd4] sm:$0xf0] }
 0x1ef   : > { %v7632_v58 = vor.u32 %v8664_v21, %v7631_v33  ;;  %v7696_v30 = vor.u32 %v8680_v11, %v7695_v36 }
 0x1f0   : > { %v10146_v32 = vadd.f32 %v1685_v47, %v1597_v14  ;;  %1546 = vmatmul.bf16.gmra.mxu3 %v9876_v35  ;;  %1635 = vmatmul.bf16.gmra.mxu0 %v9874_v41  ;;  %v10150_v40 = vpack.c.bf16 %v1949_v55, %v1945_v57 }
 0x1f1   : > { %1724 = vmatmul.bf16.gmra.mxu1 %v9876_v35  ;;  %2512 = vmatpush.bf16.msra.mxu0 %v7632_v58  ;;  %v8700_v58 = vld [vmem:[#allocation7 + $0x174] sm:$0xf0] }
 0x1f2   : > { %12670 = vst [vmem:[#allocation67_spill] sm:$0xff] %v10150_v40  ;;  %1813 = vmatmul.bf16.gmra.mxu2 %v9874_v41  ;;  %2601 = vmatpush.bf16.msra.mxu1 %v7696_v30  ;;  %v1421_v41 = vadd.f32 %v9894_v31, %v10068_v48  ;;  %v12674_v31 = vld [vmem:[#allocation20_spill] sm:$0xff]  ;;  %v7776_v30 = vor.u32 %v8700_v58, %v7775_v63  ;;  %v7759_v63 = vld [vmem:[#allocation7 + $0x150] sm:$0xf]  ;;  %v8696_v58 = vld [vmem:[#allocation7 + $0x154] sm:$0xf0] }
 0x1f3   : > { %v1507_v26 = vpop.f32.mrf.mxu3 }
 0x1f4   : > { %v1508_v14 = vadd.f32 %v1507_v26, %v1419_v54  ;;  %2688 = vmatpush.bf16.msra.mxu2 %v7776_v30  ;;  %v7760_v30 = vor.u32 %v8696_v58, %v7759_v63  ;;  %v1429_v58 = vadd.f32 %v9925_v24, %v10068_v48  ;;  %v2012_v24 = vmax.f32 %v10036_v52, 0.0  ;;  %v8690_v52 = vld [vmem:[#allocation7 + $0x124] sm:$0xf0] }
 0x1f5   : > { %v10156_v47 = vpop.f32.mrf.mxu2  ;;  %v10158_v57 = vpop.f32.mrf.mxu0 }
 0x1f6   : > { %12671 = vst [vmem:[#allocation68_spill] sm:$0xff] %v10156_v47  ;;  %v10162_v49 = vpop.f32.mrf.mxu1  ;;  %v1953_v54 = vmax.f32 %v1508_v14, 0.0  ;;  %v2000_v14 = vmax.f32 %v9999_v60, 0.0 }
 0x1fb   : > { %v1509_v55 = vpop.f32.mrf.mxu3 }
 0x1fc   : > { %v1510_v35 = vadd.f32 %v1509_v55, %v1421_v41  ;;  %v7473_v55 = vld [vmem:[#allocation5 + $0x118] sm:$0xf0] }
 0x1fd   : > { %v10166_v33 = vpop.f32.mrf.mxu2  ;;  %v1601_v21 = vpop.f32.mrf.mxu0 }
 0x1fe   : > { %12673 = vst [vmem:[#allocation70_spill] sm:$0xff] %v10166_v33  ;;  %v1957_v26 = vmax.f32 %v1510_v35, 0.0  ;;  %v1602_v36 = vadd.f32 %v1601_v21, %v10061_v23  ;;  %v1690_v11 = vpop.f32.mrf.mxu1  ;;  %v2004_v35 = vmax.f32 %v10014_v42, 0.0  ;;  %v8698_v33 = vld [vmem:[#allocation7 + $0x164] sm:$0xf0] }
 0x200   : > { %v10171_v47 = vadd.f32 %v1690_v11, %v1602_v36  ;;  %1551 = vmatmul.bf16.gmra.mxu3 %v9730_v51  ;;  %1640 = vmatmul.bf16.gmra.mxu0 %v12674_v31  ;;  %v10175_v41 = vpack.c.bf16 %v1957_v26, %v1953_v54  ;;  %v7476_v36 = vor.u32 %v8622_v34, %v7473_v55  ;;  %v7767_v11 = vld [vmem:[#allocation7 + $0x160] sm:$0xf]  ;;  %v8662_v55 = vld [vmem:[#allocation7 + $0x44] sm:$0xf0] }
 0x201   : > { %1729 = vmatmul.bf16.gmra.mxu1 %v9730_v51  ;;  %v7768_v54 = vor.u32 %v8698_v33, %v7767_v11  ;;  %v10185_v60 = vpack.c.bf16 %v2004_v35, %v2000_v14  ;;  %v8678_v14 = vld [vmem:[#allocation7 + $0xc4] sm:$0xf0]  ;;  %v7751_v35 = vld [vmem:[#allocation7 + $0x140] sm:$0xf] }
 0x202   : > { %12675 = vst [vmem:[#allocation20_spill] sm:$0xff] %v10175_v41  ;;  %1818 = vmatmul.bf16.gmra.mxu2 %v12674_v31  ;;  %1846 = vmatpush.bf16.msra.mxu3 %v7476_v36  ;;  %v1426_v31 = vadd.f32 %v9912_v10, %v10068_v48  ;;  %v8694_v51 = vld [vmem:[#allocation7 + $0x144] sm:$0xf0] }
 0x203   : > { %v1512_v21 = vpop.f32.mrf.mxu3  ;;  %12677 = vst [vmem:[#allocation72_spill] sm:$0xff] %v10185_v60  ;;  %2689 = vmatpush.bf16.msra.mxu2 %v7768_v54  ;;  %v7752_v60 = vor.u32 %v8694_v51, %v7751_v35 }
 0x204   : > { %v1513_v59 = vadd.f32 %v1512_v21, %v1424_v9  ;;  %v7623_v9 = vld [vmem:[#allocation7 + $0x40] sm:$0xf] }
 0x205   : > { %v10181_v43 = vpop.f32.mrf.mxu2  ;;  %v10183_v26 = vpop.f32.mrf.mxu0  ;;  %v7687_v21 = vld [vmem:[#allocation7 + $0xc0] sm:$0xf]  ;;  %v7624_v36 = vor.u32 %v8662_v55, %v7623_v9  ;;  %v12679_v55 = vld [vmem:[#allocation30_spill] sm:$0xff] }
 0x206   : > { %12676 = vst [vmem:[#allocation71_spill] sm:$0xff] %v10181_v43  ;;  %v10187_v42 = vpop.f32.mrf.mxu1  ;;  %v7688_v54 = vor.u32 %v8678_v14, %v7687_v21  ;;  %v1961_v19 = vmax.f32 %v1513_v59, 0.0  ;;  %v12680_v21 = vld [vmem:[#allocation22_spill] sm:$0xff]  ;;  %v8676_v59 = vld [vmem:[#allocation7 + $0xb4] sm:$0xf0] }
 0x207   : > { %2690 = vmatpush.bf16.msra.mxu2 %v7760_v30  ;;  %2513 = vmatpush.bf16.msra.mxu0 %v7624_v36  ;;  %v8660_v30 = vld [vmem:[#allocation7 + $0x34] sm:$0xf0]  ;;  %v2008_v36 = vmax.f32 %v10021_v8, 0.0  ;;  %v8674_v8 = vld [vmem:[#allocation7 + $0xa4] sm:$0xf0] }
 0x208   : > { %2602 = vmatpush.bf16.msra.mxu1 %v7688_v54 }
 0x20b   : > { %v1514_v34 = vpop.f32.mrf.mxu3  ;;  %2691 = vmatpush.bf16.msra.mxu2 %v7752_v60 }
 0x20c   : > { %v1515_v33 = vadd.f32 %v1514_v34, %v1426_v31  ;;  %v7615_v31 = vld [vmem:[#allocation7 + $0x30] sm:$0xf] }
 0x20d   : > { %v10191_v11 = vpop.f32.mrf.mxu2  ;;  %v1606_v43 = vpop.f32.mrf.mxu0  ;;  %v7679_v34 = vld [vmem:[#allocation7 + $0xb0] sm:$0xf]  ;;  %v7616_v51 = vor.u32 %v8660_v30, %v7615_v31  ;;  %v7671_v31 = vld [vmem:[#allocation7 + $0xa0] sm:$0xf] }
 0x20e   : > { %12678 = vst [vmem:[#allocation73_spill] sm:$0xff] %v10191_v11  ;;  %v1965_v15 = vmax.f32 %v1515_v33, 0.0  ;;  %v1607_v10 = vadd.f32 %v1606_v43, %v10061_v23  ;;  %v1695_v63 = vpop.f32.mrf.mxu1  ;;  %v7743_v33 = vld [vmem:[#allocation7 + $0x130] sm:$0xf]  ;;  %v8692_v43 = vld [vmem:[#allocation7 + $0x134] sm:$0xf0]  ;;  %v7680_v60 = vor.u32 %v8676_v59, %v7679_v34  ;;  %v10210_v34 = vpack.c.bf16 %v2012_v24, %v2008_v36 }
 0x20f   : > { %v7744_v35 = vor.u32 %v8692_v43, %v7743_v33  ;;  %2514 = vmatpush.bf16.msra.mxu0 %v7616_v51  ;;  %v7735_v11 = vld [vmem:[#allocation7 + $0x120] sm:$0xf]  ;;  %v7599_v59 = vld [vmem:[#allocation7 + $0x10] sm:$0xf]  ;;  %v8656_v33 = vld [vmem:[#allocation7 + $0x14] sm:$0xf0]  ;;  %v1431_v43 = vadd.f32 %v9932_v13, %v10068_v48 }
 0x210   : > { %v10196_v9 = vadd.f32 %v1695_v63, %v1607_v10  ;;  %1556 = vmatmul.bf16.gmra.mxu3 %v12679_v55  ;;  %1645 = vmatmul.bf16.gmra.mxu0 %v12680_v21  ;;  %v10200_v14 = vpack.c.bf16 %v1965_v15, %v1961_v19  ;;  %v7607_v10 = vld [vmem:[#allocation7 + $0x20] sm:$0xf]  ;;  %v8658_v63 = vld [vmem:[#allocation7 + $0x24] sm:$0xf0]  ;;  %12683 = vst [vmem:[#allocation75_spill] sm:$0xff] %v10210_v34 }
 0x211   : > { %1734 = vmatmul.bf16.gmra.mxu1 %v12679_v55  ;;  %2692 = vmatpush.bf16.msra.mxu2 %v7744_v35  ;;  %v7608_v19 = vor.u32 %v8658_v63, %v7607_v10  ;;  %v7672_v55 = vor.u32 %v8674_v8, %v7671_v31  ;;  %v8672_v35 = vld [vmem:[#allocation7 + $0x94] sm:$0xf0]  ;;  %v7591_v36 = vld [vmem:[#allocation7] sm:$0xf]  ;;  %v8654_v24 = vld [vmem:[#allocation7 + $0x4] sm:$0xf0] }
 0x212   : > { %12681 = vst [vmem:[#allocation22_spill] sm:$0xff] %v10200_v14  ;;  %1823 = vmatmul.bf16.gmra.mxu2 %v12680_v21  ;;  %2603 = vmatpush.bf16.msra.mxu1 %v7680_v60  ;;  %v7736_v21 = vor.u32 %v8690_v52, %v7735_v11  ;;  %v7600_v60 = vor.u32 %v8656_v33, %v7599_v59  ;;  %v8688_v10 = vld [vmem:[#allocation7 + $0x114] sm:$0xf0]  ;;  %v8686_v13 = vld [vmem:[#allocation7 + $0x104] sm:$0xf0] }
 0x213   : > { %v1517_v54 = vpop.f32.mrf.mxu3  ;;  %2515 = vmatpush.bf16.msra.mxu0 %v7608_v19  ;;  %v7592_v52 = vor.u32 %v8654_v24, %v7591_v36 }
 0x214   : > { %v1518_v30 = vadd.f32 %v1517_v54, %v1429_v58  ;;  %v7663_v58 = vld [vmem:[#allocation7 + $0x90] sm:$0xf] }
 0x215   : > { %v10206_v15 = vpop.f32.mrf.mxu2  ;;  %v10208_v5 = vpop.f32.mrf.mxu0  ;;  %2693 = vmatpush.bf16.msra.mxu2 %v7736_v21  ;;  %v7727_v54 = vld [vmem:[#allocation7 + $0x110] sm:$0xf]  ;;  %v7664_v63 = vor.u32 %v8672_v35, %v7663_v58  ;;  %v8670_v21 = vld [vmem:[#allocation7 + $0x84] sm:$0xf0] }
 0x216   : > { %12682 = vst [vmem:[#allocation74_spill] sm:$0xff] %v10206_v15  ;;  %v10212_v51 = vpop.f32.mrf.mxu1  ;;  %2604 = vmatpush.bf16.msra.mxu1 %v7672_v55  ;;  %v7728_v31 = vor.u32 %v8688_v10, %v7727_v54  ;;  %v7655_v55 = vld [vmem:[#allocation7 + $0x80] sm:$0xf]  ;;  %v1969_v37 = vmax.f32 %v1518_v30, 0.0  ;;  %v2016_v30 = vmax.f32 %v10043_v45, 0.0 }
 0x217   : > { %2516 = vmatpush.bf16.msra.mxu0 %v7600_v60  ;;  %v7719_v15 = vld [vmem:[#allocation7 + $0x100] sm:$0xf]  ;;  %v7656_v33 = vor.u32 %v8670_v21, %v7655_v55 }
 0x218   : > { %v7720_v34 = vor.u32 %v8686_v13, %v7719_v15  ;;  %v12684_v10 = vld [vmem:[#allocation32_spill] sm:$0xff]  ;;  %v2020_v15 = vmax.f32 %v10058_v25, 0.0  ;;  %v1436_v25 = vadd.f32 %v9952_v53, %v10068_v48 }
 0x219   : > { %2694 = vmatpush.bf16.msra.mxu2 %v7728_v31 }
 0x21a   : > { %2605 = vmatpush.bf16.msra.mxu1 %v7664_v63  ;;  %v12685_v63 = vld [vmem:[#allocation24_spill] sm:$0xff] }
 0x21b   : > { %v1519_v11 = vpop.f32.mrf.mxu3  ;;  %2517 = vmatpush.bf16.msra.mxu0 %v7592_v52 }
 0x21c   : > { %v1520_v19 = vadd.f32 %v1519_v11, %v1431_v43  ;;  %v1434_v43 = vadd.f32 %v9945_v1, %v10068_v48  ;;  %v8716_v11 = vld [vmem:[#allocation7 + $0x1f4] sm:$0xf0] }
 0x21d   : > { %v10216_v8 = vpop.f32.mrf.mxu2  ;;  %v1611_v59 = vpop.f32.mrf.mxu0  ;;  %2695 = vmatpush.bf16.msra.mxu2 %v7720_v34  ;;  %v7839_v34 = vld [vmem:[#allocation7 + $0x1f0] sm:$0xf] }
 0x21e   : > { %v1973_v58 = vmax.f32 %v1520_v19, 0.0  ;;  %v1612_v60 = vadd.f32 %v1611_v59, %v10061_v23  ;;  %v1700_v35 = vpop.f32.mrf.mxu1  ;;  %2606 = vmatpush.bf16.msra.mxu1 %v7656_v33  ;;  %v7840_v1 = vor.u32 %v8716_v11, %v7839_v34  ;;  %v1584_v34 = vadd.f32 %v10083_v7, %v10061_v23 }
 0x220   : > { %v10221_v54 = vadd.f32 %v1700_v35, %v1612_v60  ;;  %1561 = vmatmul.bf16.gmra.mxu3 %v12684_v10  ;;  %1650 = vmatmul.bf16.gmra.mxu0 %v12685_v63  ;;  %v10225_v31 = vpack.c.bf16 %v1973_v58, %v1969_v37  ;;  %v10235_v37 = vpack.c.bf16 %v2020_v15, %v2016_v30  ;;  %v12687_v30 = vld [vmem:[#allocation34_spill] sm:$0xff] }
 0x221   : > { %1739 = vmatmul.bf16.gmra.mxu1 %v12684_v10  ;;  %2777 = vmatpush.bf16.msrb.mxu3 %v7840_v1  ;;  %v12688_v15 = vld [vmem:[#allocation26_spill] sm:$0xff] }
 0x222   : > { %12686 = vst [vmem:[#allocation32_spill] sm:$0xff] %v10225_v31  ;;  %1828 = vmatmul.bf16.gmra.mxu2 %v12685_v63 }
 0x223   : > { %v1522_v36 = vpop.f32.mrf.mxu3 }
 0x224   : > { %v1523_v24 = vadd.f32 %v1522_v36, %v1434_v43  ;;  %v1439_v43 = vadd.f32 %v9965_v28, %v10068_v48  ;;  %v1673_v28 = vadd.f32 %v10087_v12, %v1584_v34 }
 0x225   : > { %v10231_v55 = vpop.f32.mrf.mxu2  ;;  %v10233_v19 = vpop.f32.mrf.mxu0 }
 0x226   : > { %v10237_v52 = vpop.f32.mrf.mxu1  ;;  %v1977_v33 = vmax.f32 %v1523_v24, 0.0  ;;  %v1934_v7 = vmax.f32 %v1673_v28, 0.0 }
 0x22b   : > { %v1524_v45 = vpop.f32.mrf.mxu3 }
 0x22c   : > { %v1525_v21 = vadd.f32 %v1524_v45, %v1436_v25  ;;  %v1441_v45 = vadd.f32 %v9972_v3, %v10068_v48  ;;  %v12691_v3 = vld [vmem:[#allocation21_spill] sm:$0xff] }
 0x22d   : > { %v10241_v13 = vpop.f32.mrf.mxu2  ;;  %v1616_v59 = vpop.f32.mrf.mxu0 }
 0x22e   : > { %v1981_v58 = vmax.f32 %v1525_v21, 0.0  ;;  %v1617_v60 = vadd.f32 %v1616_v59, %v10061_v23  ;;  %v1705_v35 = vpop.f32.mrf.mxu1  ;;  %v1930_v21 = vmax.f32 %v10073_v22, 0.0  ;;  %v12692_v22 = vld [vmem:[#allocation37_spill] sm:$0xff] }
 0x230   : > { %v10246_v63 = vadd.f32 %v1705_v35, %v1617_v60  ;;  %1566 = vmatmul.bf16.gmra.mxu3 %v12687_v30  ;;  %1655 = vmatmul.bf16.gmra.mxu0 %v12688_v15  ;;  %v10250_v53 = vpack.c.bf16 %v1981_v58, %v1977_v33  ;;  %v10268_v60 = vpack.c.bf16 %v1934_v7, %v1930_v21  ;;  %v8714_v21 = vld [vmem:[#allocation7 + $0x1e4] sm:$0xf0] }
 0x231   : > { %1744 = vmatmul.bf16.gmra.mxu1 %v12687_v30 }
 0x232   : > { %12689 = vst [vmem:[#allocation24_spill] sm:$0xff] %v10250_v53  ;;  %1833 = vmatmul.bf16.gmra.mxu2 %v12688_v15 }
 0x233   : > { %v1527_v11 = vpop.f32.mrf.mxu3  ;;  %12690 = vst [vmem:[#allocation26_spill] sm:$0xff] %v10268_v60 }
 0x234   : > { %v1528_v36 = vadd.f32 %v1527_v11, %v1439_v43  ;;  %v1444_v11 = vadd.f32 %v9987_v29, %v10068_v48 }
 0x235   : > { %v10256_v1 = vpop.f32.mrf.mxu2  ;;  %v10259_v24 = vpop.f32.mrf.mxu0 }
 0x236   : > { %v10261_v25 = vpop.f32.mrf.mxu1  ;;  %v1985_v43 = vmax.f32 %v1528_v36, 0.0  ;;  %v7831_v36 = vld [vmem:[#allocation7 + $0x1e0] sm:$0xf] }
 0x23b   : > { %v1529_v59 = vpop.f32.mrf.mxu3 }
 0x23c   : > { %v1530_v33 = vadd.f32 %v1529_v59, %v1441_v45  ;;  %v1589_v45 = vadd.f32 %v10108_v4, %v10061_v23  ;;  %v7832_v59 = vor.u32 %v8714_v21, %v7831_v36  ;;  %v1446_v4 = vadd.f32 %v9996_v18, %v10068_v48  ;;  %v12695_v18 = vld [vmem:[#allocation23_spill] sm:$0xff] }
 0x23d   : > { %v10266_v58 = vpop.f32.mrf.mxu2  ;;  %v1621_v35 = vpop.f32.mrf.mxu0 }
 0x23e   : > { %v1989_v15 = vmax.f32 %v1530_v33, 0.0  ;;  %v1622_v12 = vadd.f32 %v1621_v35, %v10061_v23  ;;  %v1710_v34 = vpop.f32.mrf.mxu1  ;;  %v1678_v35 = vadd.f32 %v10112_v62, %v1589_v45  ;;  %2778 = vmatpush.bf16.msrb.mxu3 %v7832_v59  ;;  %v1449_v59 = vadd.f32 %v10009_v46, %v10068_v48 }
 0x240   : > { %v10273_v30 = vadd.f32 %v1710_v34, %v1622_v12  ;;  %1847 = vmatmul.bf16.vlgmr.msra.gmra.mxu3 %v12691_v3  ;;  %2518 = vmatmul.bf16.vlgmr.msra.gmra.mxu0 %v12692_v22  ;;  %v10277_v28 = vpack.c.bf16 %v1989_v15, %v1985_v43  ;;  %v1938_v15 = vmax.f32 %v10098_v17, 0.0  ;;  %v1942_v34 = vmax.f32 %v1678_v35, 0.0 }
 0x241   : > { %2607 = vmatmul.bf16.vlgmr.msra.gmra.mxu1 %v10096_v61  ;;  %v1594_v35 = vadd.f32 %v10133_v0, %v10061_v23 }
 0x242   : > { %12693 = vst [vmem:[#allocation21_spill] sm:$0xff] %v10277_v28  ;;  %2696 = vmatmul.bf16.vlgmr.msra.gmra.mxu2 %v10268_v60  ;;  %v10295_v36 = vpack.c.bf16 %v1942_v34, %v1938_v15 }
 0x243   : > { %v1532_v7 = vpop.f32.mrf.mxu3  ;;  %v1683_v46 = vadd.f32 %v10137_v38, %v1594_v35 }
 0x244   : > { %v1533_v29 = vadd.f32 %v1532_v7, %v1444_v11  ;;  %12694 = vst [vmem:[#allocation76_spill] sm:$0xff] %v10295_v36 }
 0x245   : > { %v10283_v33 = vpop.f32.mrf.mxu2  ;;  %v10286_v12 = vpop.f32.mrf.mxu0  ;;  %v1950_v0 = vmax.f32 %v1683_v46, 0.0  ;;  %v1599_v46 = vadd.f32 %v10158_v57, %v10061_v23  ;;  %v1456_v57 = vadd.f32 %v10040_v6, %v10068_v48  ;;  %v12702_v6 = vld [vmem:[#allocation27_spill] sm:$0xff] }
 0x246   : > { %v10288_v43 = vpop.f32.mrf.mxu1  ;;  %v1993_v21 = vmax.f32 %v1533_v29, 0.0 }
 0x24b   : > { %v1534_v3 = vpop.f32.mrf.mxu3 }
 0x24c   : > { %v1535_v60 = vadd.f32 %v1534_v3, %v1446_v4  ;;  %v1451_v3 = vadd.f32 %v10018_v56, %v10068_v48  ;;  %v12698_v56 = vld [vmem:[#allocation25_spill] sm:$0xff] }
 0x24d   : > { %v10293_v61 = vpop.f32.mrf.mxu2  ;;  %v1626_v11 = vpop.f32.mrf.mxu0 }
 0x24e   : > { %v1997_v62 = vmax.f32 %v1535_v60, 0.0  ;;  %v1627_v45 = vadd.f32 %v1626_v11, %v10061_v23  ;;  %v1715_v7 = vpop.f32.mrf.mxu1  ;;  %v1946_v11 = vmax.f32 %v10121_v44, 0.0 }
 0x250   : > { %v10300_v22 = vadd.f32 %v1715_v7, %v1627_v45  ;;  %1852 = vmatmul.bf16.gmra.mxu3 %v12695_v18  ;;  %2523 = vmatmul.bf16.gmra.mxu0 %v9989_v39  ;;  %v10304_v17 = vpack.c.bf16 %v1997_v62, %v1993_v21 }
 0x251   : > { %2612 = vmatmul.bf16.gmra.mxu1 %v10125_v27 }
 0x252   : > { %12696 = vst [vmem:[#allocation23_spill] sm:$0xff] %v10304_v17  ;;  %2701 = vmatmul.bf16.gmra.mxu2 %v10295_v36  ;;  %v1454_v36 = vadd.f32 %v10031_v50, %v10068_v48 }
 0x253   : > { %v1537_v60 = vpop.f32.mrf.mxu3 }
 0x254   : > { %v1538_v29 = vadd.f32 %v1537_v60, %v1449_v59  ;;  %v10322_v59 = vpack.c.bf16 %v1950_v0, %v1946_v11 }
 0x255   : > { %v10310_v4 = vpop.f32.mrf.mxu2  ;;  %v10313_v15 = vpop.f32.mrf.mxu0 }
 0x256   : > { %v10315_v34 = vpop.f32.mrf.mxu1  ;;  %12697 = vst [vmem:[#allocation77_spill] sm:$0xff] %v10322_v59  ;;  %v2001_v18 = vmax.f32 %v1538_v29, 0.0  ;;  %v7823_v29 = vld [vmem:[#allocation7 + $0x1d0] sm:$0xf] }
 0x25b   : > { %v1539_v21 = vpop.f32.mrf.mxu3 }
 0x25c   : > { %v1540_v62 = vadd.f32 %v1539_v21, %v1451_v3  ;;  %v8712_v3 = vld [vmem:[#allocation7 + $0x1d4] sm:$0xf0] }
 0x25d   : > { %v10320_v45 = vpop.f32.mrf.mxu2  ;;  %v1631_v7 = vpop.f32.mrf.mxu0  ;;  %v7824_v0 = vor.u32 %v8712_v3, %v7823_v29 }
 0x25e   : > { %v2005_v60 = vmax.f32 %v1540_v62, 0.0  ;;  %v1632_v38 = vadd.f32 %v1631_v7, %v10061_v23  ;;  %v1720_v35 = vpop.f32.mrf.mxu1  ;;  %v1688_v62 = vadd.f32 %v10162_v49, %v1599_v46 }
 0x25f   : > { %2779 = vmatpush.bf16.msrb.mxu3 %v7824_v0  ;;  %v1459_v0 = vadd.f32 %v10053_v16, %v10068_v48 }
 0x260   : > { %v10327_v27 = vadd.f32 %v1720_v35, %v1632_v38  ;;  %1857 = vmatmul.bf16.gmra.mxu3 %v12698_v56  ;;  %2528 = vmatmul.bf16.gmra.mxu0 %v10011_v2  ;;  %v10331_v44 = vpack.c.bf16 %v2005_v60, %v2001_v18  ;;  %v1954_v60 = vmax.f32 %v10146_v32, 0.0  ;;  %v1958_v38 = vmax.f32 %v1688_v62, 0.0  ;;  %v12703_v32 = vld [vmem:[#allocation50_spill] sm:$0xff] }
 0x261   : > { %2617 = vmatmul.bf16.gmra.mxu1 %v10150_v40 }
 0x262   : > { %12699 = vst [vmem:[#allocation25_spill] sm:$0xff] %v10331_v44  ;;  %2706 = vmatmul.bf16.gmra.mxu2 %v10322_v59  ;;  %v10349_v29 = vpack.c.bf16 %v1958_v38, %v1954_v60 }
 0x263   : > { %v1542_v11 = vpop.f32.mrf.mxu3 }
 0x264   : > { %v1543_v50 = vadd.f32 %v1542_v11, %v1454_v36  ;;  %12701 = vst [vmem:[#allocation79_spill] sm:$0xff] %v10349_v29 }
 0x265   : > { %v10337_v21 = vpop.f32.mrf.mxu2  ;;  %v10340_v7 = vpop.f32.mrf.mxu0 }
 0x266   : > { %v10342_v18 = vpop.f32.mrf.mxu1  ;;  %v2009_v3 = vmax.f32 %v1543_v50, 0.0 }
 0x26b   : > { %v1544_v35 = vpop.f32.mrf.mxu3 }
 0x26c   : > { %v1545_v56 = vadd.f32 %v1544_v35, %v1456_v57  ;;  %v1604_v57 = vadd.f32 %v10183_v26, %v10061_v23 }
 0x26d   : > { %v10347_v59 = vpop.f32.mrf.mxu2  ;;  %v1636_v36 = vpop.f32.mrf.mxu0 }
 0x26e   : > { %12700 = vst [vmem:[#allocation78_spill] sm:$0xff] %v10347_v59  ;;  %v2013_v49 = vmax.f32 %v1545_v56, 0.0  ;;  %v1637_v46 = vadd.f32 %v1636_v36, %v10061_v23  ;;  %v1725_v11 = vpop.f32.mrf.mxu1  ;;  %v1693_v16 = vadd.f32 %v10187_v42, %v1604_v57  ;;  %v12705_v36 = vld [vmem:[#allocation55_spill] sm:$0xff]  ;;  %v12739_v59 = vld [vmem:[#allocation69_spill] sm:$0xff] }
 0x270   : > { %v10354_v40 = vadd.f32 %v1725_v11, %v1637_v46  ;;  %1862 = vmatmul.bf16.gmra.mxu3 %v12702_v6  ;;  %2533 = vmatmul.bf16.gmra.mxu0 %v12703_v32  ;;  %v10358_v62 = vpack.c.bf16 %v2013_v49, %v2009_v3  ;;  %v1461_v3 = vadd.f32 %v12705_v36, %v10068_v48  ;;  %v1962_v49 = vmax.f32 %v10171_v47, 0.0  ;;  %v12709_v36 = vld [vmem:[#allocation53_spill] sm:$0xff] }
 0x271   : > { %2622 = vmatmul.bf16.gmra.mxu1 %v10175_v41  ;;  %v1966_v26 = vmax.f32 %v1693_v16, 0.0  ;;  %v1609_v16 = vadd.f32 %v10208_v5, %v10061_v23 }
 0x272   : > { %2711 = vmatmul.bf16.gmra.mxu2 %v10349_v29 }
 0x273   : > { %v1547_v50 = vpop.f32.mrf.mxu3 }
 0x274   : > { %v1548_v60 = vadd.f32 %v1547_v50, %v1459_v0  ;;  %v10376_v0 = vpack.c.bf16 %v1966_v26, %v1962_v49  ;;  %v8710_v49 = vld [vmem:[#allocation7 + $0x1c4] sm:$0xf0] }
 0x275   : > { %v10364_v38 = vpop.f32.mrf.mxu2  ;;  %v10367_v35 = vpop.f32.mrf.mxu0 }
 0x276   : > { %12704 = vst [vmem:[#allocation27_spill] sm:$0xff] %v10364_v38  ;;  %v10369_v56 = vpop.f32.mrf.mxu1  ;;  %v2017_v50 = vmax.f32 %v1548_v60, 0.0  ;;  %v12708_v38 = vld [vmem:[#allocation29_spill] sm:$0xff] }
 0x277   : > { %12707 = vst [vmem:[#allocation80_spill] sm:$0xff] %v10376_v0  ;;  %v12711_v60 = vld [vmem:[#allocation45_spill] sm:$0xff] }
 0x27b   : > { %v1549_v46 = vpop.f32.mrf.mxu3 }
 0x27c   : > { %v1550_v11 = vadd.f32 %v1549_v46, %v1461_v3  ;;  %v1464_v3 = vadd.f32 %v12711_v60, %v10068_v48 }
 0x27d   : > { %v10374_v6 = vpop.f32.mrf.mxu2  ;;  %v1641_v29 = vpop.f32.mrf.mxu0 }
 0x27e   : > { %12706 = vst [vmem:[#allocation55_spill] sm:$0xff] %v10374_v6  ;;  %v2021_v41 = vmax.f32 %v1550_v11, 0.0  ;;  %v1642_v42 = vadd.f32 %v1641_v29, %v10061_v23  ;;  %v1730_v57 = vpop.f32.mrf.mxu1  ;;  %v7815_v29 = vld [vmem:[#allocation7 + $0x1c0] sm:$0xf] }
 0x27f   : > { %v7816_v46 = vor.u32 %v8710_v49, %v7815_v29 }
 0x280   : > { %v10379_v32 = vadd.f32 %v1730_v57, %v1642_v42  ;;  %1867 = vmatmul.bf16.gmra.mxu3 %v12708_v38  ;;  %2538 = vmatmul.bf16.gmra.mxu0 %v12709_v36  ;;  %v10383_v47 = vpack.c.bf16 %v2021_v41, %v2017_v50  ;;  %v1698_v41 = vadd.f32 %v10212_v51, %v1609_v16  ;;  %v1970_v42 = vmax.f32 %v10196_v9, 0.0 }
 0x281   : > { %2627 = vmatmul.bf16.gmra.mxu1 %v10200_v14  ;;  %2780 = vmatpush.bf16.msrb.mxu3 %v7816_v46 }
 0x282   : > { %12710 = vst [vmem:[#allocation29_spill] sm:$0xff] %v10383_v47  ;;  %2716 = vmatmul.bf16.gmra.mxu2 %v10376_v0  ;;  %v1974_v57 = vmax.f32 %v1698_v41, 0.0  ;;  %v12713_v0 = vld [vmem:[#allocation46_spill] sm:$0xff] }
 0x283   : > { %v1552_v26 = vpop.f32.mrf.mxu3  ;;  %v1466_v60 = vadd.f32 %v12713_v0, %v10068_v48  ;;  %v12718_v0 = vld [vmem:[#allocation47_spill] sm:$0xff] }
 0x284   : > { %v1553_v11 = vadd.f32 %v1552_v26, %v1464_v3  ;;  %v10403_v29 = vpack.c.bf16 %v1974_v57, %v1970_v42 }
 0x285   : > { %v10391_v38 = vpop.f32.mrf.mxu2  ;;  %v10394_v50 = vpop.f32.mrf.mxu0 }
 0x286   : > { %12712 = vst [vmem:[#allocation45_spill] sm:$0xff] %v10391_v38  ;;  %v10396_v5 = vpop.f32.mrf.mxu1  ;;  %v2025_v49 = vmax.f32 %v1553_v11, 0.0  ;;  %v12716_v38 = vld [vmem:[#allocation31_spill] sm:$0xff] }
 0x287   : > { %12715 = vst [vmem:[#allocation81_spill] sm:$0xff] %v10403_v29 }
 0x28b   : > { %v1554_v14 = vpop.f32.mrf.mxu3 }
 0x28c   : > { %v1555_v36 = vadd.f32 %v1554_v14, %v1466_v60  ;;  %v1614_v14 = vadd.f32 %v10233_v19, %v10061_v23 }
 0x28d   : > { %v10401_v6 = vpop.f32.mrf.mxu2  ;;  %v1646_v3 = vpop.f32.mrf.mxu0 }
 0x28e   : > { %12714 = vst [vmem:[#allocation46_spill] sm:$0xff] %v10401_v6  ;;  %v2029_v51 = vmax.f32 %v1555_v36, 0.0  ;;  %v1647_v16 = vadd.f32 %v1646_v3, %v10061_v23  ;;  %v1735_v26 = vpop.f32.mrf.mxu1  ;;  %v1469_v36 = vadd.f32 %v12718_v0, %v10068_v48  ;;  %v1978_v3 = vmax.f32 %v10221_v54, 0.0  ;;  %v12724_v54 = vld [vmem:[#allocation61_spill] sm:$0xff]  ;;  %v12738_v6 = vld [vmem:[#allocation36_spill] sm:$0xff] }
 0x290   : > { %v10406_v46 = vadd.f32 %v1735_v26, %v1647_v16  ;;  %1872 = vmatmul.bf16.gmra.mxu3 %v12716_v38  ;;  %2543 = vmatmul.bf16.gmra.mxu0 %v10085_v20  ;;  %v10410_v9 = vpack.c.bf16 %v2029_v51, %v2025_v49  ;;  %v1703_v38 = vadd.f32 %v10237_v52, %v1614_v14  ;;  %v12720_v49 = vld [vmem:[#allocation48_spill] sm:$0xff] }
 0x291   : > { %2632 = vmatmul.bf16.gmra.mxu1 %v10225_v31  ;;  %v1471_v51 = vadd.f32 %v12720_v49, %v10068_v48  ;;  %v1619_v49 = vadd.f32 %v10259_v24, %v10061_v23 }
 0x292   : > { %12717 = vst [vmem:[#allocation31_spill] sm:$0xff] %v10410_v9  ;;  %2721 = vmatmul.bf16.gmra.mxu2 %v10403_v29  ;;  %v1982_v19 = vmax.f32 %v1703_v38, 0.0 }
 0x293   : > { %v1557_v11 = vpop.f32.mrf.mxu3 }
 0x294   : > { %v1558_v41 = vadd.f32 %v1557_v11, %v1469_v36  ;;  %v10430_v36 = vpack.c.bf16 %v1982_v19, %v1978_v3  ;;  %v8708_v3 = vld [vmem:[#allocation7 + $0x1b4] sm:$0xf0]  ;;  %v12726_v19 = vld [vmem:[#allocation49_spill] sm:$0xff] }
 0x295   : > { %v10418_v42 = vpop.f32.mrf.mxu2  ;;  %v10421_v57 = vpop.f32.mrf.mxu0 }
 0x296   : > { %12719 = vst [vmem:[#allocation47_spill] sm:$0xff] %v10418_v42  ;;  %v10423_v60 = vpop.f32.mrf.mxu1  ;;  %v2033_v11 = vmax.f32 %v1558_v41, 0.0  ;;  %v12723_v42 = vld [vmem:[#allocation33_spill] sm:$0xff]  ;;  %v7807_v41 = vld [vmem:[#allocation7 + $0x1b0] sm:$0xf] }
 0x297   : > { %12722 = vst [vmem:[#allocation82_spill] sm:$0xff] %v10430_v36 }
 0x29b   : > { %v1559_v16 = vpop.f32.mrf.mxu3 }
 0x29c   : > { %v1560_v26 = vadd.f32 %v1559_v16, %v1471_v51  ;;  %v1474_v51 = vadd.f32 %v12726_v19, %v10068_v48  ;;  %v7808_v16 = vor.u32 %v8708_v3, %v7807_v41 }
 0x29d   : > { %v10428_v29 = vpop.f32.mrf.mxu2  ;;  %v1651_v0 = vpop.f32.mrf.mxu0 }
 0x29e   : > { %12721 = vst [vmem:[#allocation48_spill] sm:$0xff] %v10428_v29  ;;  %v2037_v31 = vmax.f32 %v1560_v26, 0.0  ;;  %v1652_v52 = vadd.f32 %v1651_v0, %v10061_v23  ;;  %v1740_v14 = vpop.f32.mrf.mxu1  ;;  %2781 = vmatpush.bf16.msrb.mxu3 %v7808_v16  ;;  %v12731_v29 = vld [vmem:[#allocation35_spill] sm:$0xff] }
 0x2a0   : > { %v10433_v20 = vadd.f32 %v1740_v14, %v1652_v52  ;;  %1877 = vmatmul.bf16.gmra.mxu3 %v12723_v42  ;;  %2548 = vmatmul.bf16.gmra.mxu0 %v12724_v54  ;;  %v10437_v38 = vpack.c.bf16 %v2037_v31, %v2033_v11  ;;  %v1708_v31 = vadd.f32 %v10261_v25, %v1619_v49  ;;  %v1986_v52 = vmax.f32 %v10246_v63, 0.0  ;;  %v12732_v63 = vld [vmem:[#allocation65_spill] sm:$0xff] }
 0x2a1   : > { %2637 = vmatmul.bf16.gmra.mxu1 %v10250_v53 }
 0x2a2   : > { %12725 = vst [vmem:[#allocation33_spill] sm:$0xff] %v10437_v38  ;;  %2726 = vmatmul.bf16.gmra.mxu2 %v10430_v36  ;;  %v1990_v14 = vmax.f32 %v1708_v31, 0.0  ;;  %v12728_v36 = vld [vmem:[#allocation51_spill] sm:$0xff] }
 0x2a3   : > { %v1562_v26 = vpop.f32.mrf.mxu3  ;;  %v1476_v53 = vadd.f32 %v12728_v36, %v10068_v48  ;;  %v8667_v36 = vld [vmem:[#allocation7 + $0x74] sm:$0xf] }
 0x2a4   : > { %v1563_v0 = vadd.f32 %v1562_v26, %v1474_v51  ;;  %v10457_v51 = vpack.c.bf16 %v1990_v14, %v1986_v52  ;;  %v12733_v52 = vld [vmem:[#allocation52_spill] sm:$0xff] }
 0x2a5   : > { %v10445_v42 = vpop.f32.mrf.mxu2  ;;  %v10448_v11 = vpop.f32.mrf.mxu0  ;;  %v1479_v14 = vadd.f32 %v12733_v52, %v10068_v48 }
 0x2a6   : > { %12727 = vst [vmem:[#allocation49_spill] sm:$0xff] %v10445_v42  ;;  %v10450_v24 = vpop.f32.mrf.mxu1  ;;  %v2041_v16 = vmax.f32 %v1563_v0, 0.0  ;;  %v8683_v0 = vld [vmem:[#allocation7 + $0xf4] sm:$0xf] }
 0x2a7   : > { %12730 = vst [vmem:[#allocation83_spill] sm:$0xff] %v10457_v51 }
 0x2ab   : > { %v1564_v54 = vpop.f32.mrf.mxu3 }
 0x2ac   : > { %v1565_v19 = vadd.f32 %v1564_v54, %v1476_v53  ;;  %v1624_v53 = vadd.f32 %v10286_v12, %v10061_v23  ;;  %v7649_v54 = vld [vmem:[#allocation7 + $0x78] sm:$0xf0] }
 0x2ad   : > { %v10455_v41 = vpop.f32.mrf.mxu2  ;;  %v1656_v3 = vpop.f32.mrf.mxu0 }
 0x2ae   : > { %12729 = vst [vmem:[#allocation51_spill] sm:$0xff] %v10455_v41  ;;  %v2045_v26 = vmax.f32 %v1565_v19, 0.0  ;;  %v1657_v25 = vadd.f32 %v1656_v3, %v10061_v23  ;;  %v1745_v49 = vpop.f32.mrf.mxu1  ;;  %v7652_v19 = vor.u32 %v8667_v36, %v7649_v54  ;;  %v7713_v3 = vld [vmem:[#allocation7 + $0xf8] sm:$0xf0]  ;;  %v1713_v12 = vadd.f32 %v10288_v43, %v1624_v53  ;;  %v9038_v43 = vld [vmem:[%s12638_s3] sm:$0xf] }
 0x2af   : > { %v1994_v36 = vmax.f32 %v10273_v30, 0.0  ;;  %v10490_v53 = vperm.slane %v9038_v43, 3 }
 0x2b0   : > { %v10460_v42 = vadd.f32 %v1745_v49, %v1657_v25  ;;  %1882 = vmatmul.bf16.gmra.mxu3 %v12731_v29  ;;  %2553 = vmatmul.bf16.gmra.mxu0 %v12732_v63  ;;  %v10464_v31 = vpack.c.bf16 %v2045_v26, %v2041_v16  ;;  %v7716_v25 = vor.u32 %v8683_v0, %v7713_v3  ;;  %v1998_v54 = vmax.f32 %v1713_v12, 0.0  ;;  %v12735_v0 = vld [vmem:[#allocation54_spill] sm:$0xff] }
 0x2b1   : > { %2642 = vmatmul.bf16.gmra.mxu1 %v10277_v28  ;;  %2866 = vmatpush.bf16.msrb.mxu0 %v7652_v19  ;;  %v2120_v28 = vld [vmem:[%s12453_s4] sm:$0x3]  ;;  %v1481_v52 = vadd.f32 %v12735_v0, %v10068_v48 }
 0x2b2   : > { %2731 = vmatmul.bf16.gmra.mxu2 %v10457_v51  ;;  %2955 = vmatpush.bf16.msrb.mxu1 %v7716_v25  ;;  %v10494_v63 = vpack.c.bf16 %v1998_v54, %v1994_v36  ;;  %v8706_v36 = vld [vmem:[#allocation7 + $0x1a4] sm:$0xf0] }
 0x2b3   : > { %v1567_v29 = vpop.f32.mrf.mxu3 }
 0x2b4   : > { %v1568_v49 = vadd.f32 %v1567_v29, %v1479_v14  ;;  %v10485_v14 = vperm.slane %v2120_v28, 0  ;;  %12736 = vst [vmem:[#allocation52_spill] sm:$0xff] %v10494_v63  ;;  %v12737_v28 = vld [vmem:[#allocation56_spill] sm:$0xff] }
 0x2b5   : > { %v10472_v16 = vpop.f32.mrf.mxu2  ;;  %v10475_v26 = vpop.f32.mrf.mxu0  ;;  %v1760_v0 = vadd.f32 %v12737_v28, %v10490_v53  ;;  %v2002_v28 = vmax.f32 %v10300_v22, 0.0 }
 0x2b6   : > { %12734 = vst [vmem:[#allocation35_spill] sm:$0xff] %v10472_v16  ;;  %v10477_v51 = vpop.f32.mrf.mxu1  ;;  %v2049_v30 = vmax.f32 %v1568_v49, 0.0  ;;  %v7799_v49 = vld [vmem:[#allocation7 + $0x1a0] sm:$0xf] }
 0x2b7   : > { %v7800_v54 = vor.u32 %v8706_v36, %v7799_v49 }
 0x2b9   : > { %2782 = vmatpush.bf16.msrb.mxu3 %v7800_v54 }
 0x2bb   : > { %v1569_v19 = vpop.f32.mrf.mxu3 }
 0x2bc   : > { %v1570_v3 = vadd.f32 %v1569_v19, %v1481_v52  ;;  %v1629_v52 = vadd.f32 %v10313_v15, %v10061_v23 }
 0x2bd   : > { %v10492_v29 = vpop.f32.mrf.mxu2  ;;  %v2519_v25 = vpop.f32.mrf.mxu0 }
 0x2be   : > { %v2053_v12 = vmax.f32 %v1570_v3, 0.0  ;;  %v2520_v16 = vadd.f32 %v2519_v25, %v10485_v14  ;;  %v2608_v48 = vpop.f32.mrf.mxu1 }
 0x2c0   : > { %v2609_v41 = vadd.f32 %v2608_v48, %v2520_v16  ;;  %1887 = vmatmul.bf16.gmra.mxu3 %v12738_v6  ;;  %2558 = vmatmul.bf16.gmra.mxu0 %v12739_v59  ;;  %v10501_v43 = vpack.c.bf16 %v2053_v12, %v2049_v30  ;;  %v1718_v6 = vadd.f32 %v10315_v34, %v1629_v52 }
 0x2c1   : > { %2647 = vmatmul.bf16.gmra.mxu1 %v10304_v17 }
 0x2c2   : > { %2736 = vmatmul.bf16.gmra.mxu2 %v10494_v63  ;;  %v2006_v17 = vmax.f32 %v1718_v6, 0.0  ;;  %v12740_v63 = vld [vmem:[#allocation58_spill] sm:$0xff] }
 0x2c3   : > { %v1848_v19 = vpop.f32.mrf.mxu3  ;;  %v1762_v59 = vadd.f32 %v12740_v63, %v10490_v53  ;;  %v12743_v63 = vld [vmem:[#allocation38_spill] sm:$0xff] }
 0x2c4   : > { %v1849_v3 = vadd.f32 %v1848_v19, %v1760_v0  ;;  %v10516_v34 = vpack.c.bf16 %v2006_v17, %v2002_v28  ;;  %v8665_v17 = vld [vmem:[#allocation7 + $0x64] sm:$0xf] }
 0x2c5   : > { %v2697_v25 = vpop.f32.mrf.mxu2  ;;  %v2521_v30 = vpop.f32.mrf.mxu0  ;;  %v8681_v28 = vld [vmem:[#allocation7 + $0xe4] sm:$0xf] }
 0x2c6   : > { %v10508_v16 = vadd.f32 %v2697_v25, %v2609_v41  ;;  %v2522_v12 = vadd.f32 %v2521_v30, %v10485_v14  ;;  %v2610_v48 = vpop.f32.mrf.mxu1  ;;  %12741 = vst [vmem:[#allocation54_spill] sm:$0xff] %v10516_v34  ;;  %v1931_v41 = vmax.f32 %v1849_v3, 0.0  ;;  %v7641_v3 = vld [vmem:[#allocation7 + $0x68] sm:$0xf0] }
 0x2c8   : > { %v2611_v15 = vadd.f32 %v2610_v48, %v2522_v12  ;;  %v12742_v12 = vld [vmem:[#allocation60_spill] sm:$0xff] }
 0x2c9   : > { %v1765_v22 = vadd.f32 %v12742_v12, %v10490_v53 }
 0x2cb   : > { %v1850_v49 = vpop.f32.mrf.mxu3 }
 0x2cc   : > { %v1851_v36 = vadd.f32 %v1850_v49, %v1762_v59  ;;  %v12744_v59 = vld [vmem:[#allocation72_spill] sm:$0xff]  ;;  %v7644_v49 = vor.u32 %v8665_v17, %v7641_v3  ;;  %v12745_v17 = vld [vmem:[#allocation62_spill] sm:$0xff] }
 0x2cd   : > { %v2699_v0 = vpop.f32.mrf.mxu2  ;;  %v2524_v54 = vpop.f32.mrf.mxu0  ;;  %v1767_v3 = vadd.f32 %v12745_v17, %v10490_v53 }
 0x2ce   : > { %v10514_v19 = vadd.f32 %v2699_v0, %v2611_v15  ;;  %v1935_v52 = vmax.f32 %v1851_v36, 0.0  ;;  %v2525_v25 = vadd.f32 %v2524_v54, %v10485_v14  ;;  %v2613_v30 = vpop.f32.mrf.mxu1  ;;  %v1634_v15 = vadd.f32 %v10340_v7, %v10061_v23  ;;  %v7705_v36 = vld [vmem:[#allocation7 + $0xe8] sm:$0xf0]  ;;  %2867 = vmatpush.bf16.msrb.mxu0 %v7644_v49 }
 0x2cf   : > { %v7708_v54 = vor.u32 %v8681_v28, %v7705_v36 }
 0x2d0   : > { %v10521_v6 = vpack.c.bf16 %v1935_v52, %v1931_v41  ;;  %v2614_v48 = vadd.f32 %v2613_v30, %v2525_v25  ;;  %1892 = vmatmul.bf16.gmra.mxu3 %v12743_v63  ;;  %2563 = vmatmul.bf16.gmra.mxu0 %v12744_v59  ;;  %v1723_v25 = vadd.f32 %v10342_v18, %v1634_v15 }
 0x2d1   : > { %2652 = vmatmul.bf16.gmra.mxu1 %v10331_v44  ;;  %v2010_v44 = vmax.f32 %v10327_v27, 0.0 }
 0x2d2   : > { %2741 = vmatmul.bf16.gmra.mxu2 %v10516_v34  ;;  %2956 = vmatpush.bf16.msrb.mxu1 %v7708_v54  ;;  %v2014_v59 = vmax.f32 %v1723_v25, 0.0 }
 0x2d3   : > { %v1853_v0 = vpop.f32.mrf.mxu3 }
 0x2d4   : > { %v1854_v41 = vadd.f32 %v1853_v0, %v1765_v22 }
 0x2d5   : > { %v2702_v52 = vpop.f32.mrf.mxu2  ;;  %v2526_v12 = vpop.f32.mrf.mxu0 }
 0x2d6   : > { %v10530_v30 = vadd.f32 %v2702_v52, %v2614_v48  ;;  %v2527_v7 = vadd.f32 %v2526_v12, %v10485_v14  ;;  %v2615_v63 = vpop.f32.mrf.mxu1  ;;  %v10538_v48 = vpack.c.bf16 %v2014_v59, %v2010_v44  ;;  %v1939_v15 = vmax.f32 %v1854_v41, 0.0  ;;  %v12747_v12 = vld [vmem:[#allocation64_spill] sm:$0xff]  ;;  %v7791_v44 = vld [vmem:[#allocation7 + $0x190] sm:$0xf]  ;;  %v8704_v59 = vld [vmem:[#allocation7 + $0x194] sm:$0xf0] }
 0x2d7   : > { %v1770_v27 = vadd.f32 %v12747_v12, %v10490_v53  ;;  %v7792_v41 = vor.u32 %v8704_v59, %v7791_v44 }
 0x2d8   : > { %v2616_v34 = vadd.f32 %v2615_v63, %v2527_v7  ;;  %12746 = vst [vmem:[#allocation56_spill] sm:$0xff] %v10538_v48  ;;  %v12748_v7 = vld [vmem:[#allocation39_spill] sm:$0xff] }
 0x2d9   : > { %v12749_v63 = vld [vmem:[#allocation75_spill] sm:$0xff]  ;;  %2783 = vmatpush.bf16.msrb.mxu3 %v7792_v41 }
 0x2db   : > { %v1855_v28 = vpop.f32.mrf.mxu3 }
 0x2dc   : > { %v1856_v22 = vadd.f32 %v1855_v28, %v1767_v3 }
 0x2dd   : > { %v2704_v36 = vpop.f32.mrf.mxu2  ;;  %v2529_v18 = vpop.f32.mrf.mxu0 }
 0x2de   : > { %v10536_v49 = vadd.f32 %v2704_v36, %v2616_v34  ;;  %v1943_v0 = vmax.f32 %v1856_v22, 0.0  ;;  %v2530_v54 = vadd.f32 %v2529_v18, %v10485_v14  ;;  %v2618_v52 = vpop.f32.mrf.mxu1  ;;  %v1639_v34 = vadd.f32 %v10367_v35, %v10061_v23 }
 0x2e0   : > { %v2619_v25 = vadd.f32 %v2618_v52, %v2530_v54  ;;  %1897 = vmatmul.bf16.gmra.mxu3 %v12748_v7  ;;  %2568 = vmatmul.bf16.gmra.mxu0 %v12749_v63  ;;  %v10545_v17 = vpack.c.bf16 %v1943_v0, %v1939_v15  ;;  %v1728_v36 = vadd.f32 %v10369_v56, %v1639_v34  ;;  %v2018_v52 = vmax.f32 %v10354_v40, 0.0  ;;  %v12750_v7 = vld [vmem:[#allocation66_spill] sm:$0xff] }
 0x2e1   : > { %2657 = vmatmul.bf16.gmra.mxu1 %v10358_v62 }
 0x2e2   : > { %2746 = vmatmul.bf16.gmra.mxu2 %v10538_v48  ;;  %v2022_v12 = vmax.f32 %v1728_v36, 0.0  ;;  %v1772_v48 = vadd.f32 %v12750_v7, %v10490_v53 }
 0x2e3   : > { %v1858_v3 = vpop.f32.mrf.mxu3 }
 0x2e4   : > { %v1859_v28 = vadd.f32 %v1858_v3, %v1770_v27  ;;  %v10560_v56 = vpack.c.bf16 %v2022_v12, %v2018_v52  ;;  %v7633_v52 = vld [vmem:[#allocation7 + $0x58] sm:$0xf0]  ;;  %v8679_v12 = vld [vmem:[#allocation7 + $0xd4] sm:$0xf] }
 0x2e5   : > { %v2707_v22 = vpop.f32.mrf.mxu2  ;;  %v2531_v15 = vpop.f32.mrf.mxu0 }
 0x2e6   : > { %v10552_v18 = vadd.f32 %v2707_v22, %v2619_v25  ;;  %v2532_v0 = vadd.f32 %v2531_v15, %v10485_v14  ;;  %v2620_v54 = vpop.f32.mrf.mxu1  ;;  %12751 = vst [vmem:[#allocation36_spill] sm:$0xff] %v10560_v56  ;;  %v1947_v25 = vmax.f32 %v1859_v28, 0.0  ;;  %v8663_v28 = vld [vmem:[#allocation7 + $0x54] sm:$0xf] }
 0x2e7   : > { %v7636_v7 = vor.u32 %v8663_v28, %v7633_v52  ;;  %v12754_v28 = vld [vmem:[#allocation70_spill] sm:$0xff] }
 0x2e8   : > { %v2621_v35 = vadd.f32 %v2620_v54, %v2532_v0  ;;  %v12752_v0 = vld [vmem:[#allocation68_spill] sm:$0xff]  ;;  %v1777_v52 = vadd.f32 %v12754_v28, %v10490_v53 }
 0x2e9   : > { %v1775_v40 = vadd.f32 %v12752_v0, %v10490_v53  ;;  %v12753_v54 = vld [vmem:[#allocation40_spill] sm:$0xff]  ;;  %2868 = vmatpush.bf16.msrb.mxu0 %v7636_v7 }
 0x2ea   : > { %v12758_v28 = vld [vmem:[#allocation28_spill] sm:$0xff] }
 0x2eb   : > { %v1860_v44 = vpop.f32.mrf.mxu3 }
 0x2ec   : > { %v1861_v59 = vadd.f32 %v1860_v44, %v1772_v48  ;;  %v7697_v44 = vld [vmem:[#allocation7 + $0xd8] sm:$0xf0] }
 0x2ed   : > { %v2709_v27 = vpop.f32.mrf.mxu2  ;;  %v2534_v41 = vpop.f32.mrf.mxu0 }
 0x2ee   : > { %v10558_v3 = vadd.f32 %v2709_v27, %v2621_v35  ;;  %v1951_v34 = vmax.f32 %v1861_v59, 0.0  ;;  %v2535_v22 = vadd.f32 %v2534_v41, %v10485_v14  ;;  %v2623_v15 = vpop.f32.mrf.mxu1  ;;  %v1644_v35 = vadd.f32 %v10394_v50, %v10061_v23 }
 0x2ef   : > { %v7700_v27 = vor.u32 %v8679_v12, %v7697_v44 }
 0x2f0   : > { %v2624_v36 = vadd.f32 %v2623_v15, %v2535_v22  ;;  %1902 = vmatmul.bf16.gmra.mxu3 %v12753_v54  ;;  %2573 = vmatmul.bf16.gmra.mxu0 %v10235_v37  ;;  %v10567_v48 = vpack.c.bf16 %v1951_v34, %v1947_v25  ;;  %v1733_v25 = vadd.f32 %v10396_v5, %v1644_v35 }
 0x2f1   : > { %2662 = vmatmul.bf16.gmra.mxu1 %v10383_v47 }
 0x2f2   : > { %2751 = vmatmul.bf16.gmra.mxu2 %v10560_v56  ;;  %2957 = vmatpush.bf16.msrb.mxu1 %v7700_v27  ;;  %v2026_v56 = vmax.f32 %v10379_v32, 0.0  ;;  %v2030_v47 = vmax.f32 %v1733_v25, 0.0  ;;  %v8699_v25 = vld [vmem:[#allocation7 + $0x174] sm:$0xf] }
 0x2f3   : > { %v1863_v59 = vpop.f32.mrf.mxu3 }
 0x2f4   : > { %v1864_v41 = vadd.f32 %v1863_v59, %v1775_v40 }
 0x2f5   : > { %v2712_v22 = vpop.f32.mrf.mxu2  ;;  %v2536_v15 = vpop.f32.mrf.mxu0 }
 0x2f6   : > { %v10574_v34 = vadd.f32 %v2712_v22, %v2624_v36  ;;  %v2537_v50 = vadd.f32 %v2536_v15, %v10485_v14  ;;  %v2625_v0 = vpop.f32.mrf.mxu1  ;;  %v10582_v36 = vpack.c.bf16 %v2030_v47, %v2026_v56  ;;  %v1955_v35 = vmax.f32 %v1864_v41, 0.0  ;;  %v12757_v15 = vld [vmem:[#allocation71_spill] sm:$0xff]  ;;  %v7783_v56 = vld [vmem:[#allocation7 + $0x180] sm:$0xf]  ;;  %v8702_v41 = vld [vmem:[#allocation7 + $0x184] sm:$0xf0] }
 0x2f7   : > { %v1780_v32 = vadd.f32 %v12757_v15, %v10490_v53  ;;  %v1649_v47 = vadd.f32 %v10421_v57, %v10061_v23 }
 0x2f8   : > { %v2626_v54 = vadd.f32 %v2625_v0, %v2537_v50  ;;  %12756 = vst [vmem:[#allocation60_spill] sm:$0xff] %v10582_v36  ;;  %v7777_v50 = vld [vmem:[#allocation7 + $0x178] sm:$0xf0] }
 0x2fb   : > { %v1865_v12 = vpop.f32.mrf.mxu3 }
 0x2fc   : > { %v1866_v40 = vadd.f32 %v1865_v12, %v1777_v52  ;;  %v12759_v52 = vld [vmem:[#allocation41_spill] sm:$0xff] }
 0x2fd   : > { %v2714_v44 = vpop.f32.mrf.mxu2  ;;  %v2539_v5 = vpop.f32.mrf.mxu0 }
 0x2fe   : > { %v10580_v7 = vadd.f32 %v2714_v44, %v2626_v54  ;;  %v1959_v59 = vmax.f32 %v1866_v40, 0.0  ;;  %v2540_v27 = vadd.f32 %v2539_v5, %v10485_v14  ;;  %v2628_v22 = vpop.f32.mrf.mxu1  ;;  %v7780_v54 = vor.u32 %v8699_v25, %v7777_v50  ;;  %v8697_v5 = vld [vmem:[#allocation7 + $0x164] sm:$0xf] }
 0x2ff   : > { %v7784_v40 = vor.u32 %v8702_v41, %v7783_v56  ;;  %v2034_v41 = vmax.f32 %v10406_v46, 0.0 }
 0x300   : > { %12755 = vst [vmem:[#allocation58_spill] sm:$0xff] %v10580_v7  ;;  %v2629_v0 = vadd.f32 %v2628_v22, %v2540_v27  ;;  %1907 = vmatmul.bf16.gmra.mxu3 %v12758_v28  ;;  %2578 = vmatmul.bf16.gmra.mxu0 %v12759_v52  ;;  %v10589_v12 = vpack.c.bf16 %v1959_v59, %v1955_v35  ;;  %v7769_v27 = vld [vmem:[#allocation7 + $0x168] sm:$0xf0] }
 0x301   : > { %2667 = vmatmul.bf16.gmra.mxu1 %v10410_v9  ;;  %3044 = vmatpush.bf16.msrb.mxu2 %v7780_v54  ;;  %v7772_v25 = vor.u32 %v8697_v5, %v7769_v27  ;;  %v1738_v35 = vadd.f32 %v10423_v60, %v1649_v47  ;;  %v7761_v9 = vld [vmem:[#allocation7 + $0x158] sm:$0xf0]  ;;  %v8661_v60 = vld [vmem:[#allocation7 + $0x44] sm:$0xf] }
 0x302   : > { %2756 = vmatmul.bf16.gmra.mxu2 %v10582_v36  ;;  %2784 = vmatpush.bf16.msrb.mxu3 %v7784_v40  ;;  %v8695_v36 = vld [vmem:[#allocation7 + $0x154] sm:$0xf]  ;;  %v8677_v47 = vld [vmem:[#allocation7 + $0xc4] sm:$0xf] }
 0x303   : > { %v1868_v44 = vpop.f32.mrf.mxu3  ;;  %v7764_v54 = vor.u32 %v8695_v36, %v7761_v9  ;;  %v2038_v52 = vmax.f32 %v1738_v35, 0.0 }
 0x304   : > { %v1869_v22 = vadd.f32 %v1868_v44, %v1780_v32  ;;  %v12761_v32 = vld [vmem:[#allocation73_spill] sm:$0xff] }
 0x305   : > { %v2717_v15 = vpop.f32.mrf.mxu2  ;;  %v2541_v57 = vpop.f32.mrf.mxu0  ;;  %3045 = vmatpush.bf16.msrb.mxu2 %v7772_v25  ;;  %v1782_v40 = vadd.f32 %v12761_v32, %v10490_v53  ;;  %v8693_v25 = vld [vmem:[#allocation7 + $0x144] sm:$0xf]  ;;  %v10604_v36 = vpack.c.bf16 %v2038_v52, %v2034_v41  ;;  %v12766_v52 = vld [vmem:[#allocation42_spill] sm:$0xff] }
 0x306   : > { %v10596_v59 = vadd.f32 %v2717_v15, %v2629_v0  ;;  %v2542_v50 = vadd.f32 %v2541_v57, %v10485_v14  ;;  %v2630_v28 = vpop.f32.mrf.mxu1  ;;  %v7625_v0 = vld [vmem:[#allocation7 + $0x48] sm:$0xf0]  ;;  %v8691_v41 = vld [vmem:[#allocation7 + $0x134] sm:$0xf] }
 0x307   : > { %v7628_v15 = vor.u32 %v8661_v60, %v7625_v0  ;;  %v7689_v57 = vld [vmem:[#allocation7 + $0xc8] sm:$0xf0]  ;;  %12763 = vst [vmem:[#allocation64_spill] sm:$0xff] %v10604_v36  ;;  %v8659_v60 = vld [vmem:[#allocation7 + $0x34] sm:$0xf] }
 0x308   : > { %12760 = vst [vmem:[#allocation38_spill] sm:$0xff] %v10596_v59  ;;  %v2631_v56 = vadd.f32 %v2630_v28, %v2542_v50  ;;  %v7753_v59 = vld [vmem:[#allocation7 + $0x148] sm:$0xf0]  ;;  %v7692_v46 = vor.u32 %v8677_v47, %v7689_v57  ;;  %v1963_v50 = vmax.f32 %v1869_v22, 0.0  ;;  %v7617_v0 = vld [vmem:[#allocation7 + $0x38] sm:$0xf0] }
 0x309   : > { %3046 = vmatpush.bf16.msrb.mxu2 %v7764_v54  ;;  %v7756_v35 = vor.u32 %v8693_v25, %v7753_v59  ;;  %2869 = vmatpush.bf16.msrb.mxu0 %v7628_v15  ;;  %v7620_v59 = vor.u32 %v8659_v60, %v7617_v0  ;;  %v7681_v22 = vld [vmem:[#allocation7 + $0xb8] sm:$0xf0]  ;;  %v1654_v15 = vadd.f32 %v10448_v11, %v10061_v23  ;;  %v7737_v60 = vld [vmem:[#allocation7 + $0x128] sm:$0xf0] }
 0x30a   : > { %2958 = vmatpush.bf16.msrb.mxu1 %v7692_v46  ;;  %v7745_v47 = vld [vmem:[#allocation7 + $0x138] sm:$0xf0]  ;;  %v7609_v46 = vld [vmem:[#allocation7 + $0x28] sm:$0xf0] }
 0x30b   : > { %v1870_v44 = vpop.f32.mrf.mxu3  ;;  %v7748_v25 = vor.u32 %v8691_v41, %v7745_v47  ;;  %v1743_v11 = vadd.f32 %v10450_v24, %v1654_v15  ;;  %v8655_v47 = vld [vmem:[#allocation7 + $0x14] sm:$0xf]  ;;  %v2042_v24 = vmax.f32 %v10433_v20, 0.0 }
 0x30c   : > { %v1871_v5 = vadd.f32 %v1870_v44, %v1782_v40  ;;  %v12764_v40 = vld [vmem:[#allocation74_spill] sm:$0xff] }
 0x30d   : > { %v2719_v27 = vpop.f32.mrf.mxu2  ;;  %v2544_v9 = vpop.f32.mrf.mxu0  ;;  %v1785_v44 = vadd.f32 %v12764_v40, %v10490_v53  ;;  %3047 = vmatpush.bf16.msrb.mxu2 %v7756_v35  ;;  %2870 = vmatpush.bf16.msrb.mxu0 %v7620_v59  ;;  %v8673_v35 = vld [vmem:[#allocation7 + $0xa4] sm:$0xf] }
 0x30e   : > { %v10602_v7 = vadd.f32 %v2719_v27, %v2631_v56  ;;  %v1967_v28 = vmax.f32 %v1871_v5, 0.0  ;;  %v2545_v54 = vadd.f32 %v2544_v9, %v10485_v14  ;;  %v2633_v32 = vpop.f32.mrf.mxu1  ;;  %v8675_v56 = vld [vmem:[#allocation7 + $0xb4] sm:$0xf]  ;;  %v8689_v40 = vld [vmem:[#allocation7 + $0x124] sm:$0xf] }
 0x30f   : > { %v7684_v57 = vor.u32 %v8675_v56, %v7681_v22  ;;  %v7740_v22 = vor.u32 %v8689_v40, %v7737_v60  ;;  %v8669_v40 = vld [vmem:[#allocation7 + $0x84] sm:$0xf] }
 0x310   : > { %12762 = vst [vmem:[#allocation62_spill] sm:$0xff] %v10602_v7  ;;  %v2634_v27 = vadd.f32 %v2633_v32, %v2545_v54  ;;  %v12765_v7 = vld [vmem:[#allocation30_spill] sm:$0xff]  ;;  %2583 = vmatmul.bf16.gmra.mxu0 %v12766_v52  ;;  %v10611_v5 = vpack.c.bf16 %v1967_v28, %v1963_v50  ;;  %v7673_v28 = vld [vmem:[#allocation7 + $0xa8] sm:$0xf0] }
 0x311   : > { %1912 = vmatmul.bf16.gmra.mxu3 %v12765_v7  ;;  %2672 = vmatmul.bf16.gmra.mxu1 %v10437_v38  ;;  %v8657_v7 = vld [vmem:[#allocation7 + $0x24] sm:$0xf]  ;;  %v7676_v56 = vor.u32 %v8673_v35, %v7673_v28  ;;  %v7729_v38 = vld [vmem:[#allocation7 + $0x118] sm:$0xf0]  ;;  %v7593_v28 = vld [vmem:[#allocation7 + $0x8] sm:$0xf0] }
 0x312   : > { %12767 = vst [vmem:[#allocation39_spill] sm:$0xff] %v10611_v5  ;;  %2761 = vmatmul.bf16.gmra.mxu2 %v10604_v36  ;;  %2959 = vmatpush.bf16.msrb.mxu1 %v7684_v57  ;;  %v7612_v50 = vor.u32 %v8657_v7, %v7609_v46  ;;  %v8671_v57 = vld [vmem:[#allocation7 + $0x94] sm:$0xf]  ;;  %v7665_v7 = vld [vmem:[#allocation7 + $0x98] sm:$0xf0] }
 0x313   : > { %v1873_v9 = vpop.f32.mrf.mxu3  ;;  %3048 = vmatpush.bf16.msrb.mxu2 %v7748_v25  ;;  %v8687_v46 = vld [vmem:[#allocation7 + $0x114] sm:$0xf]  ;;  %v7668_v15 = vor.u32 %v8671_v57, %v7665_v7 }
 0x314   : > { %v1874_v54 = vadd.f32 %v1873_v9, %v1785_v44  ;;  %2871 = vmatpush.bf16.msrb.mxu0 %v7612_v50  ;;  %v7601_v44 = vld [vmem:[#allocation7 + $0x18] sm:$0xf0]  ;;  %v7732_v35 = vor.u32 %v8687_v46, %v7729_v38  ;;  %v8653_v50 = vld [vmem:[#allocation7 + $0x4] sm:$0xf] }
 0x315   : > { %v2722_v32 = vpop.f32.mrf.mxu2  ;;  %v2546_v36 = vpop.f32.mrf.mxu0  ;;  %v7604_v9 = vor.u32 %v8655_v47, %v7601_v44  ;;  %v7721_v47 = vld [vmem:[#allocation7 + $0x108] sm:$0xf0] }
 0x316   : > { %v10618_v0 = vadd.f32 %v2722_v32, %v2634_v27  ;;  %v2547_v59 = vadd.f32 %v2546_v36, %v10485_v14  ;;  %v2635_v41 = vpop.f32.mrf.mxu1  ;;  %2960 = vmatpush.bf16.msrb.mxu1 %v7676_v56  ;;  %v2046_v27 = vmax.f32 %v1743_v11, 0.0  ;;  %v1787_v36 = vadd.f32 %v10216_v8, %v10490_v53 }
 0x317   : > { %3049 = vmatpush.bf16.msrb.mxu2 %v7740_v22  ;;  %v7596_v22 = vor.u32 %v8653_v50, %v7593_v28  ;;  %v1971_v57 = vmax.f32 %v1874_v54, 0.0  ;;  %v1659_v54 = vadd.f32 %v10475_v26, %v10061_v23  ;;  %v2050_v26 = vmax.f32 %v10460_v42, 0.0 }
 0x318   : > { %v2636_v25 = vadd.f32 %v2635_v41, %v2547_v59  ;;  %2872 = vmatpush.bf16.msrb.mxu0 %v7604_v9  ;;  %v7657_v59 = vld [vmem:[#allocation7 + $0x88] sm:$0xf0]  ;;  %v8685_v41 = vld [vmem:[#allocation7 + $0x104] sm:$0xf]  ;;  %v10626_v38 = vpack.c.bf16 %v2046_v27, %v2042_v24  ;;  %v8715_v27 = vld [vmem:[#allocation7 + $0x1f4] sm:$0xf]  ;;  %v1795_v42 = vadd.f32 %v10256_v1, %v10490_v53 }
 0x319   : > { %v7660_v44 = vor.u32 %v8669_v40, %v7657_v59  ;;  %v7724_v8 = vor.u32 %v8685_v41, %v7721_v47  ;;  %v1792_v41 = vadd.f32 %v10241_v13, %v10490_v53  ;;  %v12771_v13 = vld [vmem:[#allocation44_spill] sm:$0xff] }
 0x31a   : > { %2961 = vmatpush.bf16.msrb.mxu1 %v7668_v15  ;;  %v1790_v15 = vadd.f32 %v10231_v55, %v10490_v53 }
 0x31b   : > { %v1875_v32 = vpop.f32.mrf.mxu3  ;;  %3050 = vmatpush.bf16.msrb.mxu2 %v7732_v35 }
 0x31c   : > { %v1876_v60 = vadd.f32 %v1875_v32, %v1787_v36  ;;  %2873 = vmatpush.bf16.msrb.mxu0 %v7596_v22  ;;  %v7841_v36 = vld [vmem:[#allocation7 + $0x1f8] sm:$0xf0] }
 0x31d   : > { %v2724_v56 = vpop.f32.mrf.mxu2  ;;  %v2549_v11 = vpop.f32.mrf.mxu0  ;;  %v7844_v32 = vor.u32 %v8715_v27, %v7841_v36 }
 0x31e   : > { %v10624_v20 = vadd.f32 %v2724_v56, %v2636_v25  ;;  %v1975_v9 = vmax.f32 %v1876_v60, 0.0  ;;  %v2550_v7 = vadd.f32 %v2549_v11, %v10485_v14  ;;  %v2638_v46 = vpop.f32.mrf.mxu1  ;;  %2962 = vmatpush.bf16.msrb.mxu1 %v7660_v44  ;;  %v12768_v25 = vld [vmem:[#allocation43_spill] sm:$0xff] }
 0x31f   : > { %3051 = vmatpush.bf16.msrb.mxu2 %v7724_v8  ;;  %3133 = vmatpush.bf16.msra.mxu3 %v7844_v32 }
 0x320   : > { %v2639_v35 = vadd.f32 %v2638_v46, %v2550_v7  ;;  %2588 = vmatmul.bf16.gmra.mxu0 %v12768_v25  ;;  %v10633_v24 = vpack.c.bf16 %v1975_v9, %v1971_v57 }
 0x321   : > { %1917 = vmatmul.bf16.gmra.mxu3 %v12684_v10  ;;  %2677 = vmatmul.bf16.gmra.mxu1 %v10464_v31  ;;  %v1748_v10 = vadd.f32 %v10477_v51, %v1659_v54  ;;  %v12770_v54 = vld [vmem:[#allocation34_spill] sm:$0xff] }
 0x322   : > { %12769 = vst [vmem:[#allocation75_spill] sm:$0xff] %v10633_v24  ;;  %2766 = vmatmul.bf16.gmra.mxu2 %v10626_v38 }
 0x323   : > { %v1878_v50 = vpop.f32.mrf.mxu3  ;;  %v2054_v59 = vmax.f32 %v1748_v10, 0.0 }
 0x324   : > { %v1879_v28 = vadd.f32 %v1878_v50, %v1790_v15 }
 0x325   : > { %v2727_v55 = vpop.f32.mrf.mxu2  ;;  %v2551_v60 = vpop.f32.mrf.mxu0  ;;  %v10648_v51 = vpack.c.bf16 %v2054_v59, %v2050_v26 }
 0x326   : > { %v10640_v40 = vadd.f32 %v2727_v55, %v2639_v35  ;;  %v2552_v56 = vadd.f32 %v2551_v60, %v10485_v14  ;;  %v2640_v22 = vpop.f32.mrf.mxu1  ;;  %v1979_v9 = vmax.f32 %v1879_v28, 0.0 }
 0x328   : > { %v2641_v23 = vadd.f32 %v2640_v22, %v2552_v56  ;;  %v1797_v56 = vadd.f32 %v10266_v58, %v10490_v53 }
 0x32b   : > { %v1880_v47 = vpop.f32.mrf.mxu3 }
 0x32c   : > { %v1881_v11 = vadd.f32 %v1880_v47, %v1792_v41 }
 0x32d   : > { %v2729_v44 = vpop.f32.mrf.mxu2  ;;  %v2554_v57 = vpop.f32.mrf.mxu0 }
 0x32e   : > { %v10646_v8 = vadd.f32 %v2729_v44, %v2641_v23  ;;  %v1983_v7 = vmax.f32 %v1881_v11, 0.0  ;;  %v2555_v46 = vadd.f32 %v2554_v57, %v10485_v14  ;;  %v2643_v15 = vpop.f32.mrf.mxu1 }
 0x330   : > { %v2644_v35 = vadd.f32 %v2643_v15, %v2555_v46  ;;  %2593 = vmatmul.bf16.gmra.mxu0 %v12771_v13  ;;  %v10655_v27 = vpack.c.bf16 %v1983_v7, %v1979_v9  ;;  %v1800_v9 = vadd.f32 %v10283_v33, %v10490_v53  ;;  %v12773_v46 = vld [vmem:[#allocation37_spill] sm:$0xff]  ;;  %v12774_v15 = vld [vmem:[#allocation59_spill] sm:$0xff] }
 0x331   : > { %1922 = vmatmul.bf16.gmra.mxu3 %v12770_v54  ;;  %2682 = vmatmul.bf16.gmra.mxu1 %v10501_v43  ;;  %v7833_v54 = vld [vmem:[#allocation7 + $0x1e8] sm:$0xf0] }
 0x332   : > { %12772 = vst [vmem:[#allocation66_spill] sm:$0xff] %v10655_v27  ;;  %2771 = vmatmul.bf16.gmra.mxu2 %v10648_v51 }
 0x333   : > { %v1883_v36 = vpop.f32.mrf.mxu3 }
 0x334   : > { %v1884_v32 = vadd.f32 %v1883_v36, %v1795_v42  ;;  %v12775_v42 = vld [vmem:[#allocation26_spill] sm:$0xff] }
 0x335   : > { %v2732_v50 = vpop.f32.mrf.mxu2  ;;  %v2556_v55 = vpop.f32.mrf.mxu0 }
 0x336   : > { %v10659_v28 = vadd.f32 %v2732_v50, %v2644_v35  ;;  %v2557_v10 = vadd.f32 %v2556_v55, %v10485_v14  ;;  %v2645_v1 = vpop.f32.mrf.mxu1  ;;  %v1987_v47 = vmax.f32 %v1884_v32, 0.0  ;;  %v8713_v35 = vld [vmem:[#allocation7 + $0x1e4] sm:$0xf] }
 0x337   : > { %v7836_v36 = vor.u32 %v8713_v35, %v7833_v54  ;;  %v12778_v35 = vld [vmem:[#allocation76_spill] sm:$0xff] }
 0x338   : > { %v2646_v60 = vadd.f32 %v2645_v1, %v2557_v10 }
 0x339   : > { %3134 = vmatpush.bf16.msra.mxu3 %v7836_v36 }
 0x33b   : > { %v1885_v22 = vpop.f32.mrf.mxu3 }
 0x33c   : > { %v1886_v23 = vadd.f32 %v1885_v22, %v1797_v56  ;;  %v1802_v22 = vadd.f32 %v10293_v61, %v10490_v53 }
 0x33d   : > { %v2734_v26 = vpop.f32.mrf.mxu2  ;;  %v2559_v41 = vpop.f32.mrf.mxu0 }
 0x33e   : > { %v10664_v59 = vadd.f32 %v2734_v26, %v2646_v60  ;;  %v1991_v11 = vmax.f32 %v1886_v23, 0.0  ;;  %v2560_v44 = vadd.f32 %v2559_v41, %v10485_v14  ;;  %v2648_v57 = vpop.f32.mrf.mxu1 }
 0x340   : > { %v2649_v7 = vadd.f32 %v2648_v57, %v2560_v44  ;;  %2874 = vmatmul.bf16.vlgmr.msrb.gmra.mxu0 %v12773_v46  ;;  %v10671_v58 = vpack.c.bf16 %v1991_v11, %v1987_v47  ;;  %v1805_v46 = vadd.f32 %v10310_v4, %v10490_v53 }
 0x341   : > { %2785 = vmatmul.bf16.vlgmr.msrb.gmra.mxu3 %v10521_v6  ;;  %2963 = vmatmul.bf16.vlgmr.msrb.gmra.mxu1 %v12774_v15 }
 0x342   : > { %3052 = vmatmul.bf16.vlgmr.msrb.gmra.mxu2 %v12775_v42  ;;  %v12777_v42 = vld [vmem:[#allocation63_spill] sm:$0xff] }
 0x343   : > { %v1888_v32 = vpop.f32.mrf.mxu3 }
 0x344   : > { %v1889_v50 = vadd.f32 %v1888_v32, %v1800_v9 }
 0x345   : > { %v2737_v55 = vpop.f32.mrf.mxu2  ;;  %v2561_v33 = vpop.f32.mrf.mxu0 }
 0x346   : > { %v10675_v10 = vadd.f32 %v2737_v55, %v2649_v7  ;;  %v2562_v1 = vadd.f32 %v2561_v33, %v10485_v14  ;;  %v2650_v60 = vpop.f32.mrf.mxu1  ;;  %v1995_v44 = vmax.f32 %v1889_v50, 0.0 }
 0x348   : > { %v2651_v56 = vadd.f32 %v2650_v60, %v2562_v1  ;;  %v1807_v60 = vadd.f32 %v10320_v45, %v10490_v53 }
 0x34b   : > { %v1890_v23 = vpop.f32.mrf.mxu3 }
 0x34c   : > { %v1891_v26 = vadd.f32 %v1890_v23, %v1802_v22 }
 0x34d   : > { %v2739_v41 = vpop.f32.mrf.mxu2  ;;  %v2564_v11 = vpop.f32.mrf.mxu0 }
 0x34e   : > { %v10680_v47 = vadd.f32 %v2739_v41, %v2651_v56  ;;  %v1999_v57 = vmax.f32 %v1891_v26, 0.0  ;;  %v2565_v9 = vadd.f32 %v2564_v11, %v10485_v14  ;;  %v2653_v7 = vpop.f32.mrf.mxu1 }
 0x350   : > { %v2654_v15 = vadd.f32 %v2653_v7, %v2565_v9  ;;  %2879 = vmatmul.bf16.gmra.mxu0 %v9989_v39  ;;  %v10687_v61 = vpack.c.bf16 %v1999_v57, %v1995_v44  ;;  %v1810_v9 = vadd.f32 %v10337_v21, %v10490_v53 }
 0x351   : > { %2790 = vmatmul.bf16.gmra.mxu3 %v10545_v17  ;;  %2968 = vmatmul.bf16.gmra.mxu1 %v12777_v42  ;;  %v8711_v42 = vld [vmem:[#allocation7 + $0x1d4] sm:$0xf] }
 0x352   : > { %12776 = vst [vmem:[#allocation68_spill] sm:$0xff] %v10687_v61  ;;  %3057 = vmatmul.bf16.gmra.mxu2 %v12778_v35  ;;  %v7825_v35 = vld [vmem:[#allocation7 + $0x1d8] sm:$0xf0] }
 0x353   : > { %v1893_v54 = vpop.f32.mrf.mxu3 }
 0x354   : > { %v1894_v36 = vadd.f32 %v1893_v54, %v1805_v46  ;;  %v12780_v46 = vld [vmem:[#allocation67_spill] sm:$0xff]  ;;  %v7828_v54 = vor.u32 %v8711_v42, %v7825_v35  ;;  %v12784_v35 = vld [vmem:[#allocation50_spill] sm:$0xff] }
 0x355   : > { %v2742_v32 = vpop.f32.mrf.mxu2  ;;  %v2566_v55 = vpop.f32.mrf.mxu0 }
 0x356   : > { %v10691_v50 = vadd.f32 %v2742_v32, %v2654_v15  ;;  %v2567_v33 = vadd.f32 %v2566_v55, %v10485_v14  ;;  %v2655_v4 = vpop.f32.mrf.mxu1  ;;  %v2003_v41 = vmax.f32 %v1894_v36, 0.0  ;;  %v12781_v15 = vld [vmem:[#allocation77_spill] sm:$0xff]  ;;  %3135 = vmatpush.bf16.msra.mxu3 %v7828_v54 }
 0x358   : > { %v2656_v1 = vadd.f32 %v2655_v4, %v2567_v33 }
 0x35b   : > { %v1895_v39 = vpop.f32.mrf.mxu3 }
 0x35c   : > { %v1896_v56 = vadd.f32 %v1895_v39, %v1807_v60  ;;  %v12782_v60 = vld [vmem:[#allocation78_spill] sm:$0xff] }
 0x35d   : > { %v2744_v22 = vpop.f32.mrf.mxu2  ;;  %v2569_v26 = vpop.f32.mrf.mxu0  ;;  %v1812_v39 = vadd.f32 %v12782_v60, %v10490_v53 }
 0x35e   : > { %v10696_v23 = vadd.f32 %v2744_v22, %v2656_v1  ;;  %v2007_v11 = vmax.f32 %v1896_v56, 0.0  ;;  %v2570_v44 = vadd.f32 %v2569_v26, %v10485_v14  ;;  %v2658_v57 = vpop.f32.mrf.mxu1 }
 0x360   : > { %v2659_v7 = vadd.f32 %v2658_v57, %v2570_v44  ;;  %2884 = vmatmul.bf16.gmra.mxu0 %v10011_v2  ;;  %v10703_v45 = vpack.c.bf16 %v2007_v11, %v2003_v41 }
 0x361   : > { %2795 = vmatmul.bf16.gmra.mxu3 %v10567_v48  ;;  %2973 = vmatmul.bf16.gmra.mxu1 %v12780_v46  ;;  %v12783_v46 = vld [vmem:[#allocation27_spill] sm:$0xff] }
 0x362   : > { %12779 = vst [vmem:[#allocation40_spill] sm:$0xff] %v10703_v45  ;;  %3062 = vmatmul.bf16.gmra.mxu2 %v12781_v15  ;;  %v1815_v15 = vadd.f32 %v12783_v46, %v10490_v53 }
 0x363   : > { %v1898_v36 = vpop.f32.mrf.mxu3 }
 0x364   : > { %v1899_v32 = vadd.f32 %v1898_v36, %v1810_v9  ;;  %v12785_v36 = vld [vmem:[#allocation20_spill] sm:$0xff] }
 0x365   : > { %v2747_v55 = vpop.f32.mrf.mxu2  ;;  %v2571_v21 = vpop.f32.mrf.mxu0 }
 0x366   : > { %v10707_v33 = vadd.f32 %v2747_v55, %v2659_v7  ;;  %v2572_v4 = vadd.f32 %v2571_v21, %v10485_v14  ;;  %v2660_v1 = vpop.f32.mrf.mxu1  ;;  %v2011_v44 = vmax.f32 %v1899_v32, 0.0  ;;  %v12786_v55 = vld [vmem:[#allocation79_spill] sm:$0xff] }
 0x368   : > { %v2661_v2 = vadd.f32 %v2660_v1, %v2572_v4 }
 0x36b   : > { %v1900_v56 = vpop.f32.mrf.mxu3 }
 0x36c   : > { %v1901_v22 = vadd.f32 %v1900_v56, %v1812_v39 }
 0x36d   : > { %v2749_v26 = vpop.f32.mrf.mxu2  ;;  %v2574_v11 = vpop.f32.mrf.mxu0 }
 0x36e   : > { %v10712_v41 = vadd.f32 %v2749_v26, %v2661_v2  ;;  %v2015_v57 = vmax.f32 %v1901_v22, 0.0  ;;  %v2575_v9 = vadd.f32 %v2574_v11, %v10485_v14  ;;  %v2663_v7 = vpop.f32.mrf.mxu1  ;;  %v12787_v22 = vld [vmem:[#allocation55_spill] sm:$0xff] }
 0x36f   : > { %v1817_v26 = vadd.f32 %v12787_v22, %v10490_v53 }
 0x370   : > { %v2664_v42 = vadd.f32 %v2663_v7, %v2575_v9  ;;  %2889 = vmatmul.bf16.gmra.mxu0 %v12784_v35  ;;  %v10719_v54 = vpack.c.bf16 %v2015_v57, %v2011_v44 }
 0x371   : > { %2800 = vmatmul.bf16.gmra.mxu3 %v10589_v12  ;;  %2978 = vmatmul.bf16.gmra.mxu1 %v12785_v36  ;;  %v12788_v36 = vld [vmem:[#allocation45_spill] sm:$0xff] }
 0x372   : > { %3067 = vmatmul.bf16.gmra.mxu2 %v12786_v55  ;;  %v1820_v55 = vadd.f32 %v12788_v36, %v10490_v53 }
 0x373   : > { %v1903_v21 = vpop.f32.mrf.mxu3 }
 0x374   : > { %v1904_v32 = vadd.f32 %v1903_v21, %v1815_v15 }
 0x375   : > { %v2752_v4 = vpop.f32.mrf.mxu2  ;;  %v2576_v2 = vpop.f32.mrf.mxu0 }
 0x376   : > { %v10723_v1 = vadd.f32 %v2752_v4, %v2664_v42  ;;  %v2577_v60 = vadd.f32 %v2576_v2, %v10485_v14  ;;  %v2665_v39 = vpop.f32.mrf.mxu1  ;;  %v2019_v46 = vmax.f32 %v1904_v32, 0.0  ;;  %v12789_v4 = vld [vmem:[#allocation53_spill] sm:$0xff] }
 0x377   : > { %v7817_v32 = vld [vmem:[#allocation7 + $0x1c8] sm:$0xf0] }
 0x378   : > { %v2666_v56 = vadd.f32 %v2665_v39, %v2577_v60  ;;  %v12790_v60 = vld [vmem:[#allocation22_spill] sm:$0xff]  ;;  %v12791_v39 = vld [vmem:[#allocation80_spill] sm:$0xff] }
 0x37b   : > { %v1905_v11 = vpop.f32.mrf.mxu3 }
 0x37c   : > { %v1906_v44 = vadd.f32 %v1905_v11, %v1817_v26 }
 0x37d   : > { %v2754_v57 = vpop.f32.mrf.mxu2  ;;  %v2579_v7 = vpop.f32.mrf.mxu0 }
 0x37e   : > { %v10728_v9 = vadd.f32 %v2754_v57, %v2666_v56  ;;  %v2023_v35 = vmax.f32 %v1906_v44, 0.0  ;;  %v2580_v15 = vadd.f32 %v2579_v7, %v10485_v14  ;;  %v2668_v42 = vpop.f32.mrf.mxu1  ;;  %v8709_v56 = vld [vmem:[#allocation7 + $0x1c4] sm:$0xf] }
 0x37f   : > { %v7820_v22 = vor.u32 %v8709_v56, %v7817_v32 }
 0x380   : > { %v2669_v21 = vadd.f32 %v2668_v42, %v2580_v15  ;;  %2894 = vmatmul.bf16.gmra.mxu0 %v12789_v4  ;;  %v10735_v2 = vpack.c.bf16 %v2023_v35, %v2019_v46  ;;  %v12793_v46 = vld [vmem:[#allocation46_spill] sm:$0xff] }
 0x381   : > { %2805 = vmatmul.bf16.gmra.mxu3 %v10611_v5  ;;  %2983 = vmatmul.bf16.gmra.mxu1 %v12790_v60  ;;  %v1822_v35 = vadd.f32 %v12793_v46, %v10490_v53  ;;  %v12798_v46 = vld [vmem:[#allocation32_spill] sm:$0xff] }
 0x382   : > { %3072 = vmatmul.bf16.gmra.mxu2 %v12791_v39  ;;  %3136 = vmatpush.bf16.msra.mxu3 %v7820_v22 }
 0x383   : > { %v1908_v26 = vpop.f32.mrf.mxu3 }
 0x384   : > { %v1909_v11 = vadd.f32 %v1908_v26, %v1820_v55  ;;  %v12795_v26 = vld [vmem:[#allocation47_spill] sm:$0xff] }
 0x385   : > { %v2757_v44 = vpop.f32.mrf.mxu2  ;;  %v2581_v7 = vpop.f32.mrf.mxu0 }
 0x386   : > { %v10739_v57 = vadd.f32 %v2757_v44, %v2669_v21  ;;  %v2582_v15 = vadd.f32 %v2581_v7, %v10485_v14  ;;  %v2670_v42 = vpop.f32.mrf.mxu1  ;;  %v2027_v32 = vmax.f32 %v1909_v11, 0.0  ;;  %v1825_v44 = vadd.f32 %v12795_v26, %v10490_v53 }
 0x388   : > { %12792 = vst [vmem:[#allocation70_spill] sm:$0xff] %v10739_v57  ;;  %v2671_v36 = vadd.f32 %v2670_v42, %v2582_v15  ;;  %v12796_v15 = vld [vmem:[#allocation57_spill] sm:$0xff] }
 0x38b   : > { %v1910_v4 = vpop.f32.mrf.mxu3 }
 0x38c   : > { %v1911_v60 = vadd.f32 %v1910_v4, %v1822_v35 }
 0x38d   : > { %v2759_v39 = vpop.f32.mrf.mxu2  ;;  %v2584_v56 = vpop.f32.mrf.mxu0 }
 0x38e   : > { %v10744_v5 = vadd.f32 %v2759_v39, %v2671_v36  ;;  %v2031_v55 = vmax.f32 %v1911_v60, 0.0  ;;  %v2585_v22 = vadd.f32 %v2584_v56, %v10485_v14  ;;  %v2673_v21 = vpop.f32.mrf.mxu1  ;;  %v12799_v36 = vld [vmem:[#allocation81_spill] sm:$0xff] }
 0x390   : > { %12794 = vst [vmem:[#allocation71_spill] sm:$0xff] %v10744_v5  ;;  %v2674_v7 = vadd.f32 %v2673_v21, %v2585_v22  ;;  %2899 = vmatmul.bf16.gmra.mxu0 %v12796_v15  ;;  %v10751_v42 = vpack.c.bf16 %v2031_v55, %v2027_v32  ;;  %v12801_v21 = vld [vmem:[#allocation48_spill] sm:$0xff] }
 0x391   : > { %2810 = vmatmul.bf16.gmra.mxu3 %v10633_v24  ;;  %2988 = vmatmul.bf16.gmra.mxu1 %v12798_v46  ;;  %v1827_v24 = vadd.f32 %v12801_v21, %v10490_v53  ;;  %v8707_v21 = vld [vmem:[#allocation7 + $0x1b4] sm:$0xf] }
 0x392   : > { %12797 = vst [vmem:[#allocation28_spill] sm:$0xff] %v10751_v42  ;;  %3077 = vmatmul.bf16.gmra.mxu2 %v12799_v36 }
 0x394   : > { %v1913_v35 = vpop.f32.mrf.mxu3 }
 0x395   : > { %v1914_v11 = vadd.f32 %v1913_v35, %v1825_v44  ;;  %v2762_v4 = vpop.f32.mrf.mxu2  ;;  %v2586_v39 = vpop.f32.mrf.mxu0  ;;  %v12803_v35 = vld [vmem:[#allocation49_spill] sm:$0xff] }
 0x396   : > { %v10755_v60 = vadd.f32 %v2762_v4, %v2674_v7  ;;  %v2587_v56 = vadd.f32 %v2586_v39, %v10485_v14  ;;  %v2675_v26 = vpop.f32.mrf.mxu1  ;;  %v1830_v4 = vadd.f32 %v12803_v35, %v10490_v53 }
 0x397   : > { %v2035_v36 = vmax.f32 %v1914_v11, 0.0  ;;  %v7809_v11 = vld [vmem:[#allocation7 + $0x1b8] sm:$0xf0] }
 0x398   : > { %12800 = vst [vmem:[#allocation73_spill] sm:$0xff] %v10755_v60  ;;  %v2676_v22 = vadd.f32 %v2675_v26, %v2587_v56  ;;  %v12804_v56 = vld [vmem:[#allocation61_spill] sm:$0xff] }
 0x39c   : > { %v1915_v15 = vpop.f32.mrf.mxu3 }
 0x39d   : > { %v1916_v32 = vadd.f32 %v1915_v15, %v1827_v24  ;;  %v2764_v55 = vpop.f32.mrf.mxu2  ;;  %v2589_v46 = vpop.f32.mrf.mxu0  ;;  %v12805_v24 = vld [vmem:[#allocation24_spill] sm:$0xff]  ;;  %v7812_v15 = vor.u32 %v8707_v21, %v7809_v11 }
 0x39e   : > { %v10760_v5 = vadd.f32 %v2764_v55, %v2676_v22  ;;  %v2590_v44 = vadd.f32 %v2589_v46, %v10485_v14  ;;  %v2678_v7 = vpop.f32.mrf.mxu1  ;;  %v12806_v22 = vld [vmem:[#allocation82_spill] sm:$0xff] }
 0x39f   : > { %v2039_v57 = vmax.f32 %v1916_v32, 0.0  ;;  %3137 = vmatpush.bf16.msra.mxu3 %v7812_v15 }
 0x3a0   : > { %12802 = vst [vmem:[#allocation74_spill] sm:$0xff] %v10760_v5  ;;  %v2679_v39 = vadd.f32 %v2678_v7, %v2590_v44  ;;  %2904 = vmatmul.bf16.gmra.mxu0 %v12804_v56 }
 0x3a1   : > { %2815 = vmatmul.bf16.gmra.mxu3 %v10655_v27  ;;  %v10767_v26 = vpack.c.bf16 %v2039_v57, %v2035_v36  ;;  %2993 = vmatmul.bf16.gmra.mxu1 %v12805_v24  ;;  %v12807_v57 = vld [vmem:[#allocation51_spill] sm:$0xff] }
 0x3a2   : > { %3082 = vmatmul.bf16.gmra.mxu2 %v12806_v22  ;;  %v1832_v36 = vadd.f32 %v12807_v57, %v10490_v53  ;;  %v12810_v57 = vld [vmem:[#allocation21_spill] sm:$0xff] }
 0x3a4   : > { %v1918_v32 = vpop.f32.mrf.mxu3 }
 0x3a5   : > { %v1919_v55 = vadd.f32 %v1918_v32, %v1830_v4  ;;  %v2767_v46 = vpop.f32.mrf.mxu2  ;;  %v2591_v44 = vpop.f32.mrf.mxu0  ;;  %v12808_v32 = vld [vmem:[#allocation35_spill] sm:$0xff] }
 0x3a6   : > { %v10771_v5 = vadd.f32 %v2767_v46, %v2679_v39  ;;  %v2592_v7 = vadd.f32 %v2591_v44, %v10485_v14  ;;  %v2680_v35 = vpop.f32.mrf.mxu1  ;;  %v1835_v46 = vadd.f32 %v12808_v32, %v10490_v53 }
 0x3a7   : > { %v2043_v11 = vmax.f32 %v1919_v55, 0.0  ;;  %v8732_v55 = vld [vmem:[#allocation8 + $0x78] sm:$0xff] }
 0x3a8   : > { %v2681_v56 = vadd.f32 %v2680_v35, %v2592_v7  ;;  %v12809_v7 = vld [vmem:[#allocation65_spill] sm:$0xff]  ;;  %3539 = vmatpush.bf16.msra.mxu1 %v8732_v55 }
 0x3ac   : > { %v1920_v24 = vpop.f32.mrf.mxu3 }
 0x3ad   : > { %v1921_v27 = vadd.f32 %v1920_v24, %v1832_v36  ;;  %v2769_v22 = vpop.f32.mrf.mxu2  ;;  %v2594_v21 = vpop.f32.mrf.mxu0  ;;  %v8724_v36 = vld [vmem:[#allocation8 + $0x38] sm:$0xff] }
 0x3ae   : > { %v10776_v60 = vadd.f32 %v2769_v22, %v2681_v56  ;;  %v2595_v15 = vadd.f32 %v2594_v21, %v10485_v14  ;;  %v2683_v39 = vpop.f32.mrf.mxu1  ;;  %v12811_v56 = vld [vmem:[#allocation83_spill] sm:$0xff]  ;;  %3450 = vmatpush.bf16.msra.mxu0 %v8724_v36 }
 0x3af   : > { %v2047_v4 = vmax.f32 %v1921_v27, 0.0 }
 0x3b0   : > { %v2684_v44 = vadd.f32 %v2683_v39, %v2595_v15  ;;  %2909 = vmatmul.bf16.gmra.mxu0 %v12809_v7 }
 0x3b1   : > { %2820 = vmatmul.bf16.gmra.mxu3 %v10671_v58  ;;  %v10783_v35 = vpack.c.bf16 %v2047_v4, %v2043_v11  ;;  %2998 = vmatmul.bf16.gmra.mxu1 %v12810_v57  ;;  %v1837_v11 = vadd.f32 %v10492_v29, %v10490_v53  ;;  %v9039_v4 = vld [vmem:[%s12453_s4] sm:$0x3]  ;;  %v12813_v53 = vld [vmem:[#allocation69_spill] sm:$0xff] }
 0x3b2   : > { %3087 = vmatmul.bf16.gmra.mxu2 %v12811_v56  ;;  %v10795_v57 = vperm.slane %v9039_v4, 1  ;;  %v12815_v4 = vld [vmem:[#allocation52_spill] sm:$0xff] }
 0x3b4   : > { %v1923_v27 = vpop.f32.mrf.mxu3 }
 0x3b5   : > { %v1924_v24 = vadd.f32 %v1923_v27, %v1835_v46  ;;  %v2772_v22 = vpop.f32.mrf.mxu2  ;;  %v2596_v15 = vpop.f32.mrf.mxu0 }
 0x3b6   : > { %v10787_v21 = vadd.f32 %v2772_v22, %v2684_v44  ;;  %v2597_v39 = vadd.f32 %v2596_v15, %v10485_v14  ;;  %v2685_v32 = vpop.f32.mrf.mxu1 }
 0x3b7   : > { %v2051_v27 = vmax.f32 %v1924_v24, 0.0 }
 0x3b8   : > { %v2686_v7 = vadd.f32 %v2685_v32, %v2597_v39  ;;  %v12814_v32 = vld [vmem:[#allocation23_spill] sm:$0xff] }
 0x3bc   : > { %v1925_v56 = vpop.f32.mrf.mxu3 }
 0x3bd   : > { %v1926_v36 = vadd.f32 %v1925_v56, %v1837_v11  ;;  %v2774_v46 = vpop.f32.mrf.mxu2  ;;  %v2875_v44 = vpop.f32.mrf.mxu0  ;;  %v8705_v11 = vld [vmem:[#allocation7 + $0x1a4] sm:$0xf] }
 0x3be   : > { %v10797_v55 = vadd.f32 %v2774_v46, %v2686_v7  ;;  %v2876_v14 = vadd.f32 %v2875_v44, %v10795_v57  ;;  %v2964_v15 = vpop.f32.mrf.mxu1  ;;  %v7801_v7 = vld [vmem:[#allocation7 + $0x1a8] sm:$0xf0] }
 0x3bf   : > { %v2055_v22 = vmax.f32 %v1926_v36, 0.0  ;;  %v7804_v56 = vor.u32 %v8705_v11, %v7801_v7 }
 0x3c0   : > { %12812 = vst [vmem:[#allocation30_spill] sm:$0xff] %v10797_v55  ;;  %v2965_v39 = vadd.f32 %v2964_v15, %v2876_v14  ;;  %2914 = vmatmul.bf16.gmra.mxu0 %v12813_v53 }
 0x3c1   : > { %2825 = vmatmul.bf16.gmra.mxu3 %v10687_v61  ;;  %v10802_v29 = vpack.c.bf16 %v2055_v22, %v2051_v27  ;;  %3003 = vmatmul.bf16.gmra.mxu1 %v12814_v32 }
 0x3c2   : > { %3092 = vmatmul.bf16.gmra.mxu2 %v12815_v4  ;;  %3138 = vmatpush.bf16.msra.mxu3 %v7804_v56 }
 0x3c4   : > { %v2786_v46 = vpop.f32.mrf.mxu3 }
 0x3c5   : > { %v2787_v24 = vadd.f32 %v2786_v46, %v10508_v16  ;;  %v3053_v36 = vpop.f32.mrf.mxu2  ;;  %v2877_v14 = vpop.f32.mrf.mxu0 }
 0x3c6   : > { %v10807_v44 = vadd.f32 %v3053_v36, %v2965_v39  ;;  %v2878_v15 = vadd.f32 %v2877_v14, %v10795_v57  ;;  %v2966_v53 = vpop.f32.mrf.mxu1  ;;  %v12816_v36 = vld [vmem:[#allocation72_spill] sm:$0xff]  ;;  %v12817_v14 = vld [vmem:[#allocation25_spill] sm:$0xff] }
 0x3c7   : > { %v3222_v11 = vmax.f32 %v2787_v24, 0.0 }
 0x3c8   : > { %v2967_v27 = vadd.f32 %v2966_v53, %v2878_v15  ;;  %v12818_v15 = vld [vmem:[#allocation54_spill] sm:$0xff] }
 0x3cc   : > { %v2788_v22 = vpop.f32.mrf.mxu3 }
 0x3cd   : > { %v2789_v32 = vadd.f32 %v2788_v22, %v10514_v19  ;;  %v3055_v61 = vpop.f32.mrf.mxu2  ;;  %v2880_v55 = vpop.f32.mrf.mxu0  ;;  %v8723_v19 = vld [vmem:[#allocation8 + $0x30] sm:$0xff] }
 0x3ce   : > { %v10811_v4 = vadd.f32 %v3055_v61, %v2967_v27  ;;  %v2881_v16 = vadd.f32 %v2880_v55, %v10795_v57  ;;  %v2969_v46 = vpop.f32.mrf.mxu1  ;;  %v8731_v61 = vld [vmem:[#allocation8 + $0x70] sm:$0xff]  ;;  %3451 = vmatpush.bf16.msra.mxu0 %v8723_v19 }
 0x3cf   : > { %v3224_v7 = vmax.f32 %v2789_v32, 0.0  ;;  %3540 = vmatpush.bf16.msra.mxu1 %v8731_v61 }
 0x3d0   : > { %v2970_v39 = vadd.f32 %v2969_v46, %v2881_v16  ;;  %2919 = vmatmul.bf16.gmra.mxu0 %v12816_v36 }
 0x3d1   : > { %v10814_v56 = vpack.c.bf16 %v3224_v7, %v3222_v11  ;;  %2830 = vmatmul.bf16.gmra.mxu3 %v10703_v45  ;;  %3008 = vmatmul.bf16.gmra.mxu1 %v12817_v14 }
 0x3d2   : > { %3097 = vmatmul.bf16.gmra.mxu2 %v12818_v15 }
 0x3d4   : > { %v2791_v53 = vpop.f32.mrf.mxu3 }
 0x3d5   : > { %v2792_v24 = vadd.f32 %v2791_v53, %v10530_v30  ;;  %v3058_v55 = vpop.f32.mrf.mxu2  ;;  %v2882_v22 = vpop.f32.mrf.mxu0 }
 0x3d6   : > { %v10821_v27 = vadd.f32 %v3058_v55, %v2970_v39  ;;  %v2883_v32 = vadd.f32 %v2882_v22, %v10795_v57  ;;  %v2971_v11 = vpop.f32.mrf.mxu1  ;;  %v12819_v55 = vld [vmem:[#allocation56_spill] sm:$0xff]  ;;  %v7793_v22 = vld [vmem:[#allocation7 + $0x198] sm:$0xf0] }
 0x3d7   : > { %v3226_v45 = vmax.f32 %v2792_v24, 0.0 }
 0x3d8   : > { %v2972_v7 = vadd.f32 %v2971_v11, %v2883_v32 }
 0x3dc   : > { %v2793_v16 = vpop.f32.mrf.mxu3 }
 0x3dd   : > { %v2794_v46 = vadd.f32 %v2793_v16, %v10536_v49  ;;  %v3060_v36 = vpop.f32.mrf.mxu2  ;;  %v2885_v15 = vpop.f32.mrf.mxu0  ;;  %v8703_v49 = vld [vmem:[#allocation7 + $0x194] sm:$0xf] }
 0x3de   : > { %v10825_v14 = vadd.f32 %v3060_v36, %v2972_v7  ;;  %v2886_v61 = vadd.f32 %v2885_v15, %v10795_v57  ;;  %v2974_v30 = vpop.f32.mrf.mxu1  ;;  %v7796_v32 = vor.u32 %v8703_v49, %v7793_v22 }
 0x3df   : > { %v3228_v19 = vmax.f32 %v2794_v46, 0.0 }
 0x3e0   : > { %v2975_v53 = vadd.f32 %v2974_v30, %v2886_v61  ;;  %2924 = vmatmul.bf16.gmra.mxu0 %v12749_v63  ;;  %3139 = vmatpush.bf16.msra.mxu3 %v7796_v32 }
 0x3e1   : > { %2835 = vmatmul.bf16.gmra.mxu3 %v10719_v54  ;;  %v10830_v39 = vpack.c.bf16 %v3228_v19, %v3226_v45  ;;  %3013 = vmatmul.bf16.gmra.mxu1 %v10358_v62 }
 0x3e2   : > { %3102 = vmatmul.bf16.gmra.mxu2 %v12819_v55 }
 0x3e4   : > { %v2796_v11 = vpop.f32.mrf.mxu3 }
 0x3e5   : > { %v2797_v24 = vadd.f32 %v2796_v11, %v10552_v18  ;;  %v3063_v7 = vpop.f32.mrf.mxu2  ;;  %v2887_v46 = vpop.f32.mrf.mxu0  ;;  %v12820_v11 = vld [vmem:[#allocation29_spill] sm:$0xff] }
 0x3e6   : > { %v10835_v16 = vadd.f32 %v3063_v7, %v2975_v53  ;;  %v2888_v36 = vadd.f32 %v2887_v46, %v10795_v57  ;;  %v2976_v63 = vpop.f32.mrf.mxu1  ;;  %v12821_v7 = vld [vmem:[#allocation36_spill] sm:$0xff]  ;;  %v8730_v46 = vld [vmem:[#allocation8 + $0x68] sm:$0xff] }
 0x3e7   : > { %v3230_v55 = vmax.f32 %v2797_v24, 0.0  ;;  %3541 = vmatpush.bf16.msra.mxu1 %v8730_v46 }
 0x3e8   : > { %v2977_v45 = vadd.f32 %v2976_v63, %v2888_v36 }
 0x3ec   : > { %v2798_v15 = vpop.f32.mrf.mxu3 }
 0x3ed   : > { %v2799_v62 = vadd.f32 %v2798_v15, %v10558_v3  ;;  %v3065_v19 = vpop.f32.mrf.mxu2  ;;  %v2890_v30 = vpop.f32.mrf.mxu0  ;;  %v8722_v3 = vld [vmem:[#allocation8 + $0x28] sm:$0xff] }
 0x3ee   : > { %v10839_v61 = vadd.f32 %v3065_v19, %v2977_v45  ;;  %v2891_v18 = vadd.f32 %v2890_v30, %v10795_v57  ;;  %v2979_v22 = vpop.f32.mrf.mxu1  ;;  %3452 = vmatpush.bf16.msra.mxu0 %v8722_v3 }
 0x3ef   : > { %v3232_v49 = vmax.f32 %v2799_v62, 0.0 }
 0x3f0   : > { %v2980_v32 = vadd.f32 %v2979_v22, %v2891_v18  ;;  %2929 = vmatmul.bf16.gmra.mxu0 %v10235_v37 }
 0x3f1   : > { %2840 = vmatmul.bf16.gmra.mxu3 %v10735_v2  ;;  %v10844_v53 = vpack.c.bf16 %v3232_v49, %v3230_v55  ;;  %3018 = vmatmul.bf16.gmra.mxu1 %v12820_v11  ;;  %v12822_v55 = vld [vmem:[#allocation58_spill] sm:$0xff] }
 0x3f2   : > { %3107 = vmatmul.bf16.gmra.mxu2 %v12821_v7 }
 0x3f4   : > { %v2801_v36 = vpop.f32.mrf.mxu3 }
 0x3f5   : > { %v2802_v24 = vadd.f32 %v2801_v36, %v10574_v34  ;;  %v3068_v63 = vpop.f32.mrf.mxu2  ;;  %v2892_v15 = vpop.f32.mrf.mxu0 }
 0x3f6   : > { %v10849_v45 = vadd.f32 %v3068_v63, %v2980_v32  ;;  %v2893_v62 = vadd.f32 %v2892_v15, %v10795_v57  ;;  %v2981_v37 = vpop.f32.mrf.mxu1  ;;  %v12824_v32 = vld [vmem:[#allocation41_spill] sm:$0xff]  ;;  %v12825_v15 = vld [vmem:[#allocation31_spill] sm:$0xff] }
 0x3f7   : > { %v3234_v7 = vmax.f32 %v2802_v24, 0.0 }
 0x3f8   : > { %v2982_v19 = vadd.f32 %v2981_v37, %v2893_v62  ;;  %v12826_v62 = vld [vmem:[#allocation60_spill] sm:$0xff] }
 0x3f9   : > { %v8701_v37 = vld [vmem:[#allocation7 + $0x184] sm:$0xf] }
 0x3fc   : > { %v2803_v30 = vpop.f32.mrf.mxu3 }
 0x3fd   : > { %v2804_v49 = vadd.f32 %v2803_v30, %v12822_v55  ;;  %v3070_v18 = vpop.f32.mrf.mxu2  ;;  %v2895_v11 = vpop.f32.mrf.mxu0  ;;  %v12827_v55 = vld [vmem:[#allocation38_spill] sm:$0xff] }
 0x3fe   : > { %v10853_v22 = vadd.f32 %v3070_v18, %v2982_v19  ;;  %v2896_v46 = vadd.f32 %v2895_v11, %v10795_v57  ;;  %v2984_v34 = vpop.f32.mrf.mxu1  ;;  %v7785_v19 = vld [vmem:[#allocation7 + $0x188] sm:$0xf0] }
 0x3ff   : > { %v3236_v3 = vmax.f32 %v2804_v49, 0.0  ;;  %v7788_v30 = vor.u32 %v8701_v37, %v7785_v19  ;;  %v8720_v19 = vld [vmem:[#allocation8 + $0x18] sm:$0xff] }
 0x400   : > { %v10856_v36 = vadd.f32 %v2984_v34, %v2896_v46  ;;  %2934 = vmatmul.bf16.gmra.mxu0 %v12824_v32  ;;  %v12828_v34 = vld [vmem:[#allocation62_spill] sm:$0xff] }
 0x401   : > { %2845 = vmatmul.bf16.gmra.mxu3 %v10751_v42  ;;  %v10860_v63 = vpack.c.bf16 %v3236_v3, %v3234_v7  ;;  %3023 = vmatmul.bf16.gmra.mxu1 %v12825_v15  ;;  %v8721_v7 = vld [vmem:[#allocation8 + $0x20] sm:$0xff] }
 0x402   : > { %12823 = vst [vmem:[#allocation42_spill] sm:$0xff] %v10856_v36  ;;  %3112 = vmatmul.bf16.gmra.mxu2 %v12826_v62  ;;  %3140 = vmatpush.bf16.msra.mxu3 %v7788_v30 }
 0x403   : > { %3453 = vmatpush.bf16.msra.mxu0 %v8721_v7 }
 0x404   : > { %v2806_v24 = vpop.f32.mrf.mxu3 }
 0x405   : > { %v2807_v49 = vadd.f32 %v2806_v24, %v12827_v55  ;;  %v10865_v18 = vpop.f32.mrf.mxu0  ;;  %v12829_v24 = vld [vmem:[#allocation33_spill] sm:$0xff]  ;;  %v12830_v55 = vld [vmem:[#allocation64_spill] sm:$0xff] }
 0x406   : > { %v10867_v11 = vpop.f32.mrf.mxu1 }
 0x407   : > { %v3238_v36 = vmax.f32 %v2807_v49, 0.0  ;;  %3454 = vmatpush.bf16.msra.mxu0 %v8720_v19 }
 0x40c   : > { %v2808_v46 = vpop.f32.mrf.mxu3 }
 0x40d   : > { %v2809_v32 = vadd.f32 %v2808_v46, %v12828_v34  ;;  %v2900_v3 = vpop.f32.mrf.mxu0  ;;  %v8729_v46 = vld [vmem:[#allocation8 + $0x60] sm:$0xff] }
 0x40e   : > { %v2901_v62 = vadd.f32 %v2900_v3, %v10795_v57  ;;  %v2989_v42 = vpop.f32.mrf.mxu1  ;;  %3542 = vmatpush.bf16.msra.mxu1 %v8729_v46 }
 0x40f   : > { %v3240_v15 = vmax.f32 %v2809_v32, 0.0  ;;  %v8719_v32 = vld [vmem:[#allocation8 + $0x10] sm:$0xff] }
 0x410   : > { %v10871_v37 = vadd.f32 %v2989_v42, %v2901_v62  ;;  %2939 = vmatmul.bf16.gmra.mxu0 %v12766_v52  ;;  %v8718_v52 = vld [vmem:[#allocation8 + $0x8] sm:$0xff] }
 0x411   : > { %2850 = vmatmul.bf16.gmra.mxu3 %v10767_v26  ;;  %v10875_v30 = vpack.c.bf16 %v3240_v15, %v3238_v36  ;;  %3028 = vmatmul.bf16.gmra.mxu1 %v12829_v24  ;;  %v8717_v15 = vld [vmem:[#allocation8] sm:$0xff] }
 0x412   : > { %3117 = vmatmul.bf16.gmra.mxu2 %v12830_v55  ;;  %3455 = vmatpush.bf16.msra.mxu0 %v8719_v32 }
 0x414   : > { %v2811_v49 = vpop.f32.mrf.mxu3 }
 0x415   : > { %v2812_v34 = vadd.f32 %v2811_v49, %v10618_v0  ;;  %v10880_v42 = vpop.f32.mrf.mxu0 }
 0x416   : > { %v10882_v7 = vpop.f32.mrf.mxu1  ;;  %3456 = vmatpush.bf16.msra.mxu0 %v8718_v52 }
 0x417   : > { %v3242_v24 = vmax.f32 %v2812_v34, 0.0 }
 0x41a   : > { %3457 = vmatpush.bf16.msra.mxu0 %v8717_v15 }
 0x41c   : > { %v2813_v36 = vpop.f32.mrf.mxu3 }
 0x41d   : > { %v2814_v3 = vadd.f32 %v2813_v36, %v10624_v20  ;;  %v2905_v62 = vpop.f32.mrf.mxu0 }
 0x41e   : > { %v2906_v19 = vadd.f32 %v2905_v62, %v10795_v57  ;;  %v2994_v46 = vpop.f32.mrf.mxu1 }
 0x41f   : > { %v3244_v55 = vmax.f32 %v2814_v3, 0.0 }
 0x420   : > { %v10886_v0 = vadd.f32 %v2994_v46, %v2906_v19  ;;  %2944 = vmatmul.bf16.gmra.mxu0 %v12768_v25 }
 0x421   : > { %2855 = vmatmul.bf16.gmra.mxu3 %v10783_v35  ;;  %v10890_v49 = vpack.c.bf16 %v3244_v55, %v3242_v24  ;;  %3033 = vmatmul.bf16.gmra.mxu1 %v10464_v31  ;;  %v8728_v31 = vld [vmem:[#allocation8 + $0x58] sm:$0xff] }
 0x422   : > { %3122 = vmatmul.bf16.gmra.mxu2 %v10626_v38  ;;  %3543 = vmatpush.bf16.msra.mxu1 %v8728_v31 }
 0x424   : > { %v2816_v20 = vpop.f32.mrf.mxu3 }
 0x425   : > { %v2817_v34 = vadd.f32 %v2816_v20, %v10640_v40  ;;  %v10895_v32 = vpop.f32.mrf.mxu0 }
 0x426   : > { %v10897_v52 = vpop.f32.mrf.mxu1 }
 0x427   : > { %v3246_v62 = vmax.f32 %v2817_v34, 0.0 }
 0x42c   : > { %v2818_v36 = vpop.f32.mrf.mxu3 }
 0x42d   : > { %v2819_v3 = vadd.f32 %v2818_v36, %v10646_v8  ;;  %v2910_v15 = vpop.f32.mrf.mxu0 }
 0x42e   : > { %v2911_v25 = vadd.f32 %v2910_v15, %v10795_v57  ;;  %v2999_v24 = vpop.f32.mrf.mxu1 }
 0x42f   : > { %v3248_v19 = vmax.f32 %v2819_v3, 0.0 }
 0x430   : > { %v10901_v55 = vadd.f32 %v2999_v24, %v2911_v25  ;;  %2949 = vmatmul.bf16.gmra.mxu0 %v12771_v13 }
 0x431   : > { %2860 = vmatmul.bf16.gmra.mxu3 %v10802_v29  ;;  %v10905_v38 = vpack.c.bf16 %v3248_v19, %v3246_v62  ;;  %3038 = vmatmul.bf16.gmra.mxu1 %v10501_v43 }
 0x432   : > { %3127 = vmatmul.bf16.gmra.mxu2 %v10648_v51  ;;  %v8740_v51 = vld [vmem:[%s12456_s7 + $0x38] sm:$0xff] }
 0x433   : > { %3744 = vmatpush.bf16.msra.mxu2 %v8740_v51 }
 0x434   : > { %v2821_v40 = vpop.f32.mrf.mxu3 }
 0x435   : > { %v2822_v8 = vadd.f32 %v2821_v40, %v10659_v28  ;;  %v10910_v46 = vpop.f32.mrf.mxu0 }
 0x436   : > { %v10912_v20 = vpop.f32.mrf.mxu1 }
 0x437   : > { %v3250_v13 = vmax.f32 %v2822_v8, 0.0 }
 0x43c   : > { %v2823_v34 = vpop.f32.mrf.mxu3 }
 0x43d   : > { %v2824_v36 = vadd.f32 %v2823_v34, %v10664_v59  ;;  %v2915_v3 = vpop.f32.mrf.mxu0 }
 0x43e   : > { %v2916_v62 = vadd.f32 %v2915_v3, %v10795_v57  ;;  %v3004_v19 = vpop.f32.mrf.mxu1 }
 0x43f   : > { %v3252_v15 = vmax.f32 %v2824_v36, 0.0 }
 0x440   : > { %v10916_v43 = vadd.f32 %v3004_v19, %v2916_v62  ;;  %3458 = vmatmul.bf16.vlgmr.msra.gmra.mxu0 %v10814_v56 }
 0x441   : > { %3141 = vmatmul.bf16.vlgmr.msra.gmra.mxu3 %v10521_v6  ;;  %v10923_v28 = vpack.c.bf16 %v3252_v15, %v3250_v13 }
 0x444   : > { %v2826_v59 = vpop.f32.mrf.mxu3 }
 0x445   : > { %v2827_v25 = vadd.f32 %v2826_v59, %v10675_v10  ;;  %v10926_v24 = vpop.f32.mrf.mxu0  ;;  %v8727_v10 = vld [vmem:[#allocation8 + $0x50] sm:$0xff] }
 0x446   : > { %v10928_v31 = vpop.f32.mrf.mxu1  ;;  %3544 = vmatpush.bf16.msra.mxu1 %v8727_v10 }
 0x447   : > { %v3254_v34 = vmax.f32 %v2827_v25, 0.0 }
 0x44c   : > { %v2828_v40 = vpop.f32.mrf.mxu3 }
 0x44d   : > { %v2829_v8 = vadd.f32 %v2828_v40, %v10680_v47  ;;  %v2920_v6 = vpop.f32.mrf.mxu0 }
 0x44e   : > { %v2921_v36 = vadd.f32 %v2920_v6, %v10795_v57  ;;  %v3009_v3 = vpop.f32.mrf.mxu1 }
 0x44f   : > { %v3256_v56 = vmax.f32 %v2829_v8, 0.0 }
 0x450   : > { %v10932_v62 = vadd.f32 %v3009_v3, %v2921_v36  ;;  %3463 = vmatmul.bf16.gmra.mxu0 %v10830_v39 }
 0x451   : > { %3146 = vmatmul.bf16.gmra.mxu3 %v10545_v17  ;;  %v10936_v13 = vpack.c.bf16 %v3256_v56, %v3254_v34 }
 0x454   : > { %v2831_v15 = vpop.f32.mrf.mxu3 }
 0x455   : > { %v2832_v19 = vadd.f32 %v2831_v15, %v10691_v50  ;;  %v10939_v47 = vpop.f32.mrf.mxu0  ;;  %v8739_v50 = vld [vmem:[%s12456_s7 + $0x30] sm:$0xff] }
 0x456   : > { %v10941_v51 = vpop.f32.mrf.mxu1  ;;  %3745 = vmatpush.bf16.msra.mxu2 %v8739_v50 }
 0x457   : > { %v3258_v8 = vmax.f32 %v2832_v19, 0.0 }
 0x45c   : > { %v2833_v59 = vpop.f32.mrf.mxu3 }
 0x45d   : > { %v2834_v25 = vadd.f32 %v2833_v59, %v10696_v23  ;;  %v2925_v40 = vpop.f32.mrf.mxu0 }
 0x45e   : > { %v2926_v17 = vadd.f32 %v2925_v40, %v10795_v57  ;;  %v3014_v39 = vpop.f32.mrf.mxu1 }
 0x45f   : > { %v3260_v6 = vmax.f32 %v2834_v25, 0.0 }
 0x460   : > { %v10945_v36 = vadd.f32 %v3014_v39, %v2926_v17  ;;  %3468 = vmatmul.bf16.gmra.mxu0 %v10844_v53 }
 0x461   : > { %3151 = vmatmul.bf16.gmra.mxu3 %v10567_v48  ;;  %v10952_v34 = vpack.c.bf16 %v3260_v6, %v3258_v8 }
 0x464   : > { %v2836_v23 = vpop.f32.mrf.mxu3 }
 0x465   : > { %v2837_v56 = vadd.f32 %v2836_v23, %v10707_v33  ;;  %v10955_v3 = vpop.f32.mrf.mxu0  ;;  %v8726_v33 = vld [vmem:[#allocation8 + $0x48] sm:$0xff] }
 0x466   : > { %v10957_v10 = vpop.f32.mrf.mxu1  ;;  %3545 = vmatpush.bf16.msra.mxu1 %v8726_v33 }
 0x467   : > { %v3262_v59 = vmax.f32 %v2837_v56, 0.0 }
 0x46c   : > { %v2838_v15 = vpop.f32.mrf.mxu3 }
 0x46d   : > { %v2839_v19 = vadd.f32 %v2838_v15, %v10712_v41  ;;  %v2930_v48 = vpop.f32.mrf.mxu0 }
 0x46e   : > { %v2931_v25 = vadd.f32 %v2930_v48, %v10795_v57  ;;  %v3019_v40 = vpop.f32.mrf.mxu1 }
 0x46f   : > { %v3264_v53 = vmax.f32 %v2839_v19, 0.0 }
 0x470   : > { %v10961_v17 = vadd.f32 %v3019_v40, %v2931_v25  ;;  %3473 = vmatmul.bf16.gmra.mxu0 %v10860_v63  ;;  %v12834_v40 = vld [vmem:[#allocation70_spill] sm:$0xff] }
 0x471   : > { %3156 = vmatmul.bf16.gmra.mxu3 %v10589_v12  ;;  %v10965_v8 = vpack.c.bf16 %v3264_v53, %v3262_v59  ;;  %v12833_v59 = vld [vmem:[#allocation39_spill] sm:$0xff] }
 0x474   : > { %v2841_v6 = vpop.f32.mrf.mxu3 }
 0x475   : > { %v2842_v39 = vadd.f32 %v2841_v6, %v10723_v1  ;;  %v10968_v41 = vpop.f32.mrf.mxu0  ;;  %v8738_v1 = vld [vmem:[%s12456_s7 + $0x28] sm:$0xff] }
 0x476   : > { %v10970_v50 = vpop.f32.mrf.mxu1  ;;  %3746 = vmatpush.bf16.msra.mxu2 %v8738_v1 }
 0x477   : > { %12831 = vst [vmem:[#allocation43_spill] sm:$0xff] %v10970_v50  ;;  %v3266_v19 = vmax.f32 %v2842_v39, 0.0 }
 0x47c   : > { %v2843_v23 = vpop.f32.mrf.mxu3 }
 0x47d   : > { %v2844_v56 = vadd.f32 %v2843_v23, %v10728_v9  ;;  %v2935_v15 = vpop.f32.mrf.mxu0 }
 0x47e   : > { %v2936_v12 = vadd.f32 %v2935_v15, %v10795_v57  ;;  %v3024_v63 = vpop.f32.mrf.mxu1 }
 0x47f   : > { %v3268_v48 = vmax.f32 %v2844_v56, 0.0  ;;  %v12836_v56 = vld [vmem:[#allocation71_spill] sm:$0xff] }
 0x480   : > { %v10974_v25 = vadd.f32 %v3024_v63, %v2936_v12  ;;  %3478 = vmatmul.bf16.gmra.mxu0 %v10875_v30 }
 0x481   : > { %3161 = vmatmul.bf16.gmra.mxu3 %v12833_v59  ;;  %v10981_v53 = vpack.c.bf16 %v3268_v48, %v3266_v19  ;;  %v12838_v19 = vld [vmem:[#allocation75_spill] sm:$0xff]  ;;  %v8725_v48 = vld [vmem:[#allocation8 + $0x40] sm:$0xff] }
 0x482   : > { %12832 = vst [vmem:[#allocation34_spill] sm:$0xff] %v10974_v25  ;;  %3546 = vmatpush.bf16.msra.mxu1 %v8725_v48  ;;  %v12843_v48 = vld [vmem:[#allocation66_spill] sm:$0xff] }
 0x484   : > { %v2846_v9 = vpop.f32.mrf.mxu3 }
 0x485   : > { %v2847_v33 = vadd.f32 %v2846_v9, %v12834_v40  ;;  %v10984_v6 = vpop.f32.mrf.mxu0  ;;  %v12839_v40 = vld [vmem:[#allocation73_spill] sm:$0xff] }
 0x486   : > { %v10986_v39 = vpop.f32.mrf.mxu1 }
 0x487   : > { %12835 = vst [vmem:[#allocation44_spill] sm:$0xff] %v10986_v39  ;;  %v3270_v63 = vmax.f32 %v2847_v33, 0.0 }
 0x48c   : > { %v2848_v23 = vpop.f32.mrf.mxu3 }
 0x48d   : > { %v2849_v15 = vadd.f32 %v2848_v23, %v12836_v56  ;;  %v2940_v12 = vpop.f32.mrf.mxu0 }
 0x48e   : > { %v2941_v59 = vadd.f32 %v2940_v12, %v10795_v57  ;;  %v3029_v25 = vpop.f32.mrf.mxu1 }
 0x48f   : > { %v3272_v30 = vmax.f32 %v2849_v15, 0.0  ;;  %v12841_v15 = vld [vmem:[#allocation74_spill] sm:$0xff] }
 0x490   : > { %v10990_v50 = vadd.f32 %v3029_v25, %v2941_v59  ;;  %3483 = vmatmul.bf16.gmra.mxu0 %v10890_v49 }
 0x491   : > { %3166 = vmatmul.bf16.gmra.mxu3 %v12838_v19  ;;  %v10994_v1 = vpack.c.bf16 %v3272_v30, %v3270_v63  ;;  %v8737_v63 = vld [vmem:[%s12456_s7 + $0x20] sm:$0xff] }
 0x492   : > { %12837 = vst [vmem:[#allocation37_spill] sm:$0xff] %v10990_v50  ;;  %3747 = vmatpush.bf16.msra.mxu2 %v8737_v63 }
 0x494   : > { %v2851_v9 = vpop.f32.mrf.mxu3 }
 0x495   : > { %v2852_v39 = vadd.f32 %v2851_v9, %v12839_v40  ;;  %v10997_v23 = vpop.f32.mrf.mxu0 }
 0x496   : > { %v10999_v33 = vpop.f32.mrf.mxu1 }
 0x497   : > { %12840 = vst [vmem:[#allocation59_spill] sm:$0xff] %v10999_v33  ;;  %v3274_v59 = vmax.f32 %v2852_v39, 0.0 }
 0x49c   : > { %v2853_v56 = vpop.f32.mrf.mxu3 }
 0x49d   : > { %v2854_v12 = vadd.f32 %v2853_v56, %v12841_v15  ;;  %v2945_v25 = vpop.f32.mrf.mxu0 }
 0x49e   : > { %v2946_v19 = vadd.f32 %v2945_v25, %v10795_v57  ;;  %v3034_v49 = vpop.f32.mrf.mxu1 }
 0x49f   : > { %v3276_v50 = vmax.f32 %v2854_v12, 0.0 }
 0x4a0   : > { %v11006_v30 = vadd.f32 %v3034_v49, %v2946_v19  ;;  %3488 = vmatmul.bf16.gmra.mxu0 %v10905_v38 }
 0x4a1   : > { %3171 = vmatmul.bf16.gmra.mxu3 %v12843_v48  ;;  %v11010_v9 = vpack.c.bf16 %v3276_v50, %v3274_v59 }
 0x4a2   : > { %12842 = vst [vmem:[#allocation26_spill] sm:$0xff] %v11006_v30 }
 0x4a4   : > { %v2856_v40 = vpop.f32.mrf.mxu3 }
 0x4a5   : > { %v2857_v39 = vadd.f32 %v2856_v40, %v10771_v5  ;;  %v11013_v56 = vpop.f32.mrf.mxu0  ;;  %v12844_v40 = vld [vmem:[#allocation30_spill] sm:$0xff] }
 0x4a6   : > { %v11015_v15 = vpop.f32.mrf.mxu1 }
 0x4a7   : > { %v3278_v19 = vmax.f32 %v2857_v39, 0.0 }
 0x4ac   : > { %v2858_v12 = vpop.f32.mrf.mxu3 }
 0x4ad   : > { %v2859_v25 = vadd.f32 %v2858_v12, %v10776_v60  ;;  %v2950_v33 = vpop.f32.mrf.mxu0 }
 0x4ae   : > { %v2951_v48 = vadd.f32 %v2950_v33, %v10795_v57  ;;  %v3039_v30 = vpop.f32.mrf.mxu1  ;;  %v8736_v33 = vld [vmem:[%s12456_s7 + $0x18] sm:$0xff] }
 0x4af   : > { %v3280_v49 = vmax.f32 %v2859_v25, 0.0  ;;  %3748 = vmatpush.bf16.msra.mxu2 %v8736_v33 }
 0x4b0   : > { %v11019_v38 = vadd.f32 %v3039_v30, %v2951_v48  ;;  %3493 = vmatmul.bf16.gmra.mxu0 %v10923_v28  ;;  %v12845_v30 = vld [vmem:[#allocation68_spill] sm:$0xff] }
 0x4b1   : > { %3176 = vmatmul.bf16.gmra.mxu3 %v10671_v58  ;;  %v11023_v5 = vpack.c.bf16 %v3280_v49, %v3278_v19 }
 0x4b4   : > { %v2861_v50 = vpop.f32.mrf.mxu3 }
 0x4b5   : > { %v2862_v59 = vadd.f32 %v2861_v50, %v10787_v21  ;;  %v3073_v50 = vpop.f32.mrf.mxu2 }
 0x4b7   : > { %v3282_v12 = vmax.f32 %v2862_v59, 0.0 }
 0x4bc   : > { %v2863_v63 = vpop.f32.mrf.mxu3 }
 0x4bd   : > { %v2864_v60 = vadd.f32 %v2863_v63, %v12844_v40  ;;  %v12846_v63 = vld [vmem:[#allocation40_spill] sm:$0xff] }
 0x4bf   : > { %v3284_v39 = vmax.f32 %v2864_v60, 0.0  ;;  %v3075_v60 = vpop.f32.mrf.mxu2 }
 0x4c0   : > { %3498 = vmatmul.bf16.gmra.mxu0 %v10936_v13  ;;  %v8744_v13 = vld [vmem:[%s12458_s9 + $0x18] sm:$0xff] }
 0x4c1   : > { %3181 = vmatmul.bf16.gmra.mxu3 %v12845_v30  ;;  %v11032_v58 = vpack.c.bf16 %v3284_v39, %v3282_v12  ;;  %v8735_v30 = vld [vmem:[%s12456_s7 + $0x10] sm:$0xff] }
 0x4c2   : > { %3970 = vmatpush.bf16.msrb.mxu3 %v8744_v13  ;;  %3749 = vmatpush.bf16.msra.mxu2 %v8735_v30 }
 0x4c4   : > { %v3142_v28 = vpop.f32.mrf.mxu3 }
 0x4c5   : > { %v3143_v25 = vadd.f32 %v3142_v28, %v10807_v44 }
 0x4c7   : > { %v3223_v49 = vmax.f32 %v3143_v25, 0.0 }
 0x4cc   : > { %v3144_v21 = vpop.f32.mrf.mxu3 }
 0x4cd   : > { %v3145_v19 = vadd.f32 %v3144_v21, %v10811_v4 }
 0x4cf   : > { %v3225_v48 = vmax.f32 %v3145_v19, 0.0 }
 0x4d0   : > { %3503 = vmatmul.bf16.gmra.mxu0 %v10952_v34  ;;  %v11046_v34 = vpop.f32.mrf.mxu0 }
 0x4d1   : > { %v3320_v59 = vpack.c.bf16 %v3225_v48, %v3223_v49  ;;  %3186 = vmatmul.bf16.gmra.mxu3 %v12846_v63 }
 0x4d3   : > { %3547 = vmatmul.bf16.vlgmr.msra.gmra.mxu1 %v3320_v59 }
 0x4d4   : > { %v3147_v40 = vpop.f32.mrf.mxu3 }
 0x4d5   : > { %v3148_v44 = vadd.f32 %v3147_v40, %v10821_v27  ;;  %v3078_v27 = vpop.f32.mrf.mxu2 }
 0x4d7   : > { %v3227_v39 = vmax.f32 %v3148_v44, 0.0 }
 0x4d8   : > { %v11050_v21 = vpop.f32.mrf.mxu0 }
 0x4dc   : > { %v3149_v12 = vpop.f32.mrf.mxu3 }
 0x4dd   : > { %v3150_v4 = vadd.f32 %v3149_v12, %v10825_v14  ;;  %v3080_v48 = vpop.f32.mrf.mxu2 }
 0x4df   : > { %v3229_v33 = vmax.f32 %v3150_v4, 0.0 }
 0x4e0   : > { %3508 = vmatmul.bf16.gmra.mxu0 %v10965_v8  ;;  %v11056_v13 = vpop.f32.mrf.mxu0 }
 0x4e1   : > { %3191 = vmatmul.bf16.gmra.mxu3 %v10719_v54  ;;  %v3322_v28 = vpack.c.bf16 %v3229_v33, %v3227_v39 }
 0x4e3   : > { %3552 = vmatmul.bf16.gmra.mxu1 %v3322_v28  ;;  %v12848_v28 = vld [vmem:[#allocation42_spill] sm:$0xff] }
 0x4e4   : > { %v3152_v25 = vpop.f32.mrf.mxu3 }
 0x4e5   : > { %v3153_v14 = vadd.f32 %v3152_v25, %v10835_v16  ;;  %v3083_v40 = vpop.f32.mrf.mxu2  ;;  %v3074_v25 = vadd.f32 %v3073_v50, %v12848_v28  ;;  %v8733_v28 = vld [vmem:[%s12456_s7] sm:$0xff] }
 0x4e7   : > { %v3231_v59 = vmax.f32 %v3153_v14, 0.0 }
 0x4e8   : > { %v11060_v4 = vpop.f32.mrf.mxu0 }
 0x4ec   : > { %v3154_v19 = vpop.f32.mrf.mxu3 }
 0x4ed   : > { %v3155_v49 = vadd.f32 %v3154_v19, %v10839_v61  ;;  %v3085_v30 = vpop.f32.mrf.mxu2 }
 0x4ef   : > { %v3233_v63 = vmax.f32 %v3155_v49, 0.0 }
 0x4f0   : > { %3513 = vmatmul.bf16.gmra.mxu0 %v10981_v53  ;;  %v12847_v53 = vld [vmem:[#allocation28_spill] sm:$0xff]  ;;  %v11071_v19 = vpop.f32.mrf.mxu0 }
 0x4f1   : > { %3196 = vmatmul.bf16.gmra.mxu3 %v10735_v2  ;;  %v3324_v54 = vpack.c.bf16 %v3233_v63, %v3231_v59  ;;  %v8734_v2 = vld [vmem:[%s12456_s7 + $0x8] sm:$0xff] }
 0x4f2   : > { %3750 = vmatpush.bf16.msra.mxu2 %v8734_v2 }
 0x4f3   : > { %3557 = vmatmul.bf16.gmra.mxu1 %v3324_v54 }
 0x4f4   : > { %v3157_v8 = vpop.f32.mrf.mxu3 }
 0x4f5   : > { %v3158_v44 = vadd.f32 %v3157_v8, %v10849_v45  ;;  %v3088_v54 = vpop.f32.mrf.mxu2 }
 0x4f6   : > { %3751 = vmatpush.bf16.msra.mxu2 %v8733_v28 }
 0x4f7   : > { %v3235_v61 = vmax.f32 %v3158_v44, 0.0 }
 0x4f8   : > { %v11078_v50 = vpop.f32.mrf.mxu0 }
 0x4fc   : > { %v3159_v12 = vpop.f32.mrf.mxu3 }
 0x4fd   : > { %v3160_v16 = vadd.f32 %v3159_v12, %v10853_v22  ;;  %v2898_v22 = vadd.f32 %v10865_v18, %v10795_v57  ;;  %v8743_v18 = vld [vmem:[%s12458_s9 + $0x10] sm:$0xff] }
 0x4fe   : > { %3971 = vmatpush.bf16.msrb.mxu3 %v8743_v18 }
 0x4ff   : > { %v3237_v39 = vmax.f32 %v3160_v16, 0.0  ;;  %v2987_v14 = vadd.f32 %v10867_v11, %v2898_v22  ;;  %v3090_v16 = vpop.f32.mrf.mxu2 }
 0x500   : > { %3518 = vmatmul.bf16.gmra.mxu0 %v10994_v1 }
 0x501   : > { %3201 = vmatmul.bf16.gmra.mxu3 %v12847_v53  ;;  %v3326_v33 = vpack.c.bf16 %v3237_v39, %v3235_v61  ;;  %v3076_v49 = vadd.f32 %v3075_v60, %v2987_v14  ;;  %v2903_v60 = vadd.f32 %v10880_v42, %v10795_v57  ;;  %v3079_v61 = vadd.f32 %v3078_v27, %v10871_v37  ;;  %v11084_v53 = vpop.f32.mrf.mxu0 }
 0x503   : > { %3562 = vmatmul.bf16.gmra.mxu1 %v3326_v33 }
 0x504   : > { %v3162_v45 = vpop.f32.mrf.mxu3 }
 0x505   : > { %v3163_v59 = vadd.f32 %v3162_v45, %v3074_v25 }
 0x507   : > { %v3239_v1 = vmax.f32 %v3163_v59, 0.0  ;;  %v3093_v25 = vpop.f32.mrf.mxu2 }
 0x509   : > { %v11093_v27 = vpop.f32.mrf.mxu0 }
 0x50c   : > { %v3164_v63 = vpop.f32.mrf.mxu3 }
 0x50d   : > { %v3165_v8 = vadd.f32 %v3164_v63, %v3076_v49 }
 0x50f   : > { %v3241_v44 = vmax.f32 %v3165_v8, 0.0  ;;  %v3095_v59 = vpop.f32.mrf.mxu2 }
 0x510   : > { %3523 = vmatmul.bf16.gmra.mxu0 %v11010_v9 }
 0x511   : > { %3206 = vmatmul.bf16.gmra.mxu3 %v10767_v26  ;;  %v3328_v12 = vpack.c.bf16 %v3241_v44, %v3239_v1  ;;  %v2992_v26 = vadd.f32 %v10882_v7, %v2903_v60  ;;  %v2908_v7 = vadd.f32 %v10895_v32, %v10795_v57  ;;  %v11097_v44 = vpop.f32.mrf.mxu0 }
 0x513   : > { %3567 = vmatmul.bf16.gmra.mxu1 %v3328_v12  ;;  %v3081_v39 = vadd.f32 %v3080_v48, %v2992_v26  ;;  %v3084_v48 = vadd.f32 %v3083_v40, %v10886_v0  ;;  %v2997_v14 = vadd.f32 %v10897_v52, %v2908_v7  ;;  %v2913_v0 = vadd.f32 %v10910_v46, %v10795_v57  ;;  %v11114_v7 = vld [vmem:[%s12455_s6] ss:$0 sm:$0xff] }
 0x514   : > { %v3167_v11 = vpop.f32.mrf.mxu3  ;;  %v3089_v40 = vadd.f32 %v3088_v54, %v10901_v55  ;;  %v3094_v46 = vadd.f32 %v3093_v25, %v10916_v43  ;;  %v8742_v43 = vld [vmem:[%s12458_s9 + $0x8] sm:$0xff]  ;;  %v2923_v25 = vadd.f32 %v10939_v47, %v10795_v57 }
 0x515   : > { %v3168_v9 = vadd.f32 %v3167_v11, %v3079_v61  ;;  %v3086_v49 = vadd.f32 %v3085_v30, %v2997_v14  ;;  %v3002_v30 = vadd.f32 %v10912_v20, %v2913_v0  ;;  %v3460_v14 = vadd.f32 %v11114_v7, %v11050_v21  ;;  %3972 = vmatpush.bf16.msrb.mxu3 %v8742_v43 }
 0x517   : > { %v3243_v45 = vmax.f32 %v3168_v9, 0.0  ;;  %v3098_v52 = vpop.f32.mrf.mxu2  ;;  %v3091_v18 = vadd.f32 %v3090_v16, %v3002_v30 }
 0x519   : > { %v11127_v21 = vpop.f32.mrf.mxu0 }
 0x51c   : > { %v3169_v2 = vpop.f32.mrf.mxu3 }
 0x51d   : > { %v3170_v33 = vadd.f32 %v3169_v2, %v3081_v39  ;;  %v2918_v2 = vadd.f32 %v10926_v24, %v10795_v57 }
 0x51f   : > { %v3245_v22 = vmax.f32 %v3170_v33, 0.0  ;;  %v3100_v26 = vpop.f32.mrf.mxu2  ;;  %v11107_v33 = vpop.f32.mrf.mxu1  ;;  %v3007_v55 = vadd.f32 %v10928_v31, %v2918_v2 }
 0x520   : > { %3528 = vmatmul.bf16.gmra.mxu0 %v11023_v5 }
 0x521   : > { %3211 = vmatmul.bf16.gmra.mxu3 %v10783_v35  ;;  %v3330_v37 = vpack.c.bf16 %v3245_v22, %v3243_v45  ;;  %v3096_v54 = vadd.f32 %v3095_v59, %v3007_v55 }
 0x523   : > { %3572 = vmatmul.bf16.gmra.mxu1 %v3330_v37 }
 0x524   : > { %v3172_v42 = vpop.f32.mrf.mxu3 }
 0x525   : > { %v3173_v63 = vadd.f32 %v3172_v42, %v3084_v48 }
 0x527   : > { %v3247_v1 = vmax.f32 %v3173_v63, 0.0  ;;  %v3103_v20 = vpop.f32.mrf.mxu2 }
 0x52c   : > { %v3174_v8 = vpop.f32.mrf.mxu3 }
 0x52d   : > { %v3175_v35 = vadd.f32 %v3174_v8, %v3086_v49  ;;  %v3462_v49 = vadd.f32 %v11114_v7, %v11056_v13  ;;  %v3099_v8 = vadd.f32 %v3098_v52, %v10932_v62  ;;  %v8748_v62 = vld [vmem:[%s12849_s8 + $0x18] sm:$0xff]  ;;  %v2928_v52 = vadd.f32 %v10955_v3, %v10795_v57 }
 0x52e   : > { %4191 = vmatpush.bf16.msrb.mxu0 %v8748_v62 }
 0x52f   : > { %v3249_v5 = vmax.f32 %v3175_v35, 0.0  ;;  %v3105_v48 = vpop.f32.mrf.mxu2  ;;  %v3012_v35 = vadd.f32 %v10941_v51, %v2923_v25  ;;  %v3017_v55 = vadd.f32 %v10957_v10, %v2928_v52  ;;  %v2933_v10 = vadd.f32 %v10968_v41, %v10795_v57 }
 0x530   : > { %3533 = vmatmul.bf16.gmra.mxu0 %v11032_v58 }
 0x531   : > { %3216 = vmatmul.bf16.gmra.mxu3 %v10802_v29  ;;  %v3332_v32 = vpack.c.bf16 %v3249_v5, %v3247_v1  ;;  %v3101_v5 = vadd.f32 %v3100_v26, %v3012_v35  ;;  %v3465_v26 = vadd.f32 %v11114_v7, %v11060_v4 }
 0x533   : > { %3577 = vmatmul.bf16.gmra.mxu1 %v3332_v32 }
 0x534   : > { %v3177_v12 = vpop.f32.mrf.mxu3 }
 0x535   : > { %v3178_v11 = vadd.f32 %v3177_v12, %v3089_v40 }
 0x537   : > { %v3251_v39 = vmax.f32 %v3178_v11, 0.0  ;;  %v3108_v47 = vpop.f32.mrf.mxu2 }
 0x53c   : > { %v3179_v60 = vpop.f32.mrf.mxu3 }
 0x53d   : > { %v3180_v61 = vadd.f32 %v3179_v60, %v3091_v18 }
 0x53f   : > { %v3253_v29 = vmax.f32 %v3180_v61, 0.0 }
 0x541   : > { %v3334_v9 = vpack.c.bf16 %v3253_v29, %v3251_v39  ;;  %v3110_v39 = vpop.f32.mrf.mxu2  ;;  %v3467_v29 = vadd.f32 %v11114_v7, %v11071_v19 }
 0x543   : > { %3582 = vmatmul.bf16.gmra.mxu1 %v3334_v9 }
 0x544   : > { %v3182_v58 = vpop.f32.mrf.mxu3 }
 0x545   : > { %v3183_v16 = vadd.f32 %v3182_v58, %v3094_v46  ;;  %v11138_v58 = vpop.f32.mrf.mxu0  ;;  %v3104_v46 = vadd.f32 %v3103_v20, %v10945_v36  ;;  %v3470_v20 = vadd.f32 %v11114_v7, %v11078_v50 }
 0x547   : > { %v3255_v28 = vmax.f32 %v3183_v16, 0.0  ;;  %v3106_v16 = vadd.f32 %v3105_v48, %v3017_v55  ;;  %v3472_v48 = vadd.f32 %v11114_v7, %v11084_v53 }
 0x549   : > { %v3113_v43 = vpop.f32.mrf.mxu2 }
 0x54c   : > { %v3184_v45 = vpop.f32.mrf.mxu3 }
 0x54d   : > { %v3185_v22 = vadd.f32 %v3184_v45, %v3096_v54  ;;  %v11142_v25 = vpop.f32.mrf.mxu0 }
 0x54f   : > { %v3257_v37 = vmax.f32 %v3185_v22, 0.0 }
 0x550   : > { %v3548_v42 = vpop.f32.mrf.mxu1 }
 0x551   : > { %v3336_v24 = vpack.c.bf16 %v3257_v37, %v3255_v28  ;;  %v3549_v59 = vadd.f32 %v3548_v42, %v3460_v14 }
 0x553   : > { %3587 = vmatmul.bf16.gmra.mxu1 %v3336_v24  ;;  %v3628_v32 = vmax.f32 %v3549_v59, 0.0  ;;  %v3109_v59 = vadd.f32 %v3108_v47, %v10961_v17  ;;  %v2938_v47 = vadd.f32 %v10984_v6, %v10795_v57 }
 0x554   : > { %v3187_v31 = vpop.f32.mrf.mxu3 }
 0x555   : > { %v3188_v12 = vadd.f32 %v3187_v31, %v3099_v8 }
 0x557   : > { %v3259_v11 = vmax.f32 %v3188_v12, 0.0 }
 0x558   : > { %v3550_v63 = vpop.f32.mrf.mxu1 }
 0x559   : > { %v3551_v1 = vadd.f32 %v3550_v63, %v3462_v49  ;;  %v12850_v63 = vld [vmem:[#allocation43_spill] sm:$0xff] }
 0x55a   : > { %v3022_v8 = vadd.f32 %v12850_v63, %v2933_v10 }
 0x55b   : > { %v3629_v0 = vmax.f32 %v3551_v1, 0.0 }
 0x55c   : > { %v3189_v40 = vpop.f32.mrf.mxu3  ;;  %v3111_v1 = vadd.f32 %v3110_v39, %v3022_v8  ;;  %v12851_v39 = vld [vmem:[#allocation34_spill] sm:$0xff] }
 0x55d   : > { %v3677_v30 = vpack.c.bf16 %v3629_v0, %v3628_v32  ;;  %v3190_v18 = vadd.f32 %v3189_v40, %v3101_v5  ;;  %v3115_v5 = vpop.f32.mrf.mxu2  ;;  %v11152_v40 = vpop.f32.mrf.mxu0 }
 0x55f   : > { %v3261_v60 = vmax.f32 %v3190_v18, 0.0  ;;  %3752 = vmatmul.bf16.vlgmr.msra.gmra.mxu2 %v3677_v30 }
 0x560   : > { %v3553_v13 = vpop.f32.mrf.mxu1 }
 0x561   : > { %v3338_v61 = vpack.c.bf16 %v3261_v60, %v3259_v11  ;;  %v3554_v9 = vadd.f32 %v3553_v13, %v3465_v26 }
 0x563   : > { %3592 = vmatmul.bf16.gmra.mxu1 %v3338_v61  ;;  %v3630_v45 = vmax.f32 %v3554_v9, 0.0  ;;  %v3475_v61 = vadd.f32 %v11114_v7, %v11093_v27  ;;  %v12852_v9 = vld [vmem:[#allocation44_spill] sm:$0xff] }
 0x564   : > { %v3192_v51 = vpop.f32.mrf.mxu3 }
 0x565   : > { %v3193_v3 = vadd.f32 %v3192_v51, %v3104_v46  ;;  %v3118_v13 = vpop.f32.mrf.mxu2  ;;  %v11158_v62 = vpop.f32.mrf.mxu0  ;;  %v3477_v51 = vadd.f32 %v11114_v7, %v11097_v44 }
 0x567   : > { %v3263_v42 = vmax.f32 %v3193_v3, 0.0 }
 0x568   : > { %v3555_v2 = vpop.f32.mrf.mxu1 }
 0x569   : > { %v3556_v54 = vadd.f32 %v3555_v2, %v3467_v29  ;;  %v3114_v29 = vadd.f32 %v3113_v43, %v12851_v39  ;;  %v3027_v2 = vadd.f32 %v12852_v9, %v2938_v47  ;;  %v2943_v43 = vadd.f32 %v10997_v23, %v10795_v57 }
 0x56a   : > { %v3485_v47 = vadd.f32 %v11114_v7, %v11142_v25 }
 0x56b   : > { %v3631_v22 = vmax.f32 %v3556_v54, 0.0  ;;  %v3116_v55 = vadd.f32 %v3115_v5, %v3027_v2 }
 0x56c   : > { %v3194_v28 = vpop.f32.mrf.mxu3 }
 0x56d   : > { %v3195_v4 = vadd.f32 %v3194_v28, %v3106_v16  ;;  %v3678_v37 = vpack.c.bf16 %v3631_v22, %v3630_v45  ;;  %v3120_v27 = vpop.f32.mrf.mxu2 }
 0x56f   : > { %v3265_v24 = vmax.f32 %v3195_v4, 0.0  ;;  %3757 = vmatmul.bf16.gmra.mxu2 %v3678_v37  ;;  %v3491_v37 = vpop.f32.mrf.mxu0 }
 0x570   : > { %v3558_v19 = vpop.f32.mrf.mxu1 }
 0x571   : > { %v3340_v31 = vpack.c.bf16 %v3265_v24, %v3263_v42  ;;  %v3559_v14 = vadd.f32 %v3558_v19, %v3470_v20  ;;  %v8741_v24 = vld [vmem:[%s12458_s9] sm:$0xff] }
 0x572   : > { %3973 = vmatpush.bf16.msrb.mxu3 %v8741_v24 }
 0x573   : > { %3597 = vmatmul.bf16.gmra.mxu1 %v3340_v31  ;;  %v3632_v32 = vmax.f32 %v3559_v14, 0.0  ;;  %v3480_v31 = vadd.f32 %v11114_v7, %v11127_v21 }
 0x574   : > { %v3197_v36 = vpop.f32.mrf.mxu3 }
 0x575   : > { %v3198_v12 = vadd.f32 %v3197_v36, %v3109_v59  ;;  %v3482_v36 = vadd.f32 %v11114_v7, %v11138_v58  ;;  %v3123_v63 = vpop.f32.mrf.mxu2 }
 0x577   : > { %v3267_v18 = vmax.f32 %v3198_v12, 0.0 }
 0x578   : > { %v3560_v49 = vpop.f32.mrf.mxu1 }
 0x579   : > { %v3561_v35 = vadd.f32 %v3560_v49, %v3472_v48  ;;  %v12853_v48 = vld [vmem:[#allocation37_spill] sm:$0xff]  ;;  %v12854_v49 = vld [vmem:[#allocation59_spill] sm:$0xff] }
 0x57a   : > { %v3119_v14 = vadd.f32 %v3118_v13, %v12853_v48  ;;  %v3032_v59 = vadd.f32 %v12854_v49, %v2943_v43  ;;  %v3487_v13 = vadd.f32 %v11114_v7, %v11152_v40 }
 0x57b   : > { %v3633_v0 = vmax.f32 %v3561_v35, 0.0  ;;  %v11175_v35 = vpop.f32.mrf.mxu0 }
 0x57c   : > { %v3199_v41 = vpop.f32.mrf.mxu3 }
 0x57d   : > { %v3200_v30 = vadd.f32 %v3199_v41, %v3111_v1  ;;  %v3679_v50 = vpack.c.bf16 %v3633_v0, %v3632_v32  ;;  %v3121_v1 = vadd.f32 %v3120_v27, %v3032_v59 }
 0x57f   : > { %v3269_v11 = vmax.f32 %v3200_v30, 0.0  ;;  %3762 = vmatmul.bf16.gmra.mxu2 %v3679_v50 }
 0x580   : > { %v3563_v53 = vpop.f32.mrf.mxu1 }
 0x581   : > { %v3342_v60 = vpack.c.bf16 %v3269_v11, %v3267_v18  ;;  %v3564_v52 = vadd.f32 %v3563_v53, %v3475_v61  ;;  %v3125_v18 = vpop.f32.mrf.mxu2  ;;  %v8747_v11 = vld [vmem:[%s12849_s8 + $0x10] sm:$0xff] }
 0x582   : > { %4192 = vmatpush.bf16.msrb.mxu0 %v8747_v11 }
 0x583   : > { %3602 = vmatmul.bf16.gmra.mxu1 %v3342_v60  ;;  %v3634_v54 = vmax.f32 %v3564_v52, 0.0  ;;  %v3496_v53 = vpop.f32.mrf.mxu0  ;;  %v12855_v52 = vld [vmem:[#allocation26_spill] sm:$0xff] }
 0x584   : > { %v3202_v17 = vpop.f32.mrf.mxu3 }
 0x585   : > { %v3203_v16 = vadd.f32 %v3202_v17, %v3114_v29  ;;  %v2948_v17 = vadd.f32 %v11013_v56, %v10795_v57 }
 0x587   : > { %v3271_v28 = vmax.f32 %v3203_v16, 0.0  ;;  %v3037_v39 = vadd.f32 %v11015_v15, %v2948_v17  ;;  %v2953_v15 = vadd.f32 %v11046_v34, %v10795_v57 }
 0x588   : > { %v3565_v26 = vpop.f32.mrf.mxu1 }
 0x589   : > { %v3566_v46 = vadd.f32 %v3565_v26, %v3477_v51  ;;  %v3124_v26 = vadd.f32 %v3123_v63, %v12855_v52  ;;  %v3126_v9 = vadd.f32 %v3125_v18, %v3037_v39  ;;  %v3128_v56 = vpop.f32.mrf.mxu2  ;;  %v11204_v52 = vld [vmem:[%s12856_s1] ss:$0 sm:$0xff] }
 0x58a   : > { %v3129_v43 = vadd.f32 %v3128_v56, %v11019_v38  ;;  %v3495_v38 = vadd.f32 %v11114_v7, %v11175_v35 }
 0x58b   : > { %v3635_v6 = vmax.f32 %v3566_v46, 0.0  ;;  %v3499_v25 = vpop.f32.mrf.mxu0 }
 0x58c   : > { %v3204_v45 = vpop.f32.mrf.mxu3 }
 0x58d   : > { %v3205_v3 = vadd.f32 %v3204_v45, %v3116_v55  ;;  %v3680_v22 = vpack.c.bf16 %v3635_v6, %v3634_v54 }
 0x58f   : > { %v3273_v4 = vmax.f32 %v3205_v3, 0.0  ;;  %3767 = vmatmul.bf16.gmra.mxu2 %v3680_v22 }
 0x590   : > { %v3568_v44 = vpop.f32.mrf.mxu1 }
 0x591   : > { %v3344_v42 = vpack.c.bf16 %v3273_v4, %v3271_v28  ;;  %v3569_v10 = vadd.f32 %v3568_v44, %v3480_v31  ;;  %v3490_v28 = vadd.f32 %v11114_v7, %v11158_v62  ;;  %v3130_v4 = vpop.f32.mrf.mxu2  ;;  %v3492_v44 = vadd.f32 %v11114_v7, %v3491_v37 }
 0x592   : > { %v3042_v31 = vadd.f32 %v11107_v33, %v2953_v15  ;;  %v3497_v33 = vadd.f32 %v11114_v7, %v3496_v53 }
 0x593   : > { %3607 = vmatmul.bf16.gmra.mxu1 %v3344_v42  ;;  %v3636_v5 = vmax.f32 %v3569_v10, 0.0  ;;  %v3501_v24 = vpop.f32.mrf.mxu0 }
 0x594   : > { %v3207_v19 = vpop.f32.mrf.mxu3  ;;  %v3131_v10 = vadd.f32 %v3130_v4, %v3042_v31 }
 0x595   : > { %v3208_v23 = vadd.f32 %v3207_v19, %v3119_v14 }
 0x597   : > { %v3275_v41 = vmax.f32 %v3208_v23, 0.0 }
 0x598   : > { %v3570_v20 = vpop.f32.mrf.mxu1 }
 0x599   : > { %v3571_v8 = vadd.f32 %v3570_v20, %v3482_v36 }
 0x59b   : > { %v3637_v32 = vmax.f32 %v3571_v8, 0.0  ;;  %v3504_v8 = vpop.f32.mrf.mxu0 }
 0x59c   : > { %v3209_v12 = vpop.f32.mrf.mxu3 }
 0x59d   : > { %v3210_v21 = vadd.f32 %v3209_v12, %v3121_v1  ;;  %v3681_v0 = vpack.c.bf16 %v3637_v32, %v3636_v5 }
 0x59f   : > { %v3277_v30 = vmax.f32 %v3210_v21, 0.0  ;;  %3772 = vmatmul.bf16.gmra.mxu2 %v3681_v0 }
 0x5a0   : > { %v3573_v58 = vpop.f32.mrf.mxu1 }
 0x5a1   : > { %v3346_v50 = vpack.c.bf16 %v3277_v30, %v3275_v41  ;;  %v3574_v61 = vadd.f32 %v3573_v58, %v3485_v47  ;;  %v3500_v30 = vadd.f32 %v11114_v7, %v3499_v25 }
 0x5a3   : > { %3612 = vmatmul.bf16.gmra.mxu1 %v3346_v50  ;;  %v3638_v2 = vmax.f32 %v3574_v61, 0.0  ;;  %v3506_v21 = vpop.f32.mrf.mxu0  ;;  %v3502_v50 = vadd.f32 %v11114_v7, %v3501_v24  ;;  %v8063_v24 = vld [vmem:[#allocation10 + $0x70] sm:$0xf] }
 0x5a4   : > { %v3212_v60 = vpop.f32.mrf.mxu3  ;;  %v3507_v39 = vadd.f32 %v11114_v7, %v3506_v21 }
 0x5a5   : > { %v3213_v46 = vadd.f32 %v3212_v60, %v3124_v26  ;;  %v8746_v26 = vld [vmem:[%s12849_s8 + $0x8] sm:$0xff] }
 0x5a6   : > { %4193 = vmatpush.bf16.msrb.mxu0 %v8746_v26 }
 0x5a7   : > { %v3279_v45 = vmax.f32 %v3213_v46, 0.0 }
 0x5a8   : > { %v3575_v51 = vpop.f32.mrf.mxu1 }
 0x5a9   : > { %v3576_v29 = vadd.f32 %v3575_v51, %v3487_v13  ;;  %v3505_v51 = vadd.f32 %v11114_v7, %v3504_v8 }
 0x5ab   : > { %v3639_v55 = vmax.f32 %v3576_v29, 0.0  ;;  %v3509_v58 = vpop.f32.mrf.mxu0 }
 0x5ac   : > { %v3214_v54 = vpop.f32.mrf.mxu3 }
 0x5ad   : > { %v3215_v16 = vadd.f32 %v3214_v54, %v3126_v9  ;;  %v3682_v6 = vpack.c.bf16 %v3639_v55, %v3638_v2 }
 0x5af   : > { %v3281_v3 = vmax.f32 %v3215_v16, 0.0  ;;  %3777 = vmatmul.bf16.gmra.mxu2 %v3682_v6 }
 0x5b0   : > { %v3578_v40 = vpop.f32.mrf.mxu1 }
 0x5b1   : > { %v3348_v22 = vpack.c.bf16 %v3281_v3, %v3279_v45  ;;  %v3579_v42 = vadd.f32 %v3578_v40, %v3490_v28 }
 0x5b3   : > { %3617 = vmatmul.bf16.gmra.mxu1 %v3348_v22  ;;  %v3640_v20 = vmax.f32 %v3579_v42, 0.0  ;;  %v3511_v47 = vpop.f32.mrf.mxu0  ;;  %v8763_v22 = vld [vmem:[#allocation10 + $0x74] sm:$0xf]  ;;  %v3510_v42 = vadd.f32 %v11114_v7, %v3509_v58 }
 0x5b4   : > { %v3217_v27 = vpop.f32.mrf.mxu3  ;;  %v3512_v31 = vadd.f32 %v11114_v7, %v3511_v47 }
 0x5b5   : > { %v3218_v48 = vadd.f32 %v3217_v27, %v3129_v43  ;;  %v8065_v27 = vld [vmem:[#allocation10 + $0x78] sm:$0xf0] }
 0x5b6   : > { %v8068_v28 = vor.u32 %v8763_v22, %v8065_v27 }
 0x5b7   : > { %v3283_v59 = vmax.f32 %v3218_v48, 0.0 }
 0x5b8   : > { %v3580_v19 = vpop.f32.mrf.mxu1  ;;  %4515 = vmatpush.bf16.msrb.mxu2 %v8068_v28 }
 0x5b9   : > { %v3581_v36 = vadd.f32 %v3580_v19, %v3492_v44  ;;  %v8764_v19 = vld [vmem:[#allocation10 + $0x74] sm:$0xf0] }
 0x5ba   : > { %v8064_v43 = vor.u32 %v8764_v19, %v8063_v24 }
 0x5bb   : > { %v3641_v14 = vmax.f32 %v3581_v36, 0.0  ;;  %v3514_v55 = vpop.f32.mrf.mxu0 }
 0x5bc   : > { %v3219_v49 = vpop.f32.mrf.mxu3  ;;  %4426 = vmatpush.bf16.msrb.mxu1 %v8064_v43 }
 0x5bd   : > { %v3220_v57 = vadd.f32 %v3219_v49, %v3131_v10  ;;  %v3683_v34 = vpack.c.bf16 %v3641_v14, %v3640_v20 }
 0x5bf   : > { %v3285_v62 = vmax.f32 %v3220_v57, 0.0  ;;  %3782 = vmatmul.bf16.gmra.mxu2 %v3683_v34 }
 0x5c0   : > { %v3583_v63 = vpop.f32.mrf.mxu1 }
 0x5c1   : > { %v3350_v37 = vpack.c.bf16 %v3285_v62, %v3283_v59  ;;  %v3584_v1 = vadd.f32 %v3583_v63, %v3495_v38 }
 0x5c3   : > { %3622 = vmatmul.bf16.gmra.mxu1 %v3350_v37  ;;  %v3642_v32 = vmax.f32 %v3584_v1, 0.0  ;;  %v3516_v44 = vpop.f32.mrf.mxu0  ;;  %v3515_v1 = vadd.f32 %v11114_v7, %v3514_v55 }
 0x5c8   : > { %v3585_v5 = vpop.f32.mrf.mxu1 }
 0x5c9   : > { %v3586_v23 = vadd.f32 %v3585_v5, %v3497_v33  ;;  %v3517_v5 = vadd.f32 %v11114_v7, %v3516_v44 }
 0x5cb   : > { %v3643_v12 = vmax.f32 %v3586_v23, 0.0  ;;  %v3519_v37 = vpop.f32.mrf.mxu0 }
 0x5cc   : > { %v3520_v26 = vadd.f32 %v11114_v7, %v3519_v37  ;;  %v8049_v37 = vld [vmem:[#allocation10 + $0x58] sm:$0xf0] }
 0x5cd   : > { %v3684_v0 = vpack.c.bf16 %v3643_v12, %v3642_v32 }
 0x5cf   : > { %3787 = vmatmul.bf16.gmra.mxu2 %v3684_v0 }
 0x5d0   : > { %v3588_v41 = vpop.f32.mrf.mxu1 }
 0x5d1   : > { %v3589_v18 = vadd.f32 %v3588_v41, %v3500_v30 }
 0x5d3   : > { %v3644_v35 = vmax.f32 %v3589_v18, 0.0  ;;  %v3521_v32 = vpop.f32.mrf.mxu0 }
 0x5d8   : > { %v3590_v11 = vpop.f32.mrf.mxu1 }
 0x5d9   : > { %v3591_v60 = vadd.f32 %v3590_v11, %v3502_v50 }
 0x5db   : > { %v3645_v17 = vmax.f32 %v3591_v60, 0.0 }
 0x5dd   : > { %v3685_v53 = vpack.c.bf16 %v3645_v17, %v3644_v35  ;;  %v8761_v17 = vld [vmem:[#allocation10 + $0x64] sm:$0xf] }
 0x5df   : > { %3792 = vmatmul.bf16.gmra.mxu2 %v3685_v53  ;;  %v8057_v53 = vld [vmem:[#allocation10 + $0x68] sm:$0xf0] }
 0x5e0   : > { %v3593_v13 = vpop.f32.mrf.mxu1 }
 0x5e1   : > { %v3594_v29 = vadd.f32 %v3593_v13, %v3505_v51  ;;  %v8060_v13 = vor.u32 %v8761_v17, %v8057_v53 }
 0x5e2   : > { %v3753_v61 = vpop.f32.mrf.mxu2 }
 0x5e3   : > { %v3754_v2 = vadd.f32 %v11204_v52, %v3753_v61  ;;  %v3646_v56 = vmax.f32 %v3594_v29, 0.0  ;;  %v3524_v61 = vpop.f32.mrf.mxu0  ;;  %4516 = vmatpush.bf16.msrb.mxu2 %v8060_v13  ;;  %v8762_v29 = vld [vmem:[#allocation10 + $0x64] sm:$0xf0] }
 0x5e4   : > { %v3525_v44 = vadd.f32 %v11114_v7, %v3524_v61 }
 0x5e5   : > { %v3833_v25 = vmax.f32 %v3754_v2, 0.0  ;;  %v3522_v2 = vadd.f32 %v11114_v7, %v3521_v32  ;;  %v8760_v32 = vld [vmem:[#allocation10 + $0x54] sm:$0xf0] }
 0x5e8   : > { %v3595_v9 = vpop.f32.mrf.mxu1 }
 0x5e9   : > { %v3596_v46 = vadd.f32 %v3595_v9, %v3507_v39  ;;  %v8055_v39 = vld [vmem:[#allocation10 + $0x60] sm:$0xf] }
 0x5ea   : > { %v3755_v54 = vpop.f32.mrf.mxu2  ;;  %v8056_v9 = vor.u32 %v8762_v29, %v8055_v39 }
 0x5eb   : > { %v3647_v16 = vmax.f32 %v3596_v46, 0.0  ;;  %v3756_v6 = vadd.f32 %v11204_v52, %v3755_v54 }
 0x5ec   : > { %4427 = vmatpush.bf16.msrb.mxu1 %v8056_v9 }
 0x5ed   : > { %v3834_v45 = vmax.f32 %v3756_v6, 0.0  ;;  %v3686_v3 = vpack.c.bf16 %v3647_v16, %v3646_v56 }
 0x5ef   : > { %v3874_v40 = vpack.c.bf16 %v3834_v45, %v3833_v25  ;;  %3797 = vmatmul.bf16.gmra.mxu2 %v3686_v3  ;;  %v3526_v3 = vpop.f32.mrf.mxu0 }
 0x5f0   : > { %v3598_v15 = vpop.f32.mrf.mxu1  ;;  %v3527_v19 = vadd.f32 %v11114_v7, %v3526_v3 }
 0x5f1   : > { %7957 = vmatmul.msk.bf16.vlgmr.msrb.gmra.mxu3 %vm3917_vm0, %v3874_v40  ;;  %v3599_v36 = vadd.f32 %v3598_v15, %v3510_v42  ;;  %v8745_v42 = vld [vmem:[%s12849_s8] sm:$0xff] }
 0x5f2   : > { %v3758_v4 = vpop.f32.mrf.mxu2  ;;  %4194 = vmatpush.bf16.msrb.mxu0 %v8745_v42 }
 0x5f3   : > { %v3759_v20 = vadd.f32 %v11204_v52, %v3758_v4  ;;  %v3648_v49 = vmax.f32 %v3599_v36, 0.0 }
 0x5f5   : > { %v3835_v59 = vmax.f32 %v3759_v20, 0.0 }
 0x5f7   : > { %v3529_v24 = vpop.f32.mrf.mxu0 }
 0x5f8   : > { %v3600_v10 = vpop.f32.mrf.mxu1 }
 0x5f9   : > { %v3601_v48 = vadd.f32 %v3600_v10, %v3512_v31 }
 0x5fa   : > { %v3760_v14 = vpop.f32.mrf.mxu2 }
 0x5fb   : > { %v3649_v57 = vmax.f32 %v3601_v48, 0.0  ;;  %v3761_v34 = vadd.f32 %v11204_v52, %v3760_v14 }
 0x5fd   : > { %v3836_v62 = vmax.f32 %v3761_v34, 0.0  ;;  %v3687_v63 = vpack.c.bf16 %v3649_v57, %v3648_v49 }
 0x5ff   : > { %v3875_v8 = vpack.c.bf16 %v3836_v62, %v3835_v59  ;;  %3802 = vmatmul.bf16.gmra.mxu2 %v3687_v63  ;;  %v8759_v63 = vld [vmem:[#allocation10 + $0x54] sm:$0xf] }
 0x600   : > { %v3603_v38 = vpop.f32.mrf.mxu1 }
 0x601   : > { %7958 = vmatmul.msk.bf16.gmra.mxu3 %vm3917_vm0, %v3875_v8  ;;  %v3604_v23 = vadd.f32 %v3603_v38, %v3515_v1  ;;  %v3531_v8 = vpop.f32.mrf.mxu0 }
 0x602   : > { %v3763_v33 = vpop.f32.mrf.mxu2 }
 0x603   : > { %v3764_v21 = vadd.f32 %v11204_v52, %v3763_v33  ;;  %v3650_v30 = vmax.f32 %v3604_v23, 0.0  ;;  %v8052_v33 = vor.u32 %v8759_v63, %v8049_v37  ;;  %v8047_v23 = vld [vmem:[#allocation10 + $0x50] sm:$0xf] }
 0x605   : > { %v3837_v18 = vmax.f32 %v3764_v21, 0.0  ;;  %4517 = vmatpush.bf16.msrb.mxu2 %v8052_v33  ;;  %v3532_v21 = vadd.f32 %v11114_v7, %v3531_v8  ;;  %v8756_v33 = vld [vmem:[#allocation10 + $0x34] sm:$0xf0] }
 0x608   : > { %v3605_v12 = vpop.f32.mrf.mxu1 }
 0x609   : > { %v3606_v0 = vadd.f32 %v3605_v12, %v3517_v5  ;;  %v3530_v5 = vadd.f32 %v11114_v7, %v3529_v24  ;;  %v8048_v12 = vor.u32 %v8760_v32, %v8047_v23 }
 0x60a   : > { %v3765_v41 = vpop.f32.mrf.mxu2 }
 0x60b   : > { %v3651_v58 = vmax.f32 %v3606_v0, 0.0  ;;  %v3766_v50 = vadd.f32 %v11204_v52, %v3765_v41  ;;  %4428 = vmatpush.bf16.msrb.mxu1 %v8048_v12 }
 0x60d   : > { %v3838_v11 = vmax.f32 %v3766_v50, 0.0  ;;  %v3688_v60 = vpack.c.bf16 %v3651_v58, %v3650_v30  ;;  %v3534_v50 = vpop.f32.mrf.mxu0 }
 0x60e   : > { %v3535_v39 = vadd.f32 %v11114_v7, %v3534_v50 }
 0x60f   : > { %v3876_v35 = vpack.c.bf16 %v3838_v11, %v3837_v18  ;;  %3807 = vmatmul.bf16.gmra.mxu2 %v3688_v60 }
 0x610   : > { %v3608_v47 = vpop.f32.mrf.mxu1 }
 0x611   : > { %7959 = vmatmul.msk.bf16.gmra.mxu3 %vm3917_vm0, %v3876_v35  ;;  %v3609_v46 = vadd.f32 %v3608_v47, %v3520_v26 }
 0x612   : > { %v3768_v51 = vpop.f32.mrf.mxu2 }
 0x613   : > { %v3769_v54 = vadd.f32 %v11204_v52, %v3768_v51  ;;  %v3652_v6 = vmax.f32 %v3609_v46, 0.0 }
 0x615   : > { %v3839_v40 = vmax.f32 %v3769_v54, 0.0  ;;  %v3536_v26 = vpop.f32.mrf.mxu0 }
 0x616   : > { %v3537_v29 = vadd.f32 %v11114_v7, %v3536_v26 }
 0x618   : > { %v3610_v55 = vpop.f32.mrf.mxu1 }
 0x619   : > { %v3611_v56 = vadd.f32 %v3610_v55, %v3522_v2 }
 0x61a   : > { %v3770_v16 = vpop.f32.mrf.mxu2 }
 0x61b   : > { %v3653_v25 = vmax.f32 %v3611_v56, 0.0  ;;  %v3771_v45 = vadd.f32 %v11204_v52, %v3770_v16 }
 0x61d   : > { %v3840_v22 = vmax.f32 %v3771_v45, 0.0  ;;  %v3689_v27 = vpack.c.bf16 %v3653_v25, %v3652_v6 }
 0x61f   : > { %v3877_v15 = vpack.c.bf16 %v3840_v22, %v3839_v40  ;;  %3812 = vmatmul.bf16.gmra.mxu2 %v3689_v27  ;;  %v8757_v22 = vld [vmem:[#allocation10 + $0x44] sm:$0xf]  ;;  %v8041_v27 = vld [vmem:[#allocation10 + $0x48] sm:$0xf0] }
 0x620   : > { %v3613_v28 = vpop.f32.mrf.mxu1 }
 0x621   : > { %7960 = vmatmul.msk.bf16.gmra.mxu3 %vm3917_vm0, %v3877_v15  ;;  %v3614_v43 = vadd.f32 %v3613_v28, %v3525_v44  ;;  %v8044_v15 = vor.u32 %v8757_v22, %v8041_v27  ;;  %v8039_v28 = vld [vmem:[#allocation10 + $0x40] sm:$0xf] }
 0x622   : > { %v3773_v4 = vpop.f32.mrf.mxu2 }
 0x623   : > { %v3774_v36 = vadd.f32 %v11204_v52, %v3773_v4  ;;  %v3654_v48 = vmax.f32 %v3614_v43, 0.0  ;;  %4518 = vmatpush.bf16.msrb.mxu2 %v8044_v15  ;;  %v8758_v4 = vld [vmem:[#allocation10 + $0x44] sm:$0xf0] }
 0x624   : > { %v8040_v44 = vor.u32 %v8758_v4, %v8039_v28 }
 0x625   : > { %v3841_v57 = vmax.f32 %v3774_v36, 0.0 }
 0x626   : > { %4429 = vmatpush.bf16.msrb.mxu1 %v8040_v44 }
 0x628   : > { %v3615_v31 = vpop.f32.mrf.mxu1 }
 0x629   : > { %v3616_v10 = vadd.f32 %v3615_v31, %v3527_v19 }
 0x62a   : > { %v3775_v20 = vpop.f32.mrf.mxu2 }
 0x62b   : > { %v3655_v14 = vmax.f32 %v3616_v10, 0.0  ;;  %v3776_v49 = vadd.f32 %v11204_v52, %v3775_v20 }
 0x62d   : > { %v3842_v34 = vmax.f32 %v3776_v49, 0.0  ;;  %v3690_v59 = vpack.c.bf16 %v3655_v14, %v3654_v48 }
 0x62f   : > { %v3878_v62 = vpack.c.bf16 %v3842_v34, %v3841_v57  ;;  %3817 = vmatmul.bf16.gmra.mxu2 %v3690_v59  ;;  %v8755_v59 = vld [vmem:[#allocation10 + $0x34] sm:$0xf] }
 0x630   : > { %v3618_v38 = vpop.f32.mrf.mxu1 }
 0x631   : > { %7961 = vmatmul.msk.bf16.gmra.mxu3 %vm3917_vm0, %v3878_v62  ;;  %v3619_v0 = vadd.f32 %v3618_v38, %v3530_v5  ;;  %v8033_v62 = vld [vmem:[#allocation10 + $0x38] sm:$0xf0]  ;;  %v8031_v38 = vld [vmem:[#allocation10 + $0x30] sm:$0xf]  ;;  %v11255_v5 = vld [vmem:[%s12857_s28] ss:$0 sm:$0xff] }
 0x632   : > { %v3778_v1 = vpop.f32.mrf.mxu2  ;;  %v8036_v37 = vor.u32 %v8755_v59, %v8033_v62 }
 0x633   : > { %v3779_v30 = vadd.f32 %v11204_v52, %v3778_v1  ;;  %v3656_v11 = vmax.f32 %v3619_v0, 0.0  ;;  %v8032_v1 = vor.u32 %v8756_v33, %v8031_v38  ;;  %v8751_v33 = vld [vmem:[#allocation10 + $0x14] sm:$0xf] }
 0x634   : > { %4519 = vmatpush.bf16.msrb.mxu2 %v8036_v37 }
 0x635   : > { %v3843_v17 = vmax.f32 %v3779_v30, 0.0  ;;  %4430 = vmatpush.bf16.msrb.mxu1 %v8032_v1  ;;  %v8017_v1 = vld [vmem:[#allocation10 + $0x18] sm:$0xf0] }
 0x638   : > { %v3620_v41 = vpop.f32.mrf.mxu1 }
 0x639   : > { %v3621_v58 = vadd.f32 %v3620_v41, %v3532_v21 }
 0x63a   : > { %v3780_v18 = vpop.f32.mrf.mxu2 }
 0x63b   : > { %v3657_v60 = vmax.f32 %v3621_v58, 0.0  ;;  %v3781_v35 = vadd.f32 %v11204_v52, %v3780_v18 }
 0x63d   : > { %v3844_v53 = vmax.f32 %v3781_v35, 0.0  ;;  %v3691_v47 = vpack.c.bf16 %v3657_v60, %v3656_v11 }
 0x63f   : > { %v3879_v13 = vpack.c.bf16 %v3844_v53, %v3843_v17  ;;  %3822 = vmatmul.bf16.gmra.mxu2 %v3691_v47 }
 0x640   : > { %v3623_v61 = vpop.f32.mrf.mxu1 }
 0x641   : > { %7962 = vmatmul.msk.bf16.gmra.mxu3 %vm3917_vm0, %v3879_v13  ;;  %v3624_v9 = vadd.f32 %v3623_v61, %v3535_v39 }
 0x642   : > { %v3783_v51 = vpop.f32.mrf.mxu2 }
 0x643   : > { %v3784_v46 = vadd.f32 %v11204_v52, %v3783_v51  ;;  %v3658_v56 = vmax.f32 %v3624_v9, 0.0 }
 0x645   : > { %v3845_v25 = vmax.f32 %v3784_v46, 0.0 }
 0x648   : > { %v3625_v2 = vpop.f32.mrf.mxu1 }
 0x649   : > { %v3626_v55 = vadd.f32 %v3625_v2, %v3537_v29 }
 0x64a   : > { %v3785_v54 = vpop.f32.mrf.mxu2 }
 0x64b   : > { %v3659_v16 = vmax.f32 %v3626_v55, 0.0  ;;  %v3786_v6 = vadd.f32 %v11204_v52, %v3785_v54  ;;  %v8753_v54 = vld [vmem:[#allocation10 + $0x24] sm:$0xf] }
 0x64d   : > { %v3846_v45 = vmax.f32 %v3786_v6, 0.0  ;;  %v3692_v3 = vpack.c.bf16 %v3659_v16, %v3658_v56  ;;  %v8025_v56 = vld [vmem:[#allocation10 + $0x28] sm:$0xf0] }
 0x64e   : > { %v8028_v6 = vor.u32 %v8753_v54, %v8025_v56 }
 0x64f   : > { %v3880_v40 = vpack.c.bf16 %v3846_v45, %v3845_v25  ;;  %3827 = vmatmul.bf16.gmra.mxu2 %v3692_v3  ;;  %v8023_v45 = vld [vmem:[#allocation10 + $0x20] sm:$0xf]  ;;  %v8754_v3 = vld [vmem:[#allocation10 + $0x24] sm:$0xf0] }
 0x650   : > { %4520 = vmatpush.bf16.msrb.mxu2 %v8028_v6 }
 0x651   : > { %7963 = vmatmul.msk.bf16.gmra.mxu3 %vm3917_vm0, %v3880_v40  ;;  %v8024_v40 = vor.u32 %v8754_v3, %v8023_v45  ;;  %v8749_v3 = vld [vmem:[#allocation10 + $0x4] sm:$0xf] }
 0x652   : > { %v3788_v7 = vpop.f32.mrf.mxu2 }
 0x653   : > { %v3789_v42 = vadd.f32 %v11204_v52, %v3788_v7  ;;  %4431 = vmatpush.bf16.msrb.mxu1 %v8024_v40  ;;  %v8009_v40 = vld [vmem:[#allocation10 + $0x8] sm:$0xf0] }
 0x655   : > { %v3847_v43 = vmax.f32 %v3789_v42, 0.0 }
 0x65a   : > { %v3790_v24 = vpop.f32.mrf.mxu2 }
 0x65b   : > { %v3791_v19 = vadd.f32 %v11204_v52, %v3790_v24 }
 0x65d   : > { %v3848_v31 = vmax.f32 %v3791_v19, 0.0 }
 0x65f   : > { %v3881_v36 = vpack.c.bf16 %v3848_v31, %v3847_v43 }
 0x661   : > { %7964 = vmatmul.msk.bf16.gmra.mxu3 %vm3917_vm0, %v3881_v36 }
 0x662   : > { %v3793_v10 = vpop.f32.mrf.mxu2 }
 0x663   : > { %v3794_v20 = vadd.f32 %v11204_v52, %v3793_v10 }
 0x665   : > { %v3849_v49 = vmax.f32 %v3794_v20, 0.0 }
 0x66a   : > { %v3795_v48 = vpop.f32.mrf.mxu2 }
 0x66b   : > { %v3796_v14 = vadd.f32 %v11204_v52, %v3795_v48 }
 0x66d   : > { %v3850_v57 = vmax.f32 %v3796_v14, 0.0 }
 0x66f   : > { %v3882_v34 = vpack.c.bf16 %v3850_v57, %v3849_v49 }
 0x671   : > { %7965 = vmatmul.msk.bf16.gmra.mxu3 %vm3917_vm0, %v3882_v34 }
 0x672   : > { %v3798_v63 = vpop.f32.mrf.mxu2 }
 0x673   : > { %v3799_v23 = vadd.f32 %v11204_v52, %v3798_v63 }
 0x674   : > { %v3975_v8 = vpop.f32.mrf.mxu3 }
 0x675   : > { %v3976_v12 = vadd.f32 %v11255_v5, %v3975_v8  ;;  %v3851_v41 = vmax.f32 %v3799_v23, 0.0 }
 0x677   : > { %v4055_v50 = vmax.f32 %v3976_v12, 0.0 }
 0x67a   : > { %v3800_v32 = vpop.f32.mrf.mxu2 }
 0x67b   : > { %v3801_v21 = vadd.f32 %v11204_v52, %v3800_v32  ;;  %v8020_v32 = vor.u32 %v8751_v33, %v8017_v1  ;;  %v8825_v1 = vld [vmem:[#allocation11 + $0x1e4] sm:$0xf] }
 0x67c   : > { %v3977_v0 = vpop.f32.mrf.mxu3 }
 0x67d   : > { %v3852_v30 = vmax.f32 %v3801_v21, 0.0  ;;  %v3978_v58 = vadd.f32 %v11255_v5, %v3977_v0  ;;  %4521 = vmatpush.bf16.msrb.mxu2 %v8020_v32  ;;  %v8015_v21 = vld [vmem:[#allocation10 + $0x10] sm:$0xf]  ;;  %v8752_v0 = vld [vmem:[#allocation10 + $0x14] sm:$0xf0] }
 0x67f   : > { %v3883_v18 = vpack.c.bf16 %v3852_v30, %v3851_v41  ;;  %v4056_v11 = vmax.f32 %v3978_v58, 0.0  ;;  %v8016_v41 = vor.u32 %v8752_v0, %v8015_v21  ;;  %v8827_v21 = vld [vmem:[#allocation11 + $0x1ec] sm:$0xf0]  ;;  %v8793_v0 = vld [vmem:[#allocation11 + $0xe4] sm:$0xf] }
 0x681   : > { %v4096_v60 = vpack.c.bf16 %v4056_v11, %v4055_v50  ;;  %7966 = vmatmul.msk.bf16.gmra.mxu3 %vm3917_vm0, %v3883_v18  ;;  %4432 = vmatpush.bf16.msrb.mxu1 %v8016_v41 }
 0x682   : > { %v3803_v35 = vpop.f32.mrf.mxu2 }
 0x683   : > { %7989 = vmatmul.msk.bf16.vlgmr.msrb.gmra.mxu0 %vm3917_vm0, %v4096_v60  ;;  %v3804_v53 = vadd.f32 %v11204_v52, %v3803_v35 }
 0x684   : > { %v3980_v17 = vpop.f32.mrf.mxu3 }
 0x685   : > { %v3981_v13 = vadd.f32 %v11255_v5, %v3980_v17  ;;  %v3853_v26 = vmax.f32 %v3804_v53, 0.0 }
 0x687   : > { %v4057_v9 = vmax.f32 %v3981_v13, 0.0 }
 0x68a   : > { %v3805_v47 = vpop.f32.mrf.mxu2 }
 0x68b   : > { %v3806_v61 = vadd.f32 %v11204_v52, %v3805_v47 }
 0x68c   : > { %v3982_v51 = vpop.f32.mrf.mxu3 }
 0x68d   : > { %v3854_v39 = vmax.f32 %v3806_v61, 0.0  ;;  %v3983_v29 = vadd.f32 %v11255_v5, %v3982_v51 }
 0x68f   : > { %v3884_v2 = vpack.c.bf16 %v3854_v39, %v3853_v26  ;;  %v4058_v46 = vmax.f32 %v3983_v29, 0.0 }
 0x691   : > { %v4097_v55 = vpack.c.bf16 %v4058_v46, %v4057_v9  ;;  %7967 = vmatmul.msk.bf16.gmra.mxu3 %vm3917_vm0, %v3884_v2 }
 0x692   : > { %v3808_v16 = vpop.f32.mrf.mxu2 }
 0x693   : > { %7990 = vmatmul.msk.bf16.gmra.mxu0 %vm3917_vm0, %v4097_v55  ;;  %v3809_v22 = vadd.f32 %v11204_v52, %v3808_v16 }
 0x694   : > { %v3985_v25 = vpop.f32.mrf.mxu3 }
 0x695   : > { %v3986_v15 = vadd.f32 %v11255_v5, %v3985_v25  ;;  %v3855_v4 = vmax.f32 %v3809_v22, 0.0 }
 0x697   : > { %v4059_v24 = vmax.f32 %v3986_v15, 0.0  ;;  %v8007_v15 = vld [vmem:[#allocation10] sm:$0xf] }
 0x69a   : > { %v3810_v27 = vpop.f32.mrf.mxu2 }
 0x69b   : > { %v3811_v7 = vadd.f32 %v11204_v52, %v3810_v27  ;;  %v8012_v27 = vor.u32 %v8749_v3, %v8009_v40 }
 0x69c   : > { %v3987_v28 = vpop.f32.mrf.mxu3 }
 0x69d   : > { %v3856_v44 = vmax.f32 %v3811_v7, 0.0  ;;  %v3988_v42 = vadd.f32 %v11255_v5, %v3987_v28  ;;  %v8750_v7 = vld [vmem:[#allocation10 + $0x4] sm:$0xf0]  ;;  %4522 = vmatpush.bf16.msrb.mxu2 %v8012_v27  ;;  %v8297_v27 = vld [vmem:[#allocation11 + $0x1d0] sm:$0xf0] }
 0x69f   : > { %v3885_v19 = vpack.c.bf16 %v3856_v44, %v3855_v4  ;;  %v4060_v43 = vmax.f32 %v3988_v42, 0.0  ;;  %v8008_v4 = vor.u32 %v8750_v7, %v8007_v15  ;;  %v8295_v7 = vld [vmem:[#allocation11 + $0x1c0] sm:$0xf] }
 0x6a1   : > { %v4098_v31 = vpack.c.bf16 %v4060_v43, %v4059_v24  ;;  %7968 = vmatmul.msk.bf16.gmra.mxu3 %vm3917_vm0, %v3885_v19  ;;  %4433 = vmatpush.bf16.msrb.mxu1 %v8008_v4 }
 0x6a2   : > { %v3813_v36 = vpop.f32.mrf.mxu2 }
 0x6a3   : > { %7991 = vmatmul.msk.bf16.gmra.mxu0 %vm3917_vm0, %v4098_v31  ;;  %v3814_v20 = vadd.f32 %v11204_v52, %v3813_v36 }
 0x6a4   : > { %v3990_v10 = vpop.f32.mrf.mxu3 }
 0x6a5   : > { %v3991_v14 = vadd.f32 %v11255_v5, %v3990_v10  ;;  %v3857_v34 = vmax.f32 %v3814_v20, 0.0 }
 0x6a7   : > { %v4061_v63 = vmax.f32 %v3991_v14, 0.0 }
 0x6aa   : > { %v3815_v48 = vpop.f32.mrf.mxu2 }
 0x6ab   : > { %v3816_v49 = vadd.f32 %v11204_v52, %v3815_v48 }
 0x6ac   : > { %v3992_v57 = vpop.f32.mrf.mxu3 }
 0x6ad   : > { %v3858_v59 = vmax.f32 %v3816_v49, 0.0  ;;  %v3993_v62 = vadd.f32 %v11255_v5, %v3992_v57 }
 0x6af   : > { %v3886_v37 = vpack.c.bf16 %v3858_v59, %v3857_v34  ;;  %v4062_v8 = vmax.f32 %v3993_v62, 0.0 }
 0x6b1   : > { %v4099_v38 = vpack.c.bf16 %v4062_v8, %v4061_v63  ;;  %7969 = vmatmul.msk.bf16.gmra.mxu3 %vm3917_vm0, %v3886_v37  ;;  %v8795_v63 = vld [vmem:[#allocation11 + $0xec] sm:$0xf0] }
 0x6b2   : > { %v3818_v23 = vpop.f32.mrf.mxu2 }
 0x6b3   : > { %7992 = vmatmul.msk.bf16.gmra.mxu0 %vm3917_vm0, %v4099_v38  ;;  %v3819_v30 = vadd.f32 %v11204_v52, %v3818_v23  ;;  %v8313_v23 = vld [vmem:[#allocation11 + $0x1f0] sm:$0xf0] }
 0x6b4   : > { %v3995_v12 = vpop.f32.mrf.mxu3  ;;  %v8316_v32 = vor.u32 %v8825_v1, %v8313_v23 }
 0x6b5   : > { %v3996_v50 = vadd.f32 %v11255_v5, %v3995_v12  ;;  %v3859_v60 = vmax.f32 %v3819_v30, 0.0  ;;  %v8311_v12 = vld [vmem:[#allocation11 + $0x1e0] sm:$0xf] }
 0x6b6   : > { %5361 = vmatpush.bf16.msra.mxu2 %v8316_v32  ;;  %v8312_v30 = vor.u32 %v8827_v21, %v8311_v12  ;;  %v8151_v32 = vld [vmem:[#allocation11 + $0xa0] sm:$0xf]  ;;  %v8787_v12 = vld [vmem:[#allocation11 + $0xac] sm:$0xf0] }
 0x6b7   : > { %v4063_v53 = vmax.f32 %v3996_v50, 0.0 }
 0x6b8   : > { %5183 = vmatpush.bf16.msra.mxu0 %v8312_v30 }
 0x6ba   : > { %v3820_v58 = vpop.f32.mrf.mxu2 }
 0x6bb   : > { %v3821_v18 = vadd.f32 %v11204_v52, %v3820_v58  ;;  %v8185_v58 = vld [vmem:[#allocation11 + $0xf0] sm:$0xf0] }
 0x6bc   : > { %v3997_v11 = vpop.f32.mrf.mxu3  ;;  %v8188_v50 = vor.u32 %v8793_v0, %v8185_v58  ;;  %v8152_v0 = vor.u32 %v8787_v12, %v8151_v32 }
 0x6bd   : > { %v3860_v35 = vmax.f32 %v3821_v18, 0.0  ;;  %v3998_v17 = vadd.f32 %v11255_v5, %v3997_v11 }
 0x6be   : > { %5272 = vmatpush.bf16.msra.mxu1 %v8188_v50 }
 0x6bf   : > { %v3887_v47 = vpack.c.bf16 %v3860_v35, %v3859_v60  ;;  %v4064_v13 = vmax.f32 %v3998_v17, 0.0 }
 0x6c1   : > { %v4100_v61 = vpack.c.bf16 %v4064_v13, %v4063_v53  ;;  %7970 = vmatmul.msk.bf16.gmra.mxu3 %vm3917_vm0, %v3887_v47  ;;  %v11307_v13 = vld [vmem:[%s12858_s19] ss:$0 sm:$0xff]  ;;  %s12027_s19 = scalar_lea.vmem [#allocation14], %s7325_s13  ;;  %s8894_s13 = sshll.u32 %s9469_s24, 9 }
 0x6c2   : > { %v3823_v51 = vpop.f32.mrf.mxu2  ;;  %s7178_s29 = sshll.u32 %s12027_s19, 4  ;;  %s7165_s24 = scalar_lea.sflag [#allocation4], %s9582_s26  ;;  %s7179_s29 = int_to_ptr.vmem [resolvable:$true] %s7178_s29 }
 0x6c3   : > { %7993 = vmatmul.msk.bf16.gmra.mxu0 %vm3917_vm0, %v4100_v61  ;;  %v3824_v39 = vadd.f32 %v11204_v52, %v3823_v51 }
 0x6c4   : > { %v4000_v26 = vpop.f32.mrf.mxu3 }
 0x6c5   : > { %v4001_v9 = vadd.f32 %v11255_v5, %v4000_v26  ;;  %v3861_v55 = vmax.f32 %v3824_v39, 0.0 }
 0x6c7   : > { %v4065_v16 = vmax.f32 %v4001_v9, 0.0 }
 0x6ca   : > { %v3825_v29 = vpop.f32.mrf.mxu2 }
 0x6cb   : > { %v3826_v2 = vadd.f32 %v11204_v52, %v3825_v29 }
 0x6cc   : > { %v4002_v46 = vpop.f32.mrf.mxu3 }
 0x6cd   : > { %v3862_v54 = vmax.f32 %v3826_v2, 0.0  ;;  %v4003_v56 = vadd.f32 %v11255_v5, %v4002_v46  ;;  %v8167_v46 = vld [vmem:[#allocation11 + $0xc0] sm:$0xf] }
 0x6cf   : > { %v3888_v6 = vpack.c.bf16 %v3862_v54, %v3861_v55  ;;  %v4066_v25 = vmax.f32 %v4003_v56, 0.0  ;;  %v8791_v55 = vld [vmem:[#allocation11 + $0xcc] sm:$0xf0] }
 0x6d0   : > { %v8168_v56 = vor.u32 %v8791_v55, %v8167_v46 }
 0x6d1   : > { %v4101_v45 = vpack.c.bf16 %v4066_v25, %v4065_v16  ;;  %7971 = vmatmul.msk.bf16.gmra.mxu3 %vm3917_vm0, %v3888_v6 }
 0x6d2   : > { %v3828_v22 = vpop.f32.mrf.mxu2 }
 0x6d3   : > { %7994 = vmatmul.msk.bf16.gmra.mxu0 %vm3917_vm0, %v4101_v45  ;;  %v3829_v44 = vadd.f32 %v11204_v52, %v3828_v22  ;;  %v8821_v22 = vld [vmem:[#allocation11 + $0x1c4] sm:$0xf] }
 0x6d4   : > { %v4005_v28 = vpop.f32.mrf.mxu3  ;;  %v8300_v15 = vor.u32 %v8821_v22, %v8297_v27 }
 0x6d5   : > { %v4006_v24 = vadd.f32 %v11255_v5, %v4005_v28  ;;  %v3863_v31 = vmax.f32 %v3829_v44, 0.0  ;;  %v8823_v28 = vld [vmem:[#allocation11 + $0x1cc] sm:$0xf0] }
 0x6d6   : > { %5362 = vmatpush.bf16.msra.mxu2 %v8300_v15  ;;  %v8296_v44 = vor.u32 %v8823_v28, %v8295_v7 }
 0x6d7   : > { %v4067_v20 = vmax.f32 %v4006_v24, 0.0  ;;  %v8169_v24 = vld [vmem:[#allocation11 + $0xd0] sm:$0xf0] }
 0x6d8   : > { %5184 = vmatpush.bf16.msra.mxu0 %v8296_v44 }
 0x6da   : > { %v3830_v42 = vpop.f32.mrf.mxu2 }
 0x6db   : > { %v3831_v19 = vadd.f32 %v11204_v52, %v3830_v42  ;;  %v8183_v52 = vld [vmem:[#allocation11 + $0xe0] sm:$0xf]  ;;  %v8789_v42 = vld [vmem:[#allocation11 + $0xc4] sm:$0xf] }
 0x6dc   : > { %v4007_v43 = vpop.f32.mrf.mxu3  ;;  %v8184_v37 = vor.u32 %v8795_v63, %v8183_v52 }
 0x6dd   : > { %v3864_v36 = vmax.f32 %v3831_v19, 0.0  ;;  %v4008_v10 = vadd.f32 %v11255_v5, %v4007_v43  ;;  %v8172_v19 = vor.u32 %v8789_v42, %v8169_v24  ;;  %v8135_v24 = vld [vmem:[#allocation11 + $0x80] sm:$0xf] }
 0x6de   : > { %5094 = vmatpush.bf16.msra.mxu3 %v8184_v37 }
 0x6df   : > { %v3889_v48 = vpack.c.bf16 %v3864_v36, %v3863_v31  ;;  %v4068_v14 = vmax.f32 %v4008_v10, 0.0  ;;  %5273 = vmatpush.bf16.msra.mxu1 %v8172_v19  ;;  %v8783_v19 = vld [vmem:[#allocation11 + $0x8c] sm:$0xf0] }
 0x6e1   : > { %v4102_v49 = vpack.c.bf16 %v4068_v14, %v4067_v20  ;;  %7972 = vmatmul.msk.bf16.gmra.mxu3 %vm3917_vm0, %v3889_v48 }
 0x6e2   : > { %5095 = vmatpush.bf16.msra.mxu3 %v8168_v56 }
 0x6e3   : > { %7995 = vmatmul.msk.bf16.gmra.mxu0 %vm3917_vm0, %v4102_v49 }
 0x6e4   : > { %v4010_v57 = vpop.f32.mrf.mxu3 }
 0x6e5   : > { %v4011_v34 = vadd.f32 %v11255_v5, %v4010_v57 }
 0x6e6   : > { %5096 = vmatpush.bf16.msra.mxu3 %v8152_v0 }
 0x6e7   : > { %v4069_v8 = vmax.f32 %v4011_v34, 0.0 }
 0x6ec   : > { %v4012_v59 = vpop.f32.mrf.mxu3 }
 0x6ed   : > { %v4013_v62 = vadd.f32 %v11255_v5, %v4012_v59 }
 0x6ef   : > { %v4070_v38 = vmax.f32 %v4013_v62, 0.0 }
 0x6f1   : > { %v4103_v33 = vpack.c.bf16 %v4070_v38, %v4069_v8 }
 0x6f3   : > { %7996 = vmatmul.msk.bf16.gmra.mxu0 %vm3917_vm0, %v4103_v33 }
 0x6f4   : > { %v4015_v41 = vpop.f32.mrf.mxu3 }
 0x6f5   : > { %v4016_v18 = vadd.f32 %v11255_v5, %v4015_v41 }
 0x6f7   : > { %v4071_v35 = vmax.f32 %v4016_v18, 0.0 }
 0x6fc   : > { %v4017_v11 = vpop.f32.mrf.mxu3 }
 0x6fd   : > { %v4018_v60 = vadd.f32 %v11255_v5, %v4017_v11 }
 0x6ff   : > { %v4072_v17 = vmax.f32 %v4018_v60, 0.0  ;;  %v8817_v60 = vld [vmem:[#allocation11 + $0x1a4] sm:$0xf] }
 0x700   : > { %v4196_v53 = vpop.f32.mrf.mxu0 }
 0x701   : > { %v4104_v47 = vpack.c.bf16 %v4072_v17, %v4071_v35  ;;  %v4197_v51 = vadd.f32 %v11307_v13, %v4196_v53  ;;  %v8281_v35 = vld [vmem:[#allocation11 + $0x1b0] sm:$0xf0]  ;;  %v8279_v53 = vld [vmem:[#allocation11 + $0x1a0] sm:$0xf] }
 0x702   : > { %v8284_v17 = vor.u32 %v8817_v60, %v8281_v35 }
 0x703   : > { %7997 = vmatmul.msk.bf16.gmra.mxu0 %vm3917_vm0, %v4104_v47  ;;  %v4276_v29 = vmax.f32 %v4197_v51, 0.0  ;;  %v8819_v47 = vld [vmem:[#allocation11 + $0x1ac] sm:$0xf0] }
 0x704   : > { %v4020_v61 = vpop.f32.mrf.mxu3  ;;  %5363 = vmatpush.bf16.msra.mxu2 %v8284_v17  ;;  %v8280_v51 = vor.u32 %v8819_v47, %v8279_v53 }
 0x705   : > { %v4021_v9 = vadd.f32 %v11255_v5, %v4020_v61 }
 0x706   : > { %5185 = vmatpush.bf16.msra.mxu0 %v8280_v51  ;;  %v8779_v51 = vld [vmem:[#allocation11 + $0x6c] sm:$0xf0] }
 0x707   : > { %v4073_v25 = vmax.f32 %v4021_v9, 0.0 }
 0x708   : > { %v4198_v26 = vpop.f32.mrf.mxu0 }
 0x709   : > { %v4199_v39 = vadd.f32 %v11307_v13, %v4198_v26  ;;  %v8785_v26 = vld [vmem:[#allocation11 + $0xa4] sm:$0xf] }
 0x70b   : > { %v4277_v2 = vmax.f32 %v4199_v39, 0.0  ;;  %v8153_v39 = vld [vmem:[#allocation11 + $0xb0] sm:$0xf0] }
 0x70c   : > { %v4022_v54 = vpop.f32.mrf.mxu3 }
 0x70d   : > { %v4325_v16 = vpack.c.bf16 %v4277_v2, %v4276_v29  ;;  %v4023_v6 = vadd.f32 %v11255_v5, %v4022_v54  ;;  %v8156_v29 = vor.u32 %v8785_v26, %v8153_v39 }
 0x70f   : > { %v4074_v45 = vmax.f32 %v4023_v6, 0.0  ;;  %4434 = vmatmul.bf16.vlgmr.msrb.gmra.mxu1 %v4325_v16  ;;  %4523 = vmatmul.bf16.vlgmr.msrb.gmra.mxu2 %v4325_v16 }
 0x710   : > { %v4201_v3 = vpop.f32.mrf.mxu0  ;;  %5274 = vmatpush.bf16.msra.mxu1 %v8156_v29 }
 0x711   : > { %v4105_v40 = vpack.c.bf16 %v4074_v45, %v4073_v25  ;;  %v4202_v43 = vadd.f32 %v11307_v13, %v4201_v3 }
 0x713   : > { %7998 = vmatmul.msk.bf16.gmra.mxu0 %vm3917_vm0, %v4105_v40  ;;  %v4278_v10 = vmax.f32 %v4202_v43, 0.0 }
 0x714   : > { %v4025_v4 = vpop.f32.mrf.mxu3 }
 0x715   : > { %v4026_v20 = vadd.f32 %v11255_v5, %v4025_v4 }
 0x717   : > { %v4075_v34 = vmax.f32 %v4026_v20, 0.0 }
 0x718   : > { %v4203_v31 = vpop.f32.mrf.mxu0 }
 0x719   : > { %v4204_v36 = vadd.f32 %v11307_v13, %v4203_v31  ;;  %v8136_v31 = vor.u32 %v8783_v19, %v8135_v24  ;;  %v8807_v24 = vld [vmem:[#allocation11 + $0x14c] sm:$0xf0]  ;;  %v8777_v19 = vld [vmem:[#allocation11 + $0x64] sm:$0xf] }
 0x71b   : > { %v4279_v48 = vmax.f32 %v4204_v36, 0.0  ;;  %5097 = vmatpush.bf16.msra.mxu3 %v8136_v31 }
 0x71c   : > { %v4027_v14 = vpop.f32.mrf.mxu3 }
 0x71d   : > { %v4028_v49 = vadd.f32 %v11255_v5, %v4027_v14  ;;  %v4326_v57 = vpack.c.bf16 %v4279_v48, %v4278_v10 }
 0x71f   : > { %v4076_v59 = vmax.f32 %v4028_v49, 0.0  ;;  %4439 = vmatmul.bf16.gmra.mxu1 %v4326_v57  ;;  %4528 = vmatmul.bf16.gmra.mxu2 %v4326_v57  ;;  %v8813_v57 = vld [vmem:[#allocation11 + $0x184] sm:$0xf] }
 0x720   : > { %v4206_v62 = vpop.f32.mrf.mxu0 }
 0x721   : > { %v4106_v52 = vpack.c.bf16 %v4076_v59, %v4075_v34  ;;  %v4207_v37 = vadd.f32 %v11307_v13, %v4206_v62  ;;  %v8265_v34 = vld [vmem:[#allocation11 + $0x190] sm:$0xf0]  ;;  %v8263_v62 = vld [vmem:[#allocation11 + $0x180] sm:$0xf] }
 0x722   : > { %v8268_v59 = vor.u32 %v8813_v57, %v8265_v34  ;;  %v8215_v57 = vld [vmem:[#allocation11 + $0x120] sm:$0xf]  ;;  %v8803_v34 = vld [vmem:[#allocation11 + $0x12c] sm:$0xf0] }
 0x723   : > { %7999 = vmatmul.msk.bf16.gmra.mxu0 %vm3917_vm0, %v4106_v52  ;;  %v4280_v33 = vmax.f32 %v4207_v37, 0.0  ;;  %v8815_v52 = vld [vmem:[#allocation11 + $0x18c] sm:$0xf0] }
 0x724   : > { %v4030_v63 = vpop.f32.mrf.mxu3  ;;  %5364 = vmatpush.bf16.msra.mxu2 %v8268_v59  ;;  %v8264_v37 = vor.u32 %v8815_v52, %v8263_v62  ;;  %v8216_v62 = vor.u32 %v8803_v34, %v8215_v57 }
 0x725   : > { %v4031_v1 = vadd.f32 %v11255_v5, %v4030_v63 }
 0x726   : > { %5186 = vmatpush.bf16.msra.mxu0 %v8264_v37  ;;  %v8199_v37 = vld [vmem:[#allocation11 + $0x100] sm:$0xf] }
 0x727   : > { %v4077_v58 = vmax.f32 %v4031_v1, 0.0 }
 0x728   : > { %v4208_v8 = vpop.f32.mrf.mxu0 }
 0x729   : > { %v4209_v38 = vadd.f32 %v11307_v13, %v4208_v8  ;;  %v8781_v8 = vld [vmem:[#allocation11 + $0x84] sm:$0xf] }
 0x72b   : > { %v4281_v23 = vmax.f32 %v4209_v38, 0.0  ;;  %v8137_v38 = vld [vmem:[#allocation11 + $0x90] sm:$0xf0] }
 0x72c   : > { %v4032_v21 = vpop.f32.mrf.mxu3 }
 0x72d   : > { %v4033_v41 = vadd.f32 %v11255_v5, %v4032_v21  ;;  %v4327_v30 = vpack.c.bf16 %v4281_v23, %v4280_v33  ;;  %v8140_v33 = vor.u32 %v8781_v8, %v8137_v38  ;;  %v8799_v8 = vld [vmem:[#allocation11 + $0x10c] sm:$0xf0] }
 0x72f   : > { %v4078_v50 = vmax.f32 %v4033_v41, 0.0  ;;  %4444 = vmatmul.bf16.gmra.mxu1 %v4327_v30  ;;  %4533 = vmatmul.bf16.gmra.mxu2 %v4327_v30 }
 0x730   : > { %v4211_v18 = vpop.f32.mrf.mxu0  ;;  %5275 = vmatpush.bf16.msra.mxu1 %v8140_v33  ;;  %v8200_v33 = vor.u32 %v8799_v8, %v8199_v37  ;;  %v8801_v37 = vld [vmem:[#allocation11 + $0x124] sm:$0xf]  ;;  %v8217_v8 = vld [vmem:[#allocation11 + $0x130] sm:$0xf0] }
 0x731   : > { %v4107_v11 = vpack.c.bf16 %v4078_v50, %v4077_v58  ;;  %v4212_v9 = vadd.f32 %v11307_v13, %v4211_v18 }
 0x733   : > { %8000 = vmatmul.msk.bf16.gmra.mxu0 %vm3917_vm0, %v4107_v11  ;;  %v4282_v55 = vmax.f32 %v4212_v9, 0.0 }
 0x734   : > { %v4035_v61 = vpop.f32.mrf.mxu3 }
 0x735   : > { %v4036_v54 = vadd.f32 %v11255_v5, %v4035_v61  ;;  %v8119_v61 = vld [vmem:[#allocation11 + $0x60] sm:$0xf] }
 0x736   : > { %v8120_v9 = vor.u32 %v8779_v51, %v8119_v61 }
 0x737   : > { %v4079_v45 = vmax.f32 %v4036_v54, 0.0  ;;  %v8103_v54 = vld [vmem:[#allocation11 + $0x40] sm:$0xf] }
 0x738   : > { %v4213_v2 = vpop.f32.mrf.mxu0  ;;  %5098 = vmatpush.bf16.msra.mxu3 %v8120_v9 }
 0x739   : > { %v4214_v46 = vadd.f32 %v11307_v13, %v4213_v2 }
 0x73b   : > { %v4283_v56 = vmax.f32 %v4214_v46, 0.0 }
 0x73c   : > { %v4037_v16 = vpop.f32.mrf.mxu3 }
 0x73d   : > { %v4038_v6 = vadd.f32 %v11255_v5, %v4037_v16  ;;  %v4328_v25 = vpack.c.bf16 %v4283_v56, %v4282_v55  ;;  %v8775_v56 = vld [vmem:[#allocation11 + $0x4c] sm:$0xf0] }
 0x73f   : > { %v4080_v3 = vmax.f32 %v4038_v6, 0.0  ;;  %4449 = vmatmul.bf16.gmra.mxu1 %v4328_v25  ;;  %4538 = vmatmul.bf16.gmra.mxu2 %v4328_v25  ;;  %v8809_v25 = vld [vmem:[#allocation11 + $0x164] sm:$0xf] }
 0x740   : > { %v4216_v40 = vpop.f32.mrf.mxu0 }
 0x741   : > { %v4108_v22 = vpack.c.bf16 %v4080_v3, %v4079_v45  ;;  %v4217_v15 = vadd.f32 %v11307_v13, %v4216_v40  ;;  %v8249_v45 = vld [vmem:[#allocation11 + $0x170] sm:$0xf0]  ;;  %v8104_v3 = vor.u32 %v8775_v56, %v8103_v54 }
 0x743   : > { %8001 = vmatmul.msk.bf16.gmra.mxu0 %vm3917_vm0, %v4108_v22  ;;  %v4284_v4 = vmax.f32 %v4217_v15, 0.0  ;;  %v8252_v22 = vor.u32 %v8809_v25, %v8249_v45  ;;  %v8811_v15 = vld [vmem:[#allocation11 + $0x16c] sm:$0xf0]  ;;  %5099 = vmatpush.bf16.msra.mxu3 %v8104_v3 }
 0x744   : > { %v4040_v27 = vpop.f32.mrf.mxu3 }
 0x745   : > { %v4041_v44 = vadd.f32 %v11255_v5, %v4040_v27  ;;  %v8247_v27 = vld [vmem:[#allocation11 + $0x160] sm:$0xf]  ;;  %5365 = vmatpush.bf16.msra.mxu2 %v8252_v22 }
 0x747   : > { %v4081_v20 = vmax.f32 %v4041_v44, 0.0 }
 0x748   : > { %v4218_v7 = vpop.f32.mrf.mxu0 }
 0x749   : > { %v4219_v28 = vadd.f32 %v11307_v13, %v4218_v7 }
 0x74b   : > { %v4285_v42 = vmax.f32 %v4219_v28, 0.0  ;;  %v8248_v28 = vor.u32 %v8811_v15, %v8247_v27 }
 0x74c   : > { %v4042_v43 = vpop.f32.mrf.mxu3 }
 0x74d   : > { %v4043_v36 = vadd.f32 %v11255_v5, %v4042_v43  ;;  %v4329_v10 = vpack.c.bf16 %v4285_v42, %v4284_v4  ;;  %v8771_v4 = vld [vmem:[#allocation11 + $0x2c] sm:$0xf0]  ;;  %5187 = vmatpush.bf16.msra.mxu0 %v8248_v28  ;;  %v8231_v42 = vld [vmem:[#allocation11 + $0x140] sm:$0xf]  ;;  %v8121_v43 = vld [vmem:[#allocation11 + $0x70] sm:$0xf0] }
 0x74e   : > { %v8232_v31 = vor.u32 %v8807_v24, %v8231_v42 }
 0x74f   : > { %v4082_v48 = vmax.f32 %v4043_v36, 0.0  ;;  %4454 = vmatmul.bf16.gmra.mxu1 %v4329_v10  ;;  %4543 = vmatmul.bf16.gmra.mxu2 %v4329_v10  ;;  %v8124_v36 = vor.u32 %v8777_v19, %v8121_v43  ;;  %v8071_v10 = vld [vmem:[#allocation11] sm:$0xf] }
 0x750   : > { %v4221_v14 = vpop.f32.mrf.mxu0 }
 0x751   : > { %v4109_v49 = vpack.c.bf16 %v4082_v48, %v4081_v20  ;;  %v4222_v1 = vadd.f32 %v11307_v13, %v4221_v14  ;;  %v8767_v20 = vld [vmem:[#allocation11 + $0xc] sm:$0xf0]  ;;  %5276 = vmatpush.bf16.msra.mxu1 %v8124_v36  ;;  %5188 = vmatpush.bf16.msra.mxu0 %v8232_v31 }
 0x752   : > { %v8072_v14 = vor.u32 %v8767_v20, %v8071_v10 }
 0x753   : > { %8002 = vmatmul.msk.bf16.gmra.mxu0 %vm3917_vm0, %v4109_v49  ;;  %v4286_v12 = vmax.f32 %v4222_v1, 0.0 }
 0x754   : > { %v4045_v63 = vpop.f32.mrf.mxu3 }
 0x755   : > { %v4046_v21 = vadd.f32 %v11255_v5, %v4045_v63  ;;  %5189 = vmatpush.bf16.msra.mxu0 %v8216_v62 }
 0x757   : > { %v4083_v50 = vmax.f32 %v4046_v21, 0.0 }
 0x758   : > { %v4223_v23 = vpop.f32.mrf.mxu0 }
 0x759   : > { %v4224_v32 = vadd.f32 %v11307_v13, %v4223_v23  ;;  %5190 = vmatpush.bf16.msra.mxu0 %v8200_v33  ;;  %v8220_v33 = vor.u32 %v8801_v37, %v8217_v8  ;;  %v8073_v37 = vld [vmem:[#allocation11 + $0x10] sm:$0xf0] }
 0x75b   : > { %v4287_v0 = vmax.f32 %v4224_v32, 0.0 }
 0x75c   : > { %v4047_v41 = vpop.f32.mrf.mxu3 }
 0x75d   : > { %v4048_v30 = vadd.f32 %v11255_v5, %v4047_v41  ;;  %v4330_v58 = vpack.c.bf16 %v4287_v0, %v4286_v12  ;;  %v4324_v41 = vld [vmem:[%s12859_s10] sm:$0x3]  ;;  %s12962_s10 = sld [smem:[#allocation98_spill]] }
 0x75e   : > { %v11355_v61 = vperm.slane %v4324_v41, 1 }
 0x75f   : > { %v4084_v18 = vmax.f32 %v4048_v30, 0.0  ;;  %4459 = vmatmul.bf16.gmra.mxu1 %v4330_v58  ;;  %4548 = vmatmul.bf16.gmra.mxu2 %v4330_v58 }
 0x760   : > { %v4226_v11 = vpop.f32.mrf.mxu0 }
 0x761   : > { %v4110_v60 = vpack.c.bf16 %v4084_v18, %v4083_v50  ;;  %v4227_v17 = vadd.f32 %v11307_v13, %v4226_v11  ;;  %v11352_v50 = vperm.slane %v4324_v41, 0  ;;  %v8805_v18 = vld [vmem:[#allocation11 + $0x144] sm:$0xf]  ;;  %v8233_v11 = vld [vmem:[#allocation11 + $0x150] sm:$0xf0] }
 0x763   : > { %8003 = vmatmul.msk.bf16.gmra.mxu0 %vm3917_vm0, %v4110_v60  ;;  %v4288_v26 = vmax.f32 %v4227_v17, 0.0  ;;  %s7177_s22 = scalar_lea.hbm %s12962_s10, %s8894_s13  ;;  %s9271_s13 = scalar_lea.hbm %s12962_s10, 1024 }
 0x764   : > { %v4050_v35 = vpop.f32.mrf.mxu3  ;;  %s7180_s27 = sshll.u32 %s7177_s22, 4  ;;  %s7181_s27 = int_to_ptr.hbm [resolvable:$true] %s7180_s27 }
 0x765   : > { %v4051_v39 = vadd.f32 %v11255_v5, %v4050_v35  ;;  %v8236_v35 = vor.u32 %v8805_v18, %v8233_v11  ;;  %s9265_s5 = sshra.s32 %s7181_s27, 4  ;;  %s9266_s5 = int_to_ptr.hbm [resolvable:$true] %s9265_s5 }
 0x766   : > { %s9267_s28 = scalar_lea.hbm %s9266_s5, 512  ;;  %p9272_p12 = scmp.lt.s32.totalorder %s9266_s5, %s12962_s10 }
 0x767   : > { %v4085_v16 = vmax.f32 %v4051_v39, 0.0  ;;  %5366 = vmatpush.bf16.msra.mxu2 %v8236_v35  ;;  %v8105_v39 = vld [vmem:[#allocation11 + $0x50] sm:$0xf0]  ;;  %p9268_p1 = scmp.ne.s32.totalorder %s9266_s5, %s9267_s28  ;;  %p9273_p7 = scmp.lt.s32.totalorder %s9271_s13, %s9267_s28 }
 0x768   : > { %v4228_v53 = vpop.f32.mrf.mxu0 }
 0x769   : > { %v4229_v47 = vadd.f32 %v11307_v13, %v4228_v53  ;;  %p9269_p3 = pnand %p9268_p1, %p9548_p4  ;;  %p9274_p8 = por %p9273_p7, %p9272_p12 }
 0x76b   : > { %v4289_v29 = vmax.f32 %v4229_v47, 0.0  ;;  %5367 = vmatpush.bf16.msra.mxu2 %v8220_v33  ;;  %p9270_p5 = pneg %p9269_p3 }
 0x76c   : > { %v4052_v2 = vpop.f32.mrf.mxu3 }
 0x76d   : > { %v4053_v46 = vadd.f32 %v11255_v5, %v4052_v2  ;;  %v4331_v55 = vpack.c.bf16 %v4289_v29, %v4288_v26  ;;  %v8087_v5 = vld [vmem:[#allocation11 + $0x20] sm:$0xf]  ;;  %v8773_v26 = vld [vmem:[#allocation11 + $0x44] sm:$0xf]  ;;  %p9275_p9 = pnand %p9274_p8, %p9270_p5 }
 0x76e   : > { %v8088_v44 = vor.u32 %v8771_v4, %v8087_v5  ;;  %v8108_v29 = vor.u32 %v8773_v26, %v8105_v39 }
 0x76f   : > { %v4086_v6 = vmax.f32 %v4053_v46, 0.0  ;;  %4464 = vmatmul.bf16.gmra.mxu1 %v4331_v55  ;;  %4553 = vmatmul.bf16.gmra.mxu2 %v4331_v55 }
 0x770   : > { %v4231_v40 = vpop.f32.mrf.mxu0  ;;  %5100 = vmatpush.bf16.msra.mxu3 %v8088_v44  ;;  %5277 = vmatpush.bf16.msra.mxu1 %v8108_v29 }
 0x771   : > { %v4111_v7 = vpack.c.bf16 %v4086_v6, %v4085_v16  ;;  %v4232_v48 = vadd.f32 %v11307_v13, %v4231_v40 }
 0x773   : > { %8004 = vmatmul.msk.bf16.gmra.mxu0 %vm3917_vm0, %v4111_v7  ;;  %v4290_v52 = vmax.f32 %v4232_v48, 0.0 }
 0x774   : > { %5101 = vmatpush.bf16.msra.mxu3 %v8072_v14 }
 0x778   : > { %v4233_v49 = vpop.f32.mrf.mxu0 }
 0x779   : > { %v4234_v59 = vadd.f32 %v11307_v13, %v4233_v49 }
 0x77b   : > { %v4291_v63 = vmax.f32 %v4234_v59, 0.0 }
 0x77d   : > { %v4332_v38 = vpack.c.bf16 %v4291_v63, %v4290_v52 }
 0x77f   : > { %4469 = vmatmul.bf16.gmra.mxu1 %v4332_v38  ;;  %4558 = vmatmul.bf16.gmra.mxu2 %v4332_v38 }
 0x780   : > { %v4236_v1 = vpop.f32.mrf.mxu0 }
 0x781   : > { %v4237_v23 = vadd.f32 %v11307_v13, %v4236_v1 }
 0x783   : > { %v4292_v21 = vmax.f32 %v4237_v23, 0.0 }
 0x788   : > { %v4238_v32 = vpop.f32.mrf.mxu0 }
 0x789   : > { %v4239_v12 = vadd.f32 %v11307_v13, %v4238_v32 }
 0x78b   : > { %v4293_v0 = vmax.f32 %v4239_v12, 0.0 }
 0x78c   : > { %v4435_v30 = vpop.f32.mrf.mxu1 }
 0x78d   : > { %v4333_v58 = vpack.c.bf16 %v4293_v0, %v4292_v21  ;;  %v4436_v53 = vadd.f32 %v4435_v30, %v11352_v50  ;;  %v8769_v21 = vld [vmem:[#allocation11 + $0x24] sm:$0xf]  ;;  %v8089_v0 = vld [vmem:[#allocation11 + $0x30] sm:$0xf0] }
 0x78e   : > { %v8092_v41 = vor.u32 %v8769_v21, %v8089_v0 }
 0x78f   : > { %4474 = vmatmul.bf16.gmra.mxu1 %v4333_v58  ;;  %4563 = vmatmul.bf16.gmra.mxu2 %v4333_v58  ;;  %v4604_v9 = vmax.f32 %v4436_v53, 0.0 }
 0x790   : > { %v4241_v60 = vpop.f32.mrf.mxu0  ;;  %5278 = vmatpush.bf16.msra.mxu1 %v8092_v41 }
 0x791   : > { %v4242_v2 = vadd.f32 %v11307_v13, %v4241_v60 }
 0x792   : > { %v4524_v17 = vpop.f32.mrf.mxu2 }
 0x793   : > { %v4525_v54 = vadd.f32 %v4524_v17, %v11355_v61  ;;  %v4294_v25 = vmax.f32 %v4242_v2, 0.0 }
 0x794   : > { %v4437_v47 = vpop.f32.mrf.mxu1 }
 0x795   : > { %v4438_v51 = vadd.f32 %v4437_v47, %v11352_v50  ;;  %v4605_v22 = vmax.f32 %v4525_v54, 0.0 }
 0x797   : > { %v4606_v46 = vmax.f32 %v4438_v51, 0.0 }
 0x798   : > { %v4243_v55 = vpop.f32.mrf.mxu0 }
 0x799   : > { %v11360_v56 = vpack.c.bf16 %v4606_v46, %v4604_v9  ;;  %v4244_v16 = vadd.f32 %v11307_v13, %v4243_v55 }
 0x79a   : > { %v4526_v6 = vpop.f32.mrf.mxu2 }
 0x79b   : > { %v4295_v45 = vmax.f32 %v4244_v16, 0.0  ;;  %v4527_v3 = vadd.f32 %v4526_v6, %v11355_v61  ;;  %5102 = vmatmul.bf16.vlgmr.msra.gmra.mxu3 %v11360_v56 }
 0x79c   : > { %v4440_v40 = vpop.f32.mrf.mxu1 }
 0x79d   : > { %v4607_v27 = vmax.f32 %v4527_v3, 0.0  ;;  %v4334_v15 = vpack.c.bf16 %v4295_v45, %v4294_v25  ;;  %v4441_v4 = vadd.f32 %v4440_v40, %v11352_v50 }
 0x79f   : > { %v11365_v7 = vpack.c.bf16 %v4607_v27, %v4605_v22  ;;  %4479 = vmatmul.bf16.gmra.mxu1 %v4334_v15  ;;  %4568 = vmatmul.bf16.gmra.mxu2 %v4334_v15  ;;  %v4608_v24 = vmax.f32 %v4441_v4, 0.0 }
 0x7a0   : > { %v4246_v28 = vpop.f32.mrf.mxu0 }
 0x7a1   : > { %5191 = vmatmul.bf16.vlgmr.msra.gmra.mxu0 %v11365_v7  ;;  %v4247_v19 = vadd.f32 %v11307_v13, %v4246_v28 }
 0x7a2   : > { %v4529_v5 = vpop.f32.mrf.mxu2 }
 0x7a3   : > { %v4530_v36 = vadd.f32 %v4529_v5, %v11355_v61  ;;  %v4296_v14 = vmax.f32 %v4247_v19, 0.0 }
 0x7a4   : > { %v4442_v44 = vpop.f32.mrf.mxu1 }
 0x7a5   : > { %v4443_v42 = vadd.f32 %v4442_v44, %v11352_v50  ;;  %v4609_v59 = vmax.f32 %v4530_v36, 0.0 }
 0x7a7   : > { %v4610_v43 = vmax.f32 %v4443_v42, 0.0 }
 0x7a8   : > { %v4248_v31 = vpop.f32.mrf.mxu0 }
 0x7a9   : > { %v11372_v10 = vpack.c.bf16 %v4610_v43, %v4608_v24  ;;  %v4249_v20 = vadd.f32 %v11307_v13, %v4248_v31 }
 0x7aa   : > { %v4531_v48 = vpop.f32.mrf.mxu2 }
 0x7ab   : > { %v4297_v49 = vmax.f32 %v4249_v20, 0.0  ;;  %v4532_v57 = vadd.f32 %v4531_v48, %v11355_v61  ;;  %5107 = vmatmul.bf16.gmra.mxu3 %v11372_v10  ;;  %v8797_v20 = vld [vmem:[#allocation11 + $0x104] sm:$0xf]  ;;  %v8201_v48 = vld [vmem:[#allocation11 + $0x110] sm:$0xf0] }
 0x7ac   : > { %v4445_v34 = vpop.f32.mrf.mxu1 }
 0x7ad   : > { %v4611_v62 = vmax.f32 %v4532_v57, 0.0  ;;  %v4335_v52 = vpack.c.bf16 %v4297_v49, %v4296_v14  ;;  %v4446_v23 = vadd.f32 %v4445_v34, %v11352_v50  ;;  %v8204_v49 = vor.u32 %v8797_v20, %v8201_v48 }
 0x7af   : > { %v11377_v63 = vpack.c.bf16 %v4611_v62, %v4609_v59  ;;  %4484 = vmatmul.bf16.gmra.mxu1 %v4335_v52  ;;  %4573 = vmatmul.bf16.gmra.mxu2 %v4335_v52  ;;  %v4612_v30 = vmax.f32 %v4446_v23, 0.0  ;;  %v8765_v52 = vld [vmem:[#allocation11 + $0x4] sm:$0xf] }
 0x7b0   : > { %v4251_v38 = vpop.f32.mrf.mxu0  ;;  %5368 = vmatpush.bf16.msra.mxu2 %v8204_v49  ;;  %v8076_v8 = vor.u32 %v8765_v52, %v8073_v37  ;;  %v8828_v49 = vld [vmem:[#allocation11 + $0x1f4] sm:$0xf0]  ;;  %v8794_v37 = vld [vmem:[#allocation11 + $0xec] sm:$0xf] }
 0x7b1   : > { %5196 = vmatmul.bf16.gmra.mxu0 %v11377_v63  ;;  %v4252_v58 = vadd.f32 %v11307_v13, %v4251_v38 }
 0x7b2   : > { %v4534_v1 = vpop.f32.mrf.mxu2  ;;  %5279 = vmatpush.bf16.msra.mxu1 %v8076_v8  ;;  %v8193_v8 = vld [vmem:[#allocation11 + $0xf8] sm:$0xf0] }
 0x7b3   : > { %v4535_v60 = vadd.f32 %v4534_v1, %v11355_v61  ;;  %v4298_v47 = vmax.f32 %v4252_v58, 0.0 }
 0x7b4   : > { %v4447_v32 = vpop.f32.mrf.mxu1 }
 0x7b5   : > { %v4448_v12 = vadd.f32 %v4447_v32, %v11352_v50  ;;  %v4613_v29 = vmax.f32 %v4535_v60, 0.0 }
 0x7b7   : > { %v4614_v18 = vmax.f32 %v4448_v12, 0.0 }
 0x7b8   : > { %v4253_v11 = vpop.f32.mrf.mxu0 }
 0x7b9   : > { %v11384_v35 = vpack.c.bf16 %v4614_v18, %v4612_v30  ;;  %v4254_v17 = vadd.f32 %v11307_v13, %v4253_v11 }
 0x7ba   : > { %v4536_v53 = vpop.f32.mrf.mxu2 }
 0x7bb   : > { %v4299_v51 = vmax.f32 %v4254_v17, 0.0  ;;  %v4537_v26 = vadd.f32 %v4536_v53, %v11355_v61  ;;  %5112 = vmatmul.bf16.gmra.mxu3 %v11384_v35 }
 0x7bc   : > { %v4450_v39 = vpop.f32.mrf.mxu1 }
 0x7bd   : > { %v4615_v9 = vmax.f32 %v4537_v26, 0.0  ;;  %v4336_v2 = vpack.c.bf16 %v4299_v51, %v4298_v47  ;;  %v4451_v16 = vadd.f32 %v4450_v39, %v11352_v50 }
 0x7bf   : > { %v11389_v46 = vpack.c.bf16 %v4615_v9, %v4613_v29  ;;  %4489 = vmatmul.bf16.gmra.mxu1 %v4336_v2  ;;  %4578 = vmatmul.bf16.gmra.mxu2 %v4336_v2  ;;  %v4616_v45 = vmax.f32 %v4451_v16, 0.0 }
 0x7c0   : > { %v4256_v55 = vpop.f32.mrf.mxu0 }
 0x7c1   : > { %5201 = vmatmul.bf16.gmra.mxu0 %v11389_v46  ;;  %v4257_v3 = vadd.f32 %v11307_v13, %v4256_v55 }
 0x7c2   : > { %v4539_v54 = vpop.f32.mrf.mxu2 }
 0x7c3   : > { %v4540_v27 = vadd.f32 %v4539_v54, %v11355_v61  ;;  %v4300_v4 = vmax.f32 %v4257_v3, 0.0  ;;  %v8796_v3 = vld [vmem:[#allocation11 + $0xf4] sm:$0xf0] }
 0x7c4   : > { %v4452_v6 = vpop.f32.mrf.mxu1 }
 0x7c5   : > { %v4453_v25 = vadd.f32 %v4452_v6, %v11352_v50  ;;  %v4617_v19 = vmax.f32 %v4540_v27, 0.0 }
 0x7c7   : > { %v4618_v40 = vmax.f32 %v4453_v25, 0.0 }
 0x7c8   : > { %v4258_v22 = vpop.f32.mrf.mxu0 }
 0x7c9   : > { %v11396_v15 = vpack.c.bf16 %v4618_v40, %v4616_v45  ;;  %v4259_v28 = vadd.f32 %v11307_v13, %v4258_v22  ;;  %v8191_v45 = vld [vmem:[#allocation11 + $0xe8] sm:$0xf] }
 0x7ca   : > { %v4541_v5 = vpop.f32.mrf.mxu2  ;;  %v8192_v22 = vor.u32 %v8796_v3, %v8191_v45 }
 0x7cb   : > { %v4301_v44 = vmax.f32 %v4259_v28, 0.0  ;;  %v4542_v42 = vadd.f32 %v4541_v5, %v11355_v61  ;;  %5117 = vmatmul.bf16.gmra.mxu3 %v11396_v15 }
 0x7cc   : > { %v4455_v24 = vpop.f32.mrf.mxu1  ;;  %5450 = vmatpush.bf16.msrb.mxu3 %v8192_v22 }
 0x7cd   : > { %v4619_v43 = vmax.f32 %v4542_v42, 0.0  ;;  %v4337_v31 = vpack.c.bf16 %v4301_v44, %v4300_v4  ;;  %v4456_v34 = vadd.f32 %v4455_v24, %v11352_v50 }
 0x7cf   : > { %v11401_v36 = vpack.c.bf16 %v4619_v43, %v4617_v19  ;;  %4494 = vmatmul.bf16.gmra.mxu1 %v4337_v31  ;;  %4583 = vmatmul.bf16.gmra.mxu2 %v4337_v31  ;;  %v4620_v38 = vmax.f32 %v4456_v34, 0.0  ;;  %v8826_v43 = vld [vmem:[#allocation11 + $0x1ec] sm:$0xf]  ;;  %v8321_v31 = vld [vmem:[#allocation11 + $0x1f8] sm:$0xf0] }
 0x7d0   : > { %v4261_v14 = vpop.f32.mrf.mxu0  ;;  %v8324_v48 = vor.u32 %v8826_v43, %v8321_v31  ;;  %v8305_v43 = vld [vmem:[#allocation11 + $0x1d8] sm:$0xf0]  ;;  %v8303_v31 = vld [vmem:[#allocation11 + $0x1c8] sm:$0xf] }
 0x7d1   : > { %5206 = vmatmul.bf16.gmra.mxu0 %v11401_v36  ;;  %v4262_v33 = vadd.f32 %v11307_v13, %v4261_v14  ;;  %v8319_v14 = vld [vmem:[#allocation11 + $0x1e8] sm:$0xf] }
 0x7d2   : > { %v4544_v57 = vpop.f32.mrf.mxu2  ;;  %5717 = vmatpush.bf16.msrb.mxu2 %v8324_v48  ;;  %v8320_v34 = vor.u32 %v8828_v49, %v8319_v14  ;;  %v8824_v14 = vld [vmem:[#allocation11 + $0x1d4] sm:$0xf0] }
 0x7d3   : > { %v4545_v32 = vadd.f32 %v4544_v57, %v11355_v61  ;;  %v4302_v41 = vmax.f32 %v4262_v33, 0.0 }
 0x7d4   : > { %v4457_v59 = vpop.f32.mrf.mxu1  ;;  %5539 = vmatpush.bf16.msrb.mxu0 %v8320_v34  ;;  %v8790_v34 = vld [vmem:[#allocation11 + $0xcc] sm:$0xf] }
 0x7d5   : > { %v4458_v62 = vadd.f32 %v4457_v59, %v11352_v50  ;;  %v4621_v11 = vmax.f32 %v4545_v32, 0.0 }
 0x7d7   : > { %v4622_v1 = vmax.f32 %v4458_v62, 0.0 }
 0x7d8   : > { %v4263_v23 = vpop.f32.mrf.mxu0 }
 0x7d9   : > { %v11408_v12 = vpack.c.bf16 %v4622_v1, %v4620_v38  ;;  %v4264_v21 = vadd.f32 %v11307_v13, %v4263_v23  ;;  %v8196_v38 = vor.u32 %v8794_v37, %v8193_v8  ;;  %v11457_v8 = vld [vmem:[%s12860_s2] sm:$0xf] }
 0x7da   : > { %v4546_v0 = vpop.f32.mrf.mxu2 }
 0x7db   : > { %v4303_v30 = vmax.f32 %v4264_v21, 0.0  ;;  %v4547_v58 = vadd.f32 %v4546_v0, %v11355_v61  ;;  %5122 = vmatmul.bf16.gmra.mxu3 %v11408_v12  ;;  %5628 = vmatpush.bf16.msrb.mxu1 %v8196_v38 }
 0x7dc   : > { %v4460_v18 = vpop.f32.mrf.mxu1 }
 0x7dd   : > { %v4623_v60 = vmax.f32 %v4547_v58, 0.0  ;;  %v4338_v17 = vpack.c.bf16 %v4303_v30, %v4302_v41  ;;  %v4461_v26 = vadd.f32 %v4460_v18, %v11352_v50 }
 0x7df   : > { %v11413_v53 = vpack.c.bf16 %v4623_v60, %v4621_v11  ;;  %4499 = vmatmul.bf16.gmra.mxu1 %v4338_v17  ;;  %4588 = vmatmul.bf16.gmra.mxu2 %v4338_v17  ;;  %v4624_v9 = vmax.f32 %v4461_v26, 0.0 }
 0x7e0   : > { %v4266_v47 = vpop.f32.mrf.mxu0 }
 0x7e1   : > { %5211 = vmatmul.bf16.gmra.mxu0 %v11413_v53  ;;  %v4267_v2 = vadd.f32 %v11307_v13, %v4266_v47 }
 0x7e2   : > { %v4549_v51 = vpop.f32.mrf.mxu2 }
 0x7e3   : > { %v4550_v16 = vadd.f32 %v4549_v51, %v11355_v61  ;;  %v4304_v27 = vmax.f32 %v4267_v2, 0.0 }
 0x7e4   : > { %v4462_v39 = vpop.f32.mrf.mxu1 }
 0x7e5   : > { %v4463_v29 = vadd.f32 %v4462_v39, %v11352_v50  ;;  %v4625_v44 = vmax.f32 %v4550_v16, 0.0 }
 0x7e7   : > { %v4626_v55 = vmax.f32 %v4463_v29, 0.0 }
 0x7e8   : > { %v4268_v54 = vpop.f32.mrf.mxu0 }
 0x7e9   : > { %v11420_v6 = vpack.c.bf16 %v4626_v55, %v4624_v9  ;;  %v4269_v25 = vadd.f32 %v11307_v13, %v4268_v54 }
 0x7ea   : > { %v4551_v40 = vpop.f32.mrf.mxu2 }
 0x7eb   : > { %v4305_v28 = vmax.f32 %v4269_v25, 0.0  ;;  %v4552_v5 = vadd.f32 %v4551_v40, %v11355_v61  ;;  %5127 = vmatmul.bf16.gmra.mxu3 %v11420_v6 }
 0x7ec   : > { %v4465_v4 = vpop.f32.mrf.mxu1 }
 0x7ed   : > { %v4627_v42 = vmax.f32 %v4552_v5, 0.0  ;;  %v4339_v24 = vpack.c.bf16 %v4305_v28, %v4304_v27  ;;  %v4466_v59 = vadd.f32 %v4465_v4, %v11352_v50  ;;  %v8175_v27 = vld [vmem:[#allocation11 + $0xc8] sm:$0xf]  ;;  %v8792_v28 = vld [vmem:[#allocation11 + $0xd4] sm:$0xf0] }
 0x7ee   : > { %v8176_v5 = vor.u32 %v8792_v28, %v8175_v27 }
 0x7ef   : > { %v11425_v19 = vpack.c.bf16 %v4627_v42, %v4625_v44  ;;  %4504 = vmatmul.bf16.gmra.mxu1 %v4339_v24  ;;  %4593 = vmatmul.bf16.gmra.mxu2 %v4339_v24  ;;  %v4628_v33 = vmax.f32 %v4466_v59, 0.0  ;;  %v8822_v24 = vld [vmem:[#allocation11 + $0x1cc] sm:$0xf]  ;;  %v8177_v59 = vld [vmem:[#allocation11 + $0xd8] sm:$0xf0] }
 0x7f0   : > { %v4271_v20 = vpop.f32.mrf.mxu0  ;;  %5451 = vmatpush.bf16.msrb.mxu3 %v8176_v5  ;;  %v8308_v48 = vor.u32 %v8822_v24, %v8305_v43  ;;  %v8159_v5 = vld [vmem:[#allocation11 + $0xa8] sm:$0xf] }
 0x7f1   : > { %5216 = vmatmul.bf16.gmra.mxu0 %v11425_v19  ;;  %v4272_v1 = vadd.f32 %v11307_v13, %v4271_v20 }
 0x7f2   : > { %v4554_v57 = vpop.f32.mrf.mxu2  ;;  %5718 = vmatpush.bf16.msrb.mxu2 %v8308_v48 }
 0x7f3   : > { %v4555_v21 = vadd.f32 %v4554_v57, %v11355_v61  ;;  %v4306_v58 = vmax.f32 %v4272_v1, 0.0  ;;  %v8304_v57 = vor.u32 %v8824_v14, %v8303_v31 }
 0x7f4   : > { %v4467_v62 = vpop.f32.mrf.mxu1 }
 0x7f5   : > { %v4468_v52 = vadd.f32 %v4467_v62, %v11352_v50  ;;  %v4629_v17 = vmax.f32 %v4555_v21, 0.0  ;;  %v8180_v62 = vor.u32 %v8790_v34, %v8177_v59  ;;  %5540 = vmatpush.bf16.msrb.mxu0 %v8304_v57 }
 0x7f7   : > { %v4630_v23 = vmax.f32 %v4468_v52, 0.0  ;;  %5629 = vmatpush.bf16.msrb.mxu1 %v8180_v62 }
 0x7f8   : > { %v4273_v32 = vpop.f32.mrf.mxu0 }
 0x7f9   : > { %v11432_v0 = vpack.c.bf16 %v4630_v23, %v4628_v33  ;;  %v4274_v41 = vadd.f32 %v11307_v13, %v4273_v32  ;;  %v11465_v32 = vperm.slane %v11457_v8, 0 }
 0x7fa   : > { %v4556_v30 = vpop.f32.mrf.mxu2 }
 0x7fb   : > { %v4307_v18 = vmax.f32 %v4274_v41, 0.0  ;;  %v4557_v11 = vadd.f32 %v4556_v30, %v11355_v61  ;;  %5132 = vmatmul.bf16.gmra.mxu3 %v11432_v0 }
 0x7fc   : > { %v4470_v60 = vpop.f32.mrf.mxu1 }
 0x7fd   : > { %v4631_v47 = vmax.f32 %v4557_v11, 0.0  ;;  %v4340_v51 = vpack.c.bf16 %v4307_v18, %v4306_v58  ;;  %v4471_v13 = vadd.f32 %v4470_v60, %v11352_v50 }
 0x7ff   : > { %v11437_v26 = vpack.c.bf16 %v4631_v47, %v4629_v17  ;;  %4509 = vmatmul.bf16.gmra.mxu1 %v4340_v51  ;;  %4598 = vmatmul.bf16.gmra.mxu2 %v4340_v51  ;;  %v4632_v2 = vmax.f32 %v4471_v13, 0.0 }
 0x801   : > { %5221 = vmatmul.bf16.gmra.mxu0 %v11437_v26 }
 0x802   : > { %v4559_v39 = vpop.f32.mrf.mxu2 }
 0x803   : > { %v4560_v54 = vadd.f32 %v4559_v39, %v11355_v61 }
 0x804   : > { %v4472_v29 = vpop.f32.mrf.mxu1 }
 0x805   : > { %v4473_v9 = vadd.f32 %v4472_v29, %v11352_v50  ;;  %v4633_v40 = vmax.f32 %v4560_v54, 0.0 }
 0x807   : > { %v4634_v55 = vmax.f32 %v4473_v9, 0.0 }
 0x809   : > { %v11443_v16 = vpack.c.bf16 %v4634_v55, %v4632_v2 }
 0x80a   : > { %v4561_v25 = vpop.f32.mrf.mxu2 }
 0x80b   : > { %v4562_v45 = vadd.f32 %v4561_v25, %v11355_v61  ;;  %5137 = vmatmul.bf16.gmra.mxu3 %v11443_v16 }
 0x80c   : > { %v4475_v3 = vpop.f32.mrf.mxu1 }
 0x80d   : > { %v4635_v22 = vmax.f32 %v4562_v45, 0.0  ;;  %v4476_v42 = vadd.f32 %v4475_v3, %v11352_v50 }
 0x80f   : > { %v11447_v4 = vpack.c.bf16 %v4635_v22, %v4633_v40  ;;  %5280 = vmatmul.bf16.vlgmr.msra.gmra.mxu1 %v11360_v56  ;;  %5369 = vmatmul.bf16.vlgmr.msra.gmra.mxu2 %v11365_v7  ;;  %v4636_v52 = vmax.f32 %v4476_v42, 0.0 }
 0x811   : > { %5226 = vmatmul.bf16.gmra.mxu0 %v11447_v4 }
 0x812   : > { %v4564_v44 = vpop.f32.mrf.mxu2 }
 0x813   : > { %v4565_v38 = vadd.f32 %v4564_v44, %v11355_v61  ;;  %v8788_v44 = vld [vmem:[#allocation11 + $0xb4] sm:$0xf0] }
 0x814   : > { %v4477_v20 = vpop.f32.mrf.mxu1  ;;  %v8160_v24 = vor.u32 %v8788_v44, %v8159_v5 }
 0x815   : > { %v4478_v49 = vadd.f32 %v4477_v20, %v11352_v50  ;;  %v4637_v41 = vmax.f32 %v4565_v38, 0.0 }
 0x816   : > { %5452 = vmatpush.bf16.msrb.mxu3 %v8160_v24 }
 0x817   : > { %v4638_v37 = vmax.f32 %v4478_v49, 0.0 }
 0x819   : > { %v11460_v33 = vpack.c.bf16 %v4638_v37, %v4636_v52  ;;  %v8818_v52 = vld [vmem:[#allocation11 + $0x1ac] sm:$0xf]  ;;  %v8289_v37 = vld [vmem:[#allocation11 + $0x1b8] sm:$0xf0] }
 0x81a   : > { %v4566_v1 = vpop.f32.mrf.mxu2 }
 0x81b   : > { %v4567_v23 = vadd.f32 %v4566_v1, %v11355_v61  ;;  %5142 = vmatmul.bf16.gmra.mxu3 %v11460_v33  ;;  %v8292_v1 = vor.u32 %v8818_v52, %v8289_v37 }
 0x81c   : > { %v4480_v21 = vpop.f32.mrf.mxu1 }
 0x81d   : > { %v4639_v30 = vmax.f32 %v4567_v23, 0.0  ;;  %v4481_v51 = vadd.f32 %v4480_v21, %v11352_v50  ;;  %v8287_v23 = vld [vmem:[#allocation11 + $0x1a8] sm:$0xf]  ;;  %v8820_v21 = vld [vmem:[#allocation11 + $0x1b4] sm:$0xf0]  ;;  %5719 = vmatpush.bf16.msrb.mxu2 %v8292_v1 }
 0x81e   : > { %v5103_v58 = vpop.f32.mrf.mxu3  ;;  %v5192_v18 = vpop.f32.mrf.mxu0 }
 0x81f   : > { %v11467_v11 = vpack.c.bf16 %v4639_v30, %v4637_v41  ;;  %v5104_v60 = vadd.f32 %v5103_v58, %v11465_v32  ;;  %5285 = vmatmul.bf16.gmra.mxu1 %v11372_v10  ;;  %5374 = vmatmul.bf16.gmra.mxu2 %v11377_v63  ;;  %v4640_v2 = vmax.f32 %v4481_v51, 0.0  ;;  %v8288_v30 = vor.u32 %v8820_v21, %v8287_v23  ;;  %v8786_v58 = vld [vmem:[#allocation11 + $0xac] sm:$0xf] }
 0x821   : > { %v5193_v17 = vadd.f32 %v5192_v18, %v5104_v60  ;;  %5231 = vmatmul.bf16.gmra.mxu0 %v11467_v11  ;;  %v8161_v18 = vld [vmem:[#allocation11 + $0xb8] sm:$0xf0] }
 0x822   : > { %v4569_v47 = vpop.f32.mrf.mxu2  ;;  %5541 = vmatpush.bf16.msrb.mxu0 %v8288_v30 }
 0x823   : > { %v4570_v25 = vadd.f32 %v4569_v47, %v11355_v61  ;;  %v5806_v22 = vmax.f32 %v5193_v17, 0.0  ;;  %v8164_v47 = vor.u32 %v8786_v58, %v8161_v18  ;;  %v8143_v18 = vld [vmem:[#allocation11 + $0x88] sm:$0xf] }
 0x824   : > { %v4482_v39 = vpop.f32.mrf.mxu1 }
 0x825   : > { %v4483_v13 = vadd.f32 %v4482_v39, %v11352_v50  ;;  %v4641_v43 = vmax.f32 %v4570_v25, 0.0  ;;  %5630 = vmatpush.bf16.msrb.mxu1 %v8164_v47 }
 0x826   : > { %v5105_v29 = vpop.f32.mrf.mxu3  ;;  %v5194_v9 = vpop.f32.mrf.mxu0 }
 0x827   : > { %v4642_v55 = vmax.f32 %v4483_v13, 0.0  ;;  %v5106_v54 = vadd.f32 %v5105_v29, %v11465_v32 }
 0x829   : > { %v11477_v45 = vpack.c.bf16 %v4642_v55, %v4640_v2  ;;  %v5195_v3 = vadd.f32 %v5194_v9, %v5106_v54 }
 0x82a   : > { %v4571_v40 = vpop.f32.mrf.mxu2 }
 0x82b   : > { %v5810_v27 = vmax.f32 %v5195_v3, 0.0  ;;  %v4572_v28 = vadd.f32 %v4571_v40, %v11355_v61  ;;  %5147 = vmatmul.bf16.gmra.mxu3 %v11477_v45 }
 0x82c   : > { %v4485_v42 = vpop.f32.mrf.mxu1 }
 0x82d   : > { %v11481_v31 = vpack.c.bf16 %v5810_v27, %v5806_v22  ;;  %v4643_v20 = vmax.f32 %v4572_v28, 0.0  ;;  %v4486_v62 = vadd.f32 %v4485_v42, %v11352_v50 }
 0x82e   : > { %v5108_v48 = vpop.f32.mrf.mxu3  ;;  %v5197_v14 = vpop.f32.mrf.mxu0 }
 0x82f   : > { %v11483_v49 = vpack.c.bf16 %v4643_v20, %v4641_v43  ;;  %v5109_v57 = vadd.f32 %v5108_v48, %v11465_v32  ;;  %5290 = vmatmul.bf16.gmra.mxu1 %v11384_v35  ;;  %5379 = vmatmul.bf16.gmra.mxu2 %v11389_v46  ;;  %v4644_v51 = vmax.f32 %v4486_v62, 0.0 }
 0x831   : > { %v5198_v34 = vadd.f32 %v5197_v14, %v5109_v57  ;;  %5236 = vmatmul.bf16.gmra.mxu0 %v11483_v49 }
 0x832   : > { %v4574_v59 = vpop.f32.mrf.mxu2 }
 0x833   : > { %v4575_v29 = vadd.f32 %v4574_v59, %v11355_v61  ;;  %v5814_v54 = vmax.f32 %v5198_v34, 0.0 }
 0x834   : > { %v4487_v38 = vpop.f32.mrf.mxu1 }
 0x835   : > { %v4488_v41 = vadd.f32 %v4487_v38, %v11352_v50  ;;  %v4645_v22 = vmax.f32 %v4575_v29, 0.0 }
 0x836   : > { %v5110_v60 = vpop.f32.mrf.mxu3  ;;  %v5199_v17 = vpop.f32.mrf.mxu0 }
 0x837   : > { %v4646_v39 = vmax.f32 %v4488_v41, 0.0  ;;  %v5111_v13 = vadd.f32 %v5110_v60, %v11465_v32  ;;  %v8784_v60 = vld [vmem:[#allocation11 + $0x94] sm:$0xf0] }
 0x838   : > { %v8144_v47 = vor.u32 %v8784_v60, %v8143_v18 }
 0x839   : > { %v11493_v9 = vpack.c.bf16 %v4646_v39, %v4644_v51  ;;  %v5200_v2 = vadd.f32 %v5199_v17, %v5111_v13 }
 0x83a   : > { %v4576_v55 = vpop.f32.mrf.mxu2  ;;  %5453 = vmatpush.bf16.msrb.mxu3 %v8144_v47 }
 0x83b   : > { %v5818_v25 = vmax.f32 %v5200_v2, 0.0  ;;  %v4577_v3 = vadd.f32 %v4576_v55, %v11355_v61  ;;  %5152 = vmatmul.bf16.gmra.mxu3 %v11493_v9 }
 0x83c   : > { %v4490_v40 = vpop.f32.mrf.mxu1 }
 0x83d   : > { %v4647_v27 = vmax.f32 %v4577_v3, 0.0  ;;  %v11497_v28 = vpack.c.bf16 %v5818_v25, %v5814_v54  ;;  %v4491_v48 = vadd.f32 %v4490_v40, %v11352_v50 }
 0x83e   : > { %v5113_v5 = vpop.f32.mrf.mxu3  ;;  %v5202_v44 = vpop.f32.mrf.mxu0 }
 0x83f   : > { %v11499_v42 = vpack.c.bf16 %v4647_v27, %v4645_v22  ;;  %v5114_v24 = vadd.f32 %v5113_v5, %v11465_v32  ;;  %5295 = vmatmul.bf16.gmra.mxu1 %v11396_v15  ;;  %5384 = vmatmul.bf16.gmra.mxu2 %v11401_v36  ;;  %v4648_v62 = vmax.f32 %v4491_v48, 0.0  ;;  %v8814_v22 = vld [vmem:[#allocation11 + $0x18c] sm:$0xf]  ;;  %v8273_v27 = vld [vmem:[#allocation11 + $0x198] sm:$0xf0] }
 0x841   : > { %v5203_v43 = vadd.f32 %v5202_v44, %v5114_v24  ;;  %5241 = vmatmul.bf16.gmra.mxu0 %v11499_v42  ;;  %v8276_v44 = vor.u32 %v8814_v22, %v8273_v27  ;;  %v8271_v24 = vld [vmem:[#allocation11 + $0x188] sm:$0xf] }
 0x842   : > { %v4579_v20 = vpop.f32.mrf.mxu2 }
 0x843   : > { %v4580_v38 = vadd.f32 %v4579_v20, %v11355_v61  ;;  %v5822_v41 = vmax.f32 %v5203_v43, 0.0  ;;  %v8816_v43 = vld [vmem:[#allocation11 + $0x194] sm:$0xf0]  ;;  %5720 = vmatpush.bf16.msrb.mxu2 %v8276_v44 }
 0x844   : > { %v4492_v14 = vpop.f32.mrf.mxu1  ;;  %v8272_v48 = vor.u32 %v8816_v43, %v8271_v24 }
 0x845   : > { %v4493_v57 = vadd.f32 %v4492_v14, %v11352_v50  ;;  %v4649_v51 = vmax.f32 %v4580_v38, 0.0  ;;  %v8782_v14 = vld [vmem:[#allocation11 + $0x8c] sm:$0xf] }
 0x846   : > { %v5115_v34 = vpop.f32.mrf.mxu3  ;;  %v5204_v59 = vpop.f32.mrf.mxu0  ;;  %5542 = vmatpush.bf16.msrb.mxu0 %v8272_v48 }
 0x847   : > { %v4650_v52 = vmax.f32 %v4493_v57, 0.0  ;;  %v5116_v37 = vadd.f32 %v5115_v34, %v11465_v32  ;;  %v8145_v57 = vld [vmem:[#allocation11 + $0x98] sm:$0xf0] }
 0x849   : > { %v11509_v1 = vpack.c.bf16 %v4650_v52, %v4648_v62  ;;  %v5205_v23 = vadd.f32 %v5204_v59, %v5116_v37  ;;  %v8148_v62 = vor.u32 %v8782_v14, %v8145_v57 }
 0x84a   : > { %v4581_v21 = vpop.f32.mrf.mxu2 }
 0x84b   : > { %v5826_v30 = vmax.f32 %v5205_v23, 0.0  ;;  %v4582_v58 = vadd.f32 %v4581_v21, %v11355_v61  ;;  %5157 = vmatmul.bf16.gmra.mxu3 %v11509_v1  ;;  %5631 = vmatpush.bf16.msrb.mxu1 %v8148_v62  ;;  %v8127_v62 = vld [vmem:[#allocation11 + $0x68] sm:$0xf] }
 0x84c   : > { %v4495_v17 = vpop.f32.mrf.mxu1 }
 0x84d   : > { %v4651_v39 = vmax.f32 %v4582_v58, 0.0  ;;  %v11513_v13 = vpack.c.bf16 %v5826_v30, %v5822_v41  ;;  %v4496_v40 = vadd.f32 %v4495_v17, %v11352_v50 }
 0x84e   : > { %v5118_v29 = vpop.f32.mrf.mxu3  ;;  %v5207_v2 = vpop.f32.mrf.mxu0 }
 0x84f   : > { %v11515_v55 = vpack.c.bf16 %v4651_v39, %v4649_v51  ;;  %v5119_v54 = vadd.f32 %v5118_v29, %v11465_v32  ;;  %5300 = vmatmul.bf16.gmra.mxu1 %v11408_v12  ;;  %5389 = vmatmul.bf16.gmra.mxu2 %v11413_v53  ;;  %v4652_v52 = vmax.f32 %v4496_v40, 0.0 }
 0x851   : > { %v5208_v25 = vadd.f32 %v5207_v2, %v5119_v54  ;;  %5246 = vmatmul.bf16.gmra.mxu0 %v11515_v55 }
 0x852   : > { %v4584_v3 = vpop.f32.mrf.mxu2 }
 0x853   : > { %v4585_v23 = vadd.f32 %v4584_v3, %v11355_v61  ;;  %v5830_v58 = vmax.f32 %v5208_v25, 0.0 }
 0x854   : > { %v4497_v5 = vpop.f32.mrf.mxu1 }
 0x855   : > { %v4498_v20 = vadd.f32 %v4497_v5, %v11352_v50  ;;  %v4653_v47 = vmax.f32 %v4585_v23, 0.0 }
 0x856   : > { %v5120_v34 = vpop.f32.mrf.mxu3  ;;  %v5209_v59 = vpop.f32.mrf.mxu0 }
 0x857   : > { %v4654_v37 = vmax.f32 %v4498_v20, 0.0  ;;  %v5121_v38 = vadd.f32 %v5120_v34, %v11465_v32 }
 0x859   : > { %v11525_v21 = vpack.c.bf16 %v4654_v37, %v4652_v52  ;;  %v5210_v41 = vadd.f32 %v5209_v59, %v5121_v38  ;;  %v8780_v52 = vld [vmem:[#allocation11 + $0x74] sm:$0xf0] }
 0x85a   : > { %v4586_v30 = vpop.f32.mrf.mxu2 }
 0x85b   : > { %v5834_v18 = vmax.f32 %v5210_v41, 0.0  ;;  %v4587_v60 = vadd.f32 %v4586_v30, %v11355_v61  ;;  %5162 = vmatmul.bf16.gmra.mxu3 %v11525_v21  ;;  %v8128_v41 = vor.u32 %v8780_v52, %v8127_v62  ;;  %v8239_v52 = vld [vmem:[#allocation11 + $0x148] sm:$0xf] }
 0x85c   : > { %v4500_v17 = vpop.f32.mrf.mxu1 }
 0x85d   : > { %v4655_v51 = vmax.f32 %v4587_v60, 0.0  ;;  %v11529_v39 = vpack.c.bf16 %v5834_v18, %v5830_v58  ;;  %v4501_v22 = vadd.f32 %v4500_v17, %v11352_v50  ;;  %5454 = vmatpush.bf16.msrb.mxu3 %v8128_v41  ;;  %v8129_v41 = vld [vmem:[#allocation11 + $0x78] sm:$0xf0] }
 0x85e   : > { %v5123_v29 = vpop.f32.mrf.mxu3  ;;  %v5212_v2 = vpop.f32.mrf.mxu0 }
 0x85f   : > { %v11531_v54 = vpack.c.bf16 %v4655_v51, %v4653_v47  ;;  %v5124_v3 = vadd.f32 %v5123_v29, %v11465_v32  ;;  %5305 = vmatmul.bf16.gmra.mxu1 %v11420_v6  ;;  %5394 = vmatmul.bf16.gmra.mxu2 %v11425_v19  ;;  %v4656_v43 = vmax.f32 %v4501_v22, 0.0  ;;  %v8111_v51 = vld [vmem:[#allocation11 + $0x48] sm:$0xf]  ;;  %v8776_v29 = vld [vmem:[#allocation11 + $0x54] sm:$0xf0] }
 0x860   : > { %v8812_v22 = vld [vmem:[#allocation11 + $0x174] sm:$0xf0] }
 0x861   : > { %v5213_v25 = vadd.f32 %v5212_v2, %v5124_v3  ;;  %5251 = vmatmul.bf16.gmra.mxu0 %v11531_v54 }
 0x862   : > { %v4589_v40 = vpop.f32.mrf.mxu2 }
 0x863   : > { %v4590_v14 = vadd.f32 %v4589_v40, %v11355_v61  ;;  %v5838_v37 = vmax.f32 %v5213_v25, 0.0  ;;  %v8112_v25 = vor.u32 %v8776_v29, %v8111_v51  ;;  %v8255_v40 = vld [vmem:[#allocation11 + $0x168] sm:$0xf] }
 0x864   : > { %v4502_v27 = vpop.f32.mrf.mxu1  ;;  %v8079_v51 = vld [vmem:[#allocation11 + $0x8] sm:$0xf] }
 0x865   : > { %v4503_v5 = vadd.f32 %v4502_v27, %v11352_v50  ;;  %v4657_v58 = vmax.f32 %v4590_v14, 0.0  ;;  %5455 = vmatpush.bf16.msrb.mxu3 %v8112_v25  ;;  %v8257_v14 = vld [vmem:[#allocation11 + $0x178] sm:$0xf0] }
 0x866   : > { %v5125_v44 = vpop.f32.mrf.mxu3  ;;  %v5214_v24 = vpop.f32.mrf.mxu0 }
 0x867   : > { %v4658_v20 = vmax.f32 %v4503_v5, 0.0  ;;  %v5126_v48 = vadd.f32 %v5125_v44, %v11465_v32  ;;  %v8256_v5 = vor.u32 %v8812_v22, %v8255_v40  ;;  %v8223_v22 = vld [vmem:[#allocation11 + $0x128] sm:$0xf] }
 0x869   : > { %v11541_v57 = vpack.c.bf16 %v4658_v20, %v4656_v43  ;;  %v5215_v34 = vadd.f32 %v5214_v24, %v5126_v48  ;;  %v8095_v24 = vld [vmem:[#allocation11 + $0x28] sm:$0xf]  ;;  %v8772_v43 = vld [vmem:[#allocation11 + $0x34] sm:$0xf0]  ;;  %v8810_v48 = vld [vmem:[#allocation11 + $0x16c] sm:$0xf]  ;;  %5543 = vmatpush.bf16.msrb.mxu0 %v8256_v5 }
 0x86a   : > { %v4591_v59 = vpop.f32.mrf.mxu2  ;;  %v8260_v62 = vor.u32 %v8810_v48, %v8257_v14  ;;  %v8804_v5 = vld [vmem:[#allocation11 + $0x134] sm:$0xf0] }
 0x86b   : > { %v5842_v38 = vmax.f32 %v5215_v34, 0.0  ;;  %v4592_v23 = vadd.f32 %v4591_v59, %v11355_v61  ;;  %5167 = vmatmul.bf16.gmra.mxu3 %v11541_v57  ;;  %v8096_v34 = vor.u32 %v8772_v43, %v8095_v24  ;;  %v8224_v14 = vor.u32 %v8804_v5, %v8223_v22 }
 0x86c   : > { %v4505_v30 = vpop.f32.mrf.mxu1  ;;  %5721 = vmatpush.bf16.msrb.mxu2 %v8260_v62 }
 0x86d   : > { %v4659_v18 = vmax.f32 %v4592_v23, 0.0  ;;  %v11545_v60 = vpack.c.bf16 %v5842_v38, %v5838_v37  ;;  %v4506_v20 = vadd.f32 %v4505_v30, %v11352_v50  ;;  %v8808_v37 = vld [vmem:[#allocation11 + $0x154] sm:$0xf0]  ;;  %v8778_v23 = vld [vmem:[#allocation11 + $0x6c] sm:$0xf]  ;;  %5456 = vmatpush.bf16.msrb.mxu3 %v8096_v34 }
 0x86e   : > { %v5128_v17 = vpop.f32.mrf.mxu3  ;;  %v5217_v47 = vpop.f32.mrf.mxu0  ;;  %v8768_v30 = vld [vmem:[#allocation11 + $0x14] sm:$0xf0] }
 0x86f   : > { %12861 = vst [vmem:[#allocation63_spill] sm:$0xff] %v11545_v60  ;;  %v11547_v2 = vpack.c.bf16 %v4659_v18, %v4657_v58  ;;  %v5129_v3 = vadd.f32 %v5128_v17, %v11465_v32  ;;  %5310 = vmatmul.bf16.gmra.mxu1 %v11432_v0  ;;  %5399 = vmatmul.bf16.gmra.mxu2 %v11437_v26  ;;  %v4660_v29 = vmax.f32 %v4506_v20, 0.0 }
 0x870   : > { %v8240_v58 = vor.u32 %v8808_v37, %v8239_v52  ;;  %v8080_v40 = vor.u32 %v8768_v30, %v8079_v51  ;;  %v8207_v37 = vld [vmem:[#allocation11 + $0x108] sm:$0xf] }
 0x871   : > { %v5218_v27 = vadd.f32 %v5217_v47, %v5129_v3  ;;  %5256 = vmatmul.bf16.gmra.mxu0 %v11547_v2  ;;  %v8132_v47 = vor.u32 %v8778_v23, %v8129_v41 }
 0x872   : > { %v4594_v44 = vpop.f32.mrf.mxu2  ;;  %5544 = vmatpush.bf16.msrb.mxu0 %v8240_v58  ;;  %5457 = vmatpush.bf16.msrb.mxu3 %v8080_v40 }
 0x873   : > { %5632 = vmatpush.bf16.msrb.mxu1 %v8132_v47  ;;  %v4595_v24 = vadd.f32 %v4594_v44, %v11355_v61 }
 0x874   : > { %v4507_v59 = vpop.f32.mrf.mxu1 }
 0x875   : > { %v4508_v38 = vadd.f32 %v4507_v59, %v11352_v50  ;;  %v5846_v59 = vmax.f32 %v5218_v27, 0.0  ;;  %v4661_v23 = vmax.f32 %v4595_v24, 0.0 }
 0x876   : > { %v5130_v18 = vpop.f32.mrf.mxu3  ;;  %v5219_v17 = vpop.f32.mrf.mxu0  ;;  %5545 = vmatpush.bf16.msrb.mxu0 %v8224_v14 }
 0x877   : > { %v4662_v3 = vmax.f32 %v4508_v38, 0.0  ;;  %v5131_v25 = vadd.f32 %v5130_v18, %v11465_v32  ;;  %v8800_v38 = vld [vmem:[#allocation11 + $0x114] sm:$0xf0] }
 0x878   : > { %v8208_v58 = vor.u32 %v8800_v38, %v8207_v37 }
 0x879   : > { %v11557_v43 = vpack.c.bf16 %v4662_v3, %v4660_v29  ;;  %v5220_v48 = vadd.f32 %v5219_v17, %v5131_v25 }
 0x87a   : > { %v4596_v34 = vpop.f32.mrf.mxu2  ;;  %5546 = vmatpush.bf16.msrb.mxu0 %v8208_v58 }
 0x87b   : > { %v5850_v62 = vmax.f32 %v5220_v48, 0.0  ;;  %v4597_v20 = vadd.f32 %v4596_v34, %v11355_v61  ;;  %5172 = vmatmul.bf16.gmra.mxu3 %v11557_v43 }
 0x87c   : > { %v4510_v52 = vpop.f32.mrf.mxu1 }
 0x87d   : > { %v4663_v41 = vmax.f32 %v4597_v20, 0.0  ;;  %v11561_v44 = vpack.c.bf16 %v5850_v62, %v5846_v59  ;;  %v4511_v29 = vadd.f32 %v4510_v52, %v11352_v50 }
 0x87e   : > { %v5133_v18 = vpop.f32.mrf.mxu3  ;;  %v5222_v17 = vpop.f32.mrf.mxu0 }
 0x87f   : > { %12862 = vst [vmem:[#allocation76_spill] sm:$0xff] %v11561_v44  ;;  %v11563_v47 = vpack.c.bf16 %v4663_v41, %v4661_v23  ;;  %v5134_v27 = vadd.f32 %v5133_v18, %v11465_v32  ;;  %5315 = vmatmul.bf16.gmra.mxu1 %v11443_v16  ;;  %5404 = vmatmul.bf16.gmra.mxu2 %v11447_v4  ;;  %v4664_v5 = vmax.f32 %v4511_v29, 0.0  ;;  %v11578_v41 = vperm.slane %v11457_v8, 1 }
 0x881   : > { %v5223_v51 = vadd.f32 %v5222_v17, %v5134_v27  ;;  %5261 = vmatmul.bf16.gmra.mxu0 %v11563_v47 }
 0x882   : > { %v4599_v30 = vpop.f32.mrf.mxu2 }
 0x883   : > { %v4600_v14 = vadd.f32 %v4599_v30, %v11355_v61  ;;  %v5854_v20 = vmax.f32 %v5223_v51, 0.0 }
 0x884   : > { %v4512_v3 = vpop.f32.mrf.mxu1 }
 0x885   : > { %v4513_v25 = vadd.f32 %v4512_v3, %v11352_v50  ;;  %v4665_v50 = vmax.f32 %v4600_v14, 0.0  ;;  %v8806_v3 = vld [vmem:[#allocation11 + $0x14c] sm:$0xf] }
 0x886   : > { %v5135_v40 = vpop.f32.mrf.mxu3  ;;  %v5224_v22 = vpop.f32.mrf.mxu0 }
 0x887   : > { %v4666_v24 = vmax.f32 %v4513_v25, 0.0  ;;  %v5136_v48 = vadd.f32 %v5135_v40, %v11465_v32  ;;  %v8241_v25 = vld [vmem:[#allocation11 + $0x158] sm:$0xf0] }
 0x889   : > { %v11573_v34 = vpack.c.bf16 %v4666_v24, %v4664_v5  ;;  %v5225_v59 = vadd.f32 %v5224_v22, %v5136_v48  ;;  %v8244_v22 = vor.u32 %v8806_v3, %v8241_v25  ;;  %v8774_v5 = vld [vmem:[#allocation11 + $0x4c] sm:$0xf]  ;;  %v8113_v24 = vld [vmem:[#allocation11 + $0x58] sm:$0xf0] }
 0x88a   : > { %v4601_v62 = vpop.f32.mrf.mxu2 }
 0x88b   : > { %v5858_v37 = vmax.f32 %v5225_v59, 0.0  ;;  %v4602_v38 = vadd.f32 %v4601_v62, %v11355_v61  ;;  %5177 = vmatmul.bf16.gmra.mxu3 %v11573_v34  ;;  %5722 = vmatpush.bf16.msrb.mxu2 %v8244_v22  ;;  %v8116_v59 = vor.u32 %v8774_v5, %v8113_v24 }
 0x88c   : > { %v5281_v52 = vpop.f32.mrf.mxu1 }
 0x88d   : > { %v4667_v23 = vmax.f32 %v4602_v38, 0.0  ;;  %v11580_v58 = vpack.c.bf16 %v5858_v37, %v5854_v20  ;;  %v5282_v61 = vadd.f32 %v5281_v52, %v11578_v41  ;;  %5633 = vmatpush.bf16.msrb.mxu1 %v8116_v59 }
 0x88e   : > { %v5138_v18 = vpop.f32.mrf.mxu3  ;;  %v5227_v17 = vpop.f32.mrf.mxu0 }
 0x88f   : > { %12863 = vst [vmem:[#allocation67_spill] sm:$0xff] %v11580_v58  ;;  %v11582_v27 = vpack.c.bf16 %v4667_v23, %v4665_v50  ;;  %v5139_v30 = vadd.f32 %v5138_v18, %v11465_v32  ;;  %5320 = vmatmul.bf16.gmra.mxu1 %v11460_v33  ;;  %5409 = vmatmul.bf16.gmra.mxu2 %v11467_v11 }
 0x891   : > { %v5228_v51 = vadd.f32 %v5227_v17, %v5139_v30  ;;  %5266 = vmatmul.bf16.gmra.mxu0 %v11582_v27 }
 0x892   : > { %v5370_v29 = vpop.f32.mrf.mxu2 }
 0x893   : > { %v5371_v8 = vadd.f32 %v5370_v29, %v5282_v61  ;;  %v5862_v52 = vmax.f32 %v5228_v51, 0.0 }
 0x894   : > { %v5283_v40 = vpop.f32.mrf.mxu1 }
 0x895   : > { %v5284_v20 = vadd.f32 %v5283_v40, %v11578_v41  ;;  %v5807_v17 = vmax.f32 %v5371_v8, 0.0 }
 0x896   : > { %v5140_v48 = vpop.f32.mrf.mxu3  ;;  %v5229_v14 = vpop.f32.mrf.mxu0 }
 0x897   : > { %v5141_v62 = vadd.f32 %v5140_v48, %v11465_v32 }
 0x899   : > { %v5230_v37 = vadd.f32 %v5229_v14, %v5141_v62 }
 0x89a   : > { %v5372_v38 = vpop.f32.mrf.mxu2 }
 0x89b   : > { %v5866_v50 = vmax.f32 %v5230_v37, 0.0  ;;  %v5373_v23 = vadd.f32 %v5372_v38, %v5284_v20  ;;  %5458 = vmatmul.bf16.vlgmr.msrb.gmra.mxu3 %v11360_v56 }
 0x89c   : > { %v5286_v18 = vpop.f32.mrf.mxu1 }
 0x89d   : > { %v5811_v30 = vmax.f32 %v5373_v23, 0.0  ;;  %v11592_v61 = vpack.c.bf16 %v5866_v50, %v5862_v52  ;;  %v5287_v51 = vadd.f32 %v5286_v18, %v11578_v41 }
 0x89e   : > { %v5143_v29 = vpop.f32.mrf.mxu3  ;;  %v5232_v3 = vpop.f32.mrf.mxu0 }
 0x89f   : > { %12864 = vst [vmem:[#allocation77_spill] sm:$0xff] %v11592_v61  ;;  %v11594_v25 = vpack.c.bf16 %v5811_v30, %v5807_v17  ;;  %v5144_v22 = vadd.f32 %v5143_v29, %v11465_v32  ;;  %5325 = vmatmul.bf16.gmra.mxu1 %v11477_v45  ;;  %5414 = vmatmul.bf16.gmra.mxu2 %v11483_v49 }
 0x8a1   : > { %v5233_v40 = vadd.f32 %v5232_v3, %v5144_v22  ;;  %5547 = vmatmul.bf16.vlgmr.msrb.gmra.mxu0 %v11365_v7 }
 0x8a2   : > { %v5375_v5 = vpop.f32.mrf.mxu2 }
 0x8a3   : > { %v5376_v8 = vadd.f32 %v5375_v5, %v5287_v51  ;;  %v5870_v38 = vmax.f32 %v5233_v40, 0.0 }
 0x8a4   : > { %v5288_v24 = vpop.f32.mrf.mxu1 }
 0x8a5   : > { %v5289_v62 = vadd.f32 %v5288_v24, %v11578_v41  ;;  %v5815_v18 = vmax.f32 %v5376_v8, 0.0 }
 0x8a6   : > { %v5145_v48 = vpop.f32.mrf.mxu3  ;;  %v5234_v14 = vpop.f32.mrf.mxu0 }
 0x8a7   : > { %v5146_v59 = vadd.f32 %v5145_v48, %v11465_v32  ;;  %v8802_v48 = vld [vmem:[#allocation11 + $0x12c] sm:$0xf] }
 0x8a9   : > { %v5235_v20 = vadd.f32 %v5234_v14, %v5146_v59  ;;  %v8225_v14 = vld [vmem:[#allocation11 + $0x138] sm:$0xf0] }
 0x8aa   : > { %v5377_v37 = vpop.f32.mrf.mxu2 }
 0x8ab   : > { %v5874_v52 = vmax.f32 %v5235_v20, 0.0  ;;  %v5378_v50 = vadd.f32 %v5377_v37, %v5289_v62  ;;  %5463 = vmatmul.bf16.gmra.mxu3 %v11372_v10  ;;  %v8228_v62 = vor.u32 %v8802_v48, %v8225_v14  ;;  %v8770_v20 = vld [vmem:[#allocation11 + $0x2c] sm:$0xf]  ;;  %v8097_v37 = vld [vmem:[#allocation11 + $0x38] sm:$0xf0] }
 0x8ac   : > { %v5291_v23 = vpop.f32.mrf.mxu1 }
 0x8ad   : > { %v5819_v17 = vmax.f32 %v5378_v50, 0.0  ;;  %v11604_v30 = vpack.c.bf16 %v5874_v52, %v5870_v38  ;;  %v5292_v40 = vadd.f32 %v5291_v23, %v11578_v41  ;;  %5723 = vmatpush.bf16.msrb.mxu2 %v8228_v62  ;;  %v8100_v50 = vor.u32 %v8770_v20, %v8097_v37 }
 0x8ae   : > { %v5148_v29 = vpop.f32.mrf.mxu3  ;;  %v5237_v3 = vpop.f32.mrf.mxu0 }
 0x8af   : > { %12865 = vst [vmem:[#allocation78_spill] sm:$0xff] %v11604_v30  ;;  %v5149_v22 = vadd.f32 %v5148_v29, %v11465_v32  ;;  %5330 = vmatmul.bf16.gmra.mxu1 %v11493_v9  ;;  %5419 = vmatmul.bf16.gmra.mxu2 %v11499_v42  ;;  %v11609_v51 = vpack.c.bf16 %v5819_v17, %v5815_v18 }
 0x8b0   : > { %5634 = vmatpush.bf16.msrb.mxu1 %v8100_v50 }
 0x8b1   : > { %v5238_v5 = vadd.f32 %v5237_v3, %v5149_v22  ;;  %5552 = vmatmul.bf16.gmra.mxu0 %v11377_v63 }
 0x8b2   : > { %v5380_v24 = vpop.f32.mrf.mxu2 }
 0x8b3   : > { %v5381_v8 = vadd.f32 %v5380_v24, %v5292_v40  ;;  %v5878_v3 = vmax.f32 %v5238_v5, 0.0 }
 0x8b4   : > { %v5293_v59 = vpop.f32.mrf.mxu1 }
 0x8b5   : > { %v5294_v23 = vadd.f32 %v5293_v59, %v11578_v41  ;;  %v5823_v48 = vmax.f32 %v5381_v8, 0.0 }
 0x8b6   : > { %v5150_v38 = vpop.f32.mrf.mxu3  ;;  %v5239_v52 = vpop.f32.mrf.mxu0 }
 0x8b7   : > { %v5151_v18 = vadd.f32 %v5150_v38, %v11465_v32 }
 0x8b9   : > { %v5240_v17 = vadd.f32 %v5239_v52, %v5151_v18 }
 0x8ba   : > { %v5382_v29 = vpop.f32.mrf.mxu2 }
 0x8bb   : > { %v5882_v22 = vmax.f32 %v5240_v17, 0.0  ;;  %v5383_v40 = vadd.f32 %v5382_v29, %v5294_v23  ;;  %5468 = vmatmul.bf16.gmra.mxu3 %v11384_v35 }
 0x8bc   : > { %v5296_v24 = vpop.f32.mrf.mxu1 }
 0x8bd   : > { %v5827_v14 = vmax.f32 %v5383_v40, 0.0  ;;  %v11616_v30 = vpack.c.bf16 %v5882_v22, %v5878_v3  ;;  %v5297_v5 = vadd.f32 %v5296_v24, %v11578_v41 }
 0x8be   : > { %v5153_v61 = vpop.f32.mrf.mxu3  ;;  %v5242_v62 = vpop.f32.mrf.mxu0 }
 0x8bf   : > { %12866 = vst [vmem:[#allocation27_spill] sm:$0xff] %v11616_v30  ;;  %v5154_v20 = vadd.f32 %v5153_v61, %v11465_v32  ;;  %5335 = vmatmul.bf16.gmra.mxu1 %v11509_v1  ;;  %5424 = vmatmul.bf16.gmra.mxu2 %v11515_v55  ;;  %v11621_v59 = vpack.c.bf16 %v5827_v14, %v5823_v48 }
 0x8c1   : > { %v5243_v37 = vadd.f32 %v5242_v62, %v5154_v20  ;;  %5557 = vmatmul.bf16.gmra.mxu0 %v11389_v46 }
 0x8c2   : > { %v5385_v38 = vpop.f32.mrf.mxu2 }
 0x8c3   : > { %v5386_v8 = vadd.f32 %v5385_v38, %v5297_v5  ;;  %v5886_v3 = vmax.f32 %v5243_v37, 0.0 }
 0x8c4   : > { %v5298_v52 = vpop.f32.mrf.mxu1 }
 0x8c5   : > { %v5299_v61 = vadd.f32 %v5298_v52, %v11578_v41  ;;  %v5831_v48 = vmax.f32 %v5386_v8, 0.0 }
 0x8c6   : > { %v5155_v50 = vpop.f32.mrf.mxu3  ;;  %v5244_v18 = vpop.f32.mrf.mxu0 }
 0x8c7   : > { %v5156_v23 = vadd.f32 %v5155_v50, %v11465_v32 }
 0x8c9   : > { %v5245_v17 = vadd.f32 %v5244_v18, %v5156_v23  ;;  %v8798_v23 = vld [vmem:[#allocation11 + $0x10c] sm:$0xf] }
 0x8ca   : > { %v5387_v29 = vpop.f32.mrf.mxu2 }
 0x8cb   : > { %v5890_v22 = vmax.f32 %v5245_v17, 0.0  ;;  %v5388_v40 = vadd.f32 %v5387_v29, %v5299_v61  ;;  %5473 = vmatmul.bf16.gmra.mxu3 %v11396_v15  ;;  %v8209_v61 = vld [vmem:[#allocation11 + $0x118] sm:$0xf0] }
 0x8cc   : > { %v5301_v24 = vpop.f32.mrf.mxu1  ;;  %v8212_v29 = vor.u32 %v8798_v23, %v8209_v61 }
 0x8cd   : > { %v5835_v14 = vmax.f32 %v5388_v40, 0.0  ;;  %v11628_v62 = vpack.c.bf16 %v5890_v22, %v5886_v3  ;;  %v5302_v37 = vadd.f32 %v5301_v24, %v11578_v41  ;;  %v8766_v3 = vld [vmem:[#allocation11 + $0xc] sm:$0xf]  ;;  %v8081_v22 = vld [vmem:[#allocation11 + $0x18] sm:$0xf0] }
 0x8ce   : > { %v5158_v20 = vpop.f32.mrf.mxu3  ;;  %v5247_v5 = vpop.f32.mrf.mxu0  ;;  %5724 = vmatpush.bf16.msrb.mxu2 %v8212_v29 }
 0x8cf   : > { %12867 = vst [vmem:[#allocation50_spill] sm:$0xff] %v11628_v62  ;;  %v5159_v38 = vadd.f32 %v5158_v20, %v11465_v32  ;;  %5340 = vmatmul.bf16.gmra.mxu1 %v11525_v21  ;;  %5429 = vmatmul.bf16.gmra.mxu2 %v11531_v54  ;;  %v11633_v52 = vpack.c.bf16 %v5835_v14, %v5831_v48 }
 0x8d0   : > { %v8084_v62 = vor.u32 %v8766_v3, %v8081_v22 }
 0x8d1   : > { %v5248_v50 = vadd.f32 %v5247_v5, %v5159_v38  ;;  %5562 = vmatmul.bf16.gmra.mxu0 %v11401_v36 }
 0x8d2   : > { %v5390_v18 = vpop.f32.mrf.mxu2  ;;  %5635 = vmatpush.bf16.msrb.mxu1 %v8084_v62 }
 0x8d3   : > { %v5391_v8 = vadd.f32 %v5390_v18, %v5302_v37  ;;  %v5894_v38 = vmax.f32 %v5248_v50, 0.0 }
 0x8d4   : > { %v5303_v17 = vpop.f32.mrf.mxu1 }
 0x8d5   : > { %v5304_v24 = vadd.f32 %v5303_v17, %v11578_v41  ;;  %v5839_v23 = vmax.f32 %v5391_v8, 0.0 }
 0x8d6   : > { %v5160_v40 = vpop.f32.mrf.mxu3  ;;  %v5249_v20 = vpop.f32.mrf.mxu0 }
 0x8d7   : > { %v5161_v48 = vadd.f32 %v5160_v40, %v11465_v32 }
 0x8d9   : > { %v5250_v14 = vadd.f32 %v5249_v20, %v5161_v48 }
 0x8da   : > { %v5392_v5 = vpop.f32.mrf.mxu2 }
 0x8db   : > { %v5898_v30 = vmax.f32 %v5250_v14, 0.0  ;;  %v5393_v37 = vadd.f32 %v5392_v5, %v5304_v24  ;;  %5478 = vmatmul.bf16.gmra.mxu3 %v11408_v12 }
 0x8dc   : > { %v5306_v18 = vpop.f32.mrf.mxu1 }
 0x8dd   : > { %v5843_v61 = vmax.f32 %v5393_v37, 0.0  ;;  %v11640_v58 = vpack.c.bf16 %v5898_v30, %v5894_v38  ;;  %v5307_v50 = vadd.f32 %v5306_v18, %v11578_v41  ;;  %v8383_v18 = vld [vmem:[#allocation13 + $0x70] sm:$0xf] }
 0x8de   : > { %v5163_v44 = vpop.f32.mrf.mxu3  ;;  %v5252_v29 = vpop.f32.mrf.mxu0 }
 0x8df   : > { %12868 = vst [vmem:[#allocation20_spill] sm:$0xff] %v11640_v58  ;;  %v5164_v3 = vadd.f32 %v5163_v44, %v11465_v32  ;;  %5345 = vmatmul.bf16.gmra.mxu1 %v11541_v57  ;;  %5434 = vmatmul.bf16.gmra.mxu2 %v11547_v2  ;;  %v11645_v62 = vpack.c.bf16 %v5843_v61, %v5839_v23  ;;  %v8844_v23 = vld [vmem:[#allocation13 + $0x74] sm:$0xf0] }
 0x8e1   : > { %12869 = vst [vmem:[#allocation79_spill] sm:$0xff] %v11645_v62  ;;  %v5253_v17 = vadd.f32 %v5252_v29, %v5164_v3  ;;  %5567 = vmatmul.bf16.gmra.mxu0 %v11413_v53  ;;  %v8384_v29 = vor.u32 %v8844_v23, %v8383_v18  ;;  %v8511_v18 = vld [vmem:[#allocation13 + $0x170] sm:$0xf]  ;;  %v8876_v23 = vld [vmem:[#allocation13 + $0x174] sm:$0xf0] }
 0x8e2   : > { %v5395_v22 = vpop.f32.mrf.mxu2 }
 0x8e3   : > { %v5396_v8 = vadd.f32 %v5395_v22, %v5307_v50  ;;  %v5902_v5 = vmax.f32 %v5253_v17, 0.0  ;;  %6388 = vmatpush.bf16.msra.mxu3 %v8384_v29 }
 0x8e4   : > { %v5308_v40 = vpop.f32.mrf.mxu1 }
 0x8e5   : > { %v5309_v44 = vadd.f32 %v5308_v40, %v11578_v41  ;;  %v5847_v3 = vmax.f32 %v5396_v8, 0.0 }
 0x8e6   : > { %v5165_v30 = vpop.f32.mrf.mxu3  ;;  %v5254_v20 = vpop.f32.mrf.mxu0 }
 0x8e7   : > { %v5166_v48 = vadd.f32 %v5165_v30, %v11465_v32 }
 0x8e9   : > { %v5255_v24 = vadd.f32 %v5254_v20, %v5166_v48 }
 0x8ea   : > { %v5397_v14 = vpop.f32.mrf.mxu2 }
 0x8eb   : > { %v5906_v38 = vmax.f32 %v5255_v24, 0.0  ;;  %v5398_v37 = vadd.f32 %v5397_v14, %v5309_v44  ;;  %5483 = vmatmul.bf16.gmra.mxu3 %v11420_v6  ;;  %v8575_v44 = vld [vmem:[#allocation13 + $0x1f0] sm:$0xf]  ;;  %v8892_v24 = vld [vmem:[#allocation13 + $0x1f4] sm:$0xf0] }
 0x8ec   : > { %v5311_v61 = vpop.f32.mrf.mxu1 }
 0x8ed   : > { %v5851_v50 = vmax.f32 %v5398_v37, 0.0  ;;  %v11652_v22 = vpack.c.bf16 %v5906_v38, %v5902_v5  ;;  %v5312_v30 = vadd.f32 %v5311_v61, %v11578_v41  ;;  %v8576_v5 = vor.u32 %v8892_v24, %v8575_v44  ;;  %v8447_v38 = vld [vmem:[#allocation13 + $0xf0] sm:$0xf]  ;;  %v8860_v37 = vld [vmem:[#allocation13 + $0xf4] sm:$0xf0] }
 0x8ee   : > { %v5168_v58 = vpop.f32.mrf.mxu3  ;;  %v5257_v62 = vpop.f32.mrf.mxu0 }
 0x8ef   : > { %12870 = vst [vmem:[#allocation55_spill] sm:$0xff] %v11652_v22  ;;  %v5169_v40 = vadd.f32 %v5168_v58, %v11465_v32  ;;  %5350 = vmatmul.bf16.gmra.mxu1 %v11557_v43  ;;  %5439 = vmatmul.bf16.gmra.mxu2 %v11563_v47  ;;  %v11657_v17 = vpack.c.bf16 %v5851_v50, %v5847_v3 }
 0x8f0   : > { %v8448_v58 = vor.u32 %v8860_v37, %v8447_v38  ;;  %6655 = vmatpush.bf16.msra.mxu2 %v8576_v5  ;;  %v8512_v3 = vor.u32 %v8876_v23, %v8511_v18 }
 0x8f1   : > { %12871 = vst [vmem:[#allocation45_spill] sm:$0xff] %v11657_v17  ;;  %v5258_v20 = vadd.f32 %v5257_v62, %v5169_v40  ;;  %5572 = vmatmul.bf16.gmra.mxu0 %v11425_v19 }
 0x8f2   : > { %v5400_v8 = vpop.f32.mrf.mxu2  ;;  %6477 = vmatpush.bf16.msra.mxu0 %v8448_v58  ;;  %6566 = vmatpush.bf16.msra.mxu1 %v8512_v3 }
 0x8f3   : > { %v5401_v48 = vadd.f32 %v5400_v8, %v5312_v30  ;;  %v5910_v30 = vmax.f32 %v5258_v20, 0.0 }
 0x8f4   : > { %v5313_v14 = vpop.f32.mrf.mxu1 }
 0x8f5   : > { %v5314_v62 = vadd.f32 %v5313_v14, %v11578_v41  ;;  %v5855_v38 = vmax.f32 %v5401_v48, 0.0 }
 0x8f6   : > { %v5170_v29 = vpop.f32.mrf.mxu3  ;;  %v5259_v22 = vpop.f32.mrf.mxu0 }
 0x8f7   : > { %v5171_v61 = vadd.f32 %v5170_v29, %v11465_v32 }
 0x8f9   : > { %v5260_v50 = vadd.f32 %v5259_v22, %v5171_v61 }
 0x8fa   : > { %v5402_v40 = vpop.f32.mrf.mxu2 }
 0x8fb   : > { %v5914_v8 = vmax.f32 %v5260_v50, 0.0  ;;  %v5403_v44 = vadd.f32 %v5402_v40, %v5314_v62  ;;  %5488 = vmatmul.bf16.gmra.mxu3 %v11432_v0 }
 0x8fc   : > { %v5316_v24 = vpop.f32.mrf.mxu1 }
 0x8fd   : > { %v5859_v37 = vmax.f32 %v5403_v44, 0.0  ;;  %v11664_v17 = vpack.c.bf16 %v5914_v8, %v5910_v30  ;;  %v5317_v20 = vadd.f32 %v5316_v24, %v11578_v41 }
 0x8fe   : > { %v5173_v5 = vpop.f32.mrf.mxu3  ;;  %v5262_v18 = vpop.f32.mrf.mxu0 }
 0x8ff   : > { %12872 = vst [vmem:[#allocation53_spill] sm:$0xff] %v11664_v17  ;;  %v5174_v23 = vadd.f32 %v5173_v5, %v11465_v32  ;;  %5355 = vmatmul.bf16.gmra.mxu1 %v11573_v34  ;;  %5444 = vmatmul.bf16.gmra.mxu2 %v11582_v27  ;;  %v11669_v22 = vpack.c.bf16 %v5859_v37, %v5855_v38 }
 0x901   : > { %12873 = vst [vmem:[#allocation22_spill] sm:$0xff] %v11669_v22  ;;  %v5263_v14 = vadd.f32 %v5262_v18, %v5174_v23  ;;  %5577 = vmatmul.bf16.gmra.mxu0 %v11437_v26  ;;  %v8375_v18 = vld [vmem:[#allocation13 + $0x60] sm:$0xf]  ;;  %v8842_v23 = vld [vmem:[#allocation13 + $0x64] sm:$0xf0] }
 0x902   : > { %v5405_v58 = vpop.f32.mrf.mxu2  ;;  %v8376_v22 = vor.u32 %v8842_v23, %v8375_v18  ;;  %v8874_v23 = vld [vmem:[#allocation13 + $0x164] sm:$0xf0] }
 0x903   : > { %v5406_v48 = vadd.f32 %v5405_v58, %v5317_v20  ;;  %v5918_v8 = vmax.f32 %v5263_v14, 0.0 }
 0x904   : > { %v5318_v29 = vpop.f32.mrf.mxu1  ;;  %6389 = vmatpush.bf16.msra.mxu3 %v8376_v22 }
 0x905   : > { %v5319_v50 = vadd.f32 %v5318_v29, %v11578_v41  ;;  %v5863_v37 = vmax.f32 %v5406_v48, 0.0 }
 0x906   : > { %v5175_v3 = vpop.f32.mrf.mxu3  ;;  %v5264_v61 = vpop.f32.mrf.mxu0 }
 0x907   : > { %v5176_v62 = vadd.f32 %v5175_v3, %v11465_v32 }
 0x909   : > { %v5265_v40 = vadd.f32 %v5264_v61, %v5176_v62 }
 0x90a   : > { %v5407_v30 = vpop.f32.mrf.mxu2 }
 0x90b   : > { %v5922_v44 = vmax.f32 %v5265_v40, 0.0  ;;  %v5408_v38 = vadd.f32 %v5407_v30, %v5319_v50  ;;  %5493 = vmatmul.bf16.gmra.mxu3 %v11443_v16  ;;  %v8567_v50 = vld [vmem:[#allocation13 + $0x1e0] sm:$0xf]  ;;  %v8890_v40 = vld [vmem:[#allocation13 + $0x1e4] sm:$0xf0] }
 0x90c   : > { %v5321_v24 = vpop.f32.mrf.mxu1 }
 0x90d   : > { %v5867_v5 = vmax.f32 %v5408_v38, 0.0  ;;  %v11676_v20 = vpack.c.bf16 %v5922_v44, %v5918_v8  ;;  %v5322_v29 = vadd.f32 %v5321_v24, %v11578_v41  ;;  %v8568_v8 = vor.u32 %v8890_v40, %v8567_v50  ;;  %v8439_v44 = vld [vmem:[#allocation13 + $0xe0] sm:$0xf]  ;;  %v8858_v38 = vld [vmem:[#allocation13 + $0xe4] sm:$0xf0] }
 0x90e   : > { %v5178_v58 = vpop.f32.mrf.mxu3  ;;  %v5267_v17 = vpop.f32.mrf.mxu0  ;;  %v8440_v18 = vor.u32 %v8858_v38, %v8439_v44  ;;  %v11691_v50 = vld [vmem:[%s12860_s2] sm:$0xf] }
 0x90f   : > { %12874 = vst [vmem:[#allocation80_spill] sm:$0xff] %v11676_v20  ;;  %v5179_v3 = vadd.f32 %v5178_v58, %v11465_v32  ;;  %5636 = vmatmul.bf16.vlgmr.msrb.gmra.mxu1 %v11360_v56  ;;  %5725 = vmatmul.bf16.vlgmr.msrb.gmra.mxu2 %v11365_v7  ;;  %v11681_v14 = vpack.c.bf16 %v5867_v5, %v5863_v37  ;;  %v8503_v56 = vld [vmem:[#allocation13 + $0x160] sm:$0xf]  ;;  %v11694_v40 = vperm.slane %v11691_v50, 2  ;;  %v8868_v20 = vld [vmem:[#allocation13 + $0x134] sm:$0xf0] }
 0x910   : > { %6656 = vmatpush.bf16.msra.mxu2 %v8568_v8  ;;  %v8504_v22 = vor.u32 %v8874_v23, %v8503_v56  ;;  %6478 = vmatpush.bf16.msra.mxu0 %v8440_v18 }
 0x911   : > { %12875 = vst [vmem:[#allocation46_spill] sm:$0xff] %v11681_v14  ;;  %v5268_v48 = vadd.f32 %v5267_v17, %v5179_v3  ;;  %5582 = vmatmul.bf16.gmra.mxu0 %v11447_v4 }
 0x912   : > { %v5410_v61 = vpop.f32.mrf.mxu2  ;;  %6567 = vmatpush.bf16.msra.mxu1 %v8504_v22 }
 0x913   : > { %v5411_v62 = vadd.f32 %v5410_v61, %v5322_v29  ;;  %v5926_v3 = vmax.f32 %v5268_v48, 0.0 }
 0x914   : > { %v5323_v30 = vpop.f32.mrf.mxu1 }
 0x915   : > { %v5324_v17 = vadd.f32 %v5323_v30, %v11578_v41  ;;  %v5871_v8 = vmax.f32 %v5411_v62, 0.0 }
 0x916   : > { %v5180_v7 = vpop.f32.mrf.mxu3  ;;  %v5269_v37 = vpop.f32.mrf.mxu0 }
 0x917   : > { %v5181_v24 = vadd.f32 %v5180_v7, %v11465_v32 }
 0x919   : > { %v5270_v5 = vadd.f32 %v5269_v37, %v5181_v24 }
 0x91a   : > { %v5412_v58 = vpop.f32.mrf.mxu2 }
 0x91b   : > { %v5930_v29 = vmax.f32 %v5270_v5, 0.0  ;;  %v5413_v61 = vadd.f32 %v5412_v58, %v5324_v17  ;;  %5498 = vmatmul.bf16.gmra.mxu3 %v11460_v33 }
 0x91c   : > { %v5326_v32 = vpop.f32.mrf.mxu1 }
 0x91d   : > { %v5875_v44 = vmax.f32 %v5413_v61, 0.0  ;;  %v11696_v38 = vpack.c.bf16 %v5930_v29, %v5926_v3  ;;  %v5327_v23 = vadd.f32 %v5326_v32, %v11578_v41  ;;  %v8367_v32 = vld [vmem:[#allocation13 + $0x50] sm:$0xf] }
 0x91e   : > { %v5459_v30 = vpop.f32.mrf.mxu3  ;;  %v5548_v18 = vpop.f32.mrf.mxu0 }
 0x91f   : > { %12876 = vst [vmem:[#allocation47_spill] sm:$0xff] %v11696_v38  ;;  %v5460_v48 = vadd.f32 %v5459_v30, %v11694_v40  ;;  %5641 = vmatmul.bf16.gmra.mxu1 %v11372_v10  ;;  %5730 = vmatmul.bf16.gmra.mxu2 %v11377_v63  ;;  %v11701_v56 = vpack.c.bf16 %v5875_v44, %v5871_v8  ;;  %v8840_v8 = vld [vmem:[#allocation13 + $0x54] sm:$0xf0] }
 0x920   : > { %v8368_v30 = vor.u32 %v8840_v8, %v8367_v32  ;;  %v8495_v8 = vld [vmem:[#allocation13 + $0x150] sm:$0xf] }
 0x921   : > { %12877 = vst [vmem:[#allocation57_spill] sm:$0xff] %v11701_v56  ;;  %v5549_v7 = vadd.f32 %v5548_v18, %v5460_v48  ;;  %5587 = vmatmul.bf16.gmra.mxu0 %v11467_v11 }
 0x922   : > { %v5415_v37 = vpop.f32.mrf.mxu2  ;;  %6390 = vmatpush.bf16.msra.mxu3 %v8368_v30 }
 0x923   : > { %v5416_v62 = vadd.f32 %v5415_v37, %v5327_v23  ;;  %v5808_v29 = vmax.f32 %v5549_v7, 0.0 }
 0x924   : > { %v5328_v22 = vpop.f32.mrf.mxu1 }
 0x925   : > { %v5329_v58 = vadd.f32 %v5328_v22, %v11578_v41  ;;  %v5879_v18 = vmax.f32 %v5416_v62, 0.0 }
 0x926   : > { %v5461_v24 = vpop.f32.mrf.mxu3  ;;  %v5550_v17 = vpop.f32.mrf.mxu0 }
 0x927   : > { %v5462_v5 = vadd.f32 %v5461_v24, %v11694_v40 }
 0x929   : > { %v5551_v3 = vadd.f32 %v5550_v17, %v5462_v5 }
 0x92a   : > { %v5417_v10 = vpop.f32.mrf.mxu2 }
 0x92b   : > { %v5812_v63 = vmax.f32 %v5551_v3, 0.0  ;;  %v5418_v61 = vadd.f32 %v5417_v10, %v5329_v58  ;;  %5503 = vmatmul.bf16.gmra.mxu3 %v11477_v45  ;;  %v8559_v58 = vld [vmem:[#allocation13 + $0x1d0] sm:$0xf]  ;;  %v8888_v3 = vld [vmem:[#allocation13 + $0x1d4] sm:$0xf0] }
 0x92c   : > { %v5331_v44 = vpop.f32.mrf.mxu1 }
 0x92d   : > { %v11708_v48 = vpack.c.bf16 %v5812_v63, %v5808_v29  ;;  %v5883_v23 = vmax.f32 %v5418_v61, 0.0  ;;  %v5332_v24 = vadd.f32 %v5331_v44, %v11578_v41  ;;  %v8560_v29 = vor.u32 %v8888_v3, %v8559_v58  ;;  %v8431_v63 = vld [vmem:[#allocation13 + $0xd0] sm:$0xf]  ;;  %v8856_v61 = vld [vmem:[#allocation13 + $0xd4] sm:$0xf0] }
 0x92e   : > { %v5464_v37 = vpop.f32.mrf.mxu3  ;;  %v5553_v38 = vpop.f32.mrf.mxu0  ;;  %v8432_v32 = vor.u32 %v8856_v61, %v8431_v63 }
 0x92f   : > { %12878 = vst [vmem:[#allocation32_spill] sm:$0xff] %v11708_v48  ;;  %v5465_v22 = vadd.f32 %v5464_v37, %v11694_v40  ;;  %5646 = vmatmul.bf16.gmra.mxu1 %v11384_v35  ;;  %5735 = vmatmul.bf16.gmra.mxu2 %v11389_v46  ;;  %v11713_v7 = vpack.c.bf16 %v5883_v23, %v5879_v18  ;;  %v8872_v35 = vld [vmem:[#allocation13 + $0x154] sm:$0xf0] }
 0x930   : > { %6657 = vmatpush.bf16.msra.mxu2 %v8560_v29  ;;  %v8496_v18 = vor.u32 %v8872_v35, %v8495_v8  ;;  %6479 = vmatpush.bf16.msra.mxu0 %v8432_v32 }
 0x931   : > { %12879 = vst [vmem:[#allocation81_spill] sm:$0xff] %v11713_v7  ;;  %v5554_v17 = vadd.f32 %v5553_v38, %v5465_v22  ;;  %5592 = vmatmul.bf16.gmra.mxu0 %v11483_v49 }
 0x932   : > { %v5420_v62 = vpop.f32.mrf.mxu2  ;;  %6568 = vmatpush.bf16.msra.mxu1 %v8496_v18 }
 0x933   : > { %v5421_v5 = vadd.f32 %v5420_v62, %v5332_v24  ;;  %v5816_v22 = vmax.f32 %v5554_v17, 0.0 }
 0x934   : > { %v5333_v10 = vpop.f32.mrf.mxu1 }
 0x935   : > { %v5334_v38 = vadd.f32 %v5333_v10, %v11578_v41  ;;  %v5887_v3 = vmax.f32 %v5421_v5, 0.0 }
 0x936   : > { %v5466_v30 = vpop.f32.mrf.mxu3  ;;  %v5555_v46 = vpop.f32.mrf.mxu0 }
 0x937   : > { %v5467_v44 = vadd.f32 %v5466_v30, %v11694_v40 }
 0x939   : > { %v5556_v23 = vadd.f32 %v5555_v46, %v5467_v44 }
 0x93a   : > { %v5422_v37 = vpop.f32.mrf.mxu2 }
 0x93b   : > { %v5820_v24 = vmax.f32 %v5556_v23, 0.0  ;;  %v5423_v62 = vadd.f32 %v5422_v37, %v5334_v38  ;;  %5508 = vmatmul.bf16.gmra.mxu3 %v11493_v9 }
 0x93c   : > { %v5336_v58 = vpop.f32.mrf.mxu1 }
 0x93d   : > { %v5891_v63 = vmax.f32 %v5423_v62, 0.0  ;;  %v11720_v61 = vpack.c.bf16 %v5820_v24, %v5816_v22  ;;  %v5337_v17 = vadd.f32 %v5336_v58, %v11578_v41  ;;  %v8359_v62 = vld [vmem:[#allocation13 + $0x40] sm:$0xf]  ;;  %v8838_v58 = vld [vmem:[#allocation13 + $0x44] sm:$0xf0] }
 0x93e   : > { %v5469_v29 = vpop.f32.mrf.mxu3  ;;  %v5558_v8 = vpop.f32.mrf.mxu0 }
 0x93f   : > { %12880 = vst [vmem:[#allocation48_spill] sm:$0xff] %v11720_v61  ;;  %v5470_v35 = vadd.f32 %v5469_v29, %v11694_v40  ;;  %5651 = vmatmul.bf16.gmra.mxu1 %v11396_v15  ;;  %5740 = vmatmul.bf16.gmra.mxu2 %v11401_v36  ;;  %v11725_v10 = vpack.c.bf16 %v5891_v63, %v5887_v3 }
 0x940   : > { %v8360_v63 = vor.u32 %v8838_v58, %v8359_v62  ;;  %v8487_v58 = vld [vmem:[#allocation13 + $0x140] sm:$0xf] }
 0x941   : > { %12881 = vst [vmem:[#allocation49_spill] sm:$0xff] %v11725_v10  ;;  %v5559_v32 = vadd.f32 %v5558_v8, %v5470_v35  ;;  %5597 = vmatmul.bf16.gmra.mxu0 %v11499_v42 }
 0x942   : > { %v5425_v30 = vpop.f32.mrf.mxu2  ;;  %6391 = vmatpush.bf16.msra.mxu3 %v8360_v63 }
 0x943   : > { %v5426_v5 = vadd.f32 %v5425_v30, %v5337_v17  ;;  %v5824_v22 = vmax.f32 %v5559_v32, 0.0 }
 0x944   : > { %v5338_v46 = vpop.f32.mrf.mxu1 }
 0x945   : > { %v5339_v23 = vadd.f32 %v5338_v46, %v11578_v41  ;;  %v5895_v29 = vmax.f32 %v5426_v5, 0.0 }
 0x946   : > { %v5471_v18 = vpop.f32.mrf.mxu3  ;;  %v5560_v44 = vpop.f32.mrf.mxu0 }
 0x947   : > { %v5472_v38 = vadd.f32 %v5471_v18, %v11694_v40 }
 0x949   : > { %v5561_v37 = vadd.f32 %v5560_v44, %v5472_v38 }
 0x94a   : > { %v5427_v15 = vpop.f32.mrf.mxu2 }
 0x94b   : > { %v5828_v36 = vmax.f32 %v5561_v37, 0.0  ;;  %v5428_v24 = vadd.f32 %v5427_v15, %v5339_v23  ;;  %5513 = vmatmul.bf16.gmra.mxu3 %v11509_v1  ;;  %v8551_v23 = vld [vmem:[#allocation13 + $0x1c0] sm:$0xf]  ;;  %v8886_v37 = vld [vmem:[#allocation13 + $0x1c4] sm:$0xf0] }
 0x94c   : > { %v5341_v3 = vpop.f32.mrf.mxu1 }
 0x94d   : > { %v5899_v8 = vmax.f32 %v5428_v24, 0.0  ;;  %v11732_v35 = vpack.c.bf16 %v5828_v36, %v5824_v22  ;;  %v5342_v18 = vadd.f32 %v5341_v3, %v11578_v41  ;;  %v8552_v22 = vor.u32 %v8886_v37, %v8551_v23  ;;  %v8423_v36 = vld [vmem:[#allocation13 + $0xc0] sm:$0xf]  ;;  %v8854_v24 = vld [vmem:[#allocation13 + $0xc4] sm:$0xf0] }
 0x94e   : > { %v5474_v17 = vpop.f32.mrf.mxu3  ;;  %v5563_v30 = vpop.f32.mrf.mxu0  ;;  %v8424_v62 = vor.u32 %v8854_v24, %v8423_v36 }
 0x94f   : > { %12882 = vst [vmem:[#allocation61_spill] sm:$0xff] %v11732_v35  ;;  %v5475_v46 = vadd.f32 %v5474_v17, %v11694_v40  ;;  %5656 = vmatmul.bf16.gmra.mxu1 %v11408_v12  ;;  %5745 = vmatmul.bf16.gmra.mxu2 %v11413_v53  ;;  %v11737_v32 = vpack.c.bf16 %v5899_v8, %v5895_v29  ;;  %v8870_v12 = vld [vmem:[#allocation13 + $0x144] sm:$0xf0] }
 0x950   : > { %6658 = vmatpush.bf16.msra.mxu2 %v8552_v22  ;;  %v8488_v29 = vor.u32 %v8870_v12, %v8487_v58  ;;  %6480 = vmatpush.bf16.msra.mxu0 %v8424_v62 }
 0x951   : > { %12883 = vst [vmem:[#allocation24_spill] sm:$0xff] %v11737_v32  ;;  %v5564_v44 = vadd.f32 %v5563_v30, %v5475_v46  ;;  %5602 = vmatmul.bf16.gmra.mxu0 %v11515_v55 }
 0x952   : > { %v5430_v5 = vpop.f32.mrf.mxu2  ;;  %6569 = vmatpush.bf16.msra.mxu1 %v8488_v29 }
 0x953   : > { %v5431_v38 = vadd.f32 %v5430_v5, %v5342_v18  ;;  %v5832_v46 = vmax.f32 %v5564_v44, 0.0 }
 0x954   : > { %v5343_v15 = vpop.f32.mrf.mxu1 }
 0x955   : > { %v5344_v8 = vadd.f32 %v5343_v15, %v11578_v41  ;;  %v5903_v37 = vmax.f32 %v5431_v38, 0.0 }
 0x956   : > { %v5476_v63 = vpop.f32.mrf.mxu3  ;;  %v5565_v53 = vpop.f32.mrf.mxu0 }
 0x957   : > { %v5477_v3 = vadd.f32 %v5476_v63, %v11694_v40 }
 0x959   : > { %v5566_v17 = vadd.f32 %v5565_v53, %v5477_v3 }
 0x95a   : > { %v5432_v30 = vpop.f32.mrf.mxu2 }
 0x95b   : > { %v5836_v18 = vmax.f32 %v5566_v17, 0.0  ;;  %v5433_v5 = vadd.f32 %v5432_v30, %v5344_v8  ;;  %5518 = vmatmul.bf16.gmra.mxu3 %v11525_v21 }
 0x95c   : > { %v5346_v23 = vpop.f32.mrf.mxu1 }
 0x95d   : > { %v5907_v36 = vmax.f32 %v5433_v5, 0.0  ;;  %v11744_v24 = vpack.c.bf16 %v5836_v18, %v5832_v46  ;;  %v5347_v44 = vadd.f32 %v5346_v23, %v11578_v41  ;;  %v8351_v46 = vld [vmem:[#allocation13 + $0x30] sm:$0xf] }
 0x95e   : > { %v5479_v22 = vpop.f32.mrf.mxu3  ;;  %v5568_v58 = vpop.f32.mrf.mxu0 }
 0x95f   : > { %12884 = vst [vmem:[#allocation82_spill] sm:$0xff] %v11744_v24  ;;  %v5480_v12 = vadd.f32 %v5479_v22, %v11694_v40  ;;  %5661 = vmatmul.bf16.gmra.mxu1 %v11420_v6  ;;  %5750 = vmatmul.bf16.gmra.mxu2 %v11425_v19  ;;  %v11749_v15 = vpack.c.bf16 %v5907_v36, %v5903_v37  ;;  %v8836_v19 = vld [vmem:[#allocation13 + $0x34] sm:$0xf0] }
 0x960   : > { %v8352_v23 = vor.u32 %v8836_v19, %v8351_v46 }
 0x961   : > { %12885 = vst [vmem:[#allocation51_spill] sm:$0xff] %v11749_v15  ;;  %v5569_v62 = vadd.f32 %v5568_v58, %v5480_v12  ;;  %5607 = vmatmul.bf16.gmra.mxu0 %v11531_v54 }
 0x962   : > { %v5435_v63 = vpop.f32.mrf.mxu2  ;;  %6392 = vmatpush.bf16.msra.mxu3 %v8352_v23  ;;  %v8543_v23 = vld [vmem:[#allocation13 + $0x1b0] sm:$0xf] }
 0x963   : > { %v5436_v38 = vadd.f32 %v5435_v63, %v5347_v44  ;;  %v5840_v18 = vmax.f32 %v5569_v62, 0.0 }
 0x964   : > { %v5348_v53 = vpop.f32.mrf.mxu1 }
 0x965   : > { %v5349_v17 = vadd.f32 %v5348_v53, %v11578_v41  ;;  %v5911_v22 = vmax.f32 %v5436_v38, 0.0  ;;  %v8834_v53 = vld [vmem:[#allocation13 + $0x24] sm:$0xf0] }
 0x966   : > { %v5481_v29 = vpop.f32.mrf.mxu3  ;;  %v5570_v3 = vpop.f32.mrf.mxu0 }
 0x967   : > { %v5482_v8 = vadd.f32 %v5481_v29, %v11694_v40  ;;  %v8343_v29 = vld [vmem:[#allocation13 + $0x20] sm:$0xf] }
 0x968   : > { %v8344_v62 = vor.u32 %v8834_v53, %v8343_v29  ;;  %v8850_v29 = vld [vmem:[#allocation13 + $0xa4] sm:$0xf0]  ;;  %v8479_v53 = vld [vmem:[#allocation13 + $0x130] sm:$0xf] }
 0x969   : > { %v5571_v30 = vadd.f32 %v5570_v3, %v5482_v8 }
 0x96a   : > { %v5437_v6 = vpop.f32.mrf.mxu2  ;;  %6393 = vmatpush.bf16.msra.mxu3 %v8344_v62  ;;  %v8480_v62 = vor.u32 %v8868_v20, %v8479_v53  ;;  %v8846_v53 = vld [vmem:[#allocation13 + $0x84] sm:$0xf0] }
 0x96b   : > { %v5844_v5 = vmax.f32 %v5571_v30, 0.0  ;;  %v5438_v37 = vadd.f32 %v5437_v6, %v5349_v17  ;;  %5523 = vmatmul.bf16.gmra.mxu3 %v11541_v57  ;;  %v8415_v17 = vld [vmem:[#allocation13 + $0xb0] sm:$0xf]  ;;  %v8852_v30 = vld [vmem:[#allocation13 + $0xb4] sm:$0xf0] }
 0x96c   : > { %v5351_v36 = vpop.f32.mrf.mxu1  ;;  %v8416_v46 = vor.u32 %v8852_v30, %v8415_v17  ;;  %v8327_v17 = vld [vmem:[#allocation13] sm:$0xf]  ;;  %v8830_v30 = vld [vmem:[#allocation13 + $0x4] sm:$0xf0]  ;;  %6570 = vmatpush.bf16.msra.mxu1 %v8480_v62 }
 0x96d   : > { %v5915_v58 = vmax.f32 %v5438_v37, 0.0  ;;  %v11756_v12 = vpack.c.bf16 %v5844_v5, %v5840_v18  ;;  %v5352_v38 = vadd.f32 %v5351_v36, %v11578_v41  ;;  %v8335_v18 = vld [vmem:[#allocation13 + $0x10] sm:$0xf]  ;;  %v8832_v5 = vld [vmem:[#allocation13 + $0x14] sm:$0xf0] }
 0x96e   : > { %v5484_v44 = vpop.f32.mrf.mxu3  ;;  %v5573_v63 = vpop.f32.mrf.mxu0  ;;  %6481 = vmatpush.bf16.msra.mxu0 %v8416_v46  ;;  %v8399_v46 = vld [vmem:[#allocation13 + $0x90] sm:$0xf] }
 0x96f   : > { %12886 = vst [vmem:[#allocation35_spill] sm:$0xff] %v11756_v12  ;;  %v5485_v3 = vadd.f32 %v5484_v44, %v11694_v40  ;;  %5666 = vmatmul.bf16.gmra.mxu1 %v11432_v0  ;;  %5755 = vmatmul.bf16.gmra.mxu2 %v11437_v26  ;;  %v11761_v8 = vpack.c.bf16 %v5915_v58, %v5911_v22  ;;  %v8884_v0 = vld [vmem:[#allocation13 + $0x1b4] sm:$0xf0]  ;;  %v8407_v58 = vld [vmem:[#allocation13 + $0xa0] sm:$0xf] }
 0x970   : > { %v8336_v26 = vor.u32 %v8832_v5, %v8335_v18  ;;  %v8544_v22 = vor.u32 %v8884_v0, %v8543_v23  ;;  %v8408_v36 = vor.u32 %v8850_v29, %v8407_v58  ;;  %v8848_v18 = vld [vmem:[#allocation13 + $0x94] sm:$0xf0] }
 0x971   : > { %12887 = vst [vmem:[#allocation65_spill] sm:$0xff] %v11761_v8  ;;  %v5574_v6 = vadd.f32 %v5573_v63, %v5485_v3  ;;  %5612 = vmatmul.bf16.gmra.mxu0 %v11547_v2  ;;  %v8400_v0 = vor.u32 %v8848_v18, %v8399_v46 }
 0x972   : > { %v5440_v19 = vpop.f32.mrf.mxu2  ;;  %6394 = vmatpush.bf16.msra.mxu3 %v8336_v26  ;;  %6659 = vmatpush.bf16.msra.mxu2 %v8544_v22  ;;  %v8391_v22 = vld [vmem:[#allocation13 + $0x80] sm:$0xf] }
 0x973   : > { %v5441_v37 = vadd.f32 %v5440_v19, %v5352_v38  ;;  %6482 = vmatpush.bf16.msra.mxu0 %v8408_v36  ;;  %v8328_v19 = vor.u32 %v8830_v30, %v8327_v17  ;;  %v5848_v58 = vmax.f32 %v5574_v6, 0.0  ;;  %v8392_v62 = vor.u32 %v8846_v53, %v8391_v22 }
 0x974   : > { %v5353_v44 = vpop.f32.mrf.mxu1 }
 0x975   : > { %v5354_v5 = vadd.f32 %v5353_v44, %v11578_v41  ;;  %v5919_v36 = vmax.f32 %v5441_v37, 0.0 }
 0x976   : > { %v5486_v63 = vpop.f32.mrf.mxu3  ;;  %v5575_v3 = vpop.f32.mrf.mxu0  ;;  %6395 = vmatpush.bf16.msra.mxu3 %v8328_v19 }
 0x977   : > { %v5487_v38 = vadd.f32 %v5486_v63, %v11694_v40  ;;  %6483 = vmatpush.bf16.msra.mxu0 %v8400_v0 }
 0x979   : > { %v5576_v23 = vadd.f32 %v5575_v3, %v5487_v38 }
 0x97a   : > { %v5442_v26 = vpop.f32.mrf.mxu2 }
 0x97b   : > { %v5852_v29 = vmax.f32 %v5576_v23, 0.0  ;;  %v5443_v8 = vadd.f32 %v5442_v26, %v5354_v5  ;;  %5528 = vmatmul.bf16.gmra.mxu3 %v11557_v43  ;;  %6484 = vmatpush.bf16.msra.mxu0 %v8392_v62 }
 0x97c   : > { %v5356_v20 = vpop.f32.mrf.mxu1 }
 0x97d   : > { %v5923_v63 = vmax.f32 %v5443_v8, 0.0  ;;  %v11768_v17 = vpack.c.bf16 %v5852_v29, %v5848_v58  ;;  %v5357_v38 = vadd.f32 %v5356_v20, %v11578_v41 }
 0x97e   : > { %v5489_v30 = vpop.f32.mrf.mxu3  ;;  %v5578_v44 = vpop.f32.mrf.mxu0 }
 0x97f   : > { %12888 = vst [vmem:[#allocation21_spill] sm:$0xff] %v11768_v17  ;;  %v5490_v3 = vadd.f32 %v5489_v30, %v11694_v40  ;;  %5671 = vmatmul.bf16.gmra.mxu1 %v11443_v16  ;;  %5760 = vmatmul.bf16.gmra.mxu2 %v11447_v4  ;;  %v11773_v6 = vpack.c.bf16 %v5923_v63, %v5919_v36  ;;  %v11781_v36 = vperm.slane %v11691_v50, 3 }
 0x981   : > { %v5579_v19 = vadd.f32 %v5578_v44, %v5490_v3  ;;  %5617 = vmatmul.bf16.gmra.mxu0 %v11563_v47 }
 0x982   : > { %v5445_v8 = vpop.f32.mrf.mxu2 }
 0x983   : > { %v5446_v37 = vadd.f32 %v5445_v8, %v5357_v38  ;;  %v5856_v4 = vmax.f32 %v5579_v19, 0.0  ;;  %v8535_v8 = vld [vmem:[#allocation13 + $0x1a0] sm:$0xf] }
 0x984   : > { %v5358_v46 = vpop.f32.mrf.mxu1 }
 0x985   : > { %v5359_v0 = vadd.f32 %v5358_v46, %v11578_v41  ;;  %v5927_v22 = vmax.f32 %v5446_v37, 0.0  ;;  %v8882_v37 = vld [vmem:[#allocation13 + $0x1a4] sm:$0xf0] }
 0x986   : > { %v5491_v18 = vpop.f32.mrf.mxu3  ;;  %v5580_v5 = vpop.f32.mrf.mxu0 }
 0x987   : > { %v5492_v23 = vadd.f32 %v5491_v18, %v11694_v40  ;;  %v8536_v18 = vor.u32 %v8882_v37, %v8535_v8 }
 0x989   : > { %v5581_v16 = vadd.f32 %v5580_v5, %v5492_v23  ;;  %v8471_v5 = vld [vmem:[#allocation13 + $0x120] sm:$0xf]  ;;  %v8866_v23 = vld [vmem:[#allocation13 + $0x124] sm:$0xf0]  ;;  %6660 = vmatpush.bf16.msra.mxu2 %v8536_v18 }
 0x98a   : > { %v5447_v26 = vpop.f32.mrf.mxu2 }
 0x98b   : > { %v5860_v58 = vmax.f32 %v5581_v16, 0.0  ;;  %v5448_v29 = vadd.f32 %v5447_v26, %v5359_v0  ;;  %5533 = vmatmul.bf16.gmra.mxu3 %v11573_v34 }
 0x98c   : > { %v5637_v20 = vpop.f32.mrf.mxu1 }
 0x98d   : > { %v5931_v53 = vmax.f32 %v5448_v29, 0.0  ;;  %v11783_v63 = vpack.c.bf16 %v5860_v58, %v5856_v4  ;;  %v5638_v3 = vadd.f32 %v5637_v20, %v11781_v36 }
 0x98e   : > { %v5494_v62 = vpop.f32.mrf.mxu3  ;;  %v5583_v30 = vpop.f32.mrf.mxu0 }
 0x98f   : > { %12889 = vst [vmem:[#allocation83_spill] sm:$0xff] %v11783_v63  ;;  %v5495_v44 = vadd.f32 %v5494_v62, %v11694_v40  ;;  %5676 = vmatmul.bf16.gmra.mxu1 %v11460_v33  ;;  %5765 = vmatmul.bf16.gmra.mxu2 %v11467_v11  ;;  %v11788_v41 = vpack.c.bf16 %v5931_v53, %v5927_v22 }
 0x990   : > { %v8472_v33 = vor.u32 %v8866_v23, %v8471_v5 }
 0x991   : > { %v5584_v38 = vadd.f32 %v5583_v30, %v5495_v44  ;;  %5622 = vmatmul.bf16.gmra.mxu0 %v11582_v27 }
 0x992   : > { %v5726_v19 = vpop.f32.mrf.mxu2  ;;  %6571 = vmatpush.bf16.msra.mxu1 %v8472_v33 }
 0x993   : > { %v5727_v50 = vadd.f32 %v5726_v19, %v5638_v3  ;;  %v5864_v29 = vmax.f32 %v5584_v38, 0.0 }
 0x994   : > { %v5639_v46 = vpop.f32.mrf.mxu1 }
 0x995   : > { %v5640_v26 = vadd.f32 %v5639_v46, %v11781_v36  ;;  %v5809_v62 = vmax.f32 %v5727_v50, 0.0 }
 0x996   : > { %v5496_v0 = vpop.f32.mrf.mxu3  ;;  %v5585_v16 = vpop.f32.mrf.mxu0 }
 0x997   : > { %v5497_v11 = vadd.f32 %v5496_v0, %v11694_v40 }
 0x999   : > { %v5586_v4 = vadd.f32 %v5585_v16, %v5497_v11 }
 0x99a   : > { %v5728_v58 = vpop.f32.mrf.mxu2 }
 0x99b   : > { %v5868_v20 = vmax.f32 %v5586_v4, 0.0  ;;  %v5729_v22 = vadd.f32 %v5728_v58, %v5640_v26  ;;  %6396 = vmatmul.bf16.vlgmr.msra.gmra.mxu3 %v11481_v31 }
 0x99c   : > { %v5642_v53 = vpop.f32.mrf.mxu1 }
 0x99d   : > { %v5813_v30 = vmax.f32 %v5729_v22, 0.0  ;;  %v11795_v44 = vpack.c.bf16 %v5868_v20, %v5864_v29  ;;  %v5643_v38 = vadd.f32 %v5642_v53, %v11781_v36 }
 0x99e   : > { %v5499_v3 = vpop.f32.mrf.mxu3  ;;  %v5588_v19 = vpop.f32.mrf.mxu0 }
 0x99f   : > { %v11797_v8 = vpack.c.bf16 %v5813_v30, %v5809_v62  ;;  %v5500_v37 = vadd.f32 %v5499_v3, %v11694_v40  ;;  %5681 = vmatmul.bf16.gmra.mxu1 %v11477_v45  ;;  %5770 = vmatmul.bf16.gmra.mxu2 %v11483_v49 }
 0x9a1   : > { %12890 = vst [vmem:[#allocation69_spill] sm:$0xff] %v11797_v8  ;;  %v5589_v46 = vadd.f32 %v5588_v19, %v5500_v37  ;;  %6485 = vmatmul.bf16.vlgmr.msra.gmra.mxu0 %v11594_v25 }
 0x9a2   : > { %v5731_v18 = vpop.f32.mrf.mxu2 }
 0x9a3   : > { %v5732_v50 = vadd.f32 %v5731_v18, %v5643_v38  ;;  %v5872_v4 = vmax.f32 %v5589_v46, 0.0  ;;  %v8527_v18 = vld [vmem:[#allocation13 + $0x190] sm:$0xf] }
 0x9a4   : > { %v5644_v5 = vpop.f32.mrf.mxu1 }
 0x9a5   : > { %v5645_v33 = vadd.f32 %v5644_v5, %v11781_v36  ;;  %v5817_v29 = vmax.f32 %v5732_v50, 0.0  ;;  %v8880_v50 = vld [vmem:[#allocation13 + $0x194] sm:$0xf0] }
 0x9a6   : > { %v5501_v23 = vpop.f32.mrf.mxu3  ;;  %v5590_v0 = vpop.f32.mrf.mxu0 }
 0x9a7   : > { %v5502_v16 = vadd.f32 %v5501_v23, %v11694_v40  ;;  %v8528_v23 = vor.u32 %v8880_v50, %v8527_v18 }
 0x9a9   : > { %v5591_v11 = vadd.f32 %v5590_v0, %v5502_v16  ;;  %v8463_v0 = vld [vmem:[#allocation13 + $0x110] sm:$0xf]  ;;  %v8864_v16 = vld [vmem:[#allocation13 + $0x114] sm:$0xf0]  ;;  %6661 = vmatpush.bf16.msra.mxu2 %v8528_v23 }
 0x9aa   : > { %v5733_v26 = vpop.f32.mrf.mxu2 }
 0x9ab   : > { %v5876_v45 = vmax.f32 %v5591_v11, 0.0  ;;  %v5734_v58 = vadd.f32 %v5733_v26, %v5645_v33  ;;  %6401 = vmatmul.bf16.gmra.mxu3 %v11497_v28 }
 0x9ac   : > { %v5647_v49 = vpop.f32.mrf.mxu1 }
 0x9ad   : > { %v5821_v20 = vmax.f32 %v5734_v58, 0.0  ;;  %v11807_v22 = vpack.c.bf16 %v5876_v45, %v5872_v4  ;;  %v5648_v19 = vadd.f32 %v5647_v49, %v11781_v36 }
 0x9ae   : > { %v5504_v53 = vpop.f32.mrf.mxu3  ;;  %v5593_v62 = vpop.f32.mrf.mxu0 }
 0x9af   : > { %v5505_v30 = vadd.f32 %v5504_v53, %v11694_v40  ;;  %5686 = vmatmul.bf16.gmra.mxu1 %v11493_v9  ;;  %5775 = vmatmul.bf16.gmra.mxu2 %v11499_v42  ;;  %v11812_v3 = vpack.c.bf16 %v5821_v20, %v5817_v29  ;;  %v8464_v9 = vor.u32 %v8864_v16, %v8463_v0 }
 0x9b1   : > { %12891 = vst [vmem:[#allocation23_spill] sm:$0xff] %v11812_v3  ;;  %v5594_v37 = vadd.f32 %v5593_v62, %v5505_v30  ;;  %6490 = vmatmul.bf16.gmra.mxu0 %v11609_v51  ;;  %6572 = vmatpush.bf16.msra.mxu1 %v8464_v9 }
 0x9b2   : > { %v5736_v38 = vpop.f32.mrf.mxu2 }
 0x9b3   : > { %v5737_v46 = vadd.f32 %v5736_v38, %v5648_v19  ;;  %v5880_v58 = vmax.f32 %v5594_v37, 0.0 }
 0x9b4   : > { %v5649_v5 = vpop.f32.mrf.mxu1 }
 0x9b5   : > { %v5650_v26 = vadd.f32 %v5649_v5, %v11781_v36  ;;  %v5825_v53 = vmax.f32 %v5737_v46, 0.0 }
 0x9b6   : > { %v5506_v33 = vpop.f32.mrf.mxu3  ;;  %v5595_v11 = vpop.f32.mrf.mxu0 }
 0x9b7   : > { %v5507_v42 = vadd.f32 %v5506_v33, %v11694_v40 }
 0x9b9   : > { %v5596_v4 = vadd.f32 %v5595_v11, %v5507_v42 }
 0x9ba   : > { %v5738_v45 = vpop.f32.mrf.mxu2 }
 0x9bb   : > { %v5884_v49 = vmax.f32 %v5596_v4, 0.0  ;;  %v5739_v29 = vadd.f32 %v5738_v45, %v5650_v26  ;;  %6406 = vmatmul.bf16.gmra.mxu3 %v11513_v13 }
 0x9bc   : > { %v5652_v20 = vpop.f32.mrf.mxu1 }
 0x9bd   : > { %v5829_v62 = vmax.f32 %v5739_v29, 0.0  ;;  %v11819_v30 = vpack.c.bf16 %v5884_v49, %v5880_v58  ;;  %v5653_v37 = vadd.f32 %v5652_v20, %v11781_v36 }
 0x9be   : > { %v5509_v19 = vpop.f32.mrf.mxu3  ;;  %v5598_v38 = vpop.f32.mrf.mxu0 }
 0x9bf   : > { %v5510_v18 = vadd.f32 %v5509_v19, %v11694_v40  ;;  %5691 = vmatmul.bf16.gmra.mxu1 %v11509_v1  ;;  %5780 = vmatmul.bf16.gmra.mxu2 %v11515_v55  ;;  %v11824_v50 = vpack.c.bf16 %v5829_v62, %v5825_v53 }
 0x9c1   : > { %12892 = vst [vmem:[#allocation52_spill] sm:$0xff] %v11824_v50  ;;  %v5599_v5 = vadd.f32 %v5598_v38, %v5510_v18  ;;  %6495 = vmatmul.bf16.gmra.mxu0 %v11621_v59 }
 0x9c2   : > { %v5741_v23 = vpop.f32.mrf.mxu2 }
 0x9c3   : > { %v5742_v46 = vadd.f32 %v5741_v23, %v5653_v37  ;;  %v5888_v26 = vmax.f32 %v5599_v5, 0.0  ;;  %v8519_v23 = vld [vmem:[#allocation13 + $0x180] sm:$0xf] }
 0x9c4   : > { %v5654_v0 = vpop.f32.mrf.mxu1 }
 0x9c5   : > { %v5655_v9 = vadd.f32 %v5654_v0, %v11781_v36  ;;  %v5833_v58 = vmax.f32 %v5742_v46, 0.0  ;;  %v8878_v46 = vld [vmem:[#allocation13 + $0x184] sm:$0xf0] }
 0x9c6   : > { %v5511_v16 = vpop.f32.mrf.mxu3  ;;  %v5600_v33 = vpop.f32.mrf.mxu0 }
 0x9c7   : > { %v5512_v11 = vadd.f32 %v5511_v16, %v11694_v40  ;;  %v8520_v16 = vor.u32 %v8878_v46, %v8519_v23 }
 0x9c9   : > { %v5601_v42 = vadd.f32 %v5600_v33, %v5512_v11  ;;  %v8455_v33 = vld [vmem:[#allocation13 + $0x100] sm:$0xf]  ;;  %v8862_v11 = vld [vmem:[#allocation13 + $0x104] sm:$0xf0]  ;;  %6662 = vmatpush.bf16.msra.mxu2 %v8520_v16  ;;  %v12895_v16 = vld [vmem:[#allocation79_spill] sm:$0xff] }
 0x9ca   : > { %v5743_v1 = vpop.f32.mrf.mxu2 }
 0x9cb   : > { %v5892_v55 = vmax.f32 %v5601_v42, 0.0  ;;  %v5744_v4 = vadd.f32 %v5743_v1, %v5655_v9  ;;  %6411 = vmatmul.bf16.gmra.mxu3 %v11529_v39 }
 0x9cc   : > { %v5657_v45 = vpop.f32.mrf.mxu1 }
 0x9cd   : > { %v5837_v49 = vmax.f32 %v5744_v4, 0.0  ;;  %v11831_v29 = vpack.c.bf16 %v5892_v55, %v5888_v26  ;;  %v5658_v38 = vadd.f32 %v5657_v45, %v11781_v36 }
 0x9ce   : > { %v5514_v20 = vpop.f32.mrf.mxu3  ;;  %v5603_v53 = vpop.f32.mrf.mxu0 }
 0x9cf   : > { %v5515_v62 = vadd.f32 %v5514_v20, %v11694_v40  ;;  %5696 = vmatmul.bf16.gmra.mxu1 %v11525_v21  ;;  %5785 = vmatmul.bf16.gmra.mxu2 %v11531_v54  ;;  %v11836_v19 = vpack.c.bf16 %v5837_v49, %v5833_v58  ;;  %v8456_v21 = vor.u32 %v8862_v11, %v8455_v33 }
 0x9d1   : > { %12893 = vst [vmem:[#allocation72_spill] sm:$0xff] %v11836_v19  ;;  %v5604_v18 = vadd.f32 %v5603_v53, %v5515_v62  ;;  %6500 = vmatmul.bf16.gmra.mxu0 %v11633_v52  ;;  %6573 = vmatpush.bf16.msra.mxu1 %v8456_v21 }
 0x9d2   : > { %v5746_v37 = vpop.f32.mrf.mxu2 }
 0x9d3   : > { %v5747_v5 = vadd.f32 %v5746_v37, %v5658_v38  ;;  %v5896_v4 = vmax.f32 %v5604_v18, 0.0 }
 0x9d4   : > { %v5659_v0 = vpop.f32.mrf.mxu1 }
 0x9d5   : > { %v5660_v1 = vadd.f32 %v5659_v0, %v11781_v36  ;;  %v5841_v20 = vmax.f32 %v5747_v5, 0.0 }
 0x9d6   : > { %v5516_v9 = vpop.f32.mrf.mxu3  ;;  %v5605_v42 = vpop.f32.mrf.mxu0 }
 0x9d7   : > { %v5517_v54 = vadd.f32 %v5516_v9, %v11694_v40 }
 0x9d9   : > { %v5606_v26 = vadd.f32 %v5605_v42, %v5517_v54 }
 0x9da   : > { %v5748_v55 = vpop.f32.mrf.mxu2 }
 0x9db   : > { %v5900_v45 = vmax.f32 %v5606_v26, 0.0  ;;  %v5749_v58 = vadd.f32 %v5748_v55, %v5660_v1  ;;  %6416 = vmatmul.bf16.gmra.mxu3 %v11545_v60  ;;  %v8337_v60 = vld [vmem:[#allocation13 + $0x18] sm:$0xf0] }
 0x9dc   : > { %v5662_v49 = vpop.f32.mrf.mxu1 }
 0x9dd   : > { %v5845_v53 = vmax.f32 %v5749_v58, 0.0  ;;  %v11843_v62 = vpack.c.bf16 %v5900_v45, %v5896_v4  ;;  %v5663_v18 = vadd.f32 %v5662_v49, %v11781_v36  ;;  %v12896_v4 = vld [vmem:[#allocation76_spill] sm:$0xff]  ;;  %v8843_v45 = vld [vmem:[#allocation13 + $0x74] sm:$0xf]  ;;  %v8385_v58 = vld [vmem:[#allocation13 + $0x78] sm:$0xf0] }
 0x9de   : > { %v5519_v38 = vpop.f32.mrf.mxu3  ;;  %v5608_v37 = vpop.f32.mrf.mxu0 }
 0x9df   : > { %v5520_v23 = vadd.f32 %v5519_v38, %v11694_v40  ;;  %5701 = vmatmul.bf16.gmra.mxu1 %v11541_v57  ;;  %5790 = vmatmul.bf16.gmra.mxu2 %v11547_v2  ;;  %v11848_v46 = vpack.c.bf16 %v5845_v53, %v5841_v20  ;;  %v8388_v20 = vor.u32 %v8843_v45, %v8385_v58  ;;  %v8875_v58 = vld [vmem:[#allocation13 + $0x174] sm:$0xf] }
 0x9e1   : > { %12894 = vst [vmem:[#allocation25_spill] sm:$0xff] %v11848_v46  ;;  %v5609_v0 = vadd.f32 %v5608_v37, %v5520_v23  ;;  %6505 = vmatmul.bf16.gmra.mxu0 %v12895_v16  ;;  %6744 = vmatpush.bf16.msrb.mxu3 %v8388_v20 }
 0x9e2   : > { %v5751_v33 = vpop.f32.mrf.mxu2 }
 0x9e3   : > { %v5752_v5 = vadd.f32 %v5751_v33, %v5663_v18  ;;  %v5904_v26 = vmax.f32 %v5609_v0, 0.0 }
 0x9e4   : > { %v5664_v11 = vpop.f32.mrf.mxu1 }
 0x9e5   : > { %v5665_v54 = vadd.f32 %v5664_v11, %v11781_v36  ;;  %v5849_v53 = vmax.f32 %v5752_v5, 0.0 }
 0x9e6   : > { %v5521_v9 = vpop.f32.mrf.mxu3  ;;  %v5610_v42 = vpop.f32.mrf.mxu0 }
 0x9e7   : > { %v5522_v21 = vadd.f32 %v5521_v9, %v11694_v40 }
 0x9e9   : > { %v5611_v1 = vadd.f32 %v5610_v42, %v5522_v21  ;;  %v12898_v42 = vld [vmem:[#allocation45_spill] sm:$0xff] }
 0x9ea   : > { %v5753_v57 = vpop.f32.mrf.mxu2 }
 0x9eb   : > { %v5908_v2 = vmax.f32 %v5611_v1, 0.0  ;;  %v5754_v55 = vadd.f32 %v5753_v57, %v5665_v54  ;;  %6421 = vmatmul.bf16.gmra.mxu3 %v12896_v4  ;;  %v8891_v54 = vld [vmem:[#allocation13 + $0x1f4] sm:$0xf]  ;;  %v8577_v1 = vld [vmem:[#allocation13 + $0x1f8] sm:$0xf0] }
 0x9ec   : > { %v5667_v49 = vpop.f32.mrf.mxu1 }
 0x9ed   : > { %v5853_v38 = vmax.f32 %v5754_v55, 0.0  ;;  %v11855_v37 = vpack.c.bf16 %v5908_v2, %v5904_v26  ;;  %v5668_v11 = vadd.f32 %v5667_v49, %v11781_v36  ;;  %v8580_v26 = vor.u32 %v8891_v54, %v8577_v1  ;;  %v8859_v2 = vld [vmem:[#allocation13 + $0xf4] sm:$0xf]  ;;  %v8449_v55 = vld [vmem:[#allocation13 + $0xf8] sm:$0xf0] }
 0x9ee   : > { %v5524_v23 = vpop.f32.mrf.mxu3  ;;  %v5613_v18 = vpop.f32.mrf.mxu0  ;;  %v8452_v45 = vor.u32 %v8859_v2, %v8449_v55  ;;  %v12899_v54 = vld [vmem:[#allocation67_spill] sm:$0xff] }
 0x9ef   : > { %v5525_v33 = vadd.f32 %v5524_v23, %v11694_v40  ;;  %5706 = vmatmul.bf16.gmra.mxu1 %v11557_v43  ;;  %5795 = vmatmul.bf16.gmra.mxu2 %v11563_v47  ;;  %v11860_v0 = vpack.c.bf16 %v5853_v38, %v5849_v53  ;;  %v8513_v43 = vld [vmem:[#allocation13 + $0x178] sm:$0xf0] }
 0x9f0   : > { %7011 = vmatpush.bf16.msrb.mxu2 %v8580_v26  ;;  %v8516_v53 = vor.u32 %v8875_v58, %v8513_v43  ;;  %6833 = vmatpush.bf16.msrb.mxu0 %v8452_v45 }
 0x9f1   : > { %12897 = vst [vmem:[#allocation54_spill] sm:$0xff] %v11860_v0  ;;  %v5614_v9 = vadd.f32 %v5613_v18, %v5525_v33  ;;  %6510 = vmatmul.bf16.gmra.mxu0 %v12898_v42 }
 0x9f2   : > { %v5756_v5 = vpop.f32.mrf.mxu2  ;;  %6922 = vmatpush.bf16.msrb.mxu1 %v8516_v53 }
 0x9f3   : > { %v5757_v21 = vadd.f32 %v5756_v5, %v5668_v11  ;;  %v5912_v33 = vmax.f32 %v5614_v9, 0.0 }
 0x9f4   : > { %v5669_v57 = vpop.f32.mrf.mxu1 }
 0x9f5   : > { %v5670_v38 = vadd.f32 %v5669_v57, %v11781_v36  ;;  %v5857_v2 = vmax.f32 %v5757_v21, 0.0 }
 0x9f6   : > { %v5526_v20 = vpop.f32.mrf.mxu3  ;;  %v5615_v47 = vpop.f32.mrf.mxu0 }
 0x9f7   : > { %v5527_v49 = vadd.f32 %v5526_v20, %v11694_v40  ;;  %v12902_v20 = vld [vmem:[#allocation22_spill] sm:$0xff] }
 0x9f9   : > { %v5616_v23 = vadd.f32 %v5615_v47, %v5527_v49 }
 0x9fa   : > { %v5758_v18 = vpop.f32.mrf.mxu2 }
 0x9fb   : > { %v5916_v11 = vmax.f32 %v5616_v23, 0.0  ;;  %v5759_v5 = vadd.f32 %v5758_v18, %v5670_v38  ;;  %6426 = vmatmul.bf16.gmra.mxu3 %v12899_v54 }
 0x9fc   : > { %v5672_v1 = vpop.f32.mrf.mxu1 }
 0x9fd   : > { %v5861_v55 = vmax.f32 %v5759_v5, 0.0  ;;  %v11867_v42 = vpack.c.bf16 %v5916_v11, %v5912_v33  ;;  %v5673_v9 = vadd.f32 %v5672_v1, %v11781_v36  ;;  %v8377_v11 = vld [vmem:[#allocation13 + $0x68] sm:$0xf0] }
 0x9fe   : > { %v5529_v26 = vpop.f32.mrf.mxu3  ;;  %v5618_v58 = vpop.f32.mrf.mxu0 }
 0x9ff   : > { %12900 = vst [vmem:[#allocation56_spill] sm:$0xff] %v11867_v42  ;;  %v5530_v43 = vadd.f32 %v5529_v26, %v11694_v40  ;;  %5711 = vmatmul.bf16.gmra.mxu1 %v11573_v34  ;;  %5800 = vmatmul.bf16.gmra.mxu2 %v11582_v27  ;;  %v11872_v57 = vpack.c.bf16 %v5861_v55, %v5857_v2  ;;  %v8841_v34 = vld [vmem:[#allocation13 + $0x64] sm:$0xf]  ;;  %v12903_v26 = vld [vmem:[#allocation77_spill] sm:$0xff] }
 0xa00   : > { %v8380_v5 = vor.u32 %v8841_v34, %v8377_v11 }
 0xa01   : > { %12901 = vst [vmem:[#allocation29_spill] sm:$0xff] %v11872_v57  ;;  %v5619_v45 = vadd.f32 %v5618_v58, %v5530_v43  ;;  %6515 = vmatmul.bf16.gmra.mxu0 %v12902_v20 }
 0xa02   : > { %v5761_v47 = vpop.f32.mrf.mxu2  ;;  %6745 = vmatpush.bf16.msrb.mxu3 %v8380_v5 }
 0xa03   : > { %v5762_v21 = vadd.f32 %v5761_v47, %v5673_v9  ;;  %v5920_v2 = vmax.f32 %v5619_v45, 0.0 }
 0xa04   : > { %v5674_v53 = vpop.f32.mrf.mxu1 }
 0xa05   : > { %v5675_v18 = vadd.f32 %v5674_v53, %v11781_v36  ;;  %v5865_v43 = vmax.f32 %v5762_v21, 0.0  ;;  %v8569_v21 = vld [vmem:[#allocation13 + $0x1e8] sm:$0xf0] }
 0xa06   : > { %v5531_v49 = vpop.f32.mrf.mxu3  ;;  %v5620_v38 = vpop.f32.mrf.mxu0 }
 0xa07   : > { %v5532_v23 = vadd.f32 %v5531_v49, %v11694_v40 }
 0xa09   : > { %v5621_v33 = vadd.f32 %v5620_v38, %v5532_v23 }
 0xa0a   : > { %v5763_v27 = vpop.f32.mrf.mxu2 }
 0xa0b   : > { %v5924_v55 = vmax.f32 %v5621_v33, 0.0  ;;  %v5764_v1 = vadd.f32 %v5763_v27, %v5675_v18  ;;  %6431 = vmatmul.bf16.gmra.mxu3 %v12903_v26  ;;  %v8889_v18 = vld [vmem:[#allocation13 + $0x1e4] sm:$0xf]  ;;  %v8441_v27 = vld [vmem:[#allocation13 + $0xe8] sm:$0xf0] }
 0xa0c   : > { %v5677_v58 = vpop.f32.mrf.mxu1  ;;  %v8857_v33 = vld [vmem:[#allocation13 + $0xe4] sm:$0xf]  ;;  %v8572_v11 = vor.u32 %v8889_v18, %v8569_v21 }
 0xa0d   : > { %v5869_v9 = vmax.f32 %v5764_v1, 0.0  ;;  %v11879_v47 = vpack.c.bf16 %v5924_v55, %v5920_v2  ;;  %v5678_v45 = vadd.f32 %v5677_v58, %v11781_v36  ;;  %v8444_v2 = vor.u32 %v8857_v33, %v8441_v27  ;;  %v8873_v55 = vld [vmem:[#allocation13 + $0x164] sm:$0xf]  ;;  %v8505_v1 = vld [vmem:[#allocation13 + $0x168] sm:$0xf0] }
 0xa0e   : > { %v5534_v20 = vpop.f32.mrf.mxu3  ;;  %v5623_v49 = vpop.f32.mrf.mxu0  ;;  %7012 = vmatpush.bf16.msrb.mxu2 %v8572_v11 }
 0xa0f   : > { %12904 = vst [vmem:[#allocation36_spill] sm:$0xff] %v11879_v47  ;;  %v5535_v53 = vadd.f32 %v5534_v20, %v11694_v40  ;;  %6574 = vmatmul.bf16.vlgmr.msra.gmra.mxu1 %v11708_v48  ;;  %6663 = vmatmul.bf16.vlgmr.msra.gmra.mxu2 %v11797_v8  ;;  %v11884_v38 = vpack.c.bf16 %v5869_v9, %v5865_v43  ;;  %v12910_v47 = vld [vmem:[#allocation55_spill] sm:$0xff] }
 0xa10   : > { %6834 = vmatpush.bf16.msrb.mxu0 %v8444_v2  ;;  %v8508_v8 = vor.u32 %v8873_v55, %v8505_v1 }
 0xa11   : > { %v5624_v23 = vadd.f32 %v5623_v49, %v5535_v53  ;;  %6520 = vmatmul.bf16.gmra.mxu0 %v11681_v14 }
 0xa12   : > { %v5766_v34 = vpop.f32.mrf.mxu2  ;;  %6923 = vmatpush.bf16.msrb.mxu1 %v8508_v8 }
 0xa13   : > { %v5767_v5 = vadd.f32 %v5766_v34, %v5678_v45  ;;  %v5928_v48 = vmax.f32 %v5624_v23, 0.0  ;;  %v12905_v45 = vld [vmem:[#allocation78_spill] sm:$0xff] }
 0xa14   : > { %v5679_v20 = vpop.f32.mrf.mxu1 }
 0xa15   : > { %v5680_v49 = vadd.f32 %v5679_v20, %v11781_v36  ;;  %v5873_v34 = vmax.f32 %v5767_v5, 0.0 }
 0xa16   : > { %v5536_v43 = vpop.f32.mrf.mxu3  ;;  %v5625_v9 = vpop.f32.mrf.mxu0 }
 0xa17   : > { %v5537_v58 = vadd.f32 %v5536_v43, %v11694_v40  ;;  %v8839_v43 = vld [vmem:[#allocation13 + $0x54] sm:$0xf] }
 0xa19   : > { %v5626_v53 = vadd.f32 %v5625_v9, %v5537_v58  ;;  %v8369_v9 = vld [vmem:[#allocation13 + $0x58] sm:$0xf0] }
 0xa1a   : > { %v5768_v14 = vpop.f32.mrf.mxu2 }
 0xa1b   : > { %v5932_v18 = vmax.f32 %v5626_v53, 0.0  ;;  %v5769_v21 = vadd.f32 %v5768_v14, %v5680_v49  ;;  %6436 = vmatmul.bf16.gmra.mxu3 %v12905_v45  ;;  %v8372_v49 = vor.u32 %v8839_v43, %v8369_v9  ;;  %v8561_v43 = vld [vmem:[#allocation13 + $0x1d8] sm:$0xf0]  ;;  %v8855_v9 = vld [vmem:[#allocation13 + $0xd4] sm:$0xf] }
 0xa1c   : > { %v5682_v33 = vpop.f32.mrf.mxu1  ;;  %v12908_v45 = vld [vmem:[#allocation50_spill] sm:$0xff] }
 0xa1d   : > { %v5877_v11 = vmax.f32 %v5769_v21, 0.0  ;;  %v11891_v27 = vpack.c.bf16 %v5932_v18, %v5928_v48  ;;  %v5683_v8 = vadd.f32 %v5682_v33, %v11781_v36  ;;  %v12907_v18 = vld [vmem:[#allocation27_spill] sm:$0xff]  ;;  %6746 = vmatpush.bf16.msrb.mxu3 %v8372_v49 }
 0xa1e   : > { %v11893_v2 = vpop.f32.mrf.mxu3  ;;  %v11895_v55 = vpop.f32.mrf.mxu0  ;;  %v8433_v49 = vld [vmem:[#allocation13 + $0xd8] sm:$0xf0] }
 0xa1f   : > { %12906 = vst [vmem:[#allocation58_spill] sm:$0xff] %v11891_v27  ;;  %6579 = vmatmul.bf16.gmra.mxu1 %v11720_v61  ;;  %6668 = vmatmul.bf16.gmra.mxu2 %v11812_v3  ;;  %v11899_v40 = vpack.c.bf16 %v5877_v11, %v5873_v34  ;;  %v8497_v3 = vld [vmem:[#allocation13 + $0x158] sm:$0xf0]  ;;  %v8489_v27 = vld [vmem:[#allocation13 + $0x148] sm:$0xf0] }
 0xa21   : > { %6525 = vmatmul.bf16.gmra.mxu0 %v11701_v56 }
 0xa22   : > { %v5771_v14 = vpop.f32.mrf.mxu2 }
 0xa23   : > { %v5772_v23 = vadd.f32 %v5771_v14, %v5683_v8 }
 0xa24   : > { %v5684_v5 = vpop.f32.mrf.mxu1 }
 0xa25   : > { %v5685_v1 = vadd.f32 %v5684_v5, %v11781_v36  ;;  %v5881_v33 = vmax.f32 %v5772_v23, 0.0 }
 0xa26   : > { %v11903_v20 = vpop.f32.mrf.mxu3  ;;  %v11905_v48 = vpop.f32.mrf.mxu0 }
 0xa2a   : > { %v5773_v58 = vpop.f32.mrf.mxu2 }
 0xa2b   : > { %v5774_v53 = vadd.f32 %v5773_v58, %v5685_v1  ;;  %6441 = vmatmul.bf16.gmra.mxu3 %v12907_v18  ;;  %v8887_v1 = vld [vmem:[#allocation13 + $0x1d4] sm:$0xf]  ;;  %v8436_v18 = vor.u32 %v8855_v9, %v8433_v49 }
 0xa2c   : > { %v5687_v21 = vpop.f32.mrf.mxu1  ;;  %v8564_v23 = vor.u32 %v8887_v1, %v8561_v43 }
 0xa2d   : > { %v5885_v34 = vmax.f32 %v5774_v53, 0.0  ;;  %v5688_v5 = vadd.f32 %v5687_v21, %v11781_v36  ;;  %6835 = vmatpush.bf16.msrb.mxu0 %v8436_v18 }
 0xa2e   : > { %v11909_v11 = vpop.f32.mrf.mxu3  ;;  %v11911_v8 = vpop.f32.mrf.mxu0  ;;  %7013 = vmatpush.bf16.msrb.mxu2 %v8564_v23 }
 0xa2f   : > { %6584 = vmatmul.bf16.gmra.mxu1 %v11732_v35  ;;  %6673 = vmatmul.bf16.gmra.mxu2 %v11824_v50  ;;  %v11915_v14 = vpack.c.bf16 %v5885_v34, %v5881_v33  ;;  %v8871_v35 = vld [vmem:[#allocation13 + $0x154] sm:$0xf] }
 0xa30   : > { %v8500_v21 = vor.u32 %v8871_v35, %v8497_v3 }
 0xa31   : > { %6530 = vmatmul.bf16.gmra.mxu0 %v11713_v7 }
 0xa32   : > { %v5776_v58 = vpop.f32.mrf.mxu2  ;;  %6924 = vmatpush.bf16.msrb.mxu1 %v8500_v21  ;;  %v8361_v21 = vld [vmem:[#allocation13 + $0x48] sm:$0xf0] }
 0xa33   : > { %v5777_v53 = vadd.f32 %v5776_v58, %v5688_v5 }
 0xa34   : > { %v5689_v56 = vpop.f32.mrf.mxu1 }
 0xa35   : > { %v5690_v34 = vadd.f32 %v5689_v56, %v11781_v36  ;;  %v5889_v5 = vmax.f32 %v5777_v53, 0.0  ;;  %v8837_v53 = vld [vmem:[#allocation13 + $0x44] sm:$0xf] }
 0xa36   : > { %v11919_v50 = vpop.f32.mrf.mxu3  ;;  %v11921_v33 = vpop.f32.mrf.mxu0 }
 0xa3a   : > { %v5778_v7 = vpop.f32.mrf.mxu2 }
 0xa3b   : > { %v5779_v61 = vadd.f32 %v5778_v7, %v5690_v34  ;;  %6446 = vmatmul.bf16.gmra.mxu3 %v12908_v45 }
 0xa3c   : > { %v5692_v1 = vpop.f32.mrf.mxu1 }
 0xa3d   : > { %v5893_v43 = vmax.f32 %v5779_v61, 0.0  ;;  %v5693_v35 = vadd.f32 %v5692_v1, %v11781_v36 }
 0xa3e   : > { %v11925_v9 = vpop.f32.mrf.mxu3  ;;  %v11927_v18 = vpop.f32.mrf.mxu0 }
 0xa3f   : > { %6589 = vmatmul.bf16.gmra.mxu1 %v11744_v24  ;;  %6678 = vmatmul.bf16.gmra.mxu2 %v11836_v19  ;;  %v11931_v58 = vpack.c.bf16 %v5893_v43, %v5889_v5  ;;  %v8364_v24 = vor.u32 %v8837_v53, %v8361_v21  ;;  %v12909_v5 = vld [vmem:[#allocation20_spill] sm:$0xff]  ;;  %v8553_v53 = vld [vmem:[#allocation13 + $0x1c8] sm:$0xf0] }
 0xa40   : > { %v8853_v21 = vld [vmem:[#allocation13 + $0xc4] sm:$0xf] }
 0xa41   : > { %6535 = vmatmul.bf16.gmra.mxu0 %v11725_v10  ;;  %6747 = vmatpush.bf16.msrb.mxu3 %v8364_v24 }
 0xa42   : > { %v5781_v56 = vpop.f32.mrf.mxu2 }
 0xa43   : > { %v5782_v7 = vadd.f32 %v5781_v56, %v5693_v35 }
 0xa44   : > { %v5694_v3 = vpop.f32.mrf.mxu1 }
 0xa45   : > { %v5695_v49 = vadd.f32 %v5694_v3, %v11781_v36  ;;  %v5897_v1 = vmax.f32 %v5782_v7, 0.0 }
 0xa46   : > { %v11935_v23 = vpop.f32.mrf.mxu3  ;;  %v11937_v61 = vpop.f32.mrf.mxu0 }
 0xa4a   : > { %v5783_v34 = vpop.f32.mrf.mxu2 }
 0xa4b   : > { %v5784_v19 = vadd.f32 %v5783_v34, %v5695_v49  ;;  %6451 = vmatmul.bf16.gmra.mxu3 %v12909_v5  ;;  %v8885_v49 = vld [vmem:[#allocation13 + $0x1c4] sm:$0xf] }
 0xa4c   : > { %v5697_v43 = vpop.f32.mrf.mxu1  ;;  %v8556_v7 = vor.u32 %v8885_v49, %v8553_v53 }
 0xa4d   : > { %v5901_v10 = vmax.f32 %v5784_v19, 0.0  ;;  %v5698_v3 = vadd.f32 %v5697_v43, %v11781_v36  ;;  %v8425_v19 = vld [vmem:[#allocation13 + $0xc8] sm:$0xf0] }
 0xa4e   : > { %v11941_v45 = vpop.f32.mrf.mxu3  ;;  %v11943_v35 = vpop.f32.mrf.mxu0  ;;  %v8428_v5 = vor.u32 %v8853_v21, %v8425_v19  ;;  %7014 = vmatpush.bf16.msrb.mxu2 %v8556_v7 }
 0xa4f   : > { %6594 = vmatmul.bf16.gmra.mxu1 %v11756_v12  ;;  %6683 = vmatmul.bf16.gmra.mxu2 %v11848_v46  ;;  %v11947_v56 = vpack.c.bf16 %v5901_v10, %v5897_v1  ;;  %v8869_v12 = vld [vmem:[#allocation13 + $0x144] sm:$0xf] }
 0xa50   : > { %6836 = vmatpush.bf16.msrb.mxu0 %v8428_v5  ;;  %v8492_v43 = vor.u32 %v8869_v12, %v8489_v27 }
 0xa51   : > { %6540 = vmatmul.bf16.gmra.mxu0 %v11737_v32 }
 0xa52   : > { %v5786_v24 = vpop.f32.mrf.mxu2  ;;  %6925 = vmatpush.bf16.msrb.mxu1 %v8492_v43  ;;  %v8353_v43 = vld [vmem:[#allocation13 + $0x38] sm:$0xf0] }
 0xa53   : > { %v5787_v34 = vadd.f32 %v5786_v24, %v5698_v3 }
 0xa54   : > { %v5699_v26 = vpop.f32.mrf.mxu1 }
 0xa55   : > { %v5700_v1 = vadd.f32 %v5699_v26, %v11781_v36  ;;  %v5905_v3 = vmax.f32 %v5787_v34, 0.0  ;;  %v8835_v34 = vld [vmem:[#allocation13 + $0x34] sm:$0xf] }
 0xa56   : > { %v11951_v46 = vpop.f32.mrf.mxu3  ;;  %v11953_v10 = vpop.f32.mrf.mxu0 }
 0xa5a   : > { %v5788_v32 = vpop.f32.mrf.mxu2 }
 0xa5b   : > { %v5789_v54 = vadd.f32 %v5788_v32, %v5700_v1  ;;  %6456 = vmatmul.bf16.gmra.mxu3 %v12910_v47 }
 0xa5c   : > { %v5702_v49 = vpop.f32.mrf.mxu1 }
 0xa5d   : > { %v5909_v53 = vmax.f32 %v5789_v54, 0.0  ;;  %v5703_v12 = vadd.f32 %v5702_v49, %v11781_v36 }
 0xa5e   : > { %v11957_v21 = vpop.f32.mrf.mxu3  ;;  %v11959_v5 = vpop.f32.mrf.mxu0 }
 0xa5f   : > { %6599 = vmatmul.bf16.gmra.mxu1 %v11768_v17  ;;  %6688 = vmatmul.bf16.gmra.mxu2 %v11860_v0  ;;  %v11963_v24 = vpack.c.bf16 %v5909_v53, %v5905_v3  ;;  %v8356_v17 = vor.u32 %v8835_v34, %v8353_v43  ;;  %v12911_v3 = vld [vmem:[#allocation53_spill] sm:$0xff]  ;;  %v8417_v34 = vld [vmem:[#allocation13 + $0xb8] sm:$0xf0] }
 0xa61   : > { %6545 = vmatmul.bf16.gmra.mxu0 %v11749_v15  ;;  %6748 = vmatpush.bf16.msrb.mxu3 %v8356_v17  ;;  %v12915_v17 = vld [vmem:[#allocation65_spill] sm:$0xff] }
 0xa62   : > { %v5791_v32 = vpop.f32.mrf.mxu2 }
 0xa63   : > { %v5792_v26 = vadd.f32 %v5791_v32, %v5703_v12  ;;  %v8833_v12 = vld [vmem:[#allocation13 + $0x24] sm:$0xf]  ;;  %v8345_v32 = vld [vmem:[#allocation13 + $0x28] sm:$0xf0] }
 0xa64   : > { %v5704_v27 = vpop.f32.mrf.mxu1 }
 0xa65   : > { %v5705_v19 = vadd.f32 %v5704_v27, %v11781_v36  ;;  %v5913_v49 = vmax.f32 %v5792_v26, 0.0  ;;  %v8348_v27 = vor.u32 %v8833_v12, %v8345_v32  ;;  %v8545_v26 = vld [vmem:[#allocation13 + $0x1b8] sm:$0xf0]  ;;  %v8867_v32 = vld [vmem:[#allocation13 + $0x134] sm:$0xf] }
 0xa66   : > { %v11967_v7 = vpop.f32.mrf.mxu3  ;;  %v11969_v54 = vpop.f32.mrf.mxu0 }
 0xa67   : > { %6749 = vmatpush.bf16.msrb.mxu3 %v8348_v27  ;;  %v8829_v27 = vld [vmem:[#allocation13 + $0x4] sm:$0xf] }
 0xa6a   : > { %v5793_v1 = vpop.f32.mrf.mxu2 }
 0xa6b   : > { %v5794_v0 = vadd.f32 %v5793_v1, %v5705_v19  ;;  %6461 = vmatmul.bf16.gmra.mxu3 %v12911_v3  ;;  %v8851_v19 = vld [vmem:[#allocation13 + $0xb4] sm:$0xf] }
 0xa6c   : > { %v5707_v53 = vpop.f32.mrf.mxu1  ;;  %v8420_v1 = vor.u32 %v8851_v19, %v8417_v34  ;;  %v8329_v19 = vld [vmem:[#allocation13 + $0x8] sm:$0xf0] }
 0xa6d   : > { %v5917_v15 = vmax.f32 %v5794_v0, 0.0  ;;  %v5708_v43 = vadd.f32 %v5707_v53, %v11781_v36  ;;  %v8883_v0 = vld [vmem:[#allocation13 + $0x1b4] sm:$0xf]  ;;  %v8332_v34 = vor.u32 %v8829_v27, %v8329_v19 }
 0xa6e   : > { %v11973_v47 = vpop.f32.mrf.mxu3  ;;  %v11975_v4 = vpop.f32.mrf.mxu0  ;;  %v8548_v42 = vor.u32 %v8883_v0, %v8545_v26  ;;  %6837 = vmatpush.bf16.msrb.mxu0 %v8420_v1  ;;  %v8847_v0 = vld [vmem:[#allocation13 + $0x94] sm:$0xf] }
 0xa6f   : > { %12912 = vst [vmem:[#allocation41_spill] sm:$0xff] %v11973_v47  ;;  %6604 = vmatmul.bf16.gmra.mxu1 %v11783_v63  ;;  %6693 = vmatmul.bf16.gmra.mxu2 %v11872_v57  ;;  %v11979_v16 = vpack.c.bf16 %v5917_v15, %v5913_v49  ;;  %v8849_v15 = vld [vmem:[#allocation13 + $0xa4] sm:$0xf]  ;;  %v8409_v49 = vld [vmem:[#allocation13 + $0xa8] sm:$0xf0] }
 0xa70   : > { %12913 = vst [vmem:[#allocation31_spill] sm:$0xff] %v11975_v4  ;;  %v8831_v4 = vld [vmem:[#allocation13 + $0x14] sm:$0xf]  ;;  %7015 = vmatpush.bf16.msrb.mxu2 %v8548_v42  ;;  %v8412_v53 = vor.u32 %v8849_v15, %v8409_v49  ;;  %v8393_v15 = vld [vmem:[#allocation13 + $0x88] sm:$0xf0] }
 0xa71   : > { %12914 = vst [vmem:[#allocation60_spill] sm:$0xff] %v11979_v16  ;;  %6550 = vmatmul.bf16.gmra.mxu0 %v12915_v17  ;;  %v8340_v57 = vor.u32 %v8831_v4, %v8337_v60  ;;  %v8481_v16 = vld [vmem:[#allocation13 + $0x138] sm:$0xf0] }
 0xa72   : > { %v5796_v3 = vpop.f32.mrf.mxu2  ;;  %v8484_v47 = vor.u32 %v8867_v32, %v8481_v16  ;;  %6838 = vmatpush.bf16.msrb.mxu0 %v8412_v53  ;;  %v8845_v16 = vld [vmem:[#allocation13 + $0x84] sm:$0xf] }
 0xa73   : > { %v5797_v63 = vadd.f32 %v5796_v3, %v5708_v43  ;;  %6750 = vmatpush.bf16.msrb.mxu3 %v8340_v57  ;;  %v8401_v3 = vld [vmem:[#allocation13 + $0x98] sm:$0xf0]  ;;  %v12916_v57 = vld [vmem:[#allocation80_spill] sm:$0xff]  ;;  %v8396_v53 = vor.u32 %v8845_v16, %v8393_v15 }
 0xa74   : > { %v5709_v12 = vpop.f32.mrf.mxu1  ;;  %6926 = vmatpush.bf16.msrb.mxu1 %v8484_v47  ;;  %v8404_v42 = vor.u32 %v8847_v0, %v8401_v3  ;;  %v12919_v15 = vld [vmem:[#allocation47_spill] sm:$0xff] }
 0xa75   : > { %v5710_v60 = vadd.f32 %v5709_v12, %v11781_v36  ;;  %v5921_v49 = vmax.f32 %v5797_v63, 0.0  ;;  %v12002_v63 = vld [vmem:[%s12917_s18] sm:$0x3] }
 0xa76   : > { %v11983_v17 = vpop.f32.mrf.mxu3  ;;  %v11986_v4 = vpop.f32.mrf.mxu0  ;;  %6839 = vmatpush.bf16.msrb.mxu0 %v8404_v42  ;;  %12918 = vst [vmem:[#allocation38_spill] sm:$0xff] %v12002_v63 }
 0xa77   : > { %6751 = vmatpush.bf16.msrb.mxu3 %v8332_v34 }
 0xa7a   : > { %v5798_v43 = vpop.f32.mrf.mxu2  ;;  %6840 = vmatpush.bf16.msrb.mxu0 %v8396_v53 }
 0xa7b   : > { %v5799_v26 = vadd.f32 %v5798_v43, %v5710_v60  ;;  %6466 = vmatmul.bf16.gmra.mxu3 %v12916_v57  ;;  %v12005_v60 = vperm.slane %v12002_v63, 0 }
 0xa7c   : > { %v5712_v1 = vpop.f32.mrf.mxu1 }
 0xa7d   : > { %v5925_v32 = vmax.f32 %v5799_v26, 0.0  ;;  %v5713_v27 = vadd.f32 %v5712_v1, %v11781_v36  ;;  %v6398_v1 = vadd.f32 %v11893_v2, %v12005_v60  ;;  %v8881_v2 = vld [vmem:[#allocation13 + $0x1a4] sm:$0xf] }
 0xa7e   : > { %v11989_v47 = vpop.f32.mrf.mxu3  ;;  %v11997_v34 = vpop.f32.mrf.mxu0 }
 0xa7f   : > { %6609 = vmatmul.bf16.gmra.mxu1 %v11795_v44  ;;  %6698 = vmatmul.bf16.gmra.mxu2 %v11884_v38  ;;  %v11993_v12 = vpack.c.bf16 %v5925_v32, %v5921_v49 }
 0xa81   : > { %6555 = vmatmul.bf16.gmra.mxu0 %v11773_v6 }
 0xa82   : > { %v5801_v19 = vpop.f32.mrf.mxu2 }
 0xa83   : > { %v5802_v0 = vadd.f32 %v5801_v19, %v5713_v27  ;;  %v6487_v19 = vadd.f32 %v11895_v55, %v6398_v1  ;;  %v8865_v1 = vld [vmem:[#allocation13 + $0x124] sm:$0xf] }
 0xa84   : > { %v5714_v3 = vpop.f32.mrf.mxu1 }
 0xa85   : > { %v5715_v43 = vadd.f32 %v5714_v3, %v11781_v36  ;;  %v5929_v32 = vmax.f32 %v5802_v0, 0.0 }
 0xa86   : > { %v12007_v42 = vpop.f32.mrf.mxu3  ;;  %v12013_v53 = vpop.f32.mrf.mxu0 }
 0xa8a   : > { %v5803_v26 = vpop.f32.mrf.mxu2 }
 0xa8b   : > { %v5804_v16 = vadd.f32 %v5803_v26, %v5715_v43  ;;  %6471 = vmatmul.bf16.gmra.mxu3 %v12919_v15  ;;  %v8537_v43 = vld [vmem:[#allocation13 + $0x1a8] sm:$0xf0] }
 0xa8c   : > { %v6575_v49 = vpop.f32.mrf.mxu1  ;;  %v8540_v26 = vor.u32 %v8881_v2, %v8537_v43 }
 0xa8d   : > { %v5933_v27 = vmax.f32 %v5804_v16, 0.0  ;;  %v6576_v3 = vadd.f32 %v6575_v49, %v6487_v19  ;;  %v6400_v16 = vadd.f32 %v11903_v20, %v12005_v60  ;;  %v8473_v49 = vld [vmem:[#allocation13 + $0x128] sm:$0xf0]  ;;  %v6403_v20 = vadd.f32 %v11909_v11, %v12005_v60 }
 0xa8e   : > { %v12020_v63 = vpop.f32.mrf.mxu3  ;;  %7016 = vmatpush.bf16.msrb.mxu2 %v8540_v26  ;;  %v12031_v19 = vpop.f32.mrf.mxu0 }
 0xa8f   : > { %6614 = vmatmul.bf16.gmra.mxu1 %v11807_v22  ;;  %6703 = vmatmul.bf16.gmra.mxu2 %v11899_v40  ;;  %v12018_v36 = vpack.c.bf16 %v5933_v27, %v5929_v32  ;;  %v8476_v32 = vor.u32 %v8865_v1, %v8473_v49  ;;  %v6489_v27 = vadd.f32 %v11905_v48, %v6400_v16 }
 0xa90   : > { %v6492_v26 = vadd.f32 %v11911_v8, %v6403_v20 }
 0xa91   : > { %6560 = vmatmul.bf16.gmra.mxu0 %v11788_v41  ;;  %6927 = vmatpush.bf16.msrb.mxu1 %v8476_v32 }
 0xa92   : > { %v6664_v0 = vpop.f32.mrf.mxu2 }
 0xa93   : > { %v6665_v15 = vadd.f32 %v6664_v0, %v6576_v3 }
 0xa94   : > { %v6577_v55 = vpop.f32.mrf.mxu1 }
 0xa95   : > { %7100 = vst [vmem:[%s12027_s19] sm:$0xff] %v6665_v15  ;;  %v6578_v2 = vadd.f32 %v6577_v55, %v6489_v27  ;;  %v6405_v55 = vadd.f32 %v11919_v50, %v12005_v60 }
 0xa96   : > { %v12035_v3 = vpop.f32.mrf.mxu3  ;;  %v12042_v48 = vpop.f32.mrf.mxu0 }
 0xa97   : > { %v6494_v8 = vadd.f32 %v11921_v33, %v6405_v55 }
 0xa9a   : > { %v6666_v43 = vpop.f32.mrf.mxu2 }
 0xa9b   : > { %v6667_v0 = vadd.f32 %v6666_v43, %v6578_v2  ;;  %6752 = vmatmul.bf16.vlgmr.msrb.gmra.mxu3 %v11481_v31  ;;  %v6408_v2 = vadd.f32 %v11925_v9, %v12005_v60  ;;  %v8879_v9 = vld [vmem:[#allocation13 + $0x194] sm:$0xf] }
 0xa9c   : > { %v6580_v15 = vpop.f32.mrf.mxu1 }
 0xa9d   : > { %7102 = vst [vmem:[%s12027_s19 + $0x10] sm:$0xff] %v6667_v0  ;;  %v6581_v16 = vadd.f32 %v6580_v15, %v6492_v26  ;;  %v6497_v50 = vadd.f32 %v11927_v18, %v6408_v2  ;;  %v8529_v15 = vld [vmem:[#allocation13 + $0x198] sm:$0xf0] }
 0xa9e   : > { %v12047_v49 = vpop.f32.mrf.mxu3  ;;  %v12053_v43 = vpop.f32.mrf.mxu0 }
 0xa9f   : > { %6619 = vmatmul.bf16.gmra.mxu1 %v11819_v30  ;;  %6708 = vmatmul.bf16.gmra.mxu2 %v11915_v14 }
 0xaa1   : > { %6841 = vmatmul.bf16.vlgmr.msrb.gmra.mxu0 %v11594_v25 }
 0xaa2   : > { %v6669_v11 = vpop.f32.mrf.mxu2 }
 0xaa3   : > { %v6670_v1 = vadd.f32 %v6669_v11, %v6581_v16  ;;  %v8532_v16 = vor.u32 %v8879_v9, %v8529_v15 }
 0xaa4   : > { %v6582_v31 = vpop.f32.mrf.mxu1 }
 0xaa5   : > { %7104 = vst [vmem:[%s12027_s19 + $0x20] sm:$0xff] %v6670_v1  ;;  %v6583_v32 = vadd.f32 %v6582_v31, %v6494_v8  ;;  %7017 = vmatpush.bf16.msrb.mxu2 %v8532_v16  ;;  %v8863_v1 = vld [vmem:[#allocation13 + $0x114] sm:$0xf]  ;;  %v8465_v31 = vld [vmem:[#allocation13 + $0x118] sm:$0xf0] }
 0xaa6   : > { %v12058_v0 = vpop.f32.mrf.mxu3  ;;  %v12065_v18 = vpop.f32.mrf.mxu0  ;;  %v8468_v8 = vor.u32 %v8863_v1, %v8465_v31 }
 0xaa8   : > { %6928 = vmatpush.bf16.msrb.mxu1 %v8468_v8  ;;  %v8877_v8 = vld [vmem:[#allocation13 + $0x184] sm:$0xf] }
 0xaaa   : > { %v6671_v27 = vpop.f32.mrf.mxu2 }
 0xaab   : > { %v6672_v20 = vadd.f32 %v6671_v27, %v6583_v32  ;;  %6757 = vmatmul.bf16.gmra.mxu3 %v11497_v28  ;;  %v6410_v28 = vadd.f32 %v11935_v23, %v12005_v60  ;;  %v6413_v23 = vadd.f32 %v11941_v45, %v12005_v60  ;;  %v6415_v45 = vadd.f32 %v11951_v46, %v12005_v60 }
 0xaac   : > { %v6585_v25 = vpop.f32.mrf.mxu1 }
 0xaad   : > { %7106 = vst [vmem:[%s12027_s19 + $0x30] sm:$0xff] %v6672_v20  ;;  %v6586_v33 = vadd.f32 %v6585_v25, %v6497_v50  ;;  %v6499_v32 = vadd.f32 %v11937_v61, %v6410_v28  ;;  %v6502_v50 = vadd.f32 %v11943_v35, %v6413_v23  ;;  %v6504_v35 = vadd.f32 %v11953_v10, %v6415_v45 }
 0xaaf   : > { %6624 = vmatmul.bf16.gmra.mxu1 %v11831_v29  ;;  %6713 = vmatmul.bf16.gmra.mxu2 %v11931_v58 }
 0xab1   : > { %6846 = vmatmul.bf16.gmra.mxu0 %v11609_v51  ;;  %v12069_v51 = vpop.f32.mrf.mxu3 }
 0xab2   : > { %v6674_v26 = vpop.f32.mrf.mxu2 }
 0xab3   : > { %v6675_v11 = vadd.f32 %v6674_v26, %v6586_v33  ;;  %v12076_v33 = vpop.f32.mrf.mxu0 }
 0xab4   : > { %v6587_v55 = vpop.f32.mrf.mxu1 }
 0xab5   : > { %7108 = vst [vmem:[%s12027_s19 + $0x40] sm:$0xff] %v6675_v11  ;;  %v6588_v27 = vadd.f32 %v6587_v55, %v6499_v32  ;;  %v6418_v55 = vadd.f32 %v11957_v21, %v12005_v60  ;;  %v8521_v32 = vld [vmem:[#allocation13 + $0x188] sm:$0xf0] }
 0xab7   : > { %v6507_v46 = vadd.f32 %v11959_v5, %v6418_v55  ;;  %v8861_v5 = vld [vmem:[#allocation13 + $0x104] sm:$0xf]  ;;  %v12922_v55 = vld [vmem:[#allocation31_spill] sm:$0xff] }
 0xab9   : > { %v12083_v15 = vpop.f32.mrf.mxu3 }
 0xaba   : > { %v6676_v2 = vpop.f32.mrf.mxu2 }
 0xabb   : > { %v6677_v20 = vadd.f32 %v6676_v2, %v6588_v27  ;;  %6762 = vmatmul.bf16.gmra.mxu3 %v11513_v13  ;;  %v12087_v16 = vpop.f32.mrf.mxu0  ;;  %v8524_v27 = vor.u32 %v8877_v8, %v8521_v32  ;;  %v12925_v8 = vld [vmem:[#allocation79_spill] sm:$0xff] }
 0xabc   : > { %v6590_v25 = vpop.f32.mrf.mxu1 }
 0xabd   : > { %7110 = vst [vmem:[%s12027_s19 + $0x50] sm:$0xff] %v6677_v20  ;;  %v6591_v61 = vadd.f32 %v6590_v25, %v6502_v50  ;;  %7018 = vmatpush.bf16.msrb.mxu2 %v8524_v27  ;;  %v8457_v25 = vld [vmem:[#allocation13 + $0x108] sm:$0xf0] }
 0xabe   : > { %v8460_v50 = vor.u32 %v8861_v5, %v8457_v25 }
 0xabf   : > { %6629 = vmatmul.bf16.gmra.mxu1 %v11843_v62  ;;  %6718 = vmatmul.bf16.gmra.mxu2 %v11947_v56 }
 0xac0   : > { %6929 = vmatpush.bf16.msrb.mxu1 %v8460_v50  ;;  %v6428_v50 = vadd.f32 %v11989_v47, %v12005_v60 }
 0xac1   : > { %6851 = vmatmul.bf16.gmra.mxu0 %v11621_v59  ;;  %v12092_v31 = vpop.f32.mrf.mxu3 }
 0xac2   : > { %v6679_v9 = vpop.f32.mrf.mxu2 }
 0xac3   : > { %v6680_v13 = vadd.f32 %v6679_v9, %v6591_v61  ;;  %v12101_v2 = vpop.f32.mrf.mxu0 }
 0xac4   : > { %v6592_v26 = vpop.f32.mrf.mxu1 }
 0xac5   : > { %7112 = vst [vmem:[%s12027_s19 + $0x60] sm:$0xff] %v6680_v13  ;;  %v6593_v28 = vadd.f32 %v6592_v26, %v6504_v35  ;;  %v12920_v13 = vld [vmem:[#allocation41_spill] sm:$0xff]  ;;  %v12921_v35 = vld [vmem:[#allocation63_spill] sm:$0xff] }
 0xaca   : > { %v6681_v11 = vpop.f32.mrf.mxu2 }
 0xacb   : > { %v6682_v59 = vadd.f32 %v6681_v11, %v6593_v28  ;;  %6767 = vmatmul.bf16.gmra.mxu3 %v11529_v39  ;;  %v6420_v39 = vadd.f32 %v11967_v7, %v12005_v60  ;;  %v6423_v7 = vadd.f32 %v12920_v13, %v12005_v60  ;;  %v12110_v11 = vpop.f32.mrf.mxu0 }
 0xacc   : > { %v6595_v1 = vpop.f32.mrf.mxu1 }
 0xacd   : > { %7114 = vst [vmem:[%s12027_s19 + $0x70] sm:$0xff] %v6682_v59  ;;  %v6596_v10 = vadd.f32 %v6595_v1, %v6507_v46  ;;  %v6509_v61 = vadd.f32 %v11969_v54, %v6420_v39  ;;  %v6512_v59 = vadd.f32 %v12922_v55, %v6423_v7  ;;  %v12923_v1 = vld [vmem:[#allocation56_spill] sm:$0xff] }
 0xace   : > { %v12924_v54 = vld [vmem:[#allocation60_spill] sm:$0xff] }
 0xacf   : > { %6634 = vmatmul.bf16.gmra.mxu1 %v11855_v37  ;;  %6723 = vmatmul.bf16.gmra.mxu2 %v11963_v24  ;;  %v12927_v7 = vld [vmem:[#allocation36_spill] sm:$0xff] }
 0xad1   : > { %6856 = vmatmul.bf16.gmra.mxu0 %v11633_v52  ;;  %v12105_v52 = vpop.f32.mrf.mxu3 }
 0xad2   : > { %v6684_v21 = vpop.f32.mrf.mxu2 }
 0xad3   : > { %v6685_v23 = vadd.f32 %v6684_v21, %v6596_v10  ;;  %v6425_v21 = vadd.f32 %v11983_v17, %v12005_v60  ;;  %v6517_v17 = vadd.f32 %v11997_v34, %v6428_v50  ;;  %v12930_v50 = vld [vmem:[#allocation58_spill] sm:$0xff] }
 0xad4   : > { %v6597_v20 = vpop.f32.mrf.mxu1 }
 0xad5   : > { %7116 = vst [vmem:[%s12027_s19 + $0x80] sm:$0xff] %v6685_v23  ;;  %v6598_v9 = vadd.f32 %v6597_v20, %v6509_v61  ;;  %v6514_v23 = vadd.f32 %v11986_v4, %v6425_v21  ;;  %v12123_v20 = vpop.f32.mrf.mxu0  ;;  %v6433_v21 = vadd.f32 %v12020_v63, %v12005_v60 }
 0xad9   : > { %v12116_v46 = vpop.f32.mrf.mxu3 }
 0xada   : > { %v6686_v45 = vpop.f32.mrf.mxu2 }
 0xadb   : > { %v6687_v26 = vadd.f32 %v6686_v45, %v6598_v9  ;;  %6772 = vmatmul.bf16.gmra.mxu3 %v12921_v35  ;;  %v12926_v45 = vld [vmem:[#allocation76_spill] sm:$0xff]  ;;  %v12928_v35 = vld [vmem:[#allocation45_spill] sm:$0xff] }
 0xadc   : > { %v6600_v28 = vpop.f32.mrf.mxu1 }
 0xadd   : > { %7118 = vst [vmem:[%s12027_s19 + $0x90] sm:$0xff] %v6687_v26  ;;  %v6601_v10 = vadd.f32 %v6600_v28, %v6512_v59  ;;  %v12134_v4 = vpop.f32.mrf.mxu0  ;;  %v6430_v28 = vadd.f32 %v12007_v42, %v12005_v60  ;;  %v6522_v42 = vadd.f32 %v12031_v19, %v6433_v21  ;;  %v12933_v21 = vld [vmem:[#allocation32_spill] sm:$0xff] }
 0xadf   : > { %6639 = vmatmul.bf16.gmra.mxu1 %v12923_v1  ;;  %6728 = vmatmul.bf16.gmra.mxu2 %v12924_v54  ;;  %v6519_v34 = vadd.f32 %v12013_v53, %v6430_v28 }
 0xae1   : > { %6861 = vmatmul.bf16.gmra.mxu0 %v12925_v8  ;;  %v12127_v61 = vpop.f32.mrf.mxu3 }
 0xae2   : > { %v6689_v32 = vpop.f32.mrf.mxu2 }
 0xae3   : > { %v6690_v27 = vadd.f32 %v6689_v32, %v6601_v10 }
 0xae4   : > { %v6602_v39 = vpop.f32.mrf.mxu1 }
 0xae5   : > { %7120 = vst [vmem:[%s12027_s19 + $0xa0] sm:$0xff] %v6690_v27  ;;  %v6603_v5 = vadd.f32 %v6602_v39, %v6514_v23  ;;  %v12145_v27 = vpop.f32.mrf.mxu0  ;;  %v12929_v23 = vld [vmem:[#allocation67_spill] sm:$0xff] }
 0xae9   : > { %v12139_v10 = vpop.f32.mrf.mxu3 }
 0xaea   : > { %v6691_v25 = vpop.f32.mrf.mxu2 }
 0xaeb   : > { %v6692_v9 = vadd.f32 %v6691_v25, %v6603_v5  ;;  %6777 = vmatmul.bf16.gmra.mxu3 %v12926_v45  ;;  %v6435_v45 = vadd.f32 %v12035_v3, %v12005_v60 }
 0xaec   : > { %v6605_v13 = vpop.f32.mrf.mxu1 }
 0xaed   : > { %7122 = vst [vmem:[%s12027_s19 + $0xb0] sm:$0xff] %v6692_v9  ;;  %v6606_v26 = vadd.f32 %v6605_v13, %v6517_v17  ;;  %v12931_v9 = vld [vmem:[#allocation22_spill] sm:$0xff]  ;;  %v6524_v19 = vadd.f32 %v12042_v48, %v6435_v45  ;;  %v12934_v48 = vld [vmem:[#allocation69_spill] sm:$0xff] }
 0xaef   : > { %6644 = vmatmul.bf16.gmra.mxu1 %v12927_v7  ;;  %6733 = vmatmul.bf16.gmra.mxu2 %v11993_v12 }
 0xaf1   : > { %6866 = vmatmul.bf16.gmra.mxu0 %v12928_v35  ;;  %v12150_v25 = vpop.f32.mrf.mxu3 }
 0xaf2   : > { %v6694_v47 = vpop.f32.mrf.mxu2 }
 0xaf3   : > { %v6695_v55 = vadd.f32 %v6694_v47, %v6606_v26  ;;  %v12157_v26 = vpop.f32.mrf.mxu0 }
 0xaf4   : > { %v6607_v59 = vpop.f32.mrf.mxu1 }
 0xaf5   : > { %7124 = vst [vmem:[%s12027_s19 + $0xc0] sm:$0xff] %v6695_v55  ;;  %v6608_v8 = vadd.f32 %v6607_v59, %v6519_v34  ;;  %v6438_v55 = vadd.f32 %v12047_v49, %v12005_v60  ;;  %v12932_v34 = vld [vmem:[#allocation77_spill] sm:$0xff]  ;;  %v6440_v49 = vadd.f32 %v12058_v0, %v12005_v60 }
 0xaf7   : > { %v6527_v3 = vadd.f32 %v12053_v43, %v6438_v55  ;;  %v6529_v43 = vadd.f32 %v12065_v18, %v6440_v49  ;;  %v12938_v18 = vld [vmem:[#allocation23_spill] sm:$0xff] }
 0xaf9   : > { %v12161_v35 = vpop.f32.mrf.mxu3 }
 0xafa   : > { %v6696_v32 = vpop.f32.mrf.mxu2 }
 0xafb   : > { %v6697_v39 = vadd.f32 %v6696_v32, %v6608_v8  ;;  %6782 = vmatmul.bf16.gmra.mxu3 %v12929_v23  ;;  %v12168_v32 = vpop.f32.mrf.mxu0  ;;  %v12935_v23 = vld [vmem:[#allocation46_spill] sm:$0xff] }
 0xafc   : > { %v6610_v5 = vpop.f32.mrf.mxu1 }
 0xafd   : > { %7126 = vst [vmem:[%s12027_s19 + $0xd0] sm:$0xff] %v6697_v39  ;;  %v6611_v53 = vadd.f32 %v6610_v5, %v6522_v42 }
 0xaff   : > { %6649 = vmatmul.bf16.gmra.mxu1 %v12930_v50  ;;  %6738 = vmatmul.bf16.gmra.mxu2 %v12018_v36 }
 0xb01   : > { %6871 = vmatmul.bf16.gmra.mxu0 %v12931_v9  ;;  %v12175_v42 = vpop.f32.mrf.mxu3 }
 0xb02   : > { %v6699_v63 = vpop.f32.mrf.mxu2 }
 0xb03   : > { %v6700_v13 = vadd.f32 %v6699_v63, %v6611_v53  ;;  %v12179_v63 = vpop.f32.mrf.mxu0 }
 0xb04   : > { %v6612_v17 = vpop.f32.mrf.mxu1 }
 0xb05   : > { %7128 = vst [vmem:[%s12027_s19 + $0xe0] sm:$0xff] %v6700_v13  ;;  %v6613_v47 = vadd.f32 %v6612_v17, %v6524_v19  ;;  %v6443_v17 = vadd.f32 %v12069_v51, %v12005_v60  ;;  %v6445_v51 = vadd.f32 %v12083_v15, %v12005_v60 }
 0xb07   : > { %v6532_v55 = vadd.f32 %v12076_v33, %v6443_v17  ;;  %v12941_v17 = vld [vmem:[#allocation61_spill] sm:$0xff] }
 0xb09   : > { %v12184_v0 = vpop.f32.mrf.mxu3 }
 0xb0a   : > { %v6701_v28 = vpop.f32.mrf.mxu2 }
 0xb0b   : > { %v6702_v59 = vadd.f32 %v6701_v28, %v6613_v47  ;;  %6787 = vmatmul.bf16.gmra.mxu3 %v12932_v34  ;;  %v12936_v47 = vld [vmem:[#allocation78_spill] sm:$0xff] }
 0xb0c   : > { %v6615_v8 = vpop.f32.mrf.mxu1 }
 0xb0d   : > { %7130 = vst [vmem:[%s12027_s19 + $0xf0] sm:$0xff] %v6702_v59  ;;  %v6616_v39 = vadd.f32 %v6615_v8, %v6527_v3  ;;  %v12937_v59 = vld [vmem:[#allocation48_spill] sm:$0xff]  ;;  %v12939_v8 = vld [vmem:[#allocation57_spill] sm:$0xff] }
 0xb0f   : > { %6930 = vmatmul.bf16.vlgmr.msrb.gmra.mxu1 %v12933_v21  ;;  %7019 = vmatmul.bf16.vlgmr.msrb.gmra.mxu2 %v12934_v48  ;;  %v12193_v21 = vpop.f32.mrf.mxu0 }
 0xb11   : > { %6876 = vmatmul.bf16.gmra.mxu0 %v12935_v23  ;;  %v6534_v23 = vadd.f32 %v12087_v16, %v6445_v51  ;;  %v12197_v33 = vpop.f32.mrf.mxu3  ;;  %v12942_v16 = vld [vmem:[#allocation52_spill] sm:$0xff]  ;;  %v6453_v51 = vadd.f32 %v12116_v46, %v12005_v60 }
 0xb12   : > { %v6704_v5 = vpop.f32.mrf.mxu2 }
 0xb13   : > { %v6705_v53 = vadd.f32 %v6704_v5, %v6616_v39 }
 0xb14   : > { %v6617_v9 = vpop.f32.mrf.mxu1 }
 0xb15   : > { %7132 = vst [vmem:[%s12027_s19 + $0x100] sm:$0xff] %v6705_v53  ;;  %v6618_v45 = vadd.f32 %v6617_v9, %v6529_v43  ;;  %v6448_v53 = vadd.f32 %v12092_v31, %v12005_v60  ;;  %v12940_v43 = vld [vmem:[#allocation27_spill] sm:$0xff] }
 0xb17   : > { %v12202_v15 = vpop.f32.mrf.mxu0 }
 0xb1a   : > { %v6706_v13 = vpop.f32.mrf.mxu2 }
 0xb1b   : > { %v6707_v19 = vadd.f32 %v6706_v13, %v6618_v45  ;;  %6792 = vmatmul.bf16.gmra.mxu3 %v12936_v47  ;;  %v6537_v13 = vadd.f32 %v12101_v2, %v6448_v53 }
 0xb1c   : > { %v6620_v28 = vpop.f32.mrf.mxu1 }
 0xb1d   : > { %7134 = vst [vmem:[%s12027_s19 + $0x110] sm:$0xff] %v6707_v19  ;;  %v6621_v34 = vadd.f32 %v6620_v28, %v6532_v55  ;;  %v12208_v19 = vpop.f32.mrf.mxu3  ;;  %v12943_v28 = vld [vmem:[#allocation81_spill] sm:$0xff]  ;;  %v6450_v55 = vadd.f32 %v12105_v52, %v12005_v60  ;;  %v6542_v52 = vadd.f32 %v12123_v20, %v6453_v51 }
 0xb1f   : > { %6935 = vmatmul.bf16.gmra.mxu1 %v12937_v59  ;;  %7024 = vmatmul.bf16.gmra.mxu2 %v12938_v18  ;;  %v12215_v2 = vpop.f32.mrf.mxu0 }
 0xb21   : > { %6881 = vmatmul.bf16.gmra.mxu0 %v12939_v8 }
 0xb22   : > { %v6709_v3 = vpop.f32.mrf.mxu2 }
 0xb23   : > { %v6710_v48 = vadd.f32 %v6709_v3, %v6621_v34  ;;  %v6539_v34 = vadd.f32 %v12110_v11, %v6450_v55  ;;  %v12946_v11 = vld [vmem:[#allocation72_spill] sm:$0xff] }
 0xb24   : > { %v6622_v39 = vpop.f32.mrf.mxu1 }
 0xb25   : > { %7136 = vst [vmem:[%s12027_s19 + $0x120] sm:$0xff] %v6710_v48  ;;  %v6623_v5 = vadd.f32 %v6622_v39, %v6534_v23  ;;  %v12219_v48 = vpop.f32.mrf.mxu3  ;;  %v12944_v23 = vld [vmem:[#allocation50_spill] sm:$0xff] }
 0xb27   : > { %v12226_v53 = vpop.f32.mrf.mxu0 }
 0xb2a   : > { %v6711_v49 = vpop.f32.mrf.mxu2 }
 0xb2b   : > { %v6712_v9 = vadd.f32 %v6711_v49, %v6623_v5  ;;  %6797 = vmatmul.bf16.gmra.mxu3 %v12940_v43  ;;  %v12945_v49 = vld [vmem:[#allocation82_spill] sm:$0xff]  ;;  %v12947_v43 = vld [vmem:[#allocation49_spill] sm:$0xff] }
 0xb2c   : > { %v6625_v45 = vpop.f32.mrf.mxu1 }
 0xb2d   : > { %7138 = vst [vmem:[%s12027_s19 + $0x130] sm:$0xff] %v6712_v9  ;;  %v6626_v47 = vadd.f32 %v6625_v45, %v6537_v13  ;;  %v6455_v45 = vadd.f32 %v12127_v61, %v12005_v60 }
 0xb2f   : > { %6940 = vmatmul.bf16.gmra.mxu1 %v12941_v17  ;;  %7029 = vmatmul.bf16.gmra.mxu2 %v12942_v16  ;;  %v12231_v16 = vpop.f32.mrf.mxu3  ;;  %v6544_v20 = vadd.f32 %v12134_v4, %v6455_v45  ;;  %v12237_v55 = vpop.f32.mrf.mxu0  ;;  %v12950_v4 = vld [vmem:[#allocation25_spill] sm:$0xff] }
 0xb31   : > { %6886 = vmatmul.bf16.gmra.mxu0 %v12943_v28 }
 0xb32   : > { %v6714_v31 = vpop.f32.mrf.mxu2 }
 0xb33   : > { %v6715_v59 = vadd.f32 %v6714_v31, %v6626_v47  ;;  %v6458_v31 = vadd.f32 %v12139_v10, %v12005_v60 }
 0xb34   : > { %v6627_v18 = vpop.f32.mrf.mxu1 }
 0xb35   : > { %7140 = vst [vmem:[%s12027_s19 + $0x140] sm:$0xff] %v6715_v59  ;;  %v6628_v8 = vadd.f32 %v6627_v18, %v6539_v34  ;;  %v12948_v18 = vld [vmem:[#allocation20_spill] sm:$0xff]  ;;  %v6547_v61 = vadd.f32 %v12145_v27, %v6458_v31  ;;  %v12955_v31 = vld [vmem:[#allocation51_spill] sm:$0xff] }
 0xb3a   : > { %v6716_v3 = vpop.f32.mrf.mxu2 }
 0xb3b   : > { %v6717_v39 = vadd.f32 %v6716_v3, %v6628_v8  ;;  %6802 = vmatmul.bf16.gmra.mxu3 %v12944_v23  ;;  %v12242_v8 = vpop.f32.mrf.mxu3  ;;  %v12949_v3 = vld [vmem:[#allocation35_spill] sm:$0xff]  ;;  %v6460_v23 = vadd.f32 %v12150_v25, %v12005_v60 }
 0xb3c   : > { %v6630_v5 = vpop.f32.mrf.mxu1 }
 0xb3d   : > { %7142 = vst [vmem:[%s12027_s19 + $0x150] sm:$0xff] %v6717_v39  ;;  %v6631_v9 = vadd.f32 %v6630_v5, %v6542_v52  ;;  %v12951_v39 = vld [vmem:[#allocation24_spill] sm:$0xff]  ;;  %v6549_v27 = vadd.f32 %v12157_v26, %v6460_v23  ;;  %v12954_v26 = vld [vmem:[#allocation54_spill] sm:$0xff]  ;;  %v12956_v23 = vld [vmem:[#allocation53_spill] sm:$0xff] }
 0xb3f   : > { %6945 = vmatmul.bf16.gmra.mxu1 %v12945_v49  ;;  %7034 = vmatmul.bf16.gmra.mxu2 %v12946_v11  ;;  %v12249_v49 = vpop.f32.mrf.mxu0 }
 0xb41   : > { %6891 = vmatmul.bf16.gmra.mxu0 %v12947_v43 }
 0xb42   : > { %v6719_v46 = vpop.f32.mrf.mxu2 }
 0xb43   : > { %v6720_v13 = vadd.f32 %v6719_v46, %v6631_v9  ;;  %v12253_v11 = vpop.f32.mrf.mxu3  ;;  %v6463_v46 = vadd.f32 %v12161_v35, %v12005_v60  ;;  %v6465_v35 = vadd.f32 %v12175_v42, %v12005_v60 }
 0xb44   : > { %v6632_v17 = vpop.f32.mrf.mxu1 }
 0xb45   : > { %7144 = vst [vmem:[%s12027_s19 + $0x160] sm:$0xff] %v6720_v13  ;;  %v6633_v47 = vadd.f32 %v6632_v17, %v6544_v20  ;;  %v12952_v13 = vld [vmem:[#allocation55_spill] sm:$0xff]  ;;  %v6552_v25 = vadd.f32 %v12168_v32, %v6463_v46  ;;  %v6554_v32 = vadd.f32 %v12179_v63, %v6465_v35  ;;  %v12958_v63 = vld [vmem:[#allocation29_spill] sm:$0xff] }
 0xb47   : > { %v12260_v20 = vpop.f32.mrf.mxu0 }
 0xb4a   : > { %v6721_v28 = vpop.f32.mrf.mxu2 }
 0xb4b   : > { %v6722_v59 = vadd.f32 %v6721_v28, %v6633_v47  ;;  %6807 = vmatmul.bf16.gmra.mxu3 %v12948_v18  ;;  %v12953_v47 = vld [vmem:[#allocation21_spill] sm:$0xff]  ;;  %v12267_v18 = vpop.f32.mrf.mxu3 }
 0xb4c   : > { %v6635_v34 = vpop.f32.mrf.mxu1 }
 0xb4d   : > { %7146 = vst [vmem:[%s12027_s19 + $0x170] sm:$0xff] %v6722_v59  ;;  %v6636_v51 = vadd.f32 %v6635_v34, %v6547_v61 }
 0xb4f   : > { %6950 = vmatmul.bf16.gmra.mxu1 %v12949_v3  ;;  %7039 = vmatmul.bf16.gmra.mxu2 %v12950_v4  ;;  %v12271_v3 = vpop.f32.mrf.mxu0 }
 0xb51   : > { %6896 = vmatmul.bf16.gmra.mxu0 %v12951_v39  ;;  %v6468_v39 = vadd.f32 %v12184_v0, %v12005_v60  ;;  %v6470_v0 = vadd.f32 %v12197_v33, %v12005_v60 }
 0xb52   : > { %v6724_v10 = vpop.f32.mrf.mxu2 }
 0xb53   : > { %v6725_v5 = vadd.f32 %v6724_v10, %v6636_v51  ;;  %v12276_v42 = vpop.f32.mrf.mxu3 }
 0xb54   : > { %v6637_v52 = vpop.f32.mrf.mxu1 }
 0xb55   : > { %7148 = vst [vmem:[%s12027_s19 + $0x180] sm:$0xff] %v6725_v5  ;;  %v6638_v9 = vadd.f32 %v6637_v52, %v6549_v27  ;;  %v6557_v52 = vadd.f32 %v12193_v21, %v6468_v39  ;;  %v12957_v27 = vld [vmem:[#allocation83_spill] sm:$0xff] }
 0xb5a   : > { %v6726_v43 = vpop.f32.mrf.mxu2 }
 0xb5b   : > { %v6727_v45 = vadd.f32 %v6726_v43, %v6638_v9  ;;  %6812 = vmatmul.bf16.gmra.mxu3 %v12952_v13  ;;  %v12959_v43 = vld [vmem:[#allocation65_spill] sm:$0xff]  ;;  %v12289_v21 = vpop.f32.mrf.mxu3 }
 0xb5c   : > { %v6640_v17 = vpop.f32.mrf.mxu1 }
 0xb5d   : > { %7150 = vst [vmem:[%s12027_s19 + $0x190] sm:$0xff] %v6727_v45  ;;  %v6641_v28 = vadd.f32 %v6640_v17, %v6552_v25  ;;  %v12285_v45 = vpop.f32.mrf.mxu0  ;;  %v6559_v25 = vadd.f32 %v12202_v15, %v6470_v0 }
 0xb5f   : > { %6955 = vmatmul.bf16.gmra.mxu1 %v12953_v47  ;;  %7044 = vmatmul.bf16.gmra.mxu2 %v12954_v26 }
 0xb61   : > { %6901 = vmatmul.bf16.gmra.mxu0 %v12955_v31 }
 0xb62   : > { %v6729_v59 = vpop.f32.mrf.mxu2 }
 0xb63   : > { %v6730_v34 = vadd.f32 %v6729_v59, %v6641_v28  ;;  %v6473_v28 = vadd.f32 %v12208_v19, %v12005_v60  ;;  %v12300_v15 = vpop.f32.mrf.mxu3 }
 0xb64   : > { %v6642_v61 = vpop.f32.mrf.mxu1 }
 0xb65   : > { %7152 = vst [vmem:[%s12027_s19 + $0x1a0] sm:$0xff] %v6730_v34  ;;  %v6643_v4 = vadd.f32 %v6642_v61, %v6554_v32  ;;  %v12294_v33 = vpop.f32.mrf.mxu0  ;;  %v6562_v35 = vadd.f32 %v12215_v2, %v6473_v28  ;;  %v12960_v2 = vld [vmem:[#allocation38_spill] sm:$0xff] }
 0xb6a   : > { %v6731_v51 = vpop.f32.mrf.mxu2 }
 0xb6b   : > { %v6732_v10 = vadd.f32 %v6731_v51, %v6643_v4  ;;  %6817 = vmatmul.bf16.gmra.mxu3 %v12956_v23  ;;  %v12308_v51 = vperm.slane %v12960_v2, 1 }
 0xb6c   : > { %v6645_v5 = vpop.f32.mrf.mxu1 }
 0xb6d   : > { %7154 = vst [vmem:[%s12027_s19 + $0x1b0] sm:$0xff] %v6732_v10  ;;  %v6646_v9 = vadd.f32 %v6645_v5, %v6557_v52  ;;  %v12314_v10 = vpop.f32.mrf.mxu3 }
 0xb6f   : > { %6960 = vmatmul.bf16.gmra.mxu1 %v12957_v27  ;;  %7049 = vmatmul.bf16.gmra.mxu2 %v12958_v63  ;;  %v6756_v27 = vadd.f32 %v12242_v8, %v12308_v51 }
 0xb71   : > { %6906 = vmatmul.bf16.gmra.mxu0 %v12959_v43  ;;  %v6845_v43 = vadd.f32 %v12249_v49, %v6756_v27 }
 0xb72   : > { %v6734_v46 = vpop.f32.mrf.mxu2 }
 0xb73   : > { %v6735_v13 = vadd.f32 %v6734_v46, %v6646_v9 }
 0xb74   : > { %v6647_v17 = vpop.f32.mrf.mxu1 }
 0xb75   : > { %7156 = vst [vmem:[%s12027_s19 + $0x1c0] sm:$0xff] %v6735_v13  ;;  %v6648_v47 = vadd.f32 %v6647_v17, %v6559_v25  ;;  %v6773_v46 = vpop.f32.mrf.mxu3  ;;  %v6761_v25 = vadd.f32 %v12267_v18, %v12308_v51 }
 0xb7a   : > { %v6736_v26 = vpop.f32.mrf.mxu2 }
 0xb7b   : > { %v6737_v31 = vadd.f32 %v6736_v26, %v6648_v47  ;;  %6822 = vmatmul.bf16.gmra.mxu3 %v12916_v57  ;;  %v6475_v57 = vadd.f32 %v12219_v48, %v12005_v60  ;;  %v12961_v60 = vld [vmem:[#allocation47_spill] sm:$0xff] }
 0xb7c   : > { %v6650_v59 = vpop.f32.mrf.mxu1 }
 0xb7d   : > { %7158 = vst [vmem:[%s12027_s19 + $0x1d0] sm:$0xff] %v6737_v31  ;;  %v6651_v34 = vadd.f32 %v6650_v59, %v6562_v35  ;;  %v6564_v4 = vadd.f32 %v12226_v53, %v6475_v57  ;;  %v6775_v26 = vpop.f32.mrf.mxu3  ;;  %v6766_v57 = vadd.f32 %v12289_v21, %v12308_v51 }
 0xb7f   : > { %6965 = vmatmul.bf16.gmra.mxu1 %v11795_v44  ;;  %7054 = vmatmul.bf16.gmra.mxu2 %v11884_v38  ;;  %v12310_v44 = vpop.f32.mrf.mxu0 }
 0xb81   : > { %6911 = vmatmul.bf16.gmra.mxu0 %v11773_v6  ;;  %v6754_v6 = vadd.f32 %v12231_v16, %v12308_v51 }
 0xb82   : > { %v6739_v19 = vpop.f32.mrf.mxu2 }
 0xb83   : > { %v6740_v61 = vadd.f32 %v6739_v19, %v6651_v34  ;;  %v6843_v53 = vadd.f32 %v12237_v55, %v6754_v6 }
 0xb84   : > { %v6652_v32 = vpop.f32.mrf.mxu1 }
 0xb85   : > { %7160 = vst [vmem:[%s12027_s19 + $0x1e0] sm:$0xff] %v6740_v61  ;;  %v6653_v38 = vadd.f32 %v6652_v32, %v6564_v4  ;;  %v6778_v34 = vpop.f32.mrf.mxu3 }
 0xb87   : > { %v12321_v5 = vpop.f32.mrf.mxu0 }
 0xb8a   : > { %v6741_v39 = vpop.f32.mrf.mxu2 }
 0xb8b   : > { %v6742_v23 = vadd.f32 %v6741_v39, %v6653_v38  ;;  %6827 = vmatmul.bf16.gmra.mxu3 %v12961_v60 }
 0xb8c   : > { %v6931_v48 = vpop.f32.mrf.mxu1 }
 0xb8d   : > { %7162 = vst [vmem:[%s12027_s19 + $0x1f0] sm:$0xff] %v6742_v23  ;;  %v6932_v52 = vadd.f32 %v6931_v48, %v6843_v53  ;;  %v6780_v2 = vpop.f32.mrf.mxu3  ;;  %v6771_v48 = vadd.f32 %v12314_v10, %v12308_v51 }
 0xb8f   : > { %6970 = vmatmul.bf16.gmra.mxu1 %v11807_v22  ;;  %7059 = vmatmul.bf16.gmra.mxu2 %v11899_v40  ;;  %v6759_v40 = vadd.f32 %v12253_v11, %v12308_v51  ;;  %v6862_v8 = vpop.f32.mrf.mxu0  ;;  %v6850_v11 = vadd.f32 %v12271_v3, %v6761_v25 }
 0xb91   : > { %6916 = vmatmul.bf16.gmra.mxu0 %v11788_v41  ;;  %v6848_v41 = vadd.f32 %v12260_v20, %v6759_v40 }
 0xb92   : > { %v7020_v16 = vpop.f32.mrf.mxu2 }
 0xb93   : > { %v7021_v63 = vadd.f32 %v7020_v16, %v6932_v52 }
 0xb94   : > { %v6933_v9 = vpop.f32.mrf.mxu1 }
 0xb95   : > { %7101 = vst [vmem:[%s12027_s19 + $0x8] sm:$0xff] %v7021_v63  ;;  %v6934_v55 = vadd.f32 %v6933_v9, %v6845_v43 }
 0xb97   : > { %v6864_v59 = vpop.f32.mrf.mxu0 }
 0xb9a   : > { %v7022_v22 = vpop.f32.mrf.mxu2 }
 0xb9b   : > { %v7023_v0 = vadd.f32 %v7022_v22, %v6934_v55 }
 0xb9c   : > { %v6936_v13 = vpop.f32.mrf.mxu1 }
 0xb9d   : > { %7103 = vst [vmem:[%s12027_s19 + $0x18] sm:$0xff] %v7023_v0  ;;  %v6937_v17 = vadd.f32 %v6936_v13, %v6848_v41 }
 0xb9f   : > { %6975 = vmatmul.bf16.gmra.mxu1 %v11819_v30  ;;  %7064 = vmatmul.bf16.gmra.mxu2 %v11915_v14  ;;  %v6764_v30 = vadd.f32 %v12276_v42, %v12308_v51  ;;  %v6867_v32 = vpop.f32.mrf.mxu0  ;;  %v6855_v42 = vadd.f32 %v12294_v33, %v6766_v57  ;;  %v6783_v33 = vpop.f32.mrf.mxu3 }
 0xba1   : > { %v6853_v19 = vadd.f32 %v12285_v45, %v6764_v30 }
 0xba2   : > { %v7025_v49 = vpop.f32.mrf.mxu2 }
 0xba3   : > { %v7026_v47 = vadd.f32 %v7025_v49, %v6937_v17 }
 0xba4   : > { %v6938_v28 = vpop.f32.mrf.mxu1 }
 0xba5   : > { %7105 = vst [vmem:[%s12027_s19 + $0x28] sm:$0xff] %v7026_v47  ;;  %v6939_v31 = vadd.f32 %v6938_v28, %v6850_v11  ;;  %v6781_v11 = vadd.f32 %v6780_v2, %v12308_v51 }
 0xba7   : > { %v6869_v6 = vpop.f32.mrf.mxu0 }
 0xba8   : > { %v6870_v30 = vadd.f32 %v6869_v6, %v6781_v11 }
 0xbaa   : > { %v7027_v20 = vpop.f32.mrf.mxu2 }
 0xbab   : > { %v7028_v14 = vadd.f32 %v7027_v20, %v6939_v31 }
 0xbac   : > { %v6941_v35 = vpop.f32.mrf.mxu1 }
 0xbad   : > { %7107 = vst [vmem:[%s12027_s19 + $0x38] sm:$0xff] %v7028_v14  ;;  %v6942_v18 = vadd.f32 %v6941_v35, %v6853_v19  ;;  %v6784_v19 = vadd.f32 %v6783_v33, %v12308_v51 }
 0xbaf   : > { %6980 = vmatmul.bf16.gmra.mxu1 %v11831_v29  ;;  %7069 = vmatmul.bf16.gmra.mxu2 %v11931_v58  ;;  %v6769_v29 = vadd.f32 %v12300_v15, %v12308_v51  ;;  %v6860_v15 = vadd.f32 %v12321_v5, %v6771_v48  ;;  %v6872_v16 = vpop.f32.mrf.mxu0  ;;  %v6776_v5 = vadd.f32 %v6775_v26, %v12308_v51 }
 0xbb1   : > { %v6858_v23 = vadd.f32 %v12310_v44, %v6769_v29 }
 0xbb2   : > { %v7030_v3 = vpop.f32.mrf.mxu2 }
 0xbb3   : > { %v7031_v61 = vadd.f32 %v7030_v3, %v6942_v18 }
 0xbb4   : > { %v6943_v4 = vpop.f32.mrf.mxu1 }
 0xbb5   : > { %7109 = vst [vmem:[%s12027_s19 + $0x48] sm:$0xff] %v7031_v61  ;;  %v6944_v38 = vadd.f32 %v6943_v4, %v6855_v42 }
 0xbb7   : > { %v6874_v55 = vpop.f32.mrf.mxu0 }
 0xbba   : > { %v7032_v45 = vpop.f32.mrf.mxu2 }
 0xbbb   : > { %v7033_v39 = vadd.f32 %v7032_v45, %v6944_v38 }
 0xbbc   : > { %v6946_v58 = vpop.f32.mrf.mxu1 }
 0xbbd   : > { %7111 = vst [vmem:[%s12027_s19 + $0x58] sm:$0xff] %v7033_v39  ;;  %v6947_v21 = vadd.f32 %v6946_v58, %v6858_v23 }
 0xbbf   : > { %6985 = vmatmul.bf16.gmra.mxu1 %v11843_v62  ;;  %7074 = vmatmul.bf16.gmra.mxu2 %v11947_v56  ;;  %v6774_v62 = vadd.f32 %v6773_v46, %v12308_v51  ;;  %v6785_v56 = vpop.f32.mrf.mxu3  ;;  %v6865_v46 = vadd.f32 %v6864_v59, %v6776_v5 }
 0xbc1   : > { %v6863_v43 = vadd.f32 %v6862_v8, %v6774_v62  ;;  %v6779_v8 = vadd.f32 %v6778_v34, %v12308_v51 }
 0xbc2   : > { %v7035_v60 = vpop.f32.mrf.mxu2 }
 0xbc3   : > { %v7036_v53 = vadd.f32 %v7035_v60, %v6947_v21 }
 0xbc4   : > { %v6948_v52 = vpop.f32.mrf.mxu1 }
 0xbc5   : > { %7113 = vst [vmem:[%s12027_s19 + $0x68] sm:$0xff] %v7036_v53  ;;  %v6949_v27 = vadd.f32 %v6948_v52, %v6860_v15 }
 0xbc7   : > { %v6788_v13 = vpop.f32.mrf.mxu3 }
 0xbc8   : > { %v6789_v58 = vadd.f32 %v6788_v13, %v12308_v51 }
 0xbca   : > { %v7037_v44 = vpop.f32.mrf.mxu2 }
 0xbcb   : > { %v7038_v63 = vadd.f32 %v7037_v44, %v6949_v27 }
 0xbcc   : > { %v6951_v9 = vpop.f32.mrf.mxu1 }
 0xbcd   : > { %7115 = vst [vmem:[%s12027_s19 + $0x78] sm:$0xff] %v7038_v63  ;;  %v6952_v10 = vadd.f32 %v6951_v9, %v6863_v43 }
 0xbcf   : > { %6990 = vmatmul.bf16.gmra.mxu1 %v11855_v37  ;;  %7079 = vmatmul.bf16.gmra.mxu2 %v11963_v24  ;;  %v6877_v37 = vpop.f32.mrf.mxu0  ;;  %v6868_v24 = vadd.f32 %v6867_v32, %v6779_v8  ;;  %v6790_v47 = vpop.f32.mrf.mxu3  ;;  %v6786_v32 = vadd.f32 %v6785_v56, %v12308_v51 }
 0xbd0   : > { %v6878_v23 = vadd.f32 %v6877_v37, %v6789_v58  ;;  %v6791_v60 = vadd.f32 %v6790_v47, %v12308_v51 }
 0xbd1   : > { %v6875_v38 = vadd.f32 %v6874_v55, %v6786_v32 }
 0xbd2   : > { %v7040_v22 = vpop.f32.mrf.mxu2 }
 0xbd3   : > { %v7041_v40 = vadd.f32 %v7040_v22, %v6952_v10 }
 0xbd4   : > { %v6953_v0 = vpop.f32.mrf.mxu1 }
 0xbd5   : > { %7117 = vst [vmem:[%s12027_s19 + $0x88] sm:$0xff] %v7041_v40  ;;  %v6954_v41 = vadd.f32 %v6953_v0, %v6865_v46 }
 0xbd7   : > { %v6879_v20 = vpop.f32.mrf.mxu0  ;;  %v6793_v35 = vpop.f32.mrf.mxu3 }
 0xbd8   : > { %v6880_v15 = vadd.f32 %v6879_v20, %v6791_v60  ;;  %v6794_v62 = vadd.f32 %v6793_v35, %v12308_v51 }
 0xbda   : > { %v7042_v17 = vpop.f32.mrf.mxu2 }
 0xbdb   : > { %v7043_v49 = vadd.f32 %v7042_v17, %v6954_v41 }
 0xbdc   : > { %v6956_v25 = vpop.f32.mrf.mxu1 }
 0xbdd   : > { %7119 = vst [vmem:[%s12027_s19 + $0x98] sm:$0xff] %v7043_v49  ;;  %v6957_v26 = vadd.f32 %v6956_v25, %v6868_v24 }
 0xbdf   : > { %6995 = vmatmul.bf16.gmra.mxu1 %v12923_v1  ;;  %7084 = vmatmul.bf16.gmra.mxu2 %v12924_v54  ;;  %v6873_v54 = vadd.f32 %v6872_v16, %v6784_v19  ;;  %v6882_v3 = vpop.f32.mrf.mxu0  ;;  %v6795_v42 = vpop.f32.mrf.mxu3 }
 0xbe0   : > { %v6796_v55 = vadd.f32 %v6795_v42, %v12308_v51 }
 0xbe2   : > { %v7045_v28 = vpop.f32.mrf.mxu2 }
 0xbe3   : > { %v7046_v31 = vadd.f32 %v7045_v28, %v6957_v26 }
 0xbe4   : > { %v6958_v59 = vpop.f32.mrf.mxu1 }
 0xbe5   : > { %7121 = vst [vmem:[%s12027_s19 + $0xa8] sm:$0xff] %v7046_v31  ;;  %v6959_v14 = vadd.f32 %v6958_v59, %v6870_v30 }
 0xbe7   : > { %v6884_v29 = vpop.f32.mrf.mxu0 }
 0xbe8   : > { %v6885_v40 = vadd.f32 %v6884_v29, %v6796_v55 }
 0xbea   : > { %v7047_v34 = vpop.f32.mrf.mxu2 }
 0xbeb   : > { %v7048_v1 = vadd.f32 %v7047_v34, %v6959_v14 }
 0xbec   : > { %v6961_v18 = vpop.f32.mrf.mxu1 }
 0xbed   : > { %7123 = vst [vmem:[%s12027_s19 + $0xb8] sm:$0xff] %v7048_v1  ;;  %v6962_v57 = vadd.f32 %v6961_v18, %v6873_v54 }
 0xbef   : > { %7000 = vmatmul.bf16.gmra.mxu1 %v12927_v7  ;;  %7089 = vmatmul.bf16.gmra.mxu2 %v11993_v12  ;;  %v6798_v12 = vpop.f32.mrf.mxu3  ;;  %v6887_v53 = vpop.f32.mrf.mxu0 }
 0xbf0   : > { %v6799_v41 = vadd.f32 %v6798_v12, %v12308_v51 }
 0xbf2   : > { %v7050_v61 = vpop.f32.mrf.mxu2  ;;  %v6888_v37 = vadd.f32 %v6887_v53, %v6799_v41 }
 0xbf3   : > { %v7051_v4 = vadd.f32 %v7050_v61, %v6962_v57 }
 0xbf4   : > { %v6963_v2 = vpop.f32.mrf.mxu1 }
 0xbf5   : > { %7125 = vst [vmem:[%s12027_s19 + $0xc8] sm:$0xff] %v7051_v4  ;;  %v6964_v45 = vadd.f32 %v6963_v2, %v6875_v38 }
 0xbf7   : > { %v6800_v16 = vpop.f32.mrf.mxu3  ;;  %v6889_v56 = vpop.f32.mrf.mxu0 }
 0xbf8   : > { %v6801_v26 = vadd.f32 %v6800_v16, %v12308_v51 }
 0xbfa   : > { %v7052_v39 = vpop.f32.mrf.mxu2  ;;  %v6890_v59 = vadd.f32 %v6889_v56, %v6801_v26 }
 0xbfb   : > { %v7053_v7 = vadd.f32 %v7052_v39, %v6964_v45 }
 0xbfc   : > { %v6966_v6 = vpop.f32.mrf.mxu1 }
 0xbfd   : > { %7127 = vst [vmem:[%s12027_s19 + $0xd8] sm:$0xff] %v7053_v7  ;;  %v6967_v21 = vadd.f32 %v6966_v6, %v6878_v23 }
 0xbff   : > { %7005 = vmatmul.bf16.gmra.mxu1 %v12930_v50  ;;  %7094 = vmatmul.bf16.gmra.mxu2 %v12018_v36  ;;  %v6883_v36 = vadd.f32 %v6882_v3, %v6794_v62  ;;  %v6803_v43 = vpop.f32.mrf.mxu3  ;;  %v6892_v0 = vpop.f32.mrf.mxu0 }
 0xc00   : > { %v6804_v14 = vadd.f32 %v6803_v43, %v12308_v51 }
 0xc02   : > { %v7055_v33 = vpop.f32.mrf.mxu2  ;;  %v6893_v1 = vadd.f32 %v6892_v0, %v6804_v14 }
 0xc03   : > { %v7056_v48 = vadd.f32 %v7055_v33, %v6967_v21 }
 0xc04   : > { %v6968_v52 = vpop.f32.mrf.mxu1 }
 0xc05   : > { %7129 = vst [vmem:[%s12027_s19 + $0xe8] sm:$0xff] %v7056_v48  ;;  %v6969_v27 = vadd.f32 %v6968_v52, %v6880_v15 }
 0xc07   : > { %v6805_v8 = vpop.f32.mrf.mxu3  ;;  %v6894_v24 = vpop.f32.mrf.mxu0 }
 0xc08   : > { %v6806_v57 = vadd.f32 %v6805_v8, %v12308_v51 }
 0xc0a   : > { %v7057_v44 = vpop.f32.mrf.mxu2  ;;  %v6895_v42 = vadd.f32 %v6894_v24, %v6806_v57 }
 0xc0b   : > { %v7058_v63 = vadd.f32 %v7057_v44, %v6969_v27 }
 0xc0c   : > { %v6971_v50 = vpop.f32.mrf.mxu1 }
 0xc0d   : > { %7131 = vst [vmem:[%s12027_s19 + $0xf8] sm:$0xff] %v7058_v63  ;;  %v6972_v9 = vadd.f32 %v6971_v50, %v6883_v36 }
 0xc0f   : > { %v6808_v31 = vpop.f32.mrf.mxu3  ;;  %v6897_v34 = vpop.f32.mrf.mxu0 }
 0xc10   : > { %v6809_v29 = vadd.f32 %v6808_v31, %v12308_v51 }
 0xc12   : > { %v7060_v10 = vpop.f32.mrf.mxu2  ;;  %v6898_v7 = vadd.f32 %v6897_v34, %v6809_v29 }
 0xc13   : > { %v7061_v22 = vadd.f32 %v7060_v10, %v6972_v9 }
 0xc14   : > { %v6973_v5 = vpop.f32.mrf.mxu1 }
 0xc15   : > { %7133 = vst [vmem:[%s12027_s19 + $0x108] sm:$0xff] %v7061_v22  ;;  %v6974_v13 = vadd.f32 %v6973_v5, %v6885_v40 }
 0xc17   : > { %v6810_v18 = vpop.f32.mrf.mxu3  ;;  %v6899_v4 = vpop.f32.mrf.mxu0 }
 0xc18   : > { %v6811_v21 = vadd.f32 %v6810_v18, %v12308_v51 }
 0xc1a   : > { %v7062_v46 = vpop.f32.mrf.mxu2  ;;  %v6900_v53 = vadd.f32 %v6899_v4, %v6811_v21 }
 0xc1b   : > { %v7063_v17 = vadd.f32 %v7062_v46, %v6974_v13 }
 0xc1c   : > { %v6976_v49 = vpop.f32.mrf.mxu1 }
 0xc1d   : > { %7135 = vst [vmem:[%s12027_s19 + $0x118] sm:$0xff] %v7063_v17  ;;  %v6977_v25 = vadd.f32 %v6976_v49, %v6888_v37 }
 0xc1f   : > { %v6813_v38 = vpop.f32.mrf.mxu3  ;;  %v6902_v6 = vpop.f32.mrf.mxu0 }
 0xc20   : > { %v6814_v27 = vadd.f32 %v6813_v38, %v12308_v51 }
 0xc22   : > { %v7065_v47 = vpop.f32.mrf.mxu2  ;;  %v6903_v50 = vadd.f32 %v6902_v6, %v6814_v27 }
 0xc23   : > { %v7066_v28 = vadd.f32 %v7065_v47, %v6977_v25 }
 0xc24   : > { %v6978_v11 = vpop.f32.mrf.mxu1 }
 0xc25   : > { %7137 = vst [vmem:[%s12027_s19 + $0x128] sm:$0xff] %v7066_v28  ;;  %v6979_v20 = vadd.f32 %v6978_v11, %v6890_v59 }
 0xc27   : > { %v6815_v60 = vpop.f32.mrf.mxu3  ;;  %v6904_v15 = vpop.f32.mrf.mxu0 }
 0xc28   : > { %v6816_v9 = vadd.f32 %v6815_v60, %v12308_v51 }
 0xc2a   : > { %v7067_v30 = vpop.f32.mrf.mxu2  ;;  %v6905_v22 = vadd.f32 %v6904_v15, %v6816_v9 }
 0xc2b   : > { %v7068_v35 = vadd.f32 %v7067_v30, %v6979_v20 }
 0xc2c   : > { %v6981_v19 = vpop.f32.mrf.mxu1 }
 0xc2d   : > { %7139 = vst [vmem:[%s12027_s19 + $0x138] sm:$0xff] %v7068_v35  ;;  %v6982_v54 = vadd.f32 %v6981_v19, %v6893_v1 }
 0xc2f   : > { %v6818_v63 = vpop.f32.mrf.mxu3  ;;  %v6907_v10 = vpop.f32.mrf.mxu0 }
 0xc30   : > { %v6819_v13 = vadd.f32 %v6818_v63, %v12308_v51 }
 0xc32   : > { %v7070_v3 = vpop.f32.mrf.mxu2  ;;  %v6908_v8 = vadd.f32 %v6907_v10, %v6819_v13 }
 0xc33   : > { %v7071_v61 = vadd.f32 %v7070_v3, %v6982_v54 }
 0xc34   : > { %v6983_v32 = vpop.f32.mrf.mxu1 }
 0xc35   : > { %7141 = vst [vmem:[%s12027_s19 + $0x148] sm:$0xff] %v7071_v61  ;;  %v6984_v2 = vadd.f32 %v6983_v32, %v6895_v42 }
 0xc37   : > { %v6820_v5 = vpop.f32.mrf.mxu3  ;;  %v6909_v17 = vpop.f32.mrf.mxu0 }
 0xc38   : > { %v6821_v24 = vadd.f32 %v6820_v5, %v12308_v51 }
 0xc3a   : > { %v7072_v45 = vpop.f32.mrf.mxu2  ;;  %v6910_v28 = vadd.f32 %v6909_v17, %v6821_v24 }
 0xc3b   : > { %v7073_v39 = vadd.f32 %v7072_v45, %v6984_v2 }
 0xc3c   : > { %v6986_v58 = vpop.f32.mrf.mxu1 }
 0xc3d   : > { %7143 = vst [vmem:[%s12027_s19 + $0x158] sm:$0xff] %v7073_v39  ;;  %v6987_v12 = vadd.f32 %v6986_v58, %v6898_v7 }
 0xc3f   : > { %v6823_v37 = vpop.f32.mrf.mxu3  ;;  %v6912_v11 = vpop.f32.mrf.mxu0 }
 0xc40   : > { %v6824_v20 = vadd.f32 %v6823_v37, %v12308_v51 }
 0xc42   : > { %v7075_v23 = vpop.f32.mrf.mxu2  ;;  %v6913_v34 = vadd.f32 %v6912_v11, %v6824_v20 }
 0xc43   : > { %v7076_v33 = vadd.f32 %v7075_v23, %v6987_v12 }
 0xc44   : > { %v6988_v48 = vpop.f32.mrf.mxu1 }
 0xc45   : > { %7145 = vst [vmem:[%s12027_s19 + $0x168] sm:$0xff] %v7076_v33  ;;  %v6989_v52 = vadd.f32 %v6988_v48, %v6900_v53 }
 0xc47   : > { %v6825_v14 = vpop.f32.mrf.mxu3  ;;  %v6914_v1 = vpop.f32.mrf.mxu0 }
 0xc48   : > { %v6826_v54 = vadd.f32 %v6825_v14, %v12308_v51 }
 0xc4a   : > { %v7077_v16 = vpop.f32.mrf.mxu2  ;;  %v6915_v32 = vadd.f32 %v6914_v1, %v6826_v54 }
 0xc4b   : > { %v7078_v44 = vadd.f32 %v7077_v16, %v6989_v52 }
 0xc4c   : > { %v6991_v62 = vpop.f32.mrf.mxu1 }
 0xc4d   : > { %7147 = vst [vmem:[%s12027_s19 + $0x178] sm:$0xff] %v7078_v44  ;;  %v6992_v56 = vadd.f32 %v6991_v62, %v6903_v50 }
 0xc4f   : > { %v6828_v61 = vpop.f32.mrf.mxu3  ;;  %v6917_v45 = vpop.f32.mrf.mxu0 }
 0xc50   : > { %v6829_v2 = vadd.f32 %v6828_v61, %v12308_v51 }
 0xc52   : > { %v7080_v36 = vpop.f32.mrf.mxu2  ;;  %v6918_v39 = vadd.f32 %v6917_v45, %v6829_v2 }
 0xc53   : > { %v7081_v43 = vadd.f32 %v7080_v36, %v6992_v56 }
 0xc54   : > { %v6993_v55 = vpop.f32.mrf.mxu1 }
 0xc55   : > { %7149 = vst [vmem:[%s12027_s19 + $0x188] sm:$0xff] %v7081_v43  ;;  %v6994_v40 = vadd.f32 %v6993_v55, %v6905_v22 }
 0xc57   : > { %v6830_v58 = vpop.f32.mrf.mxu3  ;;  %v6919_v21 = vpop.f32.mrf.mxu0 }
 0xc58   : > { %v6831_v12 = vadd.f32 %v6830_v58, %v12308_v51 }
 0xc5a   : > { %v7082_v0 = vpop.f32.mrf.mxu2  ;;  %v6920_v60 = vadd.f32 %v6919_v21, %v6831_v12 }
 0xc5b   : > { %v7083_v46 = vadd.f32 %v7082_v0, %v6994_v40 }
 0xc5c   : > { %v6996_v41 = vpop.f32.mrf.mxu1 }
 0xc5d   : > { %7151 = vst [vmem:[%s12027_s19 + $0x198] sm:$0xff] %v7083_v46  ;;  %v6997_v49 = vadd.f32 %v6996_v41, %v6908_v8 }
 0xc62   : > { %v7085_v25 = vpop.f32.mrf.mxu2 }
 0xc63   : > { %v7086_v47 = vadd.f32 %v7085_v25, %v6997_v49 }
 0xc64   : > { %v6998_v26 = vpop.f32.mrf.mxu1 }
 0xc65   : > { %7153 = vst [vmem:[%s12027_s19 + $0x1a8] sm:$0xff] %v7086_v47  ;;  %v6999_v31 = vadd.f32 %v6998_v26, %v6910_v28 }
 0xc6a   : > { %v7087_v59 = vpop.f32.mrf.mxu2 }
 0xc6b   : > { %v7088_v30 = vadd.f32 %v7087_v59, %v6999_v31 }
 0xc6c   : > { %v7001_v35 = vpop.f32.mrf.mxu1 }
 0xc6d   : > { %7155 = vst [vmem:[%s12027_s19 + $0x1b8] sm:$0xff] %v7088_v30  ;;  %v7002_v19 = vadd.f32 %v7001_v35, %v6913_v34 }
 0xc72   : > { %v7090_v18 = vpop.f32.mrf.mxu2 }
 0xc73   : > { %v7091_v3 = vadd.f32 %v7090_v18, %v7002_v19 }
 0xc74   : > { %v7003_v57 = vpop.f32.mrf.mxu1 }
 0xc75   : > { %7157 = vst [vmem:[%s12027_s19 + $0x1c8] sm:$0xff] %v7091_v3  ;;  %v7004_v4 = vadd.f32 %v7003_v57, %v6915_v32 }
 0xc7a   : > { %v7092_v42 = vpop.f32.mrf.mxu2 }
 0xc7b   : > { %v7093_v38 = vadd.f32 %v7092_v42, %v7004_v4 }
 0xc7c   : > { %v7006_v29 = vpop.f32.mrf.mxu1 }
 0xc7d   : > { %7159 = vst [vmem:[%s12027_s19 + $0x1d8] sm:$0xff] %v7093_v38  ;;  %v7007_v7 = vadd.f32 %v7006_v29, %v6918_v39 }
 0xc82   : > { %v7095_v6 = vpop.f32.mrf.mxu2 }
 0xc83   : > { %v7096_v23 = vadd.f32 %v7095_v6, %v7007_v7 }
 0xc84   : > { %v7008_v33 = vpop.f32.mrf.mxu1 }
 0xc85   : > { %7161 = vst [vmem:[%s12027_s19 + $0x1e8] sm:$0xff] %v7096_v23  ;;  %v7009_v48 = vadd.f32 %v7008_v33, %v6920_v60 }
 0xc8a   : > { %v7097_v53 = vpop.f32.mrf.mxu2 }
 0xc8b   : > { %v7098_v52 = vadd.f32 %v7097_v53, %v7009_v48 }
 0xc8d   : > { %7163 = vst [vmem:[%s12027_s19 + $0x1f8] sm:$0xff] %v7098_v52 }
 0xc8e   : > { %9278 = shalt.err (!%p9275_p9)
}
 0xc8f   : > { %s9343_s26 = smov 256   ;;  %s9344_s19 = smov 16  }
 0xc90   : > { %8945 = dma.vmem_to_hbm [thread:$0]  (%p9548_p4), %s7179_s29, 8192, %s7181_s27, %s7165_s24, %s9343_s26, %s9343_s26, %s9344_s19  }
 0xc91 PF: > { %s7195_s22 = sand.u32 1, %s9317_s0   ;;  %p12963_p10 = scmp.ge.s32.totalorder %s9329_s21, 2 }
 0xc92   : > { %s7196_s15 = scalar_lea.sflag [#allocation4], %s7195_s22 }
 0xc93   : > { %p8971_p13 = pnand %p12963_p10, %p9552_p6 }
 0xc95   : > { %p8972_p11 = pneg %p8971_p13 }
 0xc97   : > { %9312 = dma.done.wait (%p8972_p11), %s7196_s15, 8192  }
 0xc98   : > { %9314 = vsyncadd (%p8972_p11), %s7196_s15, 4294959104  ;;  %p35_p0 = scmp.ge.s32.totalorder %s9522_s23, 4   ;;  %s12964_s0 = smov %s9321_s30 }
 0xc99   : > { %s12965_s30 = smov %s9325_s20  ;;  %s12966_s20 = smov %s9533_s12 }
 0xc9a   : > { %s12967_s21 = smov %s9522_s23  ;;  %37 = sbr.rel (!%p35_p0) target bundleno = 24 (0x18), region = 165 }
 0xc9f   :  { %7202 = vsyncpa [#allocation3], 1 }
 0xca0   :  { %7204 = vsyncpa [#allocation3 + $0x1], 1 }
 0xca1   :  { %7205 = vsyncpa [#allocation6], 1 }
 0xca2   :  { %7206 = vsyncpa [#allocation9], 1 }
 0xca3   :  { %7207 = vsyncpa [#allocation12], 1 }
 0xca4   :  { %7208 = vsyncpa [#allocation4], 1 }
 0xca5   :  { %7210 = vsyncpa [#allocation4 + $0x1], 1 }

</bundles_post_ra>
